<compile_context>
chip_gen: v6e
topology: v6e:2x2x1
jax: 0.10.0
libtpu: 0.0.40
codegen_flags: <defaults>
</compile_context>

<pallas_src>
import functools
import math

import jax
import jax.numpy as jnp
from jax import lax
from jax.experimental import pallas as pl
from jax.experimental.pallas import tpu as pltpu

EMB = 48              # embedding_dim
HEADS = 8             # num_attn_heads
HEAD_DIM = EMB // HEADS
NHIST = 3
ROT_IN = 9            # 'so3' rotation parametrization -> 9 input dims
ROT_OUT = 3
LN_EPS = 1e-5
OUT_PAD = 128         # lane-dense output slab width for the prediction heads

N_CROSS, N_SELF, N_ROT, N_POS = 2, 4, 2, 2
N_LAYERS_TOTAL = N_CROSS + N_SELF + N_ROT + N_POS       # 10
OFF_CROSS = 0
OFF_SELF = N_CROSS                                       # fused stack mods start here

STACK_KEYS = ('wq', 'bq', 'wk', 'bk', 'wv', 'bv', 'wo', 'bo',
              'ln1g', 'ln1b', 'w1', 'b1', 'w2', 'b2', 'ln2g', 'ln2b')
HEAD_KEYS = ('rp_w', 'rp_b', 'r1_w', 'r1_b', 'r2_pad',
             'pp_w', 'pp_b', 'p1_w', 'p1_b', 'p2_pad',
             'o1_w', 'o1_b', 'o2_pad', 'b_pad')


# ----------------------------- in-kernel math helpers -----------------------------

def _layer_norm(x, g, b):
    inv_n = 1.0 / x.shape[-1]
    mu = jnp.sum(x, axis=-1, keepdims=True) * inv_n
    var = jnp.sum(x * x, axis=-1, keepdims=True) * inv_n - mu * mu
    return (x - mu) * lax.rsqrt(var + LN_EPS) * g + b


def _head_masks(f_dim, num_heads):
    """Per-head (1, F) lane masks; avoids sub-128 lane slicing of Q/K/V."""
    dh = f_dim // num_heads
    lane = lax.broadcasted_iota(jnp.int32, (1, f_dim), 1)
    return [((lane >= h * dh) & (lane < (h + 1) * dh)).astype(jnp.float32)
            for h in range(num_heads)]


def _attn_ffw_step(x, kv, qcos, qsin, kcos, ksin, mod, rotm, masks, w):
    """One Relative{Self,Cross}AttentionLayer + FeedforwardLayer.

    x: (Sq, F) residual stream; kv: (Sk, F) raw key/value source (AdaLN on query only);
    mod: (4, F) rows = [attn scale, attn shift, ffw scale, ffw shift];
    rotm: (F, F) rotary pair-swap matrix; w: this layer's weights (already indexed).
    Full-width projections; per-head score/PV via lane masks.
    """
    f32 = jnp.float32
    dh = x.shape[-1] // len(masks)
    tr = (((1,), (1,)), ((), ()))          # contract last dims: a @ b.T

    aq = x * (1.0 + mod[0:1]) + mod[1:2]   # AdaLN on the query

    q = jnp.dot(aq, w['wq'], preferred_element_type=f32) + w['bq']
    q = q * qcos + jnp.dot(q, rotm, preferred_element_type=f32) * qsin
    q = q * (float(dh) ** -0.5)
    k = jnp.dot(kv, w['wk'], preferred_element_type=f32) + w['bk']
    k = k * kcos + jnp.dot(k, rotm, preferred_element_type=f32) * ksin
    v = jnp.dot(kv, w['wv'], preferred_element_type=f32) + w['bv']

    o = None
    for msk in masks:
        s = lax.dot_general(q * msk, k, tr, preferred_element_type=f32)     # (Sq, Sk)
        e = jnp.exp(s - jnp.max(s, axis=-1, keepdims=True))
        p = e * pl.reciprocal(jnp.sum(e, axis=-1, keepdims=True), approx=True)
        ctr = jnp.dot(p, v * msk, preferred_element_type=f32)               # head lanes only
        o = ctr if o is None else o + ctr
    attn = jnp.dot(o, w['wo'], preferred_element_type=f32) + w['bo']

    x1 = _layer_norm(x + attn, w['ln1g'], w['ln1b'])

    xm = x1 * (1.0 + mod[2:3]) + mod[3:4]                                   # AdaLN on FFW input
    hdn = jnp.maximum(jnp.dot(xm, w['w1'], preferred_element_type=f32) + w['b1'], 0.0)
    y = jnp.dot(hdn, w['w2'], preferred_element_type=f32) + w['b2']
    return _layer_norm(x1 + y, w['ln2g'], w['ln2b'])


# ----------------------------- Pallas kernels -----------------------------

def _time_mod_kernel(pe_ref, grip_ref, tw1_ref, tb1_ref, tw2_ref, tb2_ref,
                     gw1_ref, gb1_ref, gw2_ref, gb2_ref, mw_ref, mb_ref, o_ref):
    """time_emb MLP + curr_gripper_emb MLP + all layers' hoisted AdaLN modulations."""
    f32 = jnp.float32
    ht = jnp.maximum(jnp.dot(pe_ref[...], tw1_ref[...], preferred_element_type=f32)
                     + tb1_ref[...], 0.0)
    t_feats = jnp.dot(ht, tw2_ref[...], preferred_element_type=f32) + tb2_ref[...]
    hg = jnp.maximum(jnp.dot(grip_ref[...], gw1_ref[...], preferred_element_type=f32)
                     + gb1_ref[...], 0.0)
    g_feats = jnp.dot(hg, gw2_ref[...], preferred_element_type=f32) + gb2_ref[...]
    temb = jax.nn.silu(t_feats + g_feats)                      # SiLU shared by all AdaLNs
    o_ref[...] = jnp.dot(temb, mw_ref[...], preferred_element_type=f32) + mb_ref[...]


def _cross_stack_kernel(traj_ref, encw_ref, encb_ref, tpos_ref, ctx_ref,
                        gcos_ref, gsin_ref, ccos_ref, csin_ref, rotm_ref, mods_ref,
                        *rest, num_heads, batch):
    """traj_encoder (+traj-time pos-emb) + fused n-layer cross-attn/FFW stack.

    grid = (n_layers,) 'arbitrary'; batch folded into the block; residual stream
    kept in a VMEM scratch across layers; all weights VMEM-resident (constant index).
    """
    ns = len(STACK_KEYS)
    stack_refs, o_ref, res_ref = rest[:ns], rest[ns], rest[ns + 1]
    layer = pl.program_id(0)
    last = pl.num_programs(0) - 1

    @pl.when(layer == 0)
    def _():
        for b in range(batch):
            res_ref[b] = (jnp.dot(traj_ref[b], encw_ref[...],
                                  preferred_element_type=jnp.float32)
                          + encb_ref[...] + tpos_ref[...])

    w = {key: ref[layer] for key, ref in zip(STACK_KEYS, stack_refs)}
    rotm = rotm_ref[...]
    masks = _head_masks(res_ref.shape[-1], num_heads)

    outs = []
    for b in range(batch):
        out = _attn_ffw_step(res_ref[b], ctx_ref[b],
                             gcos_ref[b], gsin_ref[b], ccos_ref[b], csin_ref[b],
                             mods_ref[b, 0], rotm, masks, w)
        res_ref[b] = out
        outs.append(out)

    @pl.when(layer == last)
    def _():
        for b in range(batch):
            o_ref[b] = outs[b]


def _fused_self_kernel(x_ref, fps_ref, fcos_ref, fsin_ref, rotm_ref, mods_ref,
                       *rest, num_heads, batch, n_traj, n_self, n_rot):
    """Fused self-attn(4) + rotation(2) + position(2) stacks + prediction heads.

    grid = (8,) 'arbitrary'.  Layer 0 builds [traj | fps] in VMEM; layer n_self
    snapshots the self-stack output; layer n_self+n_rot saves the rotation-branch
    features and restarts the residual from the snapshot; the last layer's epilogue
    runs the rotation/position/openess heads and writes the (B, L, 128) output slab.
    """
    ns, nh = len(STACK_KEYS), len(HEAD_KEYS)
    stack_refs = rest[:ns]
    head_refs = dict(zip(HEAD_KEYS, rest[ns:ns + nh]))
    o_ref = rest[ns + nh]
    cur_scr, feat_scr, rot_scr = rest[ns + nh + 1:]

    g = pl.program_id(0)
    last = pl.num_programs(0) - 1
    L = n_traj
    f32 = jnp.float32

    @pl.when(g == 0)
    def _():
        cur_scr[:, 0:L, :] = x_ref[...]        # trajectory tokens (cross-attn output)
        cur_scr[:, L:, :] = fps_ref[...]       # fps context tokens, concat in VMEM

    @pl.when(g == n_self)
    def _():
        feat_scr[...] = cur_scr[...]           # snapshot self-stack output

    @pl.when(g == n_self + n_rot)
    def _():
        rot_scr[...] = cur_scr[:, 0:L, :]      # rotation-branch features
        cur_scr[...] = feat_scr[...]           # restart from snapshot for position branch

    w = {key: ref[g] for key, ref in zip(STACK_KEYS, stack_refs)}
    rotm = rotm_ref[...]
    masks = _head_masks(cur_scr.shape[-1], num_heads)

    outs = []
    for b in range(batch):
        x = cur_scr[b]
        cos, sin = fcos_ref[b], fsin_ref[b]
        # self-attention: keys/values are the RAW residual stream (AdaLN on query only)
        out = _attn_ffw_step(x, x, cos, sin, cos, sin, mods_ref[b, 0], rotm, masks, w)
        cur_scr[b] = out
        outs.append(out)

    @pl.when(g == last)
    def _():
        hp = {key: r[...] for key, r in head_refs.items()}
        for b in range(batch):
            rf = rot_scr[b]                    # (L, F) rotation features
            pf = outs[b][0:L, :]               # (L, F) position features
            rproj = jnp.dot(rf, hp['rp_w'], preferred_element_type=f32) + hp['rp_b']
            hr = jnp.maximum(jnp.dot(rproj, hp['r1_w'], preferred_element_type=f32)
                             + hp['r1_b'], 0.0)
            pproj = jnp.dot(pf, hp['pp_w'], preferred_element_type=f32) + hp['pp_b']
            hpz = jnp.maximum(jnp.dot(pproj, hp['p1_w'], preferred_element_type=f32)
                              + hp['p1_b'], 0.0)
            hop = jnp.maximum(jnp.dot(pproj, hp['o1_w'], preferred_element_type=f32)
                              + hp['o1_b'], 0.0)
            # lane-dense slab: [0:3]=position, [3:6]=rotation, [6:7]=openess, rest zero
            o_ref[b] = (jnp.dot(hpz, hp['p2_pad'], preferred_element_type=f32)
                        + jnp.dot(hr, hp['r2_pad'], preferred_element_type=f32)
                        + jnp.dot(hop, hp['o2_pad'], preferred_element_type=f32)
                        + hp['b_pad'])


# ----------------------------- Pallas wrappers -----------------------------

def _const_spec(shape):
    """Full-array block with a constant index map -> DMA'd once, VMEM-resident."""
    nd = len(shape)

    def idx(l):
        return (0,) * nd

    return pl.BlockSpec(shape, idx)


def time_mod_pallas(pe, grip, params):
    B = pe.shape[0]
    return pl.pallas_call(
        _time_mod_kernel,
        out_shape=jax.ShapeDtypeStruct((B, N_LAYERS_TOTAL * 4 * EMB), jnp.float32),
    )(pe, grip,
      params['time_w1'], params['time_b1'], params['time_w2'], params['time_b2'],
      params['grip_w1'], params['grip_b1'], params['grip_w2'], params['grip_b2'],
      params['mod_w'], params['mod_b'])


def cross_stack_pallas(traj, tpos, ctx, gcos, gsin, ccos, csin, mods, params):
    B, L, _ = traj.shape
    F_ = ctx.shape[-1]
    sp = params['cross']
    n = sp['wq'].shape[0]

    args = (traj, params['enc_w'], params['enc_b'], tpos, ctx,
            gcos, gsin, ccos, csin, params['pair_rot'], mods)
    in_specs = [_const_spec(a.shape) for a in args[:-1]]
    in_specs.append(pl.BlockSpec((B, 1, 4, F_), lambda l: (0, OFF_CROSS + l, 0, 0)))
    in_specs += [_const_spec(sp[k].shape) for k in STACK_KEYS]

    kernel = functools.partial(_cross_stack_kernel, num_heads=HEADS, batch=B)
    return pl.pallas_call(
        kernel,
        grid=(n,),
        in_specs=in_specs,
        out_specs=pl.BlockSpec((B, L, F_), lambda l: (0, 0, 0)),
        out_shape=jax.ShapeDtypeStruct((B, L, F_), jnp.float32),
        scratch_shapes=[pltpu.VMEM((B, L, F_), jnp.float32)],
        compiler_params=pltpu.CompilerParams(dimension_semantics=("arbitrary",)),
    )(*args, *[sp[k] for k in STACK_KEYS])


def fused_self_pallas(x, fps_bkf, f_cos, f_sin, mods, params):
    B, L, F_ = x.shape
    K = fps_bkf.shape[1]
    S = L + K
    sp, hp = params['fused'], params['heads']
    n = sp['wq'].shape[0]

    args = (x, fps_bkf, f_cos, f_sin, params['pair_rot'], mods)
    in_specs = [_const_spec(a.shape) for a in args[:-1]]
    in_specs.append(pl.BlockSpec((B, 1, 4, F_), lambda l: (0, OFF_SELF + l, 0, 0)))
    in_specs += [_const_spec(sp[k].shape) for k in STACK_KEYS]
    in_specs += [_const_spec(hp[k].shape) for k in HEAD_KEYS]

    kernel = functools.partial(_fused_self_kernel, num_heads=HEADS, batch=B,
                               n_traj=L, n_self=N_SELF, n_rot=N_ROT)
    # TODO(synk): on v7x add a size-2 'parallel' leading axis (rot vs pos branch) so
    # the second TensorCore is not idle; on v5e/v6e (single TC) this layout is optimal.
    return pl.pallas_call(
        kernel,
        grid=(n,),
        in_specs=in_specs,
        out_specs=pl.BlockSpec((B, L, OUT_PAD), lambda l: (0, 0, 0)),
        out_shape=jax.ShapeDtypeStruct((B, L, OUT_PAD), jnp.float32),
        scratch_shapes=[pltpu.VMEM((B, S, F_), jnp.float32),    # current residual stream
                        pltpu.VMEM((B, S, F_), jnp.float32),    # self-stack snapshot
                        pltpu.VMEM((B, L, F_), jnp.float32)],   # rotation-branch features
        compiler_params=pltpu.CompilerParams(dimension_semantics=("arbitrary",)),
    )(*args, *[sp[k] for k in STACK_KEYS], *[hp[k] for k in HEAD_KEYS])


# ----------------------------- JAX glue -----------------------------

def sinusoidal_pos_emb(x, dim):
    half = dim // 2
    emb = math.log(10000.0) / (half - 1)
    freqs = jnp.exp(jnp.arange(half, dtype=jnp.float32) * -emb)
    ang = x[..., None] * freqs
    return jnp.concatenate([jnp.sin(ang), jnp.cos(ang)], axis=-1)


def rotary3d(xyz, feat_dim):
    """RotaryPositionEncoding3D: (B, N, 3) -> cos, sin each (B, N, feat_dim)."""
    d = feat_dim // 3
    div = jnp.exp(jnp.arange(0, d, 2, dtype=jnp.float32) * (-math.log(10000.0) / d))

    def per_axis(p):
        ang = p * div
        return (jnp.repeat(jnp.cos(ang), 2, axis=-1),
                jnp.repeat(jnp.sin(ang), 2, axis=-1))

    cx, sx = per_axis(xyz[..., 0:1])
    cy, sy = per_axis(xyz[..., 1:2])
    cz, sz = per_axis(xyz[..., 2:3])
    return (jnp.concatenate([cx, cy, cz], axis=-1),
            jnp.concatenate([sx, sy, sz], axis=-1))


def _pair_rot_matrix(F_):
    """R s.t. (x @ R)[2i] = -x[2i+1], (x @ R)[2i+1] = x[2i]  (rotary pair swap)."""
    i = jnp.arange(F_)[:, None]
    j = jnp.arange(F_)[None, :]
    plus = ((j == i + 1) & (i % 2 == 0)).astype(jnp.float32)
    minus = ((j == i - 1) & (i % 2 == 1)).astype(jnp.float32)
    return plus - minus


# ----------------------------- parameters -----------------------------

def init_params(key):
    cnt = [0]

    def nk():
        cnt[0] += 1
        return jax.random.fold_in(key, cnt[0])

    def rnd(shape, scale=0.05):
        return (scale * jax.random.normal(nk(), shape)).astype(jnp.float32)

    def attn_ffw_layer():
        return dict(
            wq=rnd((EMB, EMB)), bq=rnd((1, EMB)),
            wk=rnd((EMB, EMB)), bk=rnd((1, EMB)),
            wv=rnd((EMB, EMB)), bv=rnd((1, EMB)),
            wo=rnd((EMB, EMB)), bo=rnd((1, EMB)),
            ln1g=jnp.ones((1, EMB), jnp.float32), ln1b=jnp.zeros((1, EMB), jnp.float32),
            w1=rnd((EMB, EMB)), b1=rnd((1, EMB)),
            w2=rnd((EMB, EMB)), b2=rnd((1, EMB)),
            ln2g=jnp.ones((1, EMB), jnp.float32), ln2b=jnp.zeros((1, EMB), jnp.float32),
        )

    def make_stack(n):
        layers = [attn_ffw_layer() for _ in range(n)]
        return {k: jnp.stack([lyr[k] for lyr in layers], axis=0) for k in STACK_KEYS}

    cross = make_stack(N_CROSS)
    selfa = make_stack(N_SELF)
    rot = make_stack(N_ROT)
    pos = make_stack(N_POS)
    # one fused 8-layer stack: [self(4) | rot(2) | pos(2)]
    fused = {k: jnp.concatenate([selfa[k], rot[k], pos[k]], axis=0) for k in STACK_KEYS}

    # prediction heads (final projections padded to a lane-dense 128-wide slab)
    rp_w, rp_b = rnd((EMB, EMB)), rnd((1, EMB))
    r1_w, r1_b = rnd((EMB, EMB)), rnd((1, EMB))
    r2_w, r2_b = rnd((EMB, ROT_OUT)), rnd((1, ROT_OUT))
    pp_w, pp_b = rnd((EMB, EMB)), rnd((1, EMB))
    p1_w, p1_b = rnd((EMB, EMB)), rnd((1, EMB))
    p2_w, p2_b = rnd((EMB, 3)), rnd((1, 3))
    o1_w, o1_b = rnd((EMB, EMB)), rnd((1, EMB))
    o2_w, o2_b = rnd((EMB, 1)), rnd((1, 1))
    p2_pad = jnp.zeros((EMB, OUT_PAD), jnp.float32).at[:, 0:3].set(p2_w)
    r2_pad = jnp.zeros((EMB, OUT_PAD), jnp.float32).at[:, 3:3 + ROT_OUT].set(r2_w)
    o2_pad = jnp.zeros((EMB, OUT_PAD), jnp.float32).at[:, 6:7].set(o2_w)
    b_pad = (jnp.zeros((1, OUT_PAD), jnp.float32)
             .at[:, 0:3].set(p2_b).at[:, 3:3 + ROT_OUT].set(r2_b).at[:, 6:7].set(o2_b))
    heads = dict(rp_w=rp_w, rp_b=rp_b, r1_w=r1_w, r1_b=r1_b, r2_pad=r2_pad,
                 pp_w=pp_w, pp_b=pp_b, p1_w=p1_w, p1_b=p1_b, p2_pad=p2_pad,
                 o1_w=o1_w, o1_b=o1_b, o2_pad=o2_pad, b_pad=b_pad)

    return {
        'enc_w': rnd((3 + ROT_IN, EMB)), 'enc_b': rnd((1, EMB)),
        'time_w1': rnd((EMB, EMB)), 'time_b1': rnd((1, EMB)),
        'time_w2': rnd((EMB, EMB)), 'time_b2': rnd((1, EMB)),
        'grip_w1': rnd((EMB * NHIST, EMB)), 'grip_b1': rnd((1, EMB)),
        'grip_w2': rnd((EMB, EMB)), 'grip_b2': rnd((1, EMB)),
        # all layers' AdaLN (SiLU -> Linear) hoisted into one matmul:
        # per layer 4*EMB columns = [attn scale, attn shift, ffw scale, ffw shift]
        'mod_w': rnd((EMB, N_LAYERS_TOTAL * 4 * EMB)),
        'mod_b': rnd((1, N_LAYERS_TOTAL * 4 * EMB)),
        'pair_rot': _pair_rot_matrix(EMB),
        'cross': cross,
        'fused': fused,
        'heads': heads,
    }


# ----------------------------- forward -----------------------------

def diffusion_head_forward(params, trajectory, timestep, context_feats, context,
                           instr_feats, adaln_gripper_feats, fps_feats, fps_pos):
    del instr_feats  # use_instruction=False, lang_enhanced=False -> unused
    B, L, _ = trajectory.shape
    F_ = EMB

    # denoising-timestep features + all hoisted AdaLN modulations (1 launch)
    pe = sinusoidal_pos_emb(timestep.astype(jnp.float32), F_)          # (B, F)
    grip = adaln_gripper_feats.reshape(B, NHIST * F_)                  # [hist0|hist1|hist2]
    mods = time_mod_pallas(pe, grip, params).reshape(B, N_LAYERS_TOTAL, 4, F_)

    # 3D rotary positional codes (full-width; no per-head transposes needed)
    g_cos, g_sin = rotary3d(trajectory[..., :3], F_)                   # (B, L, F)
    c_cos, c_sin = rotary3d(context[..., :3], F_)                      # (B, N, F)
    traj_time_pos = sinusoidal_pos_emb(jnp.arange(L, dtype=jnp.float32), F_)
    # TODO(synk): ParallelAttention traj/lang cross-attn skipped (use_instruction=False).

    # cross-attention over scene context (traj encoder fused into layer 0; 1 launch)
    x = cross_stack_pallas(trajectory, traj_time_pos, context_feats,
                           g_cos, g_sin, c_cos, c_sin, mods, params)   # (B, L, F)

    # fused self(4)+rot(2)+pos(2) stacks + prediction heads (1 launch)
    fps_bkf = jnp.transpose(fps_feats, (1, 0, 2))                      # (B, K, F)
    f_cos = jnp.concatenate([g_cos, fps_pos[..., 0]], axis=1)          # (B, L+K, F)
    f_sin = jnp.concatenate([g_sin, fps_pos[..., 1]], axis=1)
    out = fused_self_pallas(x, fps_bkf, f_cos, f_sin, mods, params)    # (B, L, 128)

    # slab columns: [pos(3) | rot(3) | open(1)]
    return [out[..., :3 + ROT_OUT + 1]]


# ----------------------------- main -----------------------------

if __name__ == "__main__":
    key = jax.random.PRNGKey(0)
    ks = jax.random.split(key, 10)
    B, L, N, K, MAXLEN = 2, 8, 16, 4, 5

    params = init_params(ks[0])
    trajectory = jax.random.normal(ks[1], (B, L, 3 + ROT_IN), jnp.float32)
    timestep = jax.random.uniform(ks[2], (B,), jnp.float32)
    context_feats = jax.random.normal(ks[3], (B, N, EMB), jnp.float32)
    context = jax.random.normal(ks[4], (B, N, 3), jnp.float32)
    instr_feats = jax.random.normal(ks[5], (B, MAXLEN, EMB), jnp.float32)
    adaln_gripper_feats = jax.random.normal(ks[6], (B, NHIST, EMB), jnp.float32)
    fps_feats = jax.random.normal(ks[7], (K, B, EMB), jnp.float32)
    fps_points = jax.random.normal(ks[8], (B, K, 3), jnp.float32)
    fcos, fsin = rotary3d(fps_points, EMB)
    fps_pos = jnp.stack([fcos, fsin], axis=-1)     # (B, K, EMB, 2)

    fwd = jax.jit(diffusion_head_forward)
    out = fwd(params, trajectory, timestep, context_feats, context,
              instr_feats, adaln_gripper_feats, fps_feats, fps_pos)
    jax.block_until_ready(out)
    assert out[0].shape == (B, L, 3 + ROT_OUT + 1), out[0].shape
    print("KERNEL_OK")
</pallas_src>

<mosaic_0001>
module attributes {stable_mosaic.version = 11 : i64} {
  func.func @_time_mod_kernel(%arg0: memref<2x48xf32, #tpu.memory_space<vmem>>, %arg1: memref<2x144xf32, #tpu.memory_space<vmem>>, %arg2: memref<48x48xf32, #tpu.memory_space<vmem>>, %arg3: memref<1x48xf32, #tpu.memory_space<vmem>>, %arg4: memref<48x48xf32, #tpu.memory_space<vmem>>, %arg5: memref<1x48xf32, #tpu.memory_space<vmem>>, %arg6: memref<144x48xf32, #tpu.memory_space<vmem>>, %arg7: memref<1x48xf32, #tpu.memory_space<vmem>>, %arg8: memref<48x48xf32, #tpu.memory_space<vmem>>, %arg9: memref<1x48xf32, #tpu.memory_space<vmem>>, %arg10: memref<48x1920xf32, #tpu.memory_space<vmem>>, %arg11: memref<1x1920xf32, #tpu.memory_space<vmem>>, %arg12: memref<2x1920xf32, #tpu.memory_space<vmem>>) attributes {dimension_semantics = [], scalar_prefetch = 0 : i64, scratch_operands = 0 : i64, tpu.core_type = #tpu.core_type<tc>} {
    %c0 = arith.constant 0 : index
    %c0_0 = arith.constant 0 : index
    %0 = vector.load %arg0[%c0, %c0_0] : memref<2x48xf32, #tpu.memory_space<vmem>>, vector<2x48xf32>
    %c0_1 = arith.constant 0 : index
    %c0_2 = arith.constant 0 : index
    %1 = vector.load %arg2[%c0_1, %c0_2] : memref<48x48xf32, #tpu.memory_space<vmem>>, vector<48x48xf32>
    %cst = arith.constant dense<0.000000e+00> : vector<2x48xf32>
    %2 = tpu.matmul %0, %1, %cst {dimension_numbers = #tpu.dot_dimension_numbers<[1], [0], [0], [1], [0, 0, 1, 1], [], []>} : vector<2x48xf32>, vector<48x48xf32>, vector<2x48xf32> -> vector<2x48xf32>
    %c0_3 = arith.constant 0 : index
    %c0_4 = arith.constant 0 : index
    %3 = vector.load %arg3[%c0_3, %c0_4] : memref<1x48xf32, #tpu.memory_space<vmem>>, vector<1x48xf32>
    %4 = vector.broadcast %3 : vector<1x48xf32> to vector<2x48xf32>
    %5 = arith.addf %2, %4 : vector<2x48xf32>
    %cst_5 = arith.constant 0.000000e+00 : f32
    %6 = vector.broadcast %cst_5 : f32 to vector<2x48xf32>
    %7 = arith.maximumf %5, %6 : vector<2x48xf32>
    %c0_6 = arith.constant 0 : index
    %c0_7 = arith.constant 0 : index
    %8 = vector.load %arg4[%c0_6, %c0_7] : memref<48x48xf32, #tpu.memory_space<vmem>>, vector<48x48xf32>
    %cst_8 = arith.constant dense<0.000000e+00> : vector<2x48xf32>
    %9 = tpu.matmul %7, %8, %cst_8 {dimension_numbers = #tpu.dot_dimension_numbers<[1], [0], [0], [1], [0, 0, 1, 1], [], []>} : vector<2x48xf32>, vector<48x48xf32>, vector<2x48xf32> -> vector<2x48xf32>
    %c0_9 = arith.constant 0 : index
    %c0_10 = arith.constant 0 : index
    %10 = vector.load %arg5[%c0_9, %c0_10] : memref<1x48xf32, #tpu.memory_space<vmem>>, vector<1x48xf32>
    %11 = vector.broadcast %10 : vector<1x48xf32> to vector<2x48xf32>
    %12 = arith.addf %9, %11 : vector<2x48xf32>
    %c0_11 = arith.constant 0 : index
    %c0_12 = arith.constant 0 : index
    %13 = vector.load %arg1[%c0_11, %c0_12] : memref<2x144xf32, #tpu.memory_space<vmem>>, vector<2x144xf32>
    %c0_13 = arith.constant 0 : index
    %c0_14 = arith.constant 0 : index
    %14 = vector.load %arg6[%c0_13, %c0_14] : memref<144x48xf32, #tpu.memory_space<vmem>>, vector<144x48xf32>
    %cst_15 = arith.constant dense<0.000000e+00> : vector<2x48xf32>
    %15 = tpu.matmul %13, %14, %cst_15 {dimension_numbers = #tpu.dot_dimension_numbers<[1], [0], [0], [1], [0, 0, 1, 1], [], []>} : vector<2x144xf32>, vector<144x48xf32>, vector<2x48xf32> -> vector<2x48xf32>
    %c0_16 = arith.constant 0 : index
    %c0_17 = arith.constant 0 : index
    %16 = vector.load %arg7[%c0_16, %c0_17] : memref<1x48xf32, #tpu.memory_space<vmem>>, vector<1x48xf32>
    %17 = vector.broadcast %16 : vector<1x48xf32> to vector<2x48xf32>
    %18 = arith.addf %15, %17 : vector<2x48xf32>
    %cst_18 = arith.constant 0.000000e+00 : f32
    %19 = vector.broadcast %cst_18 : f32 to vector<2x48xf32>
    %20 = arith.maximumf %18, %19 : vector<2x48xf32>
    %c0_19 = arith.constant 0 : index
    %c0_20 = arith.constant 0 : index
    %21 = vector.load %arg8[%c0_19, %c0_20] : memref<48x48xf32, #tpu.memory_space<vmem>>, vector<48x48xf32>
    %cst_21 = arith.constant dense<0.000000e+00> : vector<2x48xf32>
    %22 = tpu.matmul %20, %21, %cst_21 {dimension_numbers = #tpu.dot_dimension_numbers<[1], [0], [0], [1], [0, 0, 1, 1], [], []>} : vector<2x48xf32>, vector<48x48xf32>, vector<2x48xf32> -> vector<2x48xf32>
    %c0_22 = arith.constant 0 : index
    %c0_23 = arith.constant 0 : index
    %23 = vector.load %arg9[%c0_22, %c0_23] : memref<1x48xf32, #tpu.memory_space<vmem>>, vector<1x48xf32>
    %24 = vector.broadcast %23 : vector<1x48xf32> to vector<2x48xf32>
    %25 = arith.addf %22, %24 : vector<2x48xf32>
    %26 = arith.addf %12, %25 : vector<2x48xf32>
    %27 = arith.negf %26 : vector<2x48xf32>
    %28 = math.exp %27 : vector<2x48xf32>
    %cst_24 = arith.constant 1.000000e+00 : f32
    %29 = vector.broadcast %cst_24 : f32 to vector<2x48xf32>
    %30 = arith.addf %29, %28 : vector<2x48xf32>
    %31 = arith.divf %29, %30 : vector<2x48xf32>
    %32 = arith.mulf %26, %31 : vector<2x48xf32>
    %c0_25 = arith.constant 0 : index
    %c0_26 = arith.constant 0 : index
    %33 = vector.load %arg10[%c0_25, %c0_26] : memref<48x1920xf32, #tpu.memory_space<vmem>>, vector<48x1920xf32>
    %cst_27 = arith.constant dense<0.000000e+00> : vector<2x1920xf32>
    %34 = tpu.matmul %32, %33, %cst_27 {dimension_numbers = #tpu.dot_dimension_numbers<[1], [0], [0], [1], [0, 0, 1, 1], [], []>} : vector<2x48xf32>, vector<48x1920xf32>, vector<2x1920xf32> -> vector<2x1920xf32>
    %c0_28 = arith.constant 0 : index
    %c0_29 = arith.constant 0 : index
    %35 = vector.load %arg11[%c0_28, %c0_29] : memref<1x1920xf32, #tpu.memory_space<vmem>>, vector<1x1920xf32>
    %36 = vector.broadcast %35 : vector<1x1920xf32> to vector<2x1920xf32>
    %37 = arith.addf %34, %36 : vector<2x1920xf32>
    %c0_30 = arith.constant 0 : index
    %c0_31 = arith.constant 0 : index
    %38 = vector.load %arg12[%c0_30, %c0_31] : memref<2x1920xf32, #tpu.memory_space<vmem>>, vector<2x1920xf32>
    tpu.vector_store %arg12[%c0_30, %c0_31], %37 {strides = array<i32>} : memref<2x1920xf32, #tpu.memory_space<vmem>>, vector<2x1920xf32>,
    return
  }
}

module attributes {stable_mosaic.version = 11 : i64} {
  func.func @_fused_self_kernel(%arg0: i32, %arg1: memref<2x8x48xf32, #tpu.memory_space<vmem>>, %arg2: memref<2x4x48xf32, #tpu.memory_space<vmem>>, %arg3: memref<2x12x48xf32, #tpu.memory_space<vmem>>, %arg4: memref<2x12x48xf32, #tpu.memory_space<vmem>>, %arg5: memref<48x48xf32, #tpu.memory_space<vmem>>, %arg6: memref<2x1x4x48xf32, #tpu.memory_space<vmem>>, %arg7: memref<8x48x48xf32, #tpu.memory_space<vmem>>, %arg8: memref<8x1x48xf32, #tpu.memory_space<vmem>>, %arg9: memref<8x48x48xf32, #tpu.memory_space<vmem>>, %arg10: memref<8x1x48xf32, #tpu.memory_space<vmem>>, %arg11: memref<8x48x48xf32, #tpu.memory_space<vmem>>, %arg12: memref<8x1x48xf32, #tpu.memory_space<vmem>>, %arg13: memref<8x48x48xf32, #tpu.memory_space<vmem>>, %arg14: memref<8x1x48xf32, #tpu.memory_space<vmem>>, %arg15: memref<8x1x48xf32, #tpu.memory_space<vmem>>, %arg16: memref<8x1x48xf32, #tpu.memory_space<vmem>>, %arg17: memref<8x48x48xf32, #tpu.memory_space<vmem>>, %arg18: memref<8x1x48xf32, #tpu.memory_space<vmem>>, %arg19: memref<8x48x48xf32, #tpu.memory_space<vmem>>, %arg20: memref<8x1x48xf32, #tpu.memory_space<vmem>>, %arg21: memref<8x1x48xf32, #tpu.memory_space<vmem>>, %arg22: memref<8x1x48xf32, #tpu.memory_space<vmem>>, %arg23: memref<48x48xf32, #tpu.memory_space<vmem>>, %arg24: memref<1x48xf32, #tpu.memory_space<vmem>>, %arg25: memref<48x48xf32, #tpu.memory_space<vmem>>, %arg26: memref<1x48xf32, #tpu.memory_space<vmem>>, %arg27: memref<48x128xf32, #tpu.memory_space<vmem>>, %arg28: memref<48x48xf32, #tpu.memory_space<vmem>>, %arg29: memref<1x48xf32, #tpu.memory_space<vmem>>, %arg30: memref<48x48xf32, #tpu.memory_space<vmem>>, %arg31: memref<1x48xf32, #tpu.memory_space<vmem>>, %arg32: memref<48x128xf32, #tpu.memory_space<vmem>>, %arg33: memref<48x48xf32, #tpu.memory_space<vmem>>, %arg34: memref<1x48xf32, #tpu.memory_space<vmem>>, %arg35: memref<48x128xf32, #tpu.memory_space<vmem>>, %arg36: memref<1x128xf32, #tpu.memory_space<vmem>>, %arg37: memref<2x8x128xf32, #tpu.memory_space<vmem>>, %arg38: memref<2x12x48xf32, #tpu.memory_space<vmem>>, %arg39: memref<2x12x48xf32, #tpu.memory_space<vmem>>, %arg40: memref<2x8x48xf32, #tpu.memory_space<vmem>>) attributes {dimension_semantics = [#tpu.dimension_semantics<arbitrary>], iteration_bounds = array<i64: 8>, scalar_prefetch = 0 : i64, scratch_operands = 3 : i64, tpu.core_type = #tpu.core_type<tc>, window_params = [{pipeline_mode = #tpu.pipeline_mode<synchronous>, transform_indices = @transform_0, window_bounds = array<i64: 2, 8, 48>}, {pipeline_mode = #tpu.pipeline_mode<synchronous>, transform_indices = @transform_1, window_bounds = array<i64: 2, 4, 48>}, {pipeline_mode = #tpu.pipeline_mode<synchronous>, transform_indices = @transform_2, window_bounds = array<i64: 2, 12, 48>}, {pipeline_mode = #tpu.pipeline_mode<synchronous>, transform_indices = @transform_3, window_bounds = array<i64: 2, 12, 48>}, {pipeline_mode = #tpu.pipeline_mode<synchronous>, transform_indices = @transform_4, window_bounds = array<i64: 48, 48>}, {transform_indices = @transform_5, window_bounds = array<i64: 2, 1, 4, 48>}, {pipeline_mode = #tpu.pipeline_mode<synchronous>, transform_indices = @transform_6, window_bounds = array<i64: 8, 48, 48>}, {pipeline_mode = #tpu.pipeline_mode<synchronous>, transform_indices = @transform_7, window_bounds = array<i64: 8, 1, 48>}, {pipeline_mode = #tpu.pipeline_mode<synchronous>, transform_indices = @transform_8, window_bounds = array<i64: 8, 48, 48>}, {pipeline_mode = #tpu.pipeline_mode<synchronous>, transform_indices = @transform_9, window_bounds = array<i64: 8, 1, 48>}, {pipeline_mode = #tpu.pipeline_mode<synchronous>, transform_indices = @transform_10, window_bounds = array<i64: 8, 48, 48>}, {pipeline_mode = #tpu.pipeline_mode<synchronous>, transform_indices = @transform_11, window_bounds = array<i64: 8, 1, 48>}, {pipeline_mode = #tpu.pipeline_mode<synchronous>, transform_indices = @transform_12, window_bounds = array<i64: 8, 48, 48>}, {pipeline_mode = #tpu.pipeline_mode<synchronous>, transform_indices = @transform_13, window_bounds = array<i64: 8, 1, 48>}, {pipeline_mode = #tpu.pipeline_mode<synchronous>, transform_indices = @transform_14, window_bounds = array<i64: 8, 1, 48>}, {pipeline_mode = #tpu.pipeline_mode<synchronous>, transform_indices = @transform_15, window_bounds = array<i64: 8, 1, 48>}, {pipeline_mode = #tpu.pipeline_mode<synchronous>, transform_indices = @transform_16, window_bounds = array<i64: 8, 48, 48>}, {pipeline_mode = #tpu.pipeline_mode<synchronous>, transform_indices = @transform_17, window_bounds = array<i64: 8, 1, 48>}, {pipeline_mode = #tpu.pipeline_mode<synchronous>, transform_indices = @transform_18, window_bounds = array<i64: 8, 48, 48>}, {pipeline_mode = #tpu.pipeline_mode<synchronous>, transform_indices = @transform_19, window_bounds = array<i64: 8, 1, 48>}, {pipeline_mode = #tpu.pipeline_mode<synchronous>, transform_indices = @transform_20, window_bounds = array<i64: 8, 1, 48>}, {pipeline_mode = #tpu.pipeline_mode<synchronous>, transform_indices = @transform_21, window_bounds = array<i64: 8, 1, 48>}, {pipeline_mode = #tpu.pipeline_mode<synchronous>, transform_indices = @transform_22, window_bounds = array<i64: 48, 48>}, {pipeline_mode = #tpu.pipeline_mode<synchronous>, transform_indices = @transform_23, window_bounds = array<i64: 1, 48>}, {pipeline_mode = #tpu.pipeline_mode<synchronous>, transform_indices = @transform_24, window_bounds = array<i64: 48, 48>}, {pipeline_mode = #tpu.pipeline_mode<synchronous>, transform_indices = @transform_25, window_bounds = array<i64: 1, 48>}, {pipeline_mode = #tpu.pipeline_mode<synchronous>, transform_indices = @transform_26, window_bounds = array<i64: 48, 128>}, {pipeline_mode = #tpu.pipeline_mode<synchronous>, transform_indices = @transform_27, window_bounds = array<i64: 48, 48>}, {pipeline_mode = #tpu.pipeline_mode<synchronous>, transform_indices = @transform_28, window_bounds = array<i64: 1, 48>}, {pipeline_mode = #tpu.pipeline_mode<synchronous>, transform_indices = @transform_29, window_bounds = array<i64: 48, 48>}, {pipeline_mode = #tpu.pipeline_mode<synchronous>, transform_indices = @transform_30, window_bounds = array<i64: 1, 48>}, {pipeline_mode = #tpu.pipeline_mode<synchronous>, transform_indices = @transform_31, window_bounds = array<i64: 48, 128>}, {pipeline_mode = #tpu.pipeline_mode<synchronous>, transform_indices = @transform_32, window_bounds = array<i64: 48, 48>}, {pipeline_mode = #tpu.pipeline_mode<synchronous>, transform_indices = @transform_33, window_bounds = array<i64: 1, 48>}, {pipeline_mode = #tpu.pipeline_mode<synchronous>, transform_indices = @transform_34, window_bounds = array<i64: 48, 128>}, {pipeline_mode = #tpu.pipeline_mode<synchronous>, transform_indices = @transform_35, window_bounds = array<i64: 1, 128>}, {pipeline_mode = #tpu.pipeline_mode<synchronous>, transform_indices = @transform_36, window_bounds = array<i64: 2, 8, 128>}]} {
    %c0_i32 = arith.constant 0 : i32
    %0 = arith.cmpi eq, %arg0, %c0_i32 : i32
    %1 = arith.extui %0 : i1 to i32
    %c0_i32_0 = arith.constant 0 : i32
    %2 = arith.cmpi ne, %1, %c0_i32_0 : i32
    scf.if %2 {
      %c0_184 = arith.constant 0 : index
      %c0_185 = arith.constant 0 : index
      %c0_186 = arith.constant 0 : index
      %594 = vector.load %arg1[%c0_184, %c0_185, %c0_186] : memref<2x8x48xf32, #tpu.memory_space<vmem>>, vector<2x8x48xf32>
      %c0_187 = arith.constant 0 : index
      %c0_188 = arith.constant 0 : index
      %c0_189 = arith.constant 0 : index
      %595 = vector.load %arg38[%c0_187, %c0_188, %c0_189] : memref<2x12x48xf32, #tpu.memory_space<vmem>>, vector<2x8x48xf32>
      tpu.vector_store %arg38[%c0_187, %c0_188, %c0_189], %594 {strides = array<i32>} : memref<2x12x48xf32, #tpu.memory_space<vmem>>, vector<2x8x48xf32>,
      %c0_190 = arith.constant 0 : index
      %c0_191 = arith.constant 0 : index
      %c0_192 = arith.constant 0 : index
      %596 = vector.load %arg2[%c0_190, %c0_191, %c0_192] : memref<2x4x48xf32, #tpu.memory_space<vmem>>, vector<2x4x48xf32>
      %c0_193 = arith.constant 0 : index
      %c8 = arith.constant 8 : index
      %c0_194 = arith.constant 0 : index
      %597 = vector.load %arg38[%c0_193, %c8, %c0_194] : memref<2x12x48xf32, #tpu.memory_space<vmem>>, vector<2x4x48xf32>
      tpu.vector_store %arg38[%c0_193, %c8, %c0_194], %596 {strides = array<i32>} : memref<2x12x48xf32, #tpu.memory_space<vmem>>, vector<2x4x48xf32>,
    } else {
    }
    %c4_i32 = arith.constant 4 : i32
    %3 = arith.cmpi eq, %arg0, %c4_i32 : i32
    %4 = arith.extui %3 : i1 to i32
    %c0_i32_1 = arith.constant 0 : i32
    %5 = arith.cmpi ne, %4, %c0_i32_1 : i32
    scf.if %5 {
      %c0_184 = arith.constant 0 : index
      %c0_185 = arith.constant 0 : index
      %c0_186 = arith.constant 0 : index
      %594 = vector.load %arg38[%c0_184, %c0_185, %c0_186] : memref<2x12x48xf32, #tpu.memory_space<vmem>>, vector<2x12x48xf32>
      %c0_187 = arith.constant 0 : index
      %c0_188 = arith.constant 0 : index
      %c0_189 = arith.constant 0 : index
      %595 = vector.load %arg39[%c0_187, %c0_188, %c0_189] : memref<2x12x48xf32, #tpu.memory_space<vmem>>, vector<2x12x48xf32>
      tpu.vector_store %arg39[%c0_187, %c0_188, %c0_189], %594 {strides = array<i32>} : memref<2x12x48xf32, #tpu.memory_space<vmem>>, vector<2x12x48xf32>,
    } else {
    }
    %c6_i32 = arith.constant 6 : i32
    %6 = arith.cmpi eq, %arg0, %c6_i32 : i32
    %7 = arith.extui %6 : i1 to i32
    %c0_i32_2 = arith.constant 0 : i32
    %8 = arith.cmpi ne, %7, %c0_i32_2 : i32
    scf.if %8 {
      %c0_184 = arith.constant 0 : index
      %c0_185 = arith.constant 0 : index
      %c0_186 = arith.constant 0 : index
      %594 = vector.load %arg38[%c0_184, %c0_185, %c0_186] : memref<2x12x48xf32, #tpu.memory_space<vmem>>, vector<2x8x48xf32>
      %c0_187 = arith.constant 0 : index
      %c0_188 = arith.constant 0 : index
      %c0_189 = arith.constant 0 : index
      %595 = vector.load %arg40[%c0_187, %c0_188, %c0_189] : memref<2x8x48xf32, #tpu.memory_space<vmem>>, vector<2x8x48xf32>
      tpu.vector_store %arg40[%c0_187, %c0_188, %c0_189], %594 {strides = array<i32>} : memref<2x8x48xf32, #tpu.memory_space<vmem>>, vector<2x8x48xf32>,
      %c0_190 = arith.constant 0 : index
      %c0_191 = arith.constant 0 : index
      %c0_192 = arith.constant 0 : index
      %596 = vector.load %arg39[%c0_190, %c0_191, %c0_192] : memref<2x12x48xf32, #tpu.memory_space<vmem>>, vector<2x12x48xf32>
      %c0_193 = arith.constant 0 : index
      %c0_194 = arith.constant 0 : index
      %c0_195 = arith.constant 0 : index
      %597 = vector.load %arg38[%c0_193, %c0_194, %c0_195] : memref<2x12x48xf32, #tpu.memory_space<vmem>>, vector<2x12x48xf32>
      tpu.vector_store %arg38[%c0_193, %c0_194, %c0_195], %596 {strides = array<i32>} : memref<2x12x48xf32, #tpu.memory_space<vmem>>, vector<2x12x48xf32>,
    } else {
    }
    %9 = arith.index_cast %arg0 : i32 to index
    %c0 = arith.constant 0 : index
    %c0_3 = arith.constant 0 : index
    %10 = vector.load %arg7[%9, %c0, %c0_3] : memref<8x48x48xf32, #tpu.memory_space<vmem>>, vector<1x48x48xf32>
    %11 = vector.shape_cast %10 : vector<1x48x48xf32> to vector<48x48xf32>
    %12 = arith.index_cast %arg0 : i32 to index
    %c0_4 = arith.constant 0 : index
    %c0_5 = arith.constant 0 : index
    %13 = vector.load %arg8[%12, %c0_4, %c0_5] : memref<8x1x48xf32, #tpu.memory_space<vmem>>, vector<1x1x48xf32>
    %14 = vector.shape_cast %13 : vector<1x1x48xf32> to vector<1x48xf32>
    %15 = arith.index_cast %arg0 : i32 to index
    %c0_6 = arith.constant 0 : index
    %c0_7 = arith.constant 0 : index
    %16 = vector.load %arg9[%15, %c0_6, %c0_7] : memref<8x48x48xf32, #tpu.memory_space<vmem>>, vector<1x48x48xf32>
    %17 = vector.shape_cast %16 : vector<1x48x48xf32> to vector<48x48xf32>
    %18 = arith.index_cast %arg0 : i32 to index
    %c0_8 = arith.constant 0 : index
    %c0_9 = arith.constant 0 : index
    %19 = vector.load %arg10[%18, %c0_8, %c0_9] : memref<8x1x48xf32, #tpu.memory_space<vmem>>, vector<1x1x48xf32>
    %20 = vector.shape_cast %19 : vector<1x1x48xf32> to vector<1x48xf32>
    %21 = arith.index_cast %arg0 : i32 to index
    %c0_10 = arith.constant 0 : index
    %c0_11 = arith.constant 0 : index
    %22 = vector.load %arg11[%21, %c0_10, %c0_11] : memref<8x48x48xf32, #tpu.memory_space<vmem>>, vector<1x48x48xf32>
    %23 = vector.shape_cast %22 : vector<1x48x48xf32> to vector<48x48xf32>
    %24 = arith.index_cast %arg0 : i32 to index
    %c0_12 = arith.constant 0 : index
    %c0_13 = arith.constant 0 : index
    %25 = vector.load %arg12[%24, %c0_12, %c0_13] : memref<8x1x48xf32, #tpu.memory_space<vmem>>, vector<1x1x48xf32>
    %26 = vector.shape_cast %25 : vector<1x1x48xf32> to vector<1x48xf32>
    %27 = arith.index_cast %arg0 : i32 to index
    %c0_14 = arith.constant 0 : index
    %c0_15 = arith.constant 0 : index
    %28 = vector.load %arg13[%27, %c0_14, %c0_15] : memref<8x48x48xf32, #tpu.memory_space<vmem>>, vector<1x48x48xf32>
    %29 = vector.shape_cast %28 : vector<1x48x48xf32> to vector<48x48xf32>
    %30 = arith.index_cast %arg0 : i32 to index
    %c0_16 = arith.constant 0 : index
    %c0_17 = arith.constant 0 : index
    %31 = vector.load %arg14[%30, %c0_16, %c0_17] : memref<8x1x48xf32, #tpu.memory_space<vmem>>, vector<1x1x48xf32>
    %32 = vector.shape_cast %31 : vector<1x1x48xf32> to vector<1x48xf32>
    %33 = arith.index_cast %arg0 : i32 to index
    %c0_18 = arith.constant 0 : index
    %c0_19 = arith.constant 0 : index
    %34 = vector.load %arg15[%33, %c0_18, %c0_19] : memref<8x1x48xf32, #tpu.memory_space<vmem>>, vector<1x1x48xf32>
    %35 = vector.shape_cast %34 : vector<1x1x48xf32> to vector<1x48xf32>
    %36 = arith.index_cast %arg0 : i32 to index
    %c0_20 = arith.constant 0 : index
    %c0_21 = arith.constant 0 : index
    %37 = vector.load %arg16[%36, %c0_20, %c0_21] : memref<8x1x48xf32, #tpu.memory_space<vmem>>, vector<1x1x48xf32>
    %38 = vector.shape_cast %37 : vector<1x1x48xf32> to vector<1x48xf32>
    %39 = arith.index_cast %arg0 : i32 to index
    %c0_22 = arith.constant 0 : index
    %c0_23 = arith.constant 0 : index
    %40 = vector.load %arg17[%39, %c0_22, %c0_23] : memref<8x48x48xf32, #tpu.memory_space<vmem>>, vector<1x48x48xf32>
    %41 = vector.shape_cast %40 : vector<1x48x48xf32> to vector<48x48xf32>
    %42 = arith.index_cast %arg0 : i32 to index
    %c0_24 = arith.constant 0 : index
    %c0_25 = arith.constant 0 : index
    %43 = vector.load %arg18[%42, %c0_24, %c0_25] : memref<8x1x48xf32, #tpu.memory_space<vmem>>, vector<1x1x48xf32>
    %44 = vector.shape_cast %43 : vector<1x1x48xf32> to vector<1x48xf32>
    %45 = arith.index_cast %arg0 : i32 to index
    %c0_26 = arith.constant 0 : index
    %c0_27 = arith.constant 0 : index
    %46 = vector.load %arg19[%45, %c0_26, %c0_27] : memref<8x48x48xf32, #tpu.memory_space<vmem>>, vector<1x48x48xf32>
    %47 = vector.shape_cast %46 : vector<1x48x48xf32> to vector<48x48xf32>
    %48 = arith.index_cast %arg0 : i32 to index
    %c0_28 = arith.constant 0 : index
    %c0_29 = arith.constant 0 : index
    %49 = vector.load %arg20[%48, %c0_28, %c0_29] : memref<8x1x48xf32, #tpu.memory_space<vmem>>, vector<1x1x48xf32>
    %50 = vector.shape_cast %49 : vector<1x1x48xf32> to vector<1x48xf32>
    %51 = arith.index_cast %arg0 : i32 to index
    %c0_30 = arith.constant 0 : index
    %c0_31 = arith.constant 0 : index
    %52 = vector.load %arg21[%51, %c0_30, %c0_31] : memref<8x1x48xf32, #tpu.memory_space<vmem>>, vector<1x1x48xf32>
    %53 = vector.shape_cast %52 : vector<1x1x48xf32> to vector<1x48xf32>
    %54 = arith.index_cast %arg0 : i32 to index
    %c0_32 = arith.constant 0 : index
    %c0_33 = arith.constant 0 : index
    %55 = vector.load %arg22[%54, %c0_32, %c0_33] : memref<8x1x48xf32, #tpu.memory_space<vmem>>, vector<1x1x48xf32>
    %56 = vector.shape_cast %55 : vector<1x1x48xf32> to vector<1x48xf32>
    %c0_34 = arith.constant 0 : index
    %c0_35 = arith.constant 0 : index
    %57 = vector.load %arg5[%c0_34, %c0_35] : memref<48x48xf32, #tpu.memory_space<vmem>>, vector<48x48xf32>
    %58 = tpu.iota {dimensions = array<i32: 1>} : vector<1x48xi32>
    %c0_i32_36 = arith.constant 0 : i32
    %59 = vector.broadcast %c0_i32_36 : i32 to vector<1x48xi32>
    %60 = arith.cmpi sge, %58, %59 : vector<1x48xi32>
    %c6_i32_37 = arith.constant 6 : i32
    %61 = vector.broadcast %c6_i32_37 : i32 to vector<1x48xi32>
    %62 = arith.cmpi slt, %58, %61 : vector<1x48xi32>
    %63 = arith.andi %60, %62 : vector<1x48xi1>
    %64 = arith.extui %63 : vector<1x48xi1> to vector<1x48xi32>
    %65 = arith.sitofp %64 : vector<1x48xi32> to vector<1x48xf32>
    %c6_i32_38 = arith.constant 6 : i32
    %66 = vector.broadcast %c6_i32_38 : i32 to vector<1x48xi32>
    %67 = arith.cmpi sge, %58, %66 : vector<1x48xi32>
    %c12_i32 = arith.constant 12 : i32
    %68 = vector.broadcast %c12_i32 : i32 to vector<1x48xi32>
    %69 = arith.cmpi slt, %58, %68 : vector<1x48xi32>
    %70 = arith.andi %67, %69 : vector<1x48xi1>
    %71 = arith.extui %70 : vector<1x48xi1> to vector<1x48xi32>
    %72 = arith.sitofp %71 : vector<1x48xi32> to vector<1x48xf32>
    %c12_i32_39 = arith.constant 12 : i32
    %73 = vector.broadcast %c12_i32_39 : i32 to vector<1x48xi32>
    %74 = arith.cmpi sge, %58, %73 : vector<1x48xi32>
    %c18_i32 = arith.constant 18 : i32
    %75 = vector.broadcast %c18_i32 : i32 to vector<1x48xi32>
    %76 = arith.cmpi slt, %58, %75 : vector<1x48xi32>
    %77 = arith.andi %74, %76 : vector<1x48xi1>
    %78 = arith.extui %77 : vector<1x48xi1> to vector<1x48xi32>
    %79 = arith.sitofp %78 : vector<1x48xi32> to vector<1x48xf32>
    %c18_i32_40 = arith.constant 18 : i32
    %80 = vector.broadcast %c18_i32_40 : i32 to vector<1x48xi32>
    %81 = arith.cmpi sge, %58, %80 : vector<1x48xi32>
    %c24_i32 = arith.constant 24 : i32
    %82 = vector.broadcast %c24_i32 : i32 to vector<1x48xi32>
    %83 = arith.cmpi slt, %58, %82 : vector<1x48xi32>
    %84 = arith.andi %81, %83 : vector<1x48xi1>
    %85 = arith.extui %84 : vector<1x48xi1> to vector<1x48xi32>
    %86 = arith.sitofp %85 : vector<1x48xi32> to vector<1x48xf32>
    %c24_i32_41 = arith.constant 24 : i32
    %87 = vector.broadcast %c24_i32_41 : i32 to vector<1x48xi32>
    %88 = arith.cmpi sge, %58, %87 : vector<1x48xi32>
    %c30_i32 = arith.constant 30 : i32
    %89 = vector.broadcast %c30_i32 : i32 to vector<1x48xi32>
    %90 = arith.cmpi slt, %58, %89 : vector<1x48xi32>
    %91 = arith.andi %88, %90 : vector<1x48xi1>
    %92 = arith.extui %91 : vector<1x48xi1> to vector<1x48xi32>
    %93 = arith.sitofp %92 : vector<1x48xi32> to vector<1x48xf32>
    %c30_i32_42 = arith.constant 30 : i32
    %94 = vector.broadcast %c30_i32_42 : i32 to vector<1x48xi32>
    %95 = arith.cmpi sge, %58, %94 : vector<1x48xi32>
    %c36_i32 = arith.constant 36 : i32
    %96 = vector.broadcast %c36_i32 : i32 to vector<1x48xi32>
    %97 = arith.cmpi slt, %58, %96 : vector<1x48xi32>
    %98 = arith.andi %95, %97 : vector<1x48xi1>
    %99 = arith.extui %98 : vector<1x48xi1> to vector<1x48xi32>
    %100 = arith.sitofp %99 : vector<1x48xi32> to vector<1x48xf32>
    %c36_i32_43 = arith.constant 36 : i32
    %101 = vector.broadcast %c36_i32_43 : i32 to vector<1x48xi32>
    %102 = arith.cmpi sge, %58, %101 : vector<1x48xi32>
    %c42_i32 = arith.constant 42 : i32
    %103 = vector.broadcast %c42_i32 : i32 to vector<1x48xi32>
    %104 = arith.cmpi slt, %58, %103 : vector<1x48xi32>
    %105 = arith.andi %102, %104 : vector<1x48xi1>
    %106 = arith.extui %105 : vector<1x48xi1> to vector<1x48xi32>
    %107 = arith.sitofp %106 : vector<1x48xi32> to vector<1x48xf32>
    %c42_i32_44 = arith.constant 42 : i32
    %108 = vector.broadcast %c42_i32_44 : i32 to vector<1x48xi32>
    %109 = arith.cmpi sge, %58, %108 : vector<1x48xi32>
    %c48_i32 = arith.constant 48 : i32
    %110 = vector.broadcast %c48_i32 : i32 to vector<1x48xi32>
    %111 = arith.cmpi slt, %58, %110 : vector<1x48xi32>
    %112 = arith.andi %109, %111 : vector<1x48xi1>
    %113 = arith.extui %112 : vector<1x48xi1> to vector<1x48xi32>
    %114 = arith.sitofp %113 : vector<1x48xi32> to vector<1x48xf32>
    %c0_45 = arith.constant 0 : index
    %c0_46 = arith.constant 0 : index
    %c0_47 = arith.constant 0 : index
    %115 = vector.load %arg38[%c0_45, %c0_46, %c0_47] : memref<2x12x48xf32, #tpu.memory_space<vmem>>, vector<1x12x48xf32>
    %116 = vector.shape_cast %115 : vector<1x12x48xf32> to vector<12x48xf32>
    %c0_48 = arith.constant 0 : index
    %c0_49 = arith.constant 0 : index
    %c0_50 = arith.constant 0 : index
    %117 = vector.load %arg3[%c0_48, %c0_49, %c0_50] : memref<2x12x48xf32, #tpu.memory_space<vmem>>, vector<1x12x48xf32>
    %118 = vector.shape_cast %117 : vector<1x12x48xf32> to vector<12x48xf32>
    %c0_51 = arith.constant 0 : index
    %c0_52 = arith.constant 0 : index
    %c0_53 = arith.constant 0 : index
    %119 = vector.load %arg4[%c0_51, %c0_52, %c0_53] : memref<2x12x48xf32, #tpu.memory_space<vmem>>, vector<1x12x48xf32>
    %120 = vector.shape_cast %119 : vector<1x12x48xf32> to vector<12x48xf32>
    %c0_54 = arith.constant 0 : index
    %c0_55 = arith.constant 0 : index
    %c0_56 = arith.constant 0 : index
    %c0_57 = arith.constant 0 : index
    %121 = vector.load %arg6[%c0_54, %c0_55, %c0_56, %c0_57] : memref<2x1x4x48xf32, #tpu.memory_space<vmem>>, vector<1x1x4x48xf32>
    %122 = vector.shape_cast %121 : vector<1x1x4x48xf32> to vector<4x48xf32>
    %123 = vector.extract_strided_slice %122 {offsets = [0, 0], sizes = [1, 48], strides = [1, 1]} : vector<4x48xf32> to vector<1x48xf32>
    %cst = arith.constant 1.000000e+00 : f32
    %124 = vector.broadcast %cst : f32 to vector<1x48xf32>
    %125 = arith.addf %124, %123 : vector<1x48xf32>
    %126 = vector.broadcast %125 : vector<1x48xf32> to vector<12x48xf32>
    %127 = arith.mulf %116, %126 : vector<12x48xf32>
    %128 = vector.extract_strided_slice %122 {offsets = [1, 0], sizes = [1, 48], strides = [1, 1]} : vector<4x48xf32> to vector<1x48xf32>
    %129 = vector.broadcast %128 : vector<1x48xf32> to vector<12x48xf32>
    %130 = arith.addf %127, %129 : vector<12x48xf32>
    %cst_58 = arith.constant dense<0.000000e+00> : vector<12x48xf32>
    %131 = tpu.matmul %130, %11, %cst_58 {dimension_numbers = #tpu.dot_dimension_numbers<[1], [0], [0], [1], [0, 0, 1, 1], [], []>} : vector<12x48xf32>, vector<48x48xf32>, vector<12x48xf32> -> vector<12x48xf32>
    %132 = vector.broadcast %14 : vector<1x48xf32> to vector<12x48xf32>
    %133 = arith.addf %131, %132 : vector<12x48xf32>
    %134 = arith.mulf %133, %118 : vector<12x48xf32>
    %cst_59 = arith.constant dense<0.000000e+00> : vector<12x48xf32>
    %135 = tpu.matmul %133, %57, %cst_59 {dimension_numbers = #tpu.dot_dimension_numbers<[1], [0], [0], [1], [0, 0, 1, 1], [], []>} : vector<12x48xf32>, vector<48x48xf32>, vector<12x48xf32> -> vector<12x48xf32>
    %136 = arith.mulf %135, %120 : vector<12x48xf32>
    %137 = arith.addf %134, %136 : vector<12x48xf32>
    %cst_60 = arith.constant 0.408248305 : f32
    %138 = vector.broadcast %cst_60 : f32 to vector<12x48xf32>
    %139 = arith.mulf %137, %138 : vector<12x48xf32>
    %cst_61 = arith.constant dense<0.000000e+00> : vector<12x48xf32>
    %140 = tpu.matmul %116, %17, %cst_61 {dimension_numbers = #tpu.dot_dimension_numbers<[1], [0], [0], [1], [0, 0, 1, 1], [], []>} : vector<12x48xf32>, vector<48x48xf32>, vector<12x48xf32> -> vector<12x48xf32>
    %141 = vector.broadcast %20 : vector<1x48xf32> to vector<12x48xf32>
    %142 = arith.addf %140, %141 : vector<12x48xf32>
    %143 = arith.mulf %142, %118 : vector<12x48xf32>
    %cst_62 = arith.constant dense<0.000000e+00> : vector<12x48xf32>
    %144 = tpu.matmul %142, %57, %cst_62 {dimension_numbers = #tpu.dot_dimension_numbers<[1], [0], [0], [1], [0, 0, 1, 1], [], []>} : vector<12x48xf32>, vector<48x48xf32>, vector<12x48xf32> -> vector<12x48xf32>
    %145 = arith.mulf %144, %120 : vector<12x48xf32>
    %146 = arith.addf %143, %145 : vector<12x48xf32>
    %cst_63 = arith.constant dense<0.000000e+00> : vector<12x48xf32>
    %147 = tpu.matmul %116, %23, %cst_63 {dimension_numbers = #tpu.dot_dimension_numbers<[1], [0], [0], [1], [0, 0, 1, 1], [], []>} : vector<12x48xf32>, vector<48x48xf32>, vector<12x48xf32> -> vector<12x48xf32>
    %148 = vector.broadcast %26 : vector<1x48xf32> to vector<12x48xf32>
    %149 = arith.addf %147, %148 : vector<12x48xf32>
    %150 = vector.broadcast %65 : vector<1x48xf32> to vector<12x48xf32>
    %151 = arith.mulf %139, %150 : vector<12x48xf32>
    %cst_64 = arith.constant dense<0.000000e+00> : vector<12x12xf32>
    %152 = tpu.matmul %151, %146, %cst_64 {dimension_numbers = #tpu.dot_dimension_numbers<[1], [1], [0], [0], [0, 0, 1, 0], [], []>} : vector<12x48xf32>, vector<12x48xf32>, vector<12x12xf32> -> vector<12x12xf32>
    %cst_65 = arith.constant dense<0xFF800000> : vector<12xf32>
    %153 = vector.multi_reduction <maximumf>, %152, %cst_65 [1] : vector<12x12xf32> to vector<12xf32>
    %154 = vector.shape_cast %153 : vector<12xf32> to vector<12x1xf32>
    %155 = vector.broadcast %154 : vector<12x1xf32> to vector<12x12xf32>
    %156 = arith.subf %152, %155 : vector<12x12xf32>
    %157 = math.exp %156 : vector<12x12xf32>
    %cst_66 = arith.constant dense<0.000000e+00> : vector<12xf32>
    %158 = vector.multi_reduction <add>, %157, %cst_66 [1] : vector<12x12xf32> to vector<12xf32>
    %159 = vector.shape_cast %158 : vector<12xf32> to vector<12x1xf32>
    %160 = tpu.reciprocal %159 {approx = true} : vector<12x1xf32> -> vector<12x1xf32>
    %161 = vector.broadcast %160 : vector<12x1xf32> to vector<12x12xf32>
    %162 = arith.mulf %157, %161 : vector<12x12xf32>
    %163 = vector.broadcast %65 : vector<1x48xf32> to vector<12x48xf32>
    %164 = arith.mulf %149, %163 : vector<12x48xf32>
    %cst_67 = arith.constant dense<0.000000e+00> : vector<12x48xf32>
    %165 = tpu.matmul %162, %164, %cst_67 {dimension_numbers = #tpu.dot_dimension_numbers<[1], [0], [0], [1], [0, 0, 1, 1], [], []>} : vector<12x12xf32>, vector<12x48xf32>, vector<12x48xf32> -> vector<12x48xf32>
    %166 = vector.broadcast %72 : vector<1x48xf32> to vector<12x48xf32>
    %167 = arith.mulf %139, %166 : vector<12x48xf32>
    %cst_68 = arith.constant dense<0.000000e+00> : vector<12x12xf32>
    %168 = tpu.matmul %167, %146, %cst_68 {dimension_numbers = #tpu.dot_dimension_numbers<[1], [1], [0], [0], [0, 0, 1, 0], [], []>} : vector<12x48xf32>, vector<12x48xf32>, vector<12x12xf32> -> vector<12x12xf32>
    %cst_69 = arith.constant dense<0xFF800000> : vector<12xf32>
    %169 = vector.multi_reduction <maximumf>, %168, %cst_69 [1] : vector<12x12xf32> to vector<12xf32>
    %170 = vector.shape_cast %169 : vector<12xf32> to vector<12x1xf32>
    %171 = vector.broadcast %170 : vector<12x1xf32> to vector<12x12xf32>
    %172 = arith.subf %168, %171 : vector<12x12xf32>
    %173 = math.exp %172 : vector<12x12xf32>
    %cst_70 = arith.constant dense<0.000000e+00> : vector<12xf32>
    %174 = vector.multi_reduction <add>, %173, %cst_70 [1] : vector<12x12xf32> to vector<12xf32>
    %175 = vector.shape_cast %174 : vector<12xf32> to vector<12x1xf32>
    %176 = tpu.reciprocal %175 {approx = true} : vector<12x1xf32> -> vector<12x1xf32>
    %177 = vector.broadcast %176 : vector<12x1xf32> to vector<12x12xf32>
    %178 = arith.mulf %173, %177 : vector<12x12xf32>
    %179 = vector.broadcast %72 : vector<1x48xf32> to vector<12x48xf32>
    %180 = arith.mulf %149, %179 : vector<12x48xf32>
    %cst_71 = arith.constant dense<0.000000e+00> : vector<12x48xf32>
    %181 = tpu.matmul %178, %180, %cst_71 {dimension_numbers = #tpu.dot_dimension_numbers<[1], [0], [0], [1], [0, 0, 1, 1], [], []>} : vector<12x12xf32>, vector<12x48xf32>, vector<12x48xf32> -> vector<12x48xf32>
    %182 = arith.addf %165, %181 : vector<12x48xf32>
    %183 = vector.broadcast %79 : vector<1x48xf32> to vector<12x48xf32>
    %184 = arith.mulf %139, %183 : vector<12x48xf32>
    %cst_72 = arith.constant dense<0.000000e+00> : vector<12x12xf32>
    %185 = tpu.matmul %184, %146, %cst_72 {dimension_numbers = #tpu.dot_dimension_numbers<[1], [1], [0], [0], [0, 0, 1, 0], [], []>} : vector<12x48xf32>, vector<12x48xf32>, vector<12x12xf32> -> vector<12x12xf32>
    %cst_73 = arith.constant dense<0xFF800000> : vector<12xf32>
    %186 = vector.multi_reduction <maximumf>, %185, %cst_73 [1] : vector<12x12xf32> to vector<12xf32>
    %187 = vector.shape_cast %186 : vector<12xf32> to vector<12x1xf32>
    %188 = vector.broadcast %187 : vector<12x1xf32> to vector<12x12xf32>
    %189 = arith.subf %185, %188 : vector<12x12xf32>
    %190 = math.exp %189 : vector<12x12xf32>
    %cst_74 = arith.constant dense<0.000000e+00> : vector<12xf32>
    %191 = vector.multi_reduction <add>, %190, %cst_74 [1] : vector<12x12xf32> to vector<12xf32>
    %192 = vector.shape_cast %191 : vector<12xf32> to vector<12x1xf32>
    %193 = tpu.reciprocal %192 {approx = true} : vector<12x1xf32> -> vector<12x1xf32>
    %194 = vector.broadcast %193 : vector<12x1xf32> to vector<12x12xf32>
    %195 = arith.mulf %190, %194 : vector<12x12xf32>
    %196 = vector.broadcast %79 : vector<1x48xf32> to vector<12x48xf32>
    %197 = arith.mulf %149, %196 : vector<12x48xf32>
    %cst_75 = arith.constant dense<0.000000e+00> : vector<12x48xf32>
    %198 = tpu.matmul %195, %197, %cst_75 {dimension_numbers = #tpu.dot_dimension_numbers<[1], [0], [0], [1], [0, 0, 1, 1], [], []>} : vector<12x12xf32>, vector<12x48xf32>, vector<12x48xf32> -> vector<12x48xf32>
    %199 = arith.addf %182, %198 : vector<12x48xf32>
    %200 = vector.broadcast %86 : vector<1x48xf32> to vector<12x48xf32>
    %201 = arith.mulf %139, %200 : vector<12x48xf32>
    %cst_76 = arith.constant dense<0.000000e+00> : vector<12x12xf32>
    %202 = tpu.matmul %201, %146, %cst_76 {dimension_numbers = #tpu.dot_dimension_numbers<[1], [1], [0], [0], [0, 0, 1, 0], [], []>} : vector<12x48xf32>, vector<12x48xf32>, vector<12x12xf32> -> vector<12x12xf32>
    %cst_77 = arith.constant dense<0xFF800000> : vector<12xf32>
    %203 = vector.multi_reduction <maximumf>, %202, %cst_77 [1] : vector<12x12xf32> to vector<12xf32>
    %204 = vector.shape_cast %203 : vector<12xf32> to vector<12x1xf32>
    %205 = vector.broadcast %204 : vector<12x1xf32> to vector<12x12xf32>
    %206 = arith.subf %202, %205 : vector<12x12xf32>
    %207 = math.exp %206 : vector<12x12xf32>
    %cst_78 = arith.constant dense<0.000000e+00> : vector<12xf32>
    %208 = vector.multi_reduction <add>, %207, %cst_78 [1] : vector<12x12xf32> to vector<12xf32>
    %209 = vector.shape_cast %208 : vector<12xf32> to vector<12x1xf32>
    %210 = tpu.reciprocal %209 {approx = true} : vector<12x1xf32> -> vector<12x1xf32>
    %211 = vector.broadcast %210 : vector<12x1xf32> to vector<12x12xf32>
    %212 = arith.mulf %207, %211 : vector<12x12xf32>
    %213 = vector.broadcast %86 : vector<1x48xf32> to vector<12x48xf32>
    %214 = arith.mulf %149, %213 : vector<12x48xf32>
    %cst_79 = arith.constant dense<0.000000e+00> : vector<12x48xf32>
    %215 = tpu.matmul %212, %214, %cst_79 {dimension_numbers = #tpu.dot_dimension_numbers<[1], [0], [0], [1], [0, 0, 1, 1], [], []>} : vector<12x12xf32>, vector<12x48xf32>, vector<12x48xf32> -> vector<12x48xf32>
    %216 = arith.addf %199, %215 : vector<12x48xf32>
    %217 = vector.broadcast %93 : vector<1x48xf32> to vector<12x48xf32>
    %218 = arith.mulf %139, %217 : vector<12x48xf32>
    %cst_80 = arith.constant dense<0.000000e+00> : vector<12x12xf32>
    %219 = tpu.matmul %218, %146, %cst_80 {dimension_numbers = #tpu.dot_dimension_numbers<[1], [1], [0], [0], [0, 0, 1, 0], [], []>} : vector<12x48xf32>, vector<12x48xf32>, vector<12x12xf32> -> vector<12x12xf32>
    %cst_81 = arith.constant dense<0xFF800000> : vector<12xf32>
    %220 = vector.multi_reduction <maximumf>, %219, %cst_81 [1] : vector<12x12xf32> to vector<12xf32>
    %221 = vector.shape_cast %220 : vector<12xf32> to vector<12x1xf32>
    %222 = vector.broadcast %221 : vector<12x1xf32> to vector<12x12xf32>
    %223 = arith.subf %219, %222 : vector<12x12xf32>
    %224 = math.exp %223 : vector<12x12xf32>
    %cst_82 = arith.constant dense<0.000000e+00> : vector<12xf32>
    %225 = vector.multi_reduction <add>, %224, %cst_82 [1] : vector<12x12xf32> to vector<12xf32>
    %226 = vector.shape_cast %225 : vector<12xf32> to vector<12x1xf32>
    %227 = tpu.reciprocal %226 {approx = true} : vector<12x1xf32> -> vector<12x1xf32>
    %228 = vector.broadcast %227 : vector<12x1xf32> to vector<12x12xf32>
    %229 = arith.mulf %224, %228 : vector<12x12xf32>
    %230 = vector.broadcast %93 : vector<1x48xf32> to vector<12x48xf32>
    %231 = arith.mulf %149, %230 : vector<12x48xf32>
    %cst_83 = arith.constant dense<0.000000e+00> : vector<12x48xf32>
    %232 = tpu.matmul %229, %231, %cst_83 {dimension_numbers = #tpu.dot_dimension_numbers<[1], [0], [0], [1], [0, 0, 1, 1], [], []>} : vector<12x12xf32>, vector<12x48xf32>, vector<12x48xf32> -> vector<12x48xf32>
    %233 = arith.addf %216, %232 : vector<12x48xf32>
    %234 = vector.broadcast %100 : vector<1x48xf32> to vector<12x48xf32>
    %235 = arith.mulf %139, %234 : vector<12x48xf32>
    %cst_84 = arith.constant dense<0.000000e+00> : vector<12x12xf32>
    %236 = tpu.matmul %235, %146, %cst_84 {dimension_numbers = #tpu.dot_dimension_numbers<[1], [1], [0], [0], [0, 0, 1, 0], [], []>} : vector<12x48xf32>, vector<12x48xf32>, vector<12x12xf32> -> vector<12x12xf32>
    %cst_85 = arith.constant dense<0xFF800000> : vector<12xf32>
    %237 = vector.multi_reduction <maximumf>, %236, %cst_85 [1] : vector<12x12xf32> to vector<12xf32>
    %238 = vector.shape_cast %237 : vector<12xf32> to vector<12x1xf32>
    %239 = vector.broadcast %238 : vector<12x1xf32> to vector<12x12xf32>
    %240 = arith.subf %236, %239 : vector<12x12xf32>
    %241 = math.exp %240 : vector<12x12xf32>
    %cst_86 = arith.constant dense<0.000000e+00> : vector<12xf32>
    %242 = vector.multi_reduction <add>, %241, %cst_86 [1] : vector<12x12xf32> to vector<12xf32>
    %243 = vector.shape_cast %242 : vector<12xf32> to vector<12x1xf32>
    %244 = tpu.reciprocal %243 {approx = true} : vector<12x1xf32> -> vector<12x1xf32>
    %245 = vector.broadcast %244 : vector<12x1xf32> to vector<12x12xf32>
    %246 = arith.mulf %241, %245 : vector<12x12xf32>
    %247 = vector.broadcast %100 : vector<1x48xf32> to vector<12x48xf32>
    %248 = arith.mulf %149, %247 : vector<12x48xf32>
    %cst_87 = arith.constant dense<0.000000e+00> : vector<12x48xf32>
    %249 = tpu.matmul %246, %248, %cst_87 {dimension_numbers = #tpu.dot_dimension_numbers<[1], [0], [0], [1], [0, 0, 1, 1], [], []>} : vector<12x12xf32>, vector<12x48xf32>, vector<12x48xf32> -> vector<12x48xf32>
    %250 = arith.addf %233, %249 : vector<12x48xf32>
    %251 = vector.broadcast %107 : vector<1x48xf32> to vector<12x48xf32>
    %252 = arith.mulf %139, %251 : vector<12x48xf32>
    %cst_88 = arith.constant dense<0.000000e+00> : vector<12x12xf32>
    %253 = tpu.matmul %252, %146, %cst_88 {dimension_numbers = #tpu.dot_dimension_numbers<[1], [1], [0], [0], [0, 0, 1, 0], [], []>} : vector<12x48xf32>, vector<12x48xf32>, vector<12x12xf32> -> vector<12x12xf32>
    %cst_89 = arith.constant dense<0xFF800000> : vector<12xf32>
    %254 = vector.multi_reduction <maximumf>, %253, %cst_89 [1] : vector<12x12xf32> to vector<12xf32>
    %255 = vector.shape_cast %254 : vector<12xf32> to vector<12x1xf32>
    %256 = vector.broadcast %255 : vector<12x1xf32> to vector<12x12xf32>
    %257 = arith.subf %253, %256 : vector<12x12xf32>
    %258 = math.exp %257 : vector<12x12xf32>
    %cst_90 = arith.constant dense<0.000000e+00> : vector<12xf32>
    %259 = vector.multi_reduction <add>, %258, %cst_90 [1] : vector<12x12xf32> to vector<12xf32>
    %260 = vector.shape_cast %259 : vector<12xf32> to vector<12x1xf32>
    %261 = tpu.reciprocal %260 {approx = true} : vector<12x1xf32> -> vector<12x1xf32>
    %262 = vector.broadcast %261 : vector<12x1xf32> to vector<12x12xf32>
    %263 = arith.mulf %258, %262 : vector<12x12xf32>
    %264 = vector.broadcast %107 : vector<1x48xf32> to vector<12x48xf32>
    %265 = arith.mulf %149, %264 : vector<12x48xf32>
    %cst_91 = arith.constant dense<0.000000e+00> : vector<12x48xf32>
    %266 = tpu.matmul %263, %265, %cst_91 {dimension_numbers = #tpu.dot_dimension_numbers<[1], [0], [0], [1], [0, 0, 1, 1], [], []>} : vector<12x12xf32>, vector<12x48xf32>, vector<12x48xf32> -> vector<12x48xf32>
    %267 = arith.addf %250, %266 : vector<12x48xf32>
    %268 = vector.broadcast %114 : vector<1x48xf32> to vector<12x48xf32>
    %269 = arith.mulf %139, %268 : vector<12x48xf32>
    %cst_92 = arith.constant dense<0.000000e+00> : vector<12x12xf32>
    %270 = tpu.matmul %269, %146, %cst_92 {dimension_numbers = #tpu.dot_dimension_numbers<[1], [1], [0], [0], [0, 0, 1, 0], [], []>} : vector<12x48xf32>, vector<12x48xf32>, vector<12x12xf32> -> vector<12x12xf32>
    %cst_93 = arith.constant dense<0xFF800000> : vector<12xf32>
    %271 = vector.multi_reduction <maximumf>, %270, %cst_93 [1] : vector<12x12xf32> to vector<12xf32>
    %272 = vector.shape_cast %271 : vector<12xf32> to vector<12x1xf32>
    %273 = vector.broadcast %272 : vector<12x1xf32> to vector<12x12xf32>
    %274 = arith.subf %270, %273 : vector<12x12xf32>
    %275 = math.exp %274 : vector<12x12xf32>
    %cst_94 = arith.constant dense<0.000000e+00> : vector<12xf32>
    %276 = vector.multi_reduction <add>, %275, %cst_94 [1] : vector<12x12xf32> to vector<12xf32>
    %277 = vector.shape_cast %276 : vector<12xf32> to vector<12x1xf32>
    %278 = tpu.reciprocal %277 {approx = true} : vector<12x1xf32> -> vector<12x1xf32>
    %279 = vector.broadcast %278 : vector<12x1xf32> to vector<12x12xf32>
    %280 = arith.mulf %275, %279 : vector<12x12xf32>
    %281 = vector.broadcast %114 : vector<1x48xf32> to vector<12x48xf32>
    %282 = arith.mulf %149, %281 : vector<12x48xf32>
    %cst_95 = arith.constant dense<0.000000e+00> : vector<12x48xf32>
    %283 = tpu.matmul %280, %282, %cst_95 {dimension_numbers = #tpu.dot_dimension_numbers<[1], [0], [0], [1], [0, 0, 1, 1], [], []>} : vector<12x12xf32>, vector<12x48xf32>, vector<12x48xf32> -> vector<12x48xf32>
    %284 = arith.addf %267, %283 : vector<12x48xf32>
    %cst_96 = arith.constant dense<0.000000e+00> : vector<12x48xf32>
    %285 = tpu.matmul %284, %29, %cst_96 {dimension_numbers = #tpu.dot_dimension_numbers<[1], [0], [0], [1], [0, 0, 1, 1], [], []>} : vector<12x48xf32>, vector<48x48xf32>, vector<12x48xf32> -> vector<12x48xf32>
    %286 = vector.broadcast %32 : vector<1x48xf32> to vector<12x48xf32>
    %287 = arith.addf %285, %286 : vector<12x48xf32>
    %288 = arith.addf %116, %287 : vector<12x48xf32>
    %cst_97 = arith.constant dense<0.000000e+00> : vector<12xf32>
    %289 = vector.multi_reduction <add>, %288, %cst_97 [1] : vector<12x48xf32> to vector<12xf32>
    %290 = vector.shape_cast %289 : vector<12xf32> to vector<12x1xf32>
    %cst_98 = arith.constant 0.020833334 : f32
    %291 = vector.broadcast %cst_98 : f32 to vector<12x1xf32>
    %292 = arith.mulf %290, %291 : vector<12x1xf32>
    %293 = arith.mulf %288, %288 : vector<12x48xf32>
    %cst_99 = arith.constant dense<0.000000e+00> : vector<12xf32>
    %294 = vector.multi_reduction <add>, %293, %cst_99 [1] : vector<12x48xf32> to vector<12xf32>
    %295 = vector.shape_cast %294 : vector<12xf32> to vector<12x1xf32>
    %cst_100 = arith.constant 0.020833334 : f32
    %296 = vector.broadcast %cst_100 : f32 to vector<12x1xf32>
    %297 = arith.mulf %295, %296 : vector<12x1xf32>
    %298 = arith.mulf %292, %292 : vector<12x1xf32>
    %299 = arith.subf %297, %298 : vector<12x1xf32>
    %300 = vector.broadcast %292 : vector<12x1xf32> to vector<12x48xf32>
    %301 = arith.subf %288, %300 : vector<12x48xf32>
    %cst_101 = arith.constant 9.99999974E-6 : f32
    %302 = vector.broadcast %cst_101 : f32 to vector<12x1xf32>
    %303 = arith.addf %299, %302 : vector<12x1xf32>
    %304 = math.rsqrt %303 : vector<12x1xf32>
    %305 = vector.broadcast %304 : vector<12x1xf32> to vector<12x48xf32>
    %306 = arith.mulf %301, %305 : vector<12x48xf32>
    %307 = vector.broadcast %35 : vector<1x48xf32> to vector<12x48xf32>
    %308 = arith.mulf %306, %307 : vector<12x48xf32>
    %309 = vector.broadcast %38 : vector<1x48xf32> to vector<12x48xf32>
    %310 = arith.addf %308, %309 : vector<12x48xf32>
    %311 = vector.extract_strided_slice %122 {offsets = [2, 0], sizes = [1, 48], strides = [1, 1]} : vector<4x48xf32> to vector<1x48xf32>
    %cst_102 = arith.constant 1.000000e+00 : f32
    %312 = vector.broadcast %cst_102 : f32 to vector<1x48xf32>
    %313 = arith.addf %312, %311 : vector<1x48xf32>
    %314 = vector.broadcast %313 : vector<1x48xf32> to vector<12x48xf32>
    %315 = arith.mulf %310, %314 : vector<12x48xf32>
    %316 = vector.extract_strided_slice %122 {offsets = [3, 0], sizes = [1, 48], strides = [1, 1]} : vector<4x48xf32> to vector<1x48xf32>
    %317 = vector.broadcast %316 : vector<1x48xf32> to vector<12x48xf32>
    %318 = arith.addf %315, %317 : vector<12x48xf32>
    %cst_103 = arith.constant dense<0.000000e+00> : vector<12x48xf32>
    %319 = tpu.matmul %318, %41, %cst_103 {dimension_numbers = #tpu.dot_dimension_numbers<[1], [0], [0], [1], [0, 0, 1, 1], [], []>} : vector<12x48xf32>, vector<48x48xf32>, vector<12x48xf32> -> vector<12x48xf32>
    %320 = vector.broadcast %44 : vector<1x48xf32> to vector<12x48xf32>
    %321 = arith.addf %319, %320 : vector<12x48xf32>
    %cst_104 = arith.constant 0.000000e+00 : f32
    %322 = vector.broadcast %cst_104 : f32 to vector<12x48xf32>
    %323 = arith.maximumf %321, %322 : vector<12x48xf32>
    %cst_105 = arith.constant dense<0.000000e+00> : vector<12x48xf32>
    %324 = tpu.matmul %323, %47, %cst_105 {dimension_numbers = #tpu.dot_dimension_numbers<[1], [0], [0], [1], [0, 0, 1, 1], [], []>} : vector<12x48xf32>, vector<48x48xf32>, vector<12x48xf32> -> vector<12x48xf32>
    %325 = vector.broadcast %50 : vector<1x48xf32> to vector<12x48xf32>
    %326 = arith.addf %324, %325 : vector<12x48xf32>
    %327 = arith.addf %310, %326 : vector<12x48xf32>
    %cst_106 = arith.constant dense<0.000000e+00> : vector<12xf32>
    %328 = vector.multi_reduction <add>, %327, %cst_106 [1] : vector<12x48xf32> to vector<12xf32>
    %329 = vector.shape_cast %328 : vector<12xf32> to vector<12x1xf32>
    %cst_107 = arith.constant 0.020833334 : f32
    %330 = vector.broadcast %cst_107 : f32 to vector<12x1xf32>
    %331 = arith.mulf %329, %330 : vector<12x1xf32>
    %332 = arith.mulf %327, %327 : vector<12x48xf32>
    %cst_108 = arith.constant dense<0.000000e+00> : vector<12xf32>
    %333 = vector.multi_reduction <add>, %332, %cst_108 [1] : vector<12x48xf32> to vector<12xf32>
    %334 = vector.shape_cast %333 : vector<12xf32> to vector<12x1xf32>
    %cst_109 = arith.constant 0.020833334 : f32
    %335 = vector.broadcast %cst_109 : f32 to vector<12x1xf32>
    %336 = arith.mulf %334, %335 : vector<12x1xf32>
    %337 = arith.mulf %331, %331 : vector<12x1xf32>
    %338 = arith.subf %336, %337 : vector<12x1xf32>
    %339 = vector.broadcast %331 : vector<12x1xf32> to vector<12x48xf32>
    %340 = arith.subf %327, %339 : vector<12x48xf32>
    %cst_110 = arith.constant 9.99999974E-6 : f32
    %341 = vector.broadcast %cst_110 : f32 to vector<12x1xf32>
    %342 = arith.addf %338, %341 : vector<12x1xf32>
    %343 = math.rsqrt %342 : vector<12x1xf32>
    %344 = vector.broadcast %343 : vector<12x1xf32> to vector<12x48xf32>
    %345 = arith.mulf %340, %344 : vector<12x48xf32>
    %346 = vector.broadcast %53 : vector<1x48xf32> to vector<12x48xf32>
    %347 = arith.mulf %345, %346 : vector<12x48xf32>
    %348 = vector.broadcast %56 : vector<1x48xf32> to vector<12x48xf32>
    %349 = arith.addf %347, %348 : vector<12x48xf32>
    %c0_111 = arith.constant 0 : index
    %c0_112 = arith.constant 0 : index
    %c0_113 = arith.constant 0 : index
    %350 = vector.load %arg38[%c0_111, %c0_112, %c0_113] : memref<2x12x48xf32, #tpu.memory_space<vmem>>, vector<1x12x48xf32>
    %351 = vector.shape_cast %350 : vector<1x12x48xf32> to vector<12x48xf32>
    %352 = vector.shape_cast %349 : vector<12x48xf32> to vector<1x12x48xf32>
    tpu.vector_store %arg38[%c0_111, %c0_112, %c0_113], %352 {strides = array<i32>} : memref<2x12x48xf32, #tpu.memory_space<vmem>>, vector<1x12x48xf32>,
    %c1 = arith.constant 1 : index
    %c0_114 = arith.constant 0 : index
    %c0_115 = arith.constant 0 : index
    %353 = vector.load %arg38[%c1, %c0_114, %c0_115] : memref<2x12x48xf32, #tpu.memory_space<vmem>>, vector<1x12x48xf32>
    %354 = vector.shape_cast %353 : vector<1x12x48xf32> to vector<12x48xf32>
    %c1_116 = arith.constant 1 : index
    %c0_117 = arith.constant 0 : index
    %c0_118 = arith.constant 0 : index
    %355 = vector.load %arg3[%c1_116, %c0_117, %c0_118] : memref<2x12x48xf32, #tpu.memory_space<vmem>>, vector<1x12x48xf32>
    %356 = vector.shape_cast %355 : vector<1x12x48xf32> to vector<12x48xf32>
    %c1_119 = arith.constant 1 : index
    %c0_120 = arith.constant 0 : index
    %c0_121 = arith.constant 0 : index
    %357 = vector.load %arg4[%c1_119, %c0_120, %c0_121] : memref<2x12x48xf32, #tpu.memory_space<vmem>>, vector<1x12x48xf32>
    %358 = vector.shape_cast %357 : vector<1x12x48xf32> to vector<12x48xf32>
    %c1_122 = arith.constant 1 : index
    %c0_123 = arith.constant 0 : index
    %c0_124 = arith.constant 0 : index
    %c0_125 = arith.constant 0 : index
    %359 = vector.load %arg6[%c1_122, %c0_123, %c0_124, %c0_125] : memref<2x1x4x48xf32, #tpu.memory_space<vmem>>, vector<1x1x4x48xf32>
    %360 = vector.shape_cast %359 : vector<1x1x4x48xf32> to vector<4x48xf32>
    %361 = vector.extract_strided_slice %360 {offsets = [0, 0], sizes = [1, 48], strides = [1, 1]} : vector<4x48xf32> to vector<1x48xf32>
    %cst_126 = arith.constant 1.000000e+00 : f32
    %362 = vector.broadcast %cst_126 : f32 to vector<1x48xf32>
    %363 = arith.addf %362, %361 : vector<1x48xf32>
    %364 = vector.broadcast %363 : vector<1x48xf32> to vector<12x48xf32>
    %365 = arith.mulf %354, %364 : vector<12x48xf32>
    %366 = vector.extract_strided_slice %360 {offsets = [1, 0], sizes = [1, 48], strides = [1, 1]} : vector<4x48xf32> to vector<1x48xf32>
    %367 = vector.broadcast %366 : vector<1x48xf32> to vector<12x48xf32>
    %368 = arith.addf %365, %367 : vector<12x48xf32>
    %cst_127 = arith.constant dense<0.000000e+00> : vector<12x48xf32>
    %369 = tpu.matmul %368, %11, %cst_127 {dimension_numbers = #tpu.dot_dimension_numbers<[1], [0], [0], [1], [0, 0, 1, 1], [], []>} : vector<12x48xf32>, vector<48x48xf32>, vector<12x48xf32> -> vector<12x48xf32>
    %370 = vector.broadcast %14 : vector<1x48xf32> to vector<12x48xf32>
    %371 = arith.addf %369, %370 : vector<12x48xf32>
    %372 = arith.mulf %371, %356 : vector<12x48xf32>
    %cst_128 = arith.constant dense<0.000000e+00> : vector<12x48xf32>
    %373 = tpu.matmul %371, %57, %cst_128 {dimension_numbers = #tpu.dot_dimension_numbers<[1], [0], [0], [1], [0, 0, 1, 1], [], []>} : vector<12x48xf32>, vector<48x48xf32>, vector<12x48xf32> -> vector<12x48xf32>
    %374 = arith.mulf %373, %358 : vector<12x48xf32>
    %375 = arith.addf %372, %374 : vector<12x48xf32>
    %cst_129 = arith.constant 0.408248305 : f32
    %376 = vector.broadcast %cst_129 : f32 to vector<12x48xf32>
    %377 = arith.mulf %375, %376 : vector<12x48xf32>
    %cst_130 = arith.constant dense<0.000000e+00> : vector<12x48xf32>
    %378 = tpu.matmul %354, %17, %cst_130 {dimension_numbers = #tpu.dot_dimension_numbers<[1], [0], [0], [1], [0, 0, 1, 1], [], []>} : vector<12x48xf32>, vector<48x48xf32>, vector<12x48xf32> -> vector<12x48xf32>
    %379 = vector.broadcast %20 : vector<1x48xf32> to vector<12x48xf32>
    %380 = arith.addf %378, %379 : vector<12x48xf32>
    %381 = arith.mulf %380, %356 : vector<12x48xf32>
    %cst_131 = arith.constant dense<0.000000e+00> : vector<12x48xf32>
    %382 = tpu.matmul %380, %57, %cst_131 {dimension_numbers = #tpu.dot_dimension_numbers<[1], [0], [0], [1], [0, 0, 1, 1], [], []>} : vector<12x48xf32>, vector<48x48xf32>, vector<12x48xf32> -> vector<12x48xf32>
    %383 = arith.mulf %382, %358 : vector<12x48xf32>
    %384 = arith.addf %381, %383 : vector<12x48xf32>
    %cst_132 = arith.constant dense<0.000000e+00> : vector<12x48xf32>
    %385 = tpu.matmul %354, %23, %cst_132 {dimension_numbers = #tpu.dot_dimension_numbers<[1], [0], [0], [1], [0, 0, 1, 1], [], []>} : vector<12x48xf32>, vector<48x48xf32>, vector<12x48xf32> -> vector<12x48xf32>
    %386 = vector.broadcast %26 : vector<1x48xf32> to vector<12x48xf32>
    %387 = arith.addf %385, %386 : vector<12x48xf32>
    %388 = vector.broadcast %65 : vector<1x48xf32> to vector<12x48xf32>
    %389 = arith.mulf %377, %388 : vector<12x48xf32>
    %cst_133 = arith.constant dense<0.000000e+00> : vector<12x12xf32>
    %390 = tpu.matmul %389, %384, %cst_133 {dimension_numbers = #tpu.dot_dimension_numbers<[1], [1], [0], [0], [0, 0, 1, 0], [], []>} : vector<12x48xf32>, vector<12x48xf32>, vector<12x12xf32> -> vector<12x12xf32>
    %cst_134 = arith.constant dense<0xFF800000> : vector<12xf32>
    %391 = vector.multi_reduction <maximumf>, %390, %cst_134 [1] : vector<12x12xf32> to vector<12xf32>
    %392 = vector.shape_cast %391 : vector<12xf32> to vector<12x1xf32>
    %393 = vector.broadcast %392 : vector<12x1xf32> to vector<12x12xf32>
    %394 = arith.subf %390, %393 : vector<12x12xf32>
    %395 = math.exp %394 : vector<12x12xf32>
    %cst_135 = arith.constant dense<0.000000e+00> : vector<12xf32>
    %396 = vector.multi_reduction <add>, %395, %cst_135 [1] : vector<12x12xf32> to vector<12xf32>
    %397 = vector.shape_cast %396 : vector<12xf32> to vector<12x1xf32>
    %398 = tpu.reciprocal %397 {approx = true} : vector<12x1xf32> -> vector<12x1xf32>
    %399 = vector.broadcast %398 : vector<12x1xf32> to vector<12x12xf32>
    %400 = arith.mulf %395, %399 : vector<12x12xf32>
    %401 = vector.broadcast %65 : vector<1x48xf32> to vector<12x48xf32>
    %402 = arith.mulf %387, %401 : vector<12x48xf32>
    %cst_136 = arith.constant dense<0.000000e+00> : vector<12x48xf32>
    %403 = tpu.matmul %400, %402, %cst_136 {dimension_numbers = #tpu.dot_dimension_numbers<[1], [0], [0], [1], [0, 0, 1, 1], [], []>} : vector<12x12xf32>, vector<12x48xf32>, vector<12x48xf32> -> vector<12x48xf32>
    %404 = vector.broadcast %72 : vector<1x48xf32> to vector<12x48xf32>
    %405 = arith.mulf %377, %404 : vector<12x48xf32>
    %cst_137 = arith.constant dense<0.000000e+00> : vector<12x12xf32>
    %406 = tpu.matmul %405, %384, %cst_137 {dimension_numbers = #tpu.dot_dimension_numbers<[1], [1], [0], [0], [0, 0, 1, 0], [], []>} : vector<12x48xf32>, vector<12x48xf32>, vector<12x12xf32> -> vector<12x12xf32>
    %cst_138 = arith.constant dense<0xFF800000> : vector<12xf32>
    %407 = vector.multi_reduction <maximumf>, %406, %cst_138 [1] : vector<12x12xf32> to vector<12xf32>
    %408 = vector.shape_cast %407 : vector<12xf32> to vector<12x1xf32>
    %409 = vector.broadcast %408 : vector<12x1xf32> to vector<12x12xf32>
    %410 = arith.subf %406, %409 : vector<12x12xf32>
    %411 = math.exp %410 : vector<12x12xf32>
    %cst_139 = arith.constant dense<0.000000e+00> : vector<12xf32>
    %412 = vector.multi_reduction <add>, %411, %cst_139 [1] : vector<12x12xf32> to vector<12xf32>
    %413 = vector.shape_cast %412 : vector<12xf32> to vector<12x1xf32>
    %414 = tpu.reciprocal %413 {approx = true} : vector<12x1xf32> -> vector<12x1xf32>
    %415 = vector.broadcast %414 : vector<12x1xf32> to vector<12x12xf32>
    %416 = arith.mulf %411, %415 : vector<12x12xf32>
    %417 = vector.broadcast %72 : vector<1x48xf32> to vector<12x48xf32>
    %418 = arith.mulf %387, %417 : vector<12x48xf32>
    %cst_140 = arith.constant dense<0.000000e+00> : vector<12x48xf32>
    %419 = tpu.matmul %416, %418, %cst_140 {dimension_numbers = #tpu.dot_dimension_numbers<[1], [0], [0], [1], [0, 0, 1, 1], [], []>} : vector<12x12xf32>, vector<12x48xf32>, vector<12x48xf32> -> vector<12x48xf32>
    %420 = arith.addf %403, %419 : vector<12x48xf32>
    %421 = vector.broadcast %79 : vector<1x48xf32> to vector<12x48xf32>
    %422 = arith.mulf %377, %421 : vector<12x48xf32>
    %cst_141 = arith.constant dense<0.000000e+00> : vector<12x12xf32>
    %423 = tpu.matmul %422, %384, %cst_141 {dimension_numbers = #tpu.dot_dimension_numbers<[1], [1], [0], [0], [0, 0, 1, 0], [], []>} : vector<12x48xf32>, vector<12x48xf32>, vector<12x12xf32> -> vector<12x12xf32>
    %cst_142 = arith.constant dense<0xFF800000> : vector<12xf32>
    %424 = vector.multi_reduction <maximumf>, %423, %cst_142 [1] : vector<12x12xf32> to vector<12xf32>
    %425 = vector.shape_cast %424 : vector<12xf32> to vector<12x1xf32>
    %426 = vector.broadcast %425 : vector<12x1xf32> to vector<12x12xf32>
    %427 = arith.subf %423, %426 : vector<12x12xf32>
    %428 = math.exp %427 : vector<12x12xf32>
    %cst_143 = arith.constant dense<0.000000e+00> : vector<12xf32>
    %429 = vector.multi_reduction <add>, %428, %cst_143 [1] : vector<12x12xf32> to vector<12xf32>
    %430 = vector.shape_cast %429 : vector<12xf32> to vector<12x1xf32>
    %431 = tpu.reciprocal %430 {approx = true} : vector<12x1xf32> -> vector<12x1xf32>
    %432 = vector.broadcast %431 : vector<12x1xf32> to vector<12x12xf32>
    %433 = arith.mulf %428, %432 : vector<12x12xf32>
    %434 = vector.broadcast %79 : vector<1x48xf32> to vector<12x48xf32>
    %435 = arith.mulf %387, %434 : vector<12x48xf32>
    %cst_144 = arith.constant dense<0.000000e+00> : vector<12x48xf32>
    %436 = tpu.matmul %433, %435, %cst_144 {dimension_numbers = #tpu.dot_dimension_numbers<[1], [0], [0], [1], [0, 0, 1, 1], [], []>} : vector<12x12xf32>, vector<12x48xf32>, vector<12x48xf32> -> vector<12x48xf32>
    %437 = arith.addf %420, %436 : vector<12x48xf32>
    %438 = vector.broadcast %86 : vector<1x48xf32> to vector<12x48xf32>
    %439 = arith.mulf %377, %438 : vector<12x48xf32>
    %cst_145 = arith.constant dense<0.000000e+00> : vector<12x12xf32>
    %440 = tpu.matmul %439, %384, %cst_145 {dimension_numbers = #tpu.dot_dimension_numbers<[1], [1], [0], [0], [0, 0, 1, 0], [], []>} : vector<12x48xf32>, vector<12x48xf32>, vector<12x12xf32> -> vector<12x12xf32>
    %cst_146 = arith.constant dense<0xFF800000> : vector<12xf32>
    %441 = vector.multi_reduction <maximumf>, %440, %cst_146 [1] : vector<12x12xf32> to vector<12xf32>
    %442 = vector.shape_cast %441 : vector<12xf32> to vector<12x1xf32>
    %443 = vector.broadcast %442 : vector<12x1xf32> to vector<12x12xf32>
    %444 = arith.subf %440, %443 : vector<12x12xf32>
    %445 = math.exp %444 : vector<12x12xf32>
    %cst_147 = arith.constant dense<0.000000e+00> : vector<12xf32>
    %446 = vector.multi_reduction <add>, %445, %cst_147 [1] : vector<12x12xf32> to vector<12xf32>
    %447 = vector.shape_cast %446 : vector<12xf32> to vector<12x1xf32>
    %448 = tpu.reciprocal %447 {approx = true} : vector<12x1xf32> -> vector<12x1xf32>
    %449 = vector.broadcast %448 : vector<12x1xf32> to vector<12x12xf32>
    %450 = arith.mulf %445, %449 : vector<12x12xf32>
    %451 = vector.broadcast %86 : vector<1x48xf32> to vector<12x48xf32>
    %452 = arith.mulf %387, %451 : vector<12x48xf32>
    %cst_148 = arith.constant dense<0.000000e+00> : vector<12x48xf32>
    %453 = tpu.matmul %450, %452, %cst_148 {dimension_numbers = #tpu.dot_dimension_numbers<[1], [0], [0], [1], [0, 0, 1, 1], [], []>} : vector<12x12xf32>, vector<12x48xf32>, vector<12x48xf32> -> vector<12x48xf32>
    %454 = arith.addf %437, %453 : vector<12x48xf32>
    %455 = vector.broadcast %93 : vector<1x48xf32> to vector<12x48xf32>
    %456 = arith.mulf %377, %455 : vector<12x48xf32>
    %cst_149 = arith.constant dense<0.000000e+00> : vector<12x12xf32>
    %457 = tpu.matmul %456, %384, %cst_149 {dimension_numbers = #tpu.dot_dimension_numbers<[1], [1], [0], [0], [0, 0, 1, 0], [], []>} : vector<12x48xf32>, vector<12x48xf32>, vector<12x12xf32> -> vector<12x12xf32>
    %cst_150 = arith.constant dense<0xFF800000> : vector<12xf32>
    %458 = vector.multi_reduction <maximumf>, %457, %cst_150 [1] : vector<12x12xf32> to vector<12xf32>
    %459 = vector.shape_cast %458 : vector<12xf32> to vector<12x1xf32>
    %460 = vector.broadcast %459 : vector<12x1xf32> to vector<12x12xf32>
    %461 = arith.subf %457, %460 : vector<12x12xf32>
    %462 = math.exp %461 : vector<12x12xf32>
    %cst_151 = arith.constant dense<0.000000e+00> : vector<12xf32>
    %463 = vector.multi_reduction <add>, %462, %cst_151 [1] : vector<12x12xf32> to vector<12xf32>
    %464 = vector.shape_cast %463 : vector<12xf32> to vector<12x1xf32>
    %465 = tpu.reciprocal %464 {approx = true} : vector<12x1xf32> -> vector<12x1xf32>
    %466 = vector.broadcast %465 : vector<12x1xf32> to vector<12x12xf32>
    %467 = arith.mulf %462, %466 : vector<12x12xf32>
    %468 = vector.broadcast %93 : vector<1x48xf32> to vector<12x48xf32>
    %469 = arith.mulf %387, %468 : vector<12x48xf32>
    %cst_152 = arith.constant dense<0.000000e+00> : vector<12x48xf32>
    %470 = tpu.matmul %467, %469, %cst_152 {dimension_numbers = #tpu.dot_dimension_numbers<[1], [0], [0], [1], [0, 0, 1, 1], [], []>} : vector<12x12xf32>, vector<12x48xf32>, vector<12x48xf32> -> vector<12x48xf32>
    %471 = arith.addf %454, %470 : vector<12x48xf32>
    %472 = vector.broadcast %100 : vector<1x48xf32> to vector<12x48xf32>
    %473 = arith.mulf %377, %472 : vector<12x48xf32>
    %cst_153 = arith.constant dense<0.000000e+00> : vector<12x12xf32>
    %474 = tpu.matmul %473, %384, %cst_153 {dimension_numbers = #tpu.dot_dimension_numbers<[1], [1], [0], [0], [0, 0, 1, 0], [], []>} : vector<12x48xf32>, vector<12x48xf32>, vector<12x12xf32> -> vector<12x12xf32>
    %cst_154 = arith.constant dense<0xFF800000> : vector<12xf32>
    %475 = vector.multi_reduction <maximumf>, %474, %cst_154 [1] : vector<12x12xf32> to vector<12xf32>
    %476 = vector.shape_cast %475 : vector<12xf32> to vector<12x1xf32>
    %477 = vector.broadcast %476 : vector<12x1xf32> to vector<12x12xf32>
    %478 = arith.subf %474, %477 : vector<12x12xf32>
    %479 = math.exp %478 : vector<12x12xf32>
    %cst_155 = arith.constant dense<0.000000e+00> : vector<12xf32>
    %480 = vector.multi_reduction <add>, %479, %cst_155 [1] : vector<12x12xf32> to vector<12xf32>
    %481 = vector.shape_cast %480 : vector<12xf32> to vector<12x1xf32>
    %482 = tpu.reciprocal %481 {approx = true} : vector<12x1xf32> -> vector<12x1xf32>
    %483 = vector.broadcast %482 : vector<12x1xf32> to vector<12x12xf32>
    %484 = arith.mulf %479, %483 : vector<12x12xf32>
    %485 = vector.broadcast %100 : vector<1x48xf32> to vector<12x48xf32>
    %486 = arith.mulf %387, %485 : vector<12x48xf32>
    %cst_156 = arith.constant dense<0.000000e+00> : vector<12x48xf32>
    %487 = tpu.matmul %484, %486, %cst_156 {dimension_numbers = #tpu.dot_dimension_numbers<[1], [0], [0], [1], [0, 0, 1, 1], [], []>} : vector<12x12xf32>, vector<12x48xf32>, vector<12x48xf32> -> vector<12x48xf32>
    %488 = arith.addf %471, %487 : vector<12x48xf32>
    %489 = vector.broadcast %107 : vector<1x48xf32> to vector<12x48xf32>
    %490 = arith.mulf %377, %489 : vector<12x48xf32>
    %cst_157 = arith.constant dense<0.000000e+00> : vector<12x12xf32>
    %491 = tpu.matmul %490, %384, %cst_157 {dimension_numbers = #tpu.dot_dimension_numbers<[1], [1], [0], [0], [0, 0, 1, 0], [], []>} : vector<12x48xf32>, vector<12x48xf32>, vector<12x12xf32> -> vector<12x12xf32>
    %cst_158 = arith.constant dense<0xFF800000> : vector<12xf32>
    %492 = vector.multi_reduction <maximumf>, %491, %cst_158 [1] : vector<12x12xf32> to vector<12xf32>
    %493 = vector.shape_cast %492 : vector<12xf32> to vector<12x1xf32>
    %494 = vector.broadcast %493 : vector<12x1xf32> to vector<12x12xf32>
    %495 = arith.subf %491, %494 : vector<12x12xf32>
    %496 = math.exp %495 : vector<12x12xf32>
    %cst_159 = arith.constant dense<0.000000e+00> : vector<12xf32>
    %497 = vector.multi_reduction <add>, %496, %cst_159 [1] : vector<12x12xf32> to vector<12xf32>
    %498 = vector.shape_cast %497 : vector<12xf32> to vector<12x1xf32>
    %499 = tpu.reciprocal %498 {approx = true} : vector<12x1xf32> -> vector<12x1xf32>
    %500 = vector.broadcast %499 : vector<12x1xf32> to vector<12x12xf32>
    %501 = arith.mulf %496, %500 : vector<12x12xf32>
    %502 = vector.broadcast %107 : vector<1x48xf32> to vector<12x48xf32>
    %503 = arith.mulf %387, %502 : vector<12x48xf32>
    %cst_160 = arith.constant dense<0.000000e+00> : vector<12x48xf32>
    %504 = tpu.matmul %501, %503, %cst_160 {dimension_numbers = #tpu.dot_dimension_numbers<[1], [0], [0], [1], [0, 0, 1, 1], [], []>} : vector<12x12xf32>, vector<12x48xf32>, vector<12x48xf32> -> vector<12x48xf32>
    %505 = arith.addf %488, %504 : vector<12x48xf32>
    %506 = vector.broadcast %114 : vector<1x48xf32> to vector<12x48xf32>
    %507 = arith.mulf %377, %506 : vector<12x48xf32>
    %cst_161 = arith.constant dense<0.000000e+00> : vector<12x12xf32>
    %508 = tpu.matmul %507, %384, %cst_161 {dimension_numbers = #tpu.dot_dimension_numbers<[1], [1], [0], [0], [0, 0, 1, 0], [], []>} : vector<12x48xf32>, vector<12x48xf32>, vector<12x12xf32> -> vector<12x12xf32>
    %cst_162 = arith.constant dense<0xFF800000> : vector<12xf32>
    %509 = vector.multi_reduction <maximumf>, %508, %cst_162 [1] : vector<12x12xf32> to vector<12xf32>
    %510 = vector.shape_cast %509 : vector<12xf32> to vector<12x1xf32>
    %511 = vector.broadcast %510 : vector<12x1xf32> to vector<12x12xf32>
    %512 = arith.subf %508, %511 : vector<12x12xf32>
    %513 = math.exp %512 : vector<12x12xf32>
    %cst_163 = arith.constant dense<0.000000e+00> : vector<12xf32>
    %514 = vector.multi_reduction <add>, %513, %cst_163 [1] : vector<12x12xf32> to vector<12xf32>
    %515 = vector.shape_cast %514 : vector<12xf32> to vector<12x1xf32>
    %516 = tpu.reciprocal %515 {approx = true} : vector<12x1xf32> -> vector<12x1xf32>
    %517 = vector.broadcast %516 : vector<12x1xf32> to vector<12x12xf32>
    %518 = arith.mulf %513, %517 : vector<12x12xf32>
    %519 = vector.broadcast %114 : vector<1x48xf32> to vector<12x48xf32>
    %520 = arith.mulf %387, %519 : vector<12x48xf32>
    %cst_164 = arith.constant dense<0.000000e+00> : vector<12x48xf32>
    %521 = tpu.matmul %518, %520, %cst_164 {dimension_numbers = #tpu.dot_dimension_numbers<[1], [0], [0], [1], [0, 0, 1, 1], [], []>} : vector<12x12xf32>, vector<12x48xf32>, vector<12x48xf32> -> vector<12x48xf32>
    %522 = arith.addf %505, %521 : vector<12x48xf32>
    %cst_165 = arith.constant dense<0.000000e+00> : vector<12x48xf32>
    %523 = tpu.matmul %522, %29, %cst_165 {dimension_numbers = #tpu.dot_dimension_numbers<[1], [0], [0], [1], [0, 0, 1, 1], [], []>} : vector<12x48xf32>, vector<48x48xf32>, vector<12x48xf32> -> vector<12x48xf32>
    %524 = vector.broadcast %32 : vector<1x48xf32> to vector<12x48xf32>
    %525 = arith.addf %523, %524 : vector<12x48xf32>
    %526 = arith.addf %354, %525 : vector<12x48xf32>
    %cst_166 = arith.constant dense<0.000000e+00> : vector<12xf32>
    %527 = vector.multi_reduction <add>, %526, %cst_166 [1] : vector<12x48xf32> to vector<12xf32>
    %528 = vector.shape_cast %527 : vector<12xf32> to vector<12x1xf32>
    %cst_167 = arith.constant 0.020833334 : f32
    %529 = vector.broadcast %cst_167 : f32 to vector<12x1xf32>
    %530 = arith.mulf %528, %529 : vector<12x1xf32>
    %531 = arith.mulf %526, %526 : vector<12x48xf32>
    %cst_168 = arith.constant dense<0.000000e+00> : vector<12xf32>
    %532 = vector.multi_reduction <add>, %531, %cst_168 [1] : vector<12x48xf32> to vector<12xf32>
    %533 = vector.shape_cast %532 : vector<12xf32> to vector<12x1xf32>
    %cst_169 = arith.constant 0.020833334 : f32
    %534 = vector.broadcast %cst_169 : f32 to vector<12x1xf32>
    %535 = arith.mulf %533, %534 : vector<12x1xf32>
    %536 = arith.mulf %530, %530 : vector<12x1xf32>
    %537 = arith.subf %535, %536 : vector<12x1xf32>
    %538 = vector.broadcast %530 : vector<12x1xf32> to vector<12x48xf32>
    %539 = arith.subf %526, %538 : vector<12x48xf32>
    %cst_170 = arith.constant 9.99999974E-6 : f32
    %540 = vector.broadcast %cst_170 : f32 to vector<12x1xf32>
    %541 = arith.addf %537, %540 : vector<12x1xf32>
    %542 = math.rsqrt %541 : vector<12x1xf32>
    %543 = vector.broadcast %542 : vector<12x1xf32> to vector<12x48xf32>
    %544 = arith.mulf %539, %543 : vector<12x48xf32>
    %545 = vector.broadcast %35 : vector<1x48xf32> to vector<12x48xf32>
    %546 = arith.mulf %544, %545 : vector<12x48xf32>
    %547 = vector.broadcast %38 : vector<1x48xf32> to vector<12x48xf32>
    %548 = arith.addf %546, %547 : vector<12x48xf32>
    %549 = vector.extract_strided_slice %360 {offsets = [2, 0], sizes = [1, 48], strides = [1, 1]} : vector<4x48xf32> to vector<1x48xf32>
    %cst_171 = arith.constant 1.000000e+00 : f32
    %550 = vector.broadcast %cst_171 : f32 to vector<1x48xf32>
    %551 = arith.addf %550, %549 : vector<1x48xf32>
    %552 = vector.broadcast %551 : vector<1x48xf32> to vector<12x48xf32>
    %553 = arith.mulf %548, %552 : vector<12x48xf32>
    %554 = vector.extract_strided_slice %360 {offsets = [3, 0], sizes = [1, 48], strides = [1, 1]} : vector<4x48xf32> to vector<1x48xf32>
    %555 = vector.broadcast %554 : vector<1x48xf32> to vector<12x48xf32>
    %556 = arith.addf %553, %555 : vector<12x48xf32>
    %cst_172 = arith.constant dense<0.000000e+00> : vector<12x48xf32>
    %557 = tpu.matmul %556, %41, %cst_172 {dimension_numbers = #tpu.dot_dimension_numbers<[1], [0], [0], [1], [0, 0, 1, 1], [], []>} : vector<12x48xf32>, vector<48x48xf32>, vector<12x48xf32> -> vector<12x48xf32>
    %558 = vector.broadcast %44 : vector<1x48xf32> to vector<12x48xf32>
    %559 = arith.addf %557, %558 : vector<12x48xf32>
    %cst_173 = arith.constant 0.000000e+00 : f32
    %560 = vector.broadcast %cst_173 : f32 to vector<12x48xf32>
    %561 = arith.maximumf %559, %560 : vector<12x48xf32>
    %cst_174 = arith.constant dense<0.000000e+00> : vector<12x48xf32>
    %562 = tpu.matmul %561, %47, %cst_174 {dimension_numbers = #tpu.dot_dimension_numbers<[1], [0], [0], [1], [0, 0, 1, 1], [], []>} : vector<12x48xf32>, vector<48x48xf32>, vector<12x48xf32> -> vector<12x48xf32>
    %563 = vector.broadcast %50 : vector<1x48xf32> to vector<12x48xf32>
    %564 = arith.addf %562, %563 : vector<12x48xf32>
    %565 = arith.addf %548, %564 : vector<12x48xf32>
    %cst_175 = arith.constant dense<0.000000e+00> : vector<12xf32>
    %566 = vector.multi_reduction <add>, %565, %cst_175 [1] : vector<12x48xf32> to vector<12xf32>
    %567 = vector.shape_cast %566 : vector<12xf32> to vector<12x1xf32>
    %cst_176 = arith.constant 0.020833334 : f32
    %568 = vector.broadcast %cst_176 : f32 to vector<12x1xf32>
    %569 = arith.mulf %567, %568 : vector<12x1xf32>
    %570 = arith.mulf %565, %565 : vector<12x48xf32>
    %cst_177 = arith.constant dense<0.000000e+00> : vector<12xf32>
    %571 = vector.multi_reduction <add>, %570, %cst_177 [1] : vector<12x48xf32> to vector<12xf32>
    %572 = vector.shape_cast %571 : vector<12xf32> to vector<12x1xf32>
    %cst_178 = arith.constant 0.020833334 : f32
    %573 = vector.broadcast %cst_178 : f32 to vector<12x1xf32>
    %574 = arith.mulf %572, %573 : vector<12x1xf32>
    %575 = arith.mulf %569, %569 : vector<12x1xf32>
    %576 = arith.subf %574, %575 : vector<12x1xf32>
    %577 = vector.broadcast %569 : vector<12x1xf32> to vector<12x48xf32>
    %578 = arith.subf %565, %577 : vector<12x48xf32>
    %cst_179 = arith.constant 9.99999974E-6 : f32
    %579 = vector.broadcast %cst_179 : f32 to vector<12x1xf32>
    %580 = arith.addf %576, %579 : vector<12x1xf32>
    %581 = math.rsqrt %580 : vector<12x1xf32>
    %582 = vector.broadcast %581 : vector<12x1xf32> to vector<12x48xf32>
    %583 = arith.mulf %578, %582 : vector<12x48xf32>
    %584 = vector.broadcast %53 : vector<1x48xf32> to vector<12x48xf32>
    %585 = arith.mulf %583, %584 : vector<12x48xf32>
    %586 = vector.broadcast %56 : vector<1x48xf32> to vector<12x48xf32>
    %587 = arith.addf %585, %586 : vector<12x48xf32>
    %c1_180 = arith.constant 1 : index
    %c0_181 = arith.constant 0 : index
    %c0_182 = arith.constant 0 : index
    %588 = vector.load %arg38[%c1_180, %c0_181, %c0_182] : memref<2x12x48xf32, #tpu.memory_space<vmem>>, vector<1x12x48xf32>
    %589 = vector.shape_cast %588 : vector<1x12x48xf32> to vector<12x48xf32>
    %590 = vector.shape_cast %587 : vector<12x48xf32> to vector<1x12x48xf32>
    tpu.vector_store %arg38[%c1_180, %c0_181, %c0_182], %590 {strides = array<i32>} : memref<2x12x48xf32, #tpu.memory_space<vmem>>, vector<1x12x48xf32>,
    %c7_i32 = arith.constant 7 : i32
    %591 = arith.cmpi eq, %arg0, %c7_i32 : i32
    %592 = arith.extui %591 : i1 to i32
    %c0_i32_183 = arith.constant 0 : i32
    %593 = arith.cmpi ne, %592, %c0_i32_183 : i32
    scf.if %593 {
      %c0_184 = arith.constant 0 : index
      %c0_185 = arith.constant 0 : index
      %594 = vector.load %arg23[%c0_184, %c0_185] : memref<48x48xf32, #tpu.memory_space<vmem>>, vector<48x48xf32>
      %c0_186 = arith.constant 0 : index
      %c0_187 = arith.constant 0 : index
      %595 = vector.load %arg24[%c0_186, %c0_187] : memref<1x48xf32, #tpu.memory_space<vmem>>, vector<1x48xf32>
      %c0_188 = arith.constant 0 : index
      %c0_189 = arith.constant 0 : index
      %596 = vector.load %arg25[%c0_188, %c0_189] : memref<48x48xf32, #tpu.memory_space<vmem>>, vector<48x48xf32>
      %c0_190 = arith.constant 0 : index
      %c0_191 = arith.constant 0 : index
      %597 = vector.load %arg26[%c0_190, %c0_191] : memref<1x48xf32, #tpu.memory_space<vmem>>, vector<1x48xf32>
      %c0_192 = arith.constant 0 : index
      %c0_193 = arith.constant 0 : index
      %598 = vector.load %arg27[%c0_192, %c0_193] : memref<48x128xf32, #tpu.memory_space<vmem>>, vector<48x128xf32>
      %c0_194 = arith.constant 0 : index
      %c0_195 = arith.constant 0 : index
      %599 = vector.load %arg28[%c0_194, %c0_195] : memref<48x48xf32, #tpu.memory_space<vmem>>, vector<48x48xf32>
      %c0_196 = arith.constant 0 : index
      %c0_197 = arith.constant 0 : index
      %600 = vector.load %arg29[%c0_196, %c0_197] : memref<1x48xf32, #tpu.memory_space<vmem>>, vector<1x48xf32>
      %c0_198 = arith.constant 0 : index
      %c0_199 = arith.constant 0 : index
      %601 = vector.load %arg30[%c0_198, %c0_199] : memref<48x48xf32, #tpu.memory_space<vmem>>, vector<48x48xf32>
      %c0_200 = arith.constant 0 : index
      %c0_201 = arith.constant 0 : index
      %602 = vector.load %arg31[%c0_200, %c0_201] : memref<1x48xf32, #tpu.memory_space<vmem>>, vector<1x48xf32>
      %c0_202 = arith.constant 0 : index
      %c0_203 = arith.constant 0 : index
      %603 = vector.load %arg32[%c0_202, %c0_203] : memref<48x128xf32, #tpu.memory_space<vmem>>, vector<48x128xf32>
      %c0_204 = arith.constant 0 : index
      %c0_205 = arith.constant 0 : index
      %604 = vector.load %arg33[%c0_204, %c0_205] : memref<48x48xf32, #tpu.memory_space<vmem>>, vector<48x48xf32>
      %c0_206 = arith.constant 0 : index
      %c0_207 = arith.constant 0 : index
      %605 = vector.load %arg34[%c0_206, %c0_207] : memref<1x48xf32, #tpu.memory_space<vmem>>, vector<1x48xf32>
      %c0_208 = arith.constant 0 : index
      %c0_209 = arith.constant 0 : index
      %606 = vector.load %arg35[%c0_208, %c0_209] : memref<48x128xf32, #tpu.memory_space<vmem>>, vector<48x128xf32>
      %c0_210 = arith.constant 0 : index
      %c0_211 = arith.constant 0 : index
      %607 = vector.load %arg36[%c0_210, %c0_211] : memref<1x128xf32, #tpu.memory_space<vmem>>, vector<1x128xf32>
      %c0_212 = arith.constant 0 : index
      %c0_213 = arith.constant 0 : index
      %c0_214 = arith.constant 0 : index
      %608 = vector.load %arg40[%c0_212, %c0_213, %c0_214] : memref<2x8x48xf32, #tpu.memory_space<vmem>>, vector<1x8x48xf32>
      %609 = vector.shape_cast %608 : vector<1x8x48xf32> to vector<8x48xf32>
      %610 = vector.extract_strided_slice %349 {offsets = [0, 0], sizes = [8, 48], strides = [1, 1]} : vector<12x48xf32> to vector<8x48xf32>
      %cst_215 = arith.constant dense<0.000000e+00> : vector<8x48xf32>
      %611 = tpu.matmul %609, %594, %cst_215 {dimension_numbers = #tpu.dot_dimension_numbers<[1], [0], [0], [1], [0, 0, 1, 1], [], []>} : vector<8x48xf32>, vector<48x48xf32>, vector<8x48xf32> -> vector<8x48xf32>
      %612 = vector.broadcast %595 : vector<1x48xf32> to vector<8x48xf32>
      %613 = arith.addf %611, %612 : vector<8x48xf32>
      %cst_216 = arith.constant dense<0.000000e+00> : vector<8x48xf32>
      %614 = tpu.matmul %613, %596, %cst_216 {dimension_numbers = #tpu.dot_dimension_numbers<[1], [0], [0], [1], [0, 0, 1, 1], [], []>} : vector<8x48xf32>, vector<48x48xf32>, vector<8x48xf32> -> vector<8x48xf32>
      %615 = vector.broadcast %597 : vector<1x48xf32> to vector<8x48xf32>
      %616 = arith.addf %614, %615 : vector<8x48xf32>
      %cst_217 = arith.constant 0.000000e+00 : f32
      %617 = vector.broadcast %cst_217 : f32 to vector<8x48xf32>
      %618 = arith.maximumf %616, %617 : vector<8x48xf32>
      %cst_218 = arith.constant dense<0.000000e+00> : vector<8x48xf32>
      %619 = tpu.matmul %610, %599, %cst_218 {dimension_numbers = #tpu.dot_dimension_numbers<[1], [0], [0], [1], [0, 0, 1, 1], [], []>} : vector<8x48xf32>, vector<48x48xf32>, vector<8x48xf32> -> vector<8x48xf32>
      %620 = vector.broadcast %600 : vector<1x48xf32> to vector<8x48xf32>
      %621 = arith.addf %619, %620 : vector<8x48xf32>
      %cst_219 = arith.constant dense<0.000000e+00> : vector<8x48xf32>
      %622 = tpu.matmul %621, %601, %cst_219 {dimension_numbers = #tpu.dot_dimension_numbers<[1], [0], [0], [1], [0, 0, 1, 1], [], []>} : vector<8x48xf32>, vector<48x48xf32>, vector<8x48xf32> -> vector<8x48xf32>
      %623 = vector.broadcast %602 : vector<1x48xf32> to vector<8x48xf32>
      %624 = arith.addf %622, %623 : vector<8x48xf32>
      %cst_220 = arith.constant 0.000000e+00 : f32
      %625 = vector.broadcast %cst_220 : f32 to vector<8x48xf32>
      %626 = arith.maximumf %624, %625 : vector<8x48xf32>
      %cst_221 = arith.constant dense<0.000000e+00> : vector<8x48xf32>
      %627 = tpu.matmul %621, %604, %cst_221 {dimension_numbers = #tpu.dot_dimension_numbers<[1], [0], [0], [1], [0, 0, 1, 1], [], []>} : vector<8x48xf32>, vector<48x48xf32>, vector<8x48xf32> -> vector<8x48xf32>
      %628 = vector.broadcast %605 : vector<1x48xf32> to vector<8x48xf32>
      %629 = arith.addf %627, %628 : vector<8x48xf32>
      %cst_222 = arith.constant 0.000000e+00 : f32
      %630 = vector.broadcast %cst_222 : f32 to vector<8x48xf32>
      %631 = arith.maximumf %629, %630 : vector<8x48xf32>
      %cst_223 = arith.constant dense<0.000000e+00> : vector<8x128xf32>
      %632 = tpu.matmul %626, %603, %cst_223 {dimension_numbers = #tpu.dot_dimension_numbers<[1], [0], [0], [1], [0, 0, 1, 1], [], []>} : vector<8x48xf32>, vector<48x128xf32>, vector<8x128xf32> -> vector<8x128xf32>
      %cst_224 = arith.constant dense<0.000000e+00> : vector<8x128xf32>
      %633 = tpu.matmul %618, %598, %cst_224 {dimension_numbers = #tpu.dot_dimension_numbers<[1], [0], [0], [1], [0, 0, 1, 1], [], []>} : vector<8x48xf32>, vector<48x128xf32>, vector<8x128xf32> -> vector<8x128xf32>
      %634 = arith.addf %632, %633 : vector<8x128xf32>
      %cst_225 = arith.constant dense<0.000000e+00> : vector<8x128xf32>
      %635 = tpu.matmul %631, %606, %cst_225 {dimension_numbers = #tpu.dot_dimension_numbers<[1], [0], [0], [1], [0, 0, 1, 1], [], []>} : vector<8x48xf32>, vector<48x128xf32>, vector<8x128xf32> -> vector<8x128xf32>
      %636 = arith.addf %634, %635 : vector<8x128xf32>
      %637 = vector.broadcast %607 : vector<1x128xf32> to vector<8x128xf32>
      %638 = arith.addf %636, %637 : vector<8x128xf32>
      %c0_226 = arith.constant 0 : index
      %c0_227 = arith.constant 0 : index
      %c0_228 = arith.constant 0 : index
      %639 = vector.load %arg37[%c0_226, %c0_227, %c0_228] : memref<2x8x128xf32, #tpu.memory_space<vmem>>, vector<1x8x128xf32>
      %640 = vector.shape_cast %639 : vector<1x8x128xf32> to vector<8x128xf32>
      %641 = vector.shape_cast %638 : vector<8x128xf32> to vector<1x8x128xf32>
      tpu.vector_store %arg37[%c0_226, %c0_227, %c0_228], %641 {strides = array<i32>} : memref<2x8x128xf32, #tpu.memory_space<vmem>>, vector<1x8x128xf32>,
      %c1_229 = arith.constant 1 : index
      %c0_230 = arith.constant 0 : index
      %c0_231 = arith.constant 0 : index
      %642 = vector.load %arg40[%c1_229, %c0_230, %c0_231] : memref<2x8x48xf32, #tpu.memory_space<vmem>>, vector<1x8x48xf32>
      %643 = vector.shape_cast %642 : vector<1x8x48xf32> to vector<8x48xf32>
      %644 = vector.extract_strided_slice %587 {offsets = [0, 0], sizes = [8, 48], strides = [1, 1]} : vector<12x48xf32> to vector<8x48xf32>
      %cst_232 = arith.constant dense<0.000000e+00> : vector<8x48xf32>
      %645 = tpu.matmul %643, %594, %cst_232 {dimension_numbers = #tpu.dot_dimension_numbers<[1], [0], [0], [1], [0, 0, 1, 1], [], []>} : vector<8x48xf32>, vector<48x48xf32>, vector<8x48xf32> -> vector<8x48xf32>
      %646 = vector.broadcast %595 : vector<1x48xf32> to vector<8x48xf32>
      %647 = arith.addf %645, %646 : vector<8x48xf32>
      %cst_233 = arith.constant dense<0.000000e+00> : vector<8x48xf32>
      %648 = tpu.matmul %647, %596, %cst_233 {dimension_numbers = #tpu.dot_dimension_numbers<[1], [0], [0], [1], [0, 0, 1, 1], [], []>} : vector<8x48xf32>, vector<48x48xf32>, vector<8x48xf32> -> vector<8x48xf32>
      %649 = vector.broadcast %597 : vector<1x48xf32> to vector<8x48xf32>
      %650 = arith.addf %648, %649 : vector<8x48xf32>
      %cst_234 = arith.constant 0.000000e+00 : f32
      %651 = vector.broadcast %cst_234 : f32 to vector<8x48xf32>
      %652 = arith.maximumf %650, %651 : vector<8x48xf32>
      %cst_235 = arith.constant dense<0.000000e+00> : vector<8x48xf32>
      %653 = tpu.matmul %644, %599, %cst_235 {dimension_numbers = #tpu.dot_dimension_numbers<[1], [0], [0], [1], [0, 0, 1, 1], [], []>} : vector<8x48xf32>, vector<48x48xf32>, vector<8x48xf32> -> vector<8x48xf32>
      %654 = vector.broadcast %600 : vector<1x48xf32> to vector<8x48xf32>
      %655 = arith.addf %653, %654 : vector<8x48xf32>
      %cst_236 = arith.constant dense<0.000000e+00> : vector<8x48xf32>
      %656 = tpu.matmul %655, %601, %cst_236 {dimension_numbers = #tpu.dot_dimension_numbers<[1], [0], [0], [1], [0, 0, 1, 1], [], []>} : vector<8x48xf32>, vector<48x48xf32>, vector<8x48xf32> -> vector<8x48xf32>
      %657 = vector.broadcast %602 : vector<1x48xf32> to vector<8x48xf32>
      %658 = arith.addf %656, %657 : vector<8x48xf32>
      %cst_237 = arith.constant 0.000000e+00 : f32
      %659 = vector.broadcast %cst_237 : f32 to vector<8x48xf32>
      %660 = arith.maximumf %658, %659 : vector<8x48xf32>
      %cst_238 = arith.constant dense<0.000000e+00> : vector<8x48xf32>
      %661 = tpu.matmul %655, %604, %cst_238 {dimension_numbers = #tpu.dot_dimension_numbers<[1], [0], [0], [1], [0, 0, 1, 1], [], []>} : vector<8x48xf32>, vector<48x48xf32>, vector<8x48xf32> -> vector<8x48xf32>
      %662 = vector.broadcast %605 : vector<1x48xf32> to vector<8x48xf32>
      %663 = arith.addf %661, %662 : vector<8x48xf32>
      %cst_239 = arith.constant 0.000000e+00 : f32
      %664 = vector.broadcast %cst_239 : f32 to vector<8x48xf32>
      %665 = arith.maximumf %663, %664 : vector<8x48xf32>
      %cst_240 = arith.constant dense<0.000000e+00> : vector<8x128xf32>
      %666 = tpu.matmul %660, %603, %cst_240 {dimension_numbers = #tpu.dot_dimension_numbers<[1], [0], [0], [1], [0, 0, 1, 1], [], []>} : vector<8x48xf32>, vector<48x128xf32>, vector<8x128xf32> -> vector<8x128xf32>
      %cst_241 = arith.constant dense<0.000000e+00> : vector<8x128xf32>
      %667 = tpu.matmul %652, %598, %cst_241 {dimension_numbers = #tpu.dot_dimension_numbers<[1], [0], [0], [1], [0, 0, 1, 1], [], []>} : vector<8x48xf32>, vector<48x128xf32>, vector<8x128xf32> -> vector<8x128xf32>
      %668 = arith.addf %666, %667 : vector<8x128xf32>
      %cst_242 = arith.constant dense<0.000000e+00> : vector<8x128xf32>
      %669 = tpu.matmul %665, %606, %cst_242 {dimension_numbers = #tpu.dot_dimension_numbers<[1], [0], [0], [1], [0, 0, 1, 1], [], []>} : vector<8x48xf32>, vector<48x128xf32>, vector<8x128xf32> -> vector<8x128xf32>
      %670 = arith.addf %668, %669 : vector<8x128xf32>
      %671 = vector.broadcast %607 : vector<1x128xf32> to vector<8x128xf32>
      %672 = arith.addf %670, %671 : vector<8x128xf32>
      %c1_243 = arith.constant 1 : index
      %c0_244 = arith.constant 0 : index
      %c0_245 = arith.constant 0 : index
      %673 = vector.load %arg37[%c1_243, %c0_244, %c0_245] : memref<2x8x128xf32, #tpu.memory_space<vmem>>, vector<1x8x128xf32>
      %674 = vector.shape_cast %673 : vector<1x8x128xf32> to vector<8x128xf32>
      %675 = vector.shape_cast %672 : vector<8x128xf32> to vector<1x8x128xf32>
      tpu.vector_store %arg37[%c1_243, %c0_244, %c0_245], %675 {strides = array<i32>} : memref<2x8x128xf32, #tpu.memory_space<vmem>>, vector<1x8x128xf32>,
    } else {
    }
    return
  }
  func.func @transform_0(%arg0: i32) -> (i32, i32, i32) {
    %c0_i32 = arith.constant 0 : i32
    %c0_i32_0 = arith.constant 0 : i32
    %c0_i32_1 = arith.constant 0 : i32
    %c0_i32_2 = arith.constant 0 : i32
    return %c0_i32, %c0_i32_0, %c0_i32_1 : i32, i32, i32
  }
  func.func @transform_1(%arg0: i32) -> (i32, i32, i32) {
    %c0_i32 = arith.constant 0 : i32
    %c0_i32_0 = arith.constant 0 : i32
    %c0_i32_1 = arith.constant 0 : i32
    %c0_i32_2 = arith.constant 0 : i32
    return %c0_i32, %c0_i32_0, %c0_i32_1 : i32, i32, i32
  }
  func.func @transform_2(%arg0: i32) -> (i32, i32, i32) {
    %c0_i32 = arith.constant 0 : i32
    %c0_i32_0 = arith.constant 0 : i32
    %c0_i32_1 = arith.constant 0 : i32
    %c0_i32_2 = arith.constant 0 : i32
    return %c0_i32, %c0_i32_0, %c0_i32_1 : i32, i32, i32
  }
  func.func @transform_3(%arg0: i32) -> (i32, i32, i32) {
    %c0_i32 = arith.constant 0 : i32
    %c0_i32_0 = arith.constant 0 : i32
    %c0_i32_1 = arith.constant 0 : i32
    %c0_i32_2 = arith.constant 0 : i32
    return %c0_i32, %c0_i32_0, %c0_i32_1 : i32, i32, i32
  }
  func.func @transform_4(%arg0: i32) -> (i32, i32) {
    %c0_i32 = arith.constant 0 : i32
    %c0_i32_0 = arith.constant 0 : i32
    %c0_i32_1 = arith.constant 0 : i32
    return %c0_i32, %c0_i32_0 : i32, i32
  }
  func.func @transform_5(%arg0: i32) -> (i32, i32, i32, i32) {
    %c2_i32 = arith.constant 2 : i32
    %0 = arith.addi %c2_i32, %arg0 : i32
    %c0_i32 = arith.constant 0 : i32
    %c0_i32_0 = arith.constant 0 : i32
    %c0_i32_1 = arith.constant 0 : i32
    %c0_i32_2 = arith.constant 0 : i32
    return %c0_i32, %0, %c0_i32_0, %c0_i32_1 : i32, i32, i32, i32
  }
  func.func @transform_6(%arg0: i32) -> (i32, i32, i32) {
    %c0_i32 = arith.constant 0 : i32
    %c0_i32_0 = arith.constant 0 : i32
    %c0_i32_1 = arith.constant 0 : i32
    %c0_i32_2 = arith.constant 0 : i32
    return %c0_i32, %c0_i32_0, %c0_i32_1 : i32, i32, i32
  }
  func.func @transform_7(%arg0: i32) -> (i32, i32, i32) {
    %c0_i32 = arith.constant 0 : i32
    %c0_i32_0 = arith.constant 0 : i32
    %c0_i32_1 = arith.constant 0 : i32
    %c0_i32_2 = arith.constant 0 : i32
    return %c0_i32, %c0_i32_0, %c0_i32_1 : i32, i32, i32
  }
  func.func @transform_8(%arg0: i32) -> (i32, i32, i32) {
    %c0_i32 = arith.constant 0 : i32
    %c0_i32_0 = arith.constant 0 : i32
    %c0_i32_1 = arith.constant 0 : i32
    %c0_i32_2 = arith.constant 0 : i32
    return %c0_i32, %c0_i32_0, %c0_i32_1 : i32, i32, i32
  }
  func.func @transform_9(%arg0: i32) -> (i32, i32, i32) {
    %c0_i32 = arith.constant 0 : i32
    %c0_i32_0 = arith.constant 0 : i32
    %c0_i32_1 = arith.constant 0 : i32
    %c0_i32_2 = arith.constant 0 : i32
    return %c0_i32, %c0_i32_0, %c0_i32_1 : i32, i32, i32
  }
  func.func @transform_10(%arg0: i32) -> (i32, i32, i32) {
    %c0_i32 = arith.constant 0 : i32
    %c0_i32_0 = arith.constant 0 : i32
    %c0_i32_1 = arith.constant 0 : i32
    %c0_i32_2 = arith.constant 0 : i32
    return %c0_i32, %c0_i32_0, %c0_i32_1 : i32, i32, i32
  }
  func.func @transform_11(%arg0: i32) -> (i32, i32, i32) {
    %c0_i32 = arith.constant 0 : i32
    %c0_i32_0 = arith.constant 0 : i32
    %c0_i32_1 = arith.constant 0 : i32
    %c0_i32_2 = arith.constant 0 : i32
    return %c0_i32, %c0_i32_0, %c0_i32_1 : i32, i32, i32
  }
  func.func @transform_12(%arg0: i32) -> (i32, i32, i32) {
    %c0_i32 = arith.constant 0 : i32
    %c0_i32_0 = arith.constant 0 : i32
    %c0_i32_1 = arith.constant 0 : i32
    %c0_i32_2 = arith.constant 0 : i32
    return %c0_i32, %c0_i32_0, %c0_i32_1 : i32, i32, i32
  }
  func.func @transform_13(%arg0: i32) -> (i32, i32, i32) {
    %c0_i32 = arith.constant 0 : i32
    %c0_i32_0 = arith.constant 0 : i32
    %c0_i32_1 = arith.constant 0 : i32
    %c0_i32_2 = arith.constant 0 : i32
    return %c0_i32, %c0_i32_0, %c0_i32_1 : i32, i32, i32
  }
  func.func @transform_14(%arg0: i32) -> (i32, i32, i32) {
    %c0_i32 = arith.constant 0 : i32
    %c0_i32_0 = arith.constant 0 : i32
    %c0_i32_1 = arith.constant 0 : i32
    %c0_i32_2 = arith.constant 0 : i32
    return %c0_i32, %c0_i32_0, %c0_i32_1 : i32, i32, i32
  }
  func.func @transform_15(%arg0: i32) -> (i32, i32, i32) {
    %c0_i32 = arith.constant 0 : i32
    %c0_i32_0 = arith.constant 0 : i32
    %c0_i32_1 = arith.constant 0 : i32
    %c0_i32_2 = arith.constant 0 : i32
    return %c0_i32, %c0_i32_0, %c0_i32_1 : i32, i32, i32
  }
  func.func @transform_16(%arg0: i32) -> (i32, i32, i32) {
    %c0_i32 = arith.constant 0 : i32
    %c0_i32_0 = arith.constant 0 : i32
    %c0_i32_1 = arith.constant 0 : i32
    %c0_i32_2 = arith.constant 0 : i32
    return %c0_i32, %c0_i32_0, %c0_i32_1 : i32, i32, i32
  }
  func.func @transform_17(%arg0: i32) -> (i32, i32, i32) {
    %c0_i32 = arith.constant 0 : i32
    %c0_i32_0 = arith.constant 0 : i32
    %c0_i32_1 = arith.constant 0 : i32
    %c0_i32_2 = arith.constant 0 : i32
    return %c0_i32, %c0_i32_0, %c0_i32_1 : i32, i32, i32
  }
  func.func @transform_18(%arg0: i32) -> (i32, i32, i32) {
    %c0_i32 = arith.constant 0 : i32
    %c0_i32_0 = arith.constant 0 : i32
    %c0_i32_1 = arith.constant 0 : i32
    %c0_i32_2 = arith.constant 0 : i32
    return %c0_i32, %c0_i32_0, %c0_i32_1 : i32, i32, i32
  }
  func.func @transform_19(%arg0: i32) -> (i32, i32, i32) {
    %c0_i32 = arith.constant 0 : i32
    %c0_i32_0 = arith.constant 0 : i32
    %c0_i32_1 = arith.constant 0 : i32
    %c0_i32_2 = arith.constant 0 : i32
    return %c0_i32, %c0_i32_0, %c0_i32_1 : i32, i32, i32
  }
  func.func @transform_20(%arg0: i32) -> (i32, i32, i32) {
    %c0_i32 = arith.constant 0 : i32
    %c0_i32_0 = arith.constant 0 : i32
    %c0_i32_1 = arith.constant 0 : i32
    %c0_i32_2 = arith.constant 0 : i32
    return %c0_i32, %c0_i32_0, %c0_i32_1 : i32, i32, i32
  }
  func.func @transform_21(%arg0: i32) -> (i32, i32, i32) {
    %c0_i32 = arith.constant 0 : i32
    %c0_i32_0 = arith.constant 0 : i32
    %c0_i32_1 = arith.constant 0 : i32
    %c0_i32_2 = arith.constant 0 : i32
    return %c0_i32, %c0_i32_0, %c0_i32_1 : i32, i32, i32
  }
  func.func @transform_22(%arg0: i32) -> (i32, i32) {
    %c0_i32 = arith.constant 0 : i32
    %c0_i32_0 = arith.constant 0 : i32
    %c0_i32_1 = arith.constant 0 : i32
    return %c0_i32, %c0_i32_0 : i32, i32
  }
  func.func @transform_23(%arg0: i32) -> (i32, i32) {
    %c0_i32 = arith.constant 0 : i32
    %c0_i32_0 = arith.constant 0 : i32
    %c0_i32_1 = arith.constant 0 : i32
    return %c0_i32, %c0_i32_0 : i32, i32
  }
  func.func @transform_24(%arg0: i32) -> (i32, i32) {
    %c0_i32 = arith.constant 0 : i32
    %c0_i32_0 = arith.constant 0 : i32
    %c0_i32_1 = arith.constant 0 : i32
    return %c0_i32, %c0_i32_0 : i32, i32
  }
  func.func @transform_25(%arg0: i32) -> (i32, i32) {
    %c0_i32 = arith.constant 0 : i32
    %c0_i32_0 = arith.constant 0 : i32
    %c0_i32_1 = arith.constant 0 : i32
    return %c0_i32, %c0_i32_0 : i32, i32
  }
  func.func @transform_26(%arg0: i32) -> (i32, i32) {
    %c0_i32 = arith.constant 0 : i32
    %c0_i32_0 = arith.constant 0 : i32
    %c0_i32_1 = arith.constant 0 : i32
    return %c0_i32, %c0_i32_0 : i32, i32
  }
  func.func @transform_27(%arg0: i32) -> (i32, i32) {
    %c0_i32 = arith.constant 0 : i32
    %c0_i32_0 = arith.constant 0 : i32
    %c0_i32_1 = arith.constant 0 : i32
    return %c0_i32, %c0_i32_0 : i32, i32
  }
  func.func @transform_28(%arg0: i32) -> (i32, i32) {
    %c0_i32 = arith.constant 0 : i32
    %c0_i32_0 = arith.constant 0 : i32
    %c0_i32_1 = arith.constant 0 : i32
    return %c0_i32, %c0_i32_0 : i32, i32
  }
  func.func @transform_29(%arg0: i32) -> (i32, i32) {
    %c0_i32 = arith.constant 0 : i32
    %c0_i32_0 = arith.constant 0 : i32
    %c0_i32_1 = arith.constant 0 : i32
    return %c0_i32, %c0_i32_0 : i32, i32
  }
  func.func @transform_30(%arg0: i32) -> (i32, i32) {
    %c0_i32 = arith.constant 0 : i32
    %c0_i32_0 = arith.constant 0 : i32
    %c0_i32_1 = arith.constant 0 : i32
    return %c0_i32, %c0_i32_0 : i32, i32
  }
  func.func @transform_31(%arg0: i32) -> (i32, i32) {
    %c0_i32 = arith.constant 0 : i32
    %c0_i32_0 = arith.constant 0 : i32
    %c0_i32_1 = arith.constant 0 : i32
    return %c0_i32, %c0_i32_0 : i32, i32
  }
  func.func @transform_32(%arg0: i32) -> (i32, i32) {
    %c0_i32 = arith.constant 0 : i32
    %c0_i32_0 = arith.constant 0 : i32
    %c0_i32_1 = arith.constant 0 : i32
    return %c0_i32, %c0_i32_0 : i32, i32
  }
  func.func @transform_33(%arg0: i32) -> (i32, i32) {
    %c0_i32 = arith.constant 0 : i32
    %c0_i32_0 = arith.constant 0 : i32
    %c0_i32_1 = arith.constant 0 : i32
    return %c0_i32, %c0_i32_0 : i32, i32
  }
  func.func @transform_34(%arg0: i32) -> (i32, i32) {
    %c0_i32 = arith.constant 0 : i32
    %c0_i32_0 = arith.constant 0 : i32
    %c0_i32_1 = arith.constant 0 : i32
    return %c0_i32, %c0_i32_0 : i32, i32
  }
  func.func @transform_35(%arg0: i32) -> (i32, i32) {
    %c0_i32 = arith.constant 0 : i32
    %c0_i32_0 = arith.constant 0 : i32
    %c0_i32_1 = arith.constant 0 : i32
    return %c0_i32, %c0_i32_0 : i32, i32
  }
  func.func @transform_36(%arg0: i32) -> (i32, i32, i32) {
    %c0_i32 = arith.constant 0 : i32
    %c0_i32_0 = arith.constant 0 : i32
    %c0_i32_1 = arith.constant 0 : i32
    %c0_i32_2 = arith.constant 0 : i32
    return %c0_i32, %c0_i32_0, %c0_i32_1 : i32, i32, i32
  }
}

module attributes {stable_mosaic.version = 11 : i64} {
  func.func @_cross_stack_kernel(%arg0: i32, %arg1: memref<2x8x12xf32, #tpu.memory_space<vmem>>, %arg2: memref<12x48xf32, #tpu.memory_space<vmem>>, %arg3: memref<1x48xf32, #tpu.memory_space<vmem>>, %arg4: memref<8x48xf32, #tpu.memory_space<vmem>>, %arg5: memref<2x16x48xf32, #tpu.memory_space<vmem>>, %arg6: memref<2x8x48xf32, #tpu.memory_space<vmem>>, %arg7: memref<2x8x48xf32, #tpu.memory_space<vmem>>, %arg8: memref<2x16x48xf32, #tpu.memory_space<vmem>>, %arg9: memref<2x16x48xf32, #tpu.memory_space<vmem>>, %arg10: memref<48x48xf32, #tpu.memory_space<vmem>>, %arg11: memref<2x1x4x48xf32, #tpu.memory_space<vmem>>, %arg12: memref<2x48x48xf32, #tpu.memory_space<vmem>>, %arg13: memref<2x1x48xf32, #tpu.memory_space<vmem>>, %arg14: memref<2x48x48xf32, #tpu.memory_space<vmem>>, %arg15: memref<2x1x48xf32, #tpu.memory_space<vmem>>, %arg16: memref<2x48x48xf32, #tpu.memory_space<vmem>>, %arg17: memref<2x1x48xf32, #tpu.memory_space<vmem>>, %arg18: memref<2x48x48xf32, #tpu.memory_space<vmem>>, %arg19: memref<2x1x48xf32, #tpu.memory_space<vmem>>, %arg20: memref<2x1x48xf32, #tpu.memory_space<vmem>>, %arg21: memref<2x1x48xf32, #tpu.memory_space<vmem>>, %arg22: memref<2x48x48xf32, #tpu.memory_space<vmem>>, %arg23: memref<2x1x48xf32, #tpu.memory_space<vmem>>, %arg24: memref<2x48x48xf32, #tpu.memory_space<vmem>>, %arg25: memref<2x1x48xf32, #tpu.memory_space<vmem>>, %arg26: memref<2x1x48xf32, #tpu.memory_space<vmem>>, %arg27: memref<2x1x48xf32, #tpu.memory_space<vmem>>, %arg28: memref<2x8x48xf32, #tpu.memory_space<vmem>>, %arg29: memref<2x8x48xf32, #tpu.memory_space<vmem>>) attributes {dimension_semantics = [#tpu.dimension_semantics<arbitrary>], iteration_bounds = array<i64: 2>, scalar_prefetch = 0 : i64, scratch_operands = 1 : i64, tpu.core_type = #tpu.core_type<tc>, window_params = [{pipeline_mode = #tpu.pipeline_mode<synchronous>, transform_indices = @transform_0, window_bounds = array<i64: 2, 8, 12>}, {pipeline_mode = #tpu.pipeline_mode<synchronous>, transform_indices = @transform_1, window_bounds = array<i64: 12, 48>}, {pipeline_mode = #tpu.pipeline_mode<synchronous>, transform_indices = @transform_2, window_bounds = array<i64: 1, 48>}, {pipeline_mode = #tpu.pipeline_mode<synchronous>, transform_indices = @transform_3, window_bounds = array<i64: 8, 48>}, {pipeline_mode = #tpu.pipeline_mode<synchronous>, transform_indices = @transform_4, window_bounds = array<i64: 2, 16, 48>}, {pipeline_mode = #tpu.pipeline_mode<synchronous>, transform_indices = @transform_5, window_bounds = array<i64: 2, 8, 48>}, {pipeline_mode = #tpu.pipeline_mode<synchronous>, transform_indices = @transform_6, window_bounds = array<i64: 2, 8, 48>}, {pipeline_mode = #tpu.pipeline_mode<synchronous>, transform_indices = @transform_7, window_bounds = array<i64: 2, 16, 48>}, {pipeline_mode = #tpu.pipeline_mode<synchronous>, transform_indices = @transform_8, window_bounds = array<i64: 2, 16, 48>}, {pipeline_mode = #tpu.pipeline_mode<synchronous>, transform_indices = @transform_9, window_bounds = array<i64: 48, 48>}, {transform_indices = @transform_10, window_bounds = array<i64: 2, 1, 4, 48>}, {pipeline_mode = #tpu.pipeline_mode<synchronous>, transform_indices = @transform_11, window_bounds = array<i64: 2, 48, 48>}, {pipeline_mode = #tpu.pipeline_mode<synchronous>, transform_indices = @transform_12, window_bounds = array<i64: 2, 1, 48>}, {pipeline_mode = #tpu.pipeline_mode<synchronous>, transform_indices = @transform_13, window_bounds = array<i64: 2, 48, 48>}, {pipeline_mode = #tpu.pipeline_mode<synchronous>, transform_indices = @transform_14, window_bounds = array<i64: 2, 1, 48>}, {pipeline_mode = #tpu.pipeline_mode<synchronous>, transform_indices = @transform_15, window_bounds = array<i64: 2, 48, 48>}, {pipeline_mode = #tpu.pipeline_mode<synchronous>, transform_indices = @transform_16, window_bounds = array<i64: 2, 1, 48>}, {pipeline_mode = #tpu.pipeline_mode<synchronous>, transform_indices = @transform_17, window_bounds = array<i64: 2, 48, 48>}, {pipeline_mode = #tpu.pipeline_mode<synchronous>, transform_indices = @transform_18, window_bounds = array<i64: 2, 1, 48>}, {pipeline_mode = #tpu.pipeline_mode<synchronous>, transform_indices = @transform_19, window_bounds = array<i64: 2, 1, 48>}, {pipeline_mode = #tpu.pipeline_mode<synchronous>, transform_indices = @transform_20, window_bounds = array<i64: 2, 1, 48>}, {pipeline_mode = #tpu.pipeline_mode<synchronous>, transform_indices = @transform_21, window_bounds = array<i64: 2, 48, 48>}, {pipeline_mode = #tpu.pipeline_mode<synchronous>, transform_indices = @transform_22, window_bounds = array<i64: 2, 1, 48>}, {pipeline_mode = #tpu.pipeline_mode<synchronous>, transform_indices = @transform_23, window_bounds = array<i64: 2, 48, 48>}, {pipeline_mode = #tpu.pipeline_mode<synchronous>, transform_indices = @transform_24, window_bounds = array<i64: 2, 1, 48>}, {pipeline_mode = #tpu.pipeline_mode<synchronous>, transform_indices = @transform_25, window_bounds = array<i64: 2, 1, 48>}, {pipeline_mode = #tpu.pipeline_mode<synchronous>, transform_indices = @transform_26, window_bounds = array<i64: 2, 1, 48>}, {pipeline_mode = #tpu.pipeline_mode<synchronous>, transform_indices = @transform_27, window_bounds = array<i64: 2, 8, 48>}]} {
    %c0_i32 = arith.constant 0 : i32
    %0 = arith.cmpi eq, %arg0, %c0_i32 : i32
    %1 = arith.extui %0 : i1 to i32
    %c0_i32_0 = arith.constant 0 : i32
    %2 = arith.cmpi ne, %1, %c0_i32_0 : i32
    scf.if %2 {
      %c0_199 = arith.constant 0 : index
      %c0_200 = arith.constant 0 : index
      %c0_201 = arith.constant 0 : index
      %600 = vector.load %arg1[%c0_199, %c0_200, %c0_201] : memref<2x8x12xf32, #tpu.memory_space<vmem>>, vector<1x8x12xf32>
      %601 = vector.shape_cast %600 : vector<1x8x12xf32> to vector<8x12xf32>
      %c0_202 = arith.constant 0 : index
      %c0_203 = arith.constant 0 : index
      %602 = vector.load %arg2[%c0_202, %c0_203] : memref<12x48xf32, #tpu.memory_space<vmem>>, vector<12x48xf32>
      %cst_204 = arith.constant dense<0.000000e+00> : vector<8x48xf32>
      %603 = tpu.matmul %601, %602, %cst_204 {dimension_numbers = #tpu.dot_dimension_numbers<[1], [0], [0], [1], [0, 0, 1, 1], [], []>} : vector<8x12xf32>, vector<12x48xf32>, vector<8x48xf32> -> vector<8x48xf32>
      %c0_205 = arith.constant 0 : index
      %c0_206 = arith.constant 0 : index
      %604 = vector.load %arg3[%c0_205, %c0_206] : memref<1x48xf32, #tpu.memory_space<vmem>>, vector<1x48xf32>
      %605 = vector.broadcast %604 : vector<1x48xf32> to vector<8x48xf32>
      %606 = arith.addf %603, %605 : vector<8x48xf32>
      %c0_207 = arith.constant 0 : index
      %c0_208 = arith.constant 0 : index
      %607 = vector.load %arg4[%c0_207, %c0_208] : memref<8x48xf32, #tpu.memory_space<vmem>>, vector<8x48xf32>
      %608 = arith.addf %606, %607 : vector<8x48xf32>
      %c0_209 = arith.constant 0 : index
      %c0_210 = arith.constant 0 : index
      %c0_211 = arith.constant 0 : index
      %609 = vector.load %arg29[%c0_209, %c0_210, %c0_211] : memref<2x8x48xf32, #tpu.memory_space<vmem>>, vector<1x8x48xf32>
      %610 = vector.shape_cast %609 : vector<1x8x48xf32> to vector<8x48xf32>
      %611 = vector.shape_cast %608 : vector<8x48xf32> to vector<1x8x48xf32>
      tpu.vector_store %arg29[%c0_209, %c0_210, %c0_211], %611 {strides = array<i32>} : memref<2x8x48xf32, #tpu.memory_space<vmem>>, vector<1x8x48xf32>,
      %c1_212 = arith.constant 1 : index
      %c0_213 = arith.constant 0 : index
      %c0_214 = arith.constant 0 : index
      %612 = vector.load %arg1[%c1_212, %c0_213, %c0_214] : memref<2x8x12xf32, #tpu.memory_space<vmem>>, vector<1x8x12xf32>
      %613 = vector.shape_cast %612 : vector<1x8x12xf32> to vector<8x12xf32>
      %c0_215 = arith.constant 0 : index
      %c0_216 = arith.constant 0 : index
      %614 = vector.load %arg2[%c0_215, %c0_216] : memref<12x48xf32, #tpu.memory_space<vmem>>, vector<12x48xf32>
      %cst_217 = arith.constant dense<0.000000e+00> : vector<8x48xf32>
      %615 = tpu.matmul %613, %614, %cst_217 {dimension_numbers = #tpu.dot_dimension_numbers<[1], [0], [0], [1], [0, 0, 1, 1], [], []>} : vector<8x12xf32>, vector<12x48xf32>, vector<8x48xf32> -> vector<8x48xf32>
      %c0_218 = arith.constant 0 : index
      %c0_219 = arith.constant 0 : index
      %616 = vector.load %arg3[%c0_218, %c0_219] : memref<1x48xf32, #tpu.memory_space<vmem>>, vector<1x48xf32>
      %617 = vector.broadcast %616 : vector<1x48xf32> to vector<8x48xf32>
      %618 = arith.addf %615, %617 : vector<8x48xf32>
      %c0_220 = arith.constant 0 : index
      %c0_221 = arith.constant 0 : index
      %619 = vector.load %arg4[%c0_220, %c0_221] : memref<8x48xf32, #tpu.memory_space<vmem>>, vector<8x48xf32>
      %620 = arith.addf %618, %619 : vector<8x48xf32>
      %c1_222 = arith.constant 1 : index
      %c0_223 = arith.constant 0 : index
      %c0_224 = arith.constant 0 : index
      %621 = vector.load %arg29[%c1_222, %c0_223, %c0_224] : memref<2x8x48xf32, #tpu.memory_space<vmem>>, vector<1x8x48xf32>
      %622 = vector.shape_cast %621 : vector<1x8x48xf32> to vector<8x48xf32>
      %623 = vector.shape_cast %620 : vector<8x48xf32> to vector<1x8x48xf32>
      tpu.vector_store %arg29[%c1_222, %c0_223, %c0_224], %623 {strides = array<i32>} : memref<2x8x48xf32, #tpu.memory_space<vmem>>, vector<1x8x48xf32>,
    } else {
    }
    %3 = arith.index_cast %arg0 : i32 to index
    %c0 = arith.constant 0 : index
    %c0_1 = arith.constant 0 : index
    %4 = vector.load %arg12[%3, %c0, %c0_1] : memref<2x48x48xf32, #tpu.memory_space<vmem>>, vector<1x48x48xf32>
    %5 = vector.shape_cast %4 : vector<1x48x48xf32> to vector<48x48xf32>
    %6 = arith.index_cast %arg0 : i32 to index
    %c0_2 = arith.constant 0 : index
    %c0_3 = arith.constant 0 : index
    %7 = vector.load %arg13[%6, %c0_2, %c0_3] : memref<2x1x48xf32, #tpu.memory_space<vmem>>, vector<1x1x48xf32>
    %8 = vector.shape_cast %7 : vector<1x1x48xf32> to vector<1x48xf32>
    %9 = arith.index_cast %arg0 : i32 to index
    %c0_4 = arith.constant 0 : index
    %c0_5 = arith.constant 0 : index
    %10 = vector.load %arg14[%9, %c0_4, %c0_5] : memref<2x48x48xf32, #tpu.memory_space<vmem>>, vector<1x48x48xf32>
    %11 = vector.shape_cast %10 : vector<1x48x48xf32> to vector<48x48xf32>
    %12 = arith.index_cast %arg0 : i32 to index
    %c0_6 = arith.constant 0 : index
    %c0_7 = arith.constant 0 : index
    %13 = vector.load %arg15[%12, %c0_6, %c0_7] : memref<2x1x48xf32, #tpu.memory_space<vmem>>, vector<1x1x48xf32>
    %14 = vector.shape_cast %13 : vector<1x1x48xf32> to vector<1x48xf32>
    %15 = arith.index_cast %arg0 : i32 to index
    %c0_8 = arith.constant 0 : index
    %c0_9 = arith.constant 0 : index
    %16 = vector.load %arg16[%15, %c0_8, %c0_9] : memref<2x48x48xf32, #tpu.memory_space<vmem>>, vector<1x48x48xf32>
    %17 = vector.shape_cast %16 : vector<1x48x48xf32> to vector<48x48xf32>
    %18 = arith.index_cast %arg0 : i32 to index
    %c0_10 = arith.constant 0 : index
    %c0_11 = arith.constant 0 : index
    %19 = vector.load %arg17[%18, %c0_10, %c0_11] : memref<2x1x48xf32, #tpu.memory_space<vmem>>, vector<1x1x48xf32>
    %20 = vector.shape_cast %19 : vector<1x1x48xf32> to vector<1x48xf32>
    %21 = arith.index_cast %arg0 : i32 to index
    %c0_12 = arith.constant 0 : index
    %c0_13 = arith.constant 0 : index
    %22 = vector.load %arg18[%21, %c0_12, %c0_13] : memref<2x48x48xf32, #tpu.memory_space<vmem>>, vector<1x48x48xf32>
    %23 = vector.shape_cast %22 : vector<1x48x48xf32> to vector<48x48xf32>
    %24 = arith.index_cast %arg0 : i32 to index
    %c0_14 = arith.constant 0 : index
    %c0_15 = arith.constant 0 : index
    %25 = vector.load %arg19[%24, %c0_14, %c0_15] : memref<2x1x48xf32, #tpu.memory_space<vmem>>, vector<1x1x48xf32>
    %26 = vector.shape_cast %25 : vector<1x1x48xf32> to vector<1x48xf32>
    %27 = arith.index_cast %arg0 : i32 to index
    %c0_16 = arith.constant 0 : index
    %c0_17 = arith.constant 0 : index
    %28 = vector.load %arg20[%27, %c0_16, %c0_17] : memref<2x1x48xf32, #tpu.memory_space<vmem>>, vector<1x1x48xf32>
    %29 = vector.shape_cast %28 : vector<1x1x48xf32> to vector<1x48xf32>
    %30 = arith.index_cast %arg0 : i32 to index
    %c0_18 = arith.constant 0 : index
    %c0_19 = arith.constant 0 : index
    %31 = vector.load %arg21[%30, %c0_18, %c0_19] : memref<2x1x48xf32, #tpu.memory_space<vmem>>, vector<1x1x48xf32>
    %32 = vector.shape_cast %31 : vector<1x1x48xf32> to vector<1x48xf32>
    %33 = arith.index_cast %arg0 : i32 to index
    %c0_20 = arith.constant 0 : index
    %c0_21 = arith.constant 0 : index
    %34 = vector.load %arg22[%33, %c0_20, %c0_21] : memref<2x48x48xf32, #tpu.memory_space<vmem>>, vector<1x48x48xf32>
    %35 = vector.shape_cast %34 : vector<1x48x48xf32> to vector<48x48xf32>
    %36 = arith.index_cast %arg0 : i32 to index
    %c0_22 = arith.constant 0 : index
    %c0_23 = arith.constant 0 : index
    %37 = vector.load %arg23[%36, %c0_22, %c0_23] : memref<2x1x48xf32, #tpu.memory_space<vmem>>, vector<1x1x48xf32>
    %38 = vector.shape_cast %37 : vector<1x1x48xf32> to vector<1x48xf32>
    %39 = arith.index_cast %arg0 : i32 to index
    %c0_24 = arith.constant 0 : index
    %c0_25 = arith.constant 0 : index
    %40 = vector.load %arg24[%39, %c0_24, %c0_25] : memref<2x48x48xf32, #tpu.memory_space<vmem>>, vector<1x48x48xf32>
    %41 = vector.shape_cast %40 : vector<1x48x48xf32> to vector<48x48xf32>
    %42 = arith.index_cast %arg0 : i32 to index
    %c0_26 = arith.constant 0 : index
    %c0_27 = arith.constant 0 : index
    %43 = vector.load %arg25[%42, %c0_26, %c0_27] : memref<2x1x48xf32, #tpu.memory_space<vmem>>, vector<1x1x48xf32>
    %44 = vector.shape_cast %43 : vector<1x1x48xf32> to vector<1x48xf32>
    %45 = arith.index_cast %arg0 : i32 to index
    %c0_28 = arith.constant 0 : index
    %c0_29 = arith.constant 0 : index
    %46 = vector.load %arg26[%45, %c0_28, %c0_29] : memref<2x1x48xf32, #tpu.memory_space<vmem>>, vector<1x1x48xf32>
    %47 = vector.shape_cast %46 : vector<1x1x48xf32> to vector<1x48xf32>
    %48 = arith.index_cast %arg0 : i32 to index
    %c0_30 = arith.constant 0 : index
    %c0_31 = arith.constant 0 : index
    %49 = vector.load %arg27[%48, %c0_30, %c0_31] : memref<2x1x48xf32, #tpu.memory_space<vmem>>, vector<1x1x48xf32>
    %50 = vector.shape_cast %49 : vector<1x1x48xf32> to vector<1x48xf32>
    %c0_32 = arith.constant 0 : index
    %c0_33 = arith.constant 0 : index
    %51 = vector.load %arg10[%c0_32, %c0_33] : memref<48x48xf32, #tpu.memory_space<vmem>>, vector<48x48xf32>
    %52 = tpu.iota {dimensions = array<i32: 1>} : vector<1x48xi32>
    %c0_i32_34 = arith.constant 0 : i32
    %53 = vector.broadcast %c0_i32_34 : i32 to vector<1x48xi32>
    %54 = arith.cmpi sge, %52, %53 : vector<1x48xi32>
    %c6_i32 = arith.constant 6 : i32
    %55 = vector.broadcast %c6_i32 : i32 to vector<1x48xi32>
    %56 = arith.cmpi slt, %52, %55 : vector<1x48xi32>
    %57 = arith.andi %54, %56 : vector<1x48xi1>
    %58 = arith.extui %57 : vector<1x48xi1> to vector<1x48xi32>
    %59 = arith.sitofp %58 : vector<1x48xi32> to vector<1x48xf32>
    %c6_i32_35 = arith.constant 6 : i32
    %60 = vector.broadcast %c6_i32_35 : i32 to vector<1x48xi32>
    %61 = arith.cmpi sge, %52, %60 : vector<1x48xi32>
    %c12_i32 = arith.constant 12 : i32
    %62 = vector.broadcast %c12_i32 : i32 to vector<1x48xi32>
    %63 = arith.cmpi slt, %52, %62 : vector<1x48xi32>
    %64 = arith.andi %61, %63 : vector<1x48xi1>
    %65 = arith.extui %64 : vector<1x48xi1> to vector<1x48xi32>
    %66 = arith.sitofp %65 : vector<1x48xi32> to vector<1x48xf32>
    %c12_i32_36 = arith.constant 12 : i32
    %67 = vector.broadcast %c12_i32_36 : i32 to vector<1x48xi32>
    %68 = arith.cmpi sge, %52, %67 : vector<1x48xi32>
    %c18_i32 = arith.constant 18 : i32
    %69 = vector.broadcast %c18_i32 : i32 to vector<1x48xi32>
    %70 = arith.cmpi slt, %52, %69 : vector<1x48xi32>
    %71 = arith.andi %68, %70 : vector<1x48xi1>
    %72 = arith.extui %71 : vector<1x48xi1> to vector<1x48xi32>
    %73 = arith.sitofp %72 : vector<1x48xi32> to vector<1x48xf32>
    %c18_i32_37 = arith.constant 18 : i32
    %74 = vector.broadcast %c18_i32_37 : i32 to vector<1x48xi32>
    %75 = arith.cmpi sge, %52, %74 : vector<1x48xi32>
    %c24_i32 = arith.constant 24 : i32
    %76 = vector.broadcast %c24_i32 : i32 to vector<1x48xi32>
    %77 = arith.cmpi slt, %52, %76 : vector<1x48xi32>
    %78 = arith.andi %75, %77 : vector<1x48xi1>
    %79 = arith.extui %78 : vector<1x48xi1> to vector<1x48xi32>
    %80 = arith.sitofp %79 : vector<1x48xi32> to vector<1x48xf32>
    %c24_i32_38 = arith.constant 24 : i32
    %81 = vector.broadcast %c24_i32_38 : i32 to vector<1x48xi32>
    %82 = arith.cmpi sge, %52, %81 : vector<1x48xi32>
    %c30_i32 = arith.constant 30 : i32
    %83 = vector.broadcast %c30_i32 : i32 to vector<1x48xi32>
    %84 = arith.cmpi slt, %52, %83 : vector<1x48xi32>
    %85 = arith.andi %82, %84 : vector<1x48xi1>
    %86 = arith.extui %85 : vector<1x48xi1> to vector<1x48xi32>
    %87 = arith.sitofp %86 : vector<1x48xi32> to vector<1x48xf32>
    %c30_i32_39 = arith.constant 30 : i32
    %88 = vector.broadcast %c30_i32_39 : i32 to vector<1x48xi32>
    %89 = arith.cmpi sge, %52, %88 : vector<1x48xi32>
    %c36_i32 = arith.constant 36 : i32
    %90 = vector.broadcast %c36_i32 : i32 to vector<1x48xi32>
    %91 = arith.cmpi slt, %52, %90 : vector<1x48xi32>
    %92 = arith.andi %89, %91 : vector<1x48xi1>
    %93 = arith.extui %92 : vector<1x48xi1> to vector<1x48xi32>
    %94 = arith.sitofp %93 : vector<1x48xi32> to vector<1x48xf32>
    %c36_i32_40 = arith.constant 36 : i32
    %95 = vector.broadcast %c36_i32_40 : i32 to vector<1x48xi32>
    %96 = arith.cmpi sge, %52, %95 : vector<1x48xi32>
    %c42_i32 = arith.constant 42 : i32
    %97 = vector.broadcast %c42_i32 : i32 to vector<1x48xi32>
    %98 = arith.cmpi slt, %52, %97 : vector<1x48xi32>
    %99 = arith.andi %96, %98 : vector<1x48xi1>
    %100 = arith.extui %99 : vector<1x48xi1> to vector<1x48xi32>
    %101 = arith.sitofp %100 : vector<1x48xi32> to vector<1x48xf32>
    %c42_i32_41 = arith.constant 42 : i32
    %102 = vector.broadcast %c42_i32_41 : i32 to vector<1x48xi32>
    %103 = arith.cmpi sge, %52, %102 : vector<1x48xi32>
    %c48_i32 = arith.constant 48 : i32
    %104 = vector.broadcast %c48_i32 : i32 to vector<1x48xi32>
    %105 = arith.cmpi slt, %52, %104 : vector<1x48xi32>
    %106 = arith.andi %103, %105 : vector<1x48xi1>
    %107 = arith.extui %106 : vector<1x48xi1> to vector<1x48xi32>
    %108 = arith.sitofp %107 : vector<1x48xi32> to vector<1x48xf32>
    %c0_42 = arith.constant 0 : index
    %c0_43 = arith.constant 0 : index
    %c0_44 = arith.constant 0 : index
    %109 = vector.load %arg29[%c0_42, %c0_43, %c0_44] : memref<2x8x48xf32, #tpu.memory_space<vmem>>, vector<1x8x48xf32>
    %110 = vector.shape_cast %109 : vector<1x8x48xf32> to vector<8x48xf32>
    %c0_45 = arith.constant 0 : index
    %c0_46 = arith.constant 0 : index
    %c0_47 = arith.constant 0 : index
    %111 = vector.load %arg5[%c0_45, %c0_46, %c0_47] : memref<2x16x48xf32, #tpu.memory_space<vmem>>, vector<1x16x48xf32>
    %112 = vector.shape_cast %111 : vector<1x16x48xf32> to vector<16x48xf32>
    %c0_48 = arith.constant 0 : index
    %c0_49 = arith.constant 0 : index
    %c0_50 = arith.constant 0 : index
    %113 = vector.load %arg6[%c0_48, %c0_49, %c0_50] : memref<2x8x48xf32, #tpu.memory_space<vmem>>, vector<1x8x48xf32>
    %114 = vector.shape_cast %113 : vector<1x8x48xf32> to vector<8x48xf32>
    %c0_51 = arith.constant 0 : index
    %c0_52 = arith.constant 0 : index
    %c0_53 = arith.constant 0 : index
    %115 = vector.load %arg7[%c0_51, %c0_52, %c0_53] : memref<2x8x48xf32, #tpu.memory_space<vmem>>, vector<1x8x48xf32>
    %116 = vector.shape_cast %115 : vector<1x8x48xf32> to vector<8x48xf32>
    %c0_54 = arith.constant 0 : index
    %c0_55 = arith.constant 0 : index
    %c0_56 = arith.constant 0 : index
    %117 = vector.load %arg8[%c0_54, %c0_55, %c0_56] : memref<2x16x48xf32, #tpu.memory_space<vmem>>, vector<1x16x48xf32>
    %118 = vector.shape_cast %117 : vector<1x16x48xf32> to vector<16x48xf32>
    %c0_57 = arith.constant 0 : index
    %c0_58 = arith.constant 0 : index
    %c0_59 = arith.constant 0 : index
    %119 = vector.load %arg9[%c0_57, %c0_58, %c0_59] : memref<2x16x48xf32, #tpu.memory_space<vmem>>, vector<1x16x48xf32>
    %120 = vector.shape_cast %119 : vector<1x16x48xf32> to vector<16x48xf32>
    %c0_60 = arith.constant 0 : index
    %c0_61 = arith.constant 0 : index
    %c0_62 = arith.constant 0 : index
    %c0_63 = arith.constant 0 : index
    %121 = vector.load %arg11[%c0_60, %c0_61, %c0_62, %c0_63] : memref<2x1x4x48xf32, #tpu.memory_space<vmem>>, vector<1x1x4x48xf32>
    %122 = vector.shape_cast %121 : vector<1x1x4x48xf32> to vector<4x48xf32>
    %123 = vector.extract_strided_slice %122 {offsets = [0, 0], sizes = [1, 48], strides = [1, 1]} : vector<4x48xf32> to vector<1x48xf32>
    %cst = arith.constant 1.000000e+00 : f32
    %124 = vector.broadcast %cst : f32 to vector<1x48xf32>
    %125 = arith.addf %124, %123 : vector<1x48xf32>
    %126 = vector.broadcast %125 : vector<1x48xf32> to vector<8x48xf32>
    %127 = arith.mulf %110, %126 : vector<8x48xf32>
    %128 = vector.extract_strided_slice %122 {offsets = [1, 0], sizes = [1, 48], strides = [1, 1]} : vector<4x48xf32> to vector<1x48xf32>
    %129 = vector.broadcast %128 : vector<1x48xf32> to vector<8x48xf32>
    %130 = arith.addf %127, %129 : vector<8x48xf32>
    %cst_64 = arith.constant dense<0.000000e+00> : vector<8x48xf32>
    %131 = tpu.matmul %130, %5, %cst_64 {dimension_numbers = #tpu.dot_dimension_numbers<[1], [0], [0], [1], [0, 0, 1, 1], [], []>} : vector<8x48xf32>, vector<48x48xf32>, vector<8x48xf32> -> vector<8x48xf32>
    %132 = vector.broadcast %8 : vector<1x48xf32> to vector<8x48xf32>
    %133 = arith.addf %131, %132 : vector<8x48xf32>
    %134 = arith.mulf %133, %114 : vector<8x48xf32>
    %cst_65 = arith.constant dense<0.000000e+00> : vector<8x48xf32>
    %135 = tpu.matmul %133, %51, %cst_65 {dimension_numbers = #tpu.dot_dimension_numbers<[1], [0], [0], [1], [0, 0, 1, 1], [], []>} : vector<8x48xf32>, vector<48x48xf32>, vector<8x48xf32> -> vector<8x48xf32>
    %136 = arith.mulf %135, %116 : vector<8x48xf32>
    %137 = arith.addf %134, %136 : vector<8x48xf32>
    %cst_66 = arith.constant 0.408248305 : f32
    %138 = vector.broadcast %cst_66 : f32 to vector<8x48xf32>
    %139 = arith.mulf %137, %138 : vector<8x48xf32>
    %cst_67 = arith.constant dense<0.000000e+00> : vector<16x48xf32>
    %140 = tpu.matmul %112, %11, %cst_67 {dimension_numbers = #tpu.dot_dimension_numbers<[1], [0], [0], [1], [0, 0, 1, 1], [], []>} : vector<16x48xf32>, vector<48x48xf32>, vector<16x48xf32> -> vector<16x48xf32>
    %141 = vector.broadcast %14 : vector<1x48xf32> to vector<16x48xf32>
    %142 = arith.addf %140, %141 : vector<16x48xf32>
    %143 = arith.mulf %142, %118 : vector<16x48xf32>
    %cst_68 = arith.constant dense<0.000000e+00> : vector<16x48xf32>
    %144 = tpu.matmul %142, %51, %cst_68 {dimension_numbers = #tpu.dot_dimension_numbers<[1], [0], [0], [1], [0, 0, 1, 1], [], []>} : vector<16x48xf32>, vector<48x48xf32>, vector<16x48xf32> -> vector<16x48xf32>
    %145 = arith.mulf %144, %120 : vector<16x48xf32>
    %146 = arith.addf %143, %145 : vector<16x48xf32>
    %cst_69 = arith.constant dense<0.000000e+00> : vector<16x48xf32>
    %147 = tpu.matmul %112, %17, %cst_69 {dimension_numbers = #tpu.dot_dimension_numbers<[1], [0], [0], [1], [0, 0, 1, 1], [], []>} : vector<16x48xf32>, vector<48x48xf32>, vector<16x48xf32> -> vector<16x48xf32>
    %148 = vector.broadcast %20 : vector<1x48xf32> to vector<16x48xf32>
    %149 = arith.addf %147, %148 : vector<16x48xf32>
    %150 = vector.broadcast %59 : vector<1x48xf32> to vector<8x48xf32>
    %151 = arith.mulf %139, %150 : vector<8x48xf32>
    %cst_70 = arith.constant dense<0.000000e+00> : vector<8x16xf32>
    %152 = tpu.matmul %151, %146, %cst_70 {dimension_numbers = #tpu.dot_dimension_numbers<[1], [1], [0], [0], [0, 0, 1, 0], [], []>} : vector<8x48xf32>, vector<16x48xf32>, vector<8x16xf32> -> vector<8x16xf32>
    %cst_71 = arith.constant dense<0xFF800000> : vector<8xf32>
    %153 = vector.multi_reduction <maximumf>, %152, %cst_71 [1] : vector<8x16xf32> to vector<8xf32>
    %154 = vector.shape_cast %153 : vector<8xf32> to vector<8x1xf32>
    %155 = vector.broadcast %154 : vector<8x1xf32> to vector<8x16xf32>
    %156 = arith.subf %152, %155 : vector<8x16xf32>
    %157 = math.exp %156 : vector<8x16xf32>
    %cst_72 = arith.constant dense<0.000000e+00> : vector<8xf32>
    %158 = vector.multi_reduction <add>, %157, %cst_72 [1] : vector<8x16xf32> to vector<8xf32>
    %159 = vector.shape_cast %158 : vector<8xf32> to vector<8x1xf32>
    %160 = tpu.reciprocal %159 {approx = true} : vector<8x1xf32> -> vector<8x1xf32>
    %161 = vector.broadcast %160 : vector<8x1xf32> to vector<8x16xf32>
    %162 = arith.mulf %157, %161 : vector<8x16xf32>
    %163 = vector.broadcast %59 : vector<1x48xf32> to vector<16x48xf32>
    %164 = arith.mulf %149, %163 : vector<16x48xf32>
    %cst_73 = arith.constant dense<0.000000e+00> : vector<8x48xf32>
    %165 = tpu.matmul %162, %164, %cst_73 {dimension_numbers = #tpu.dot_dimension_numbers<[1], [0], [0], [1], [0, 0, 1, 1], [], []>} : vector<8x16xf32>, vector<16x48xf32>, vector<8x48xf32> -> vector<8x48xf32>
    %166 = vector.broadcast %66 : vector<1x48xf32> to vector<8x48xf32>
    %167 = arith.mulf %139, %166 : vector<8x48xf32>
    %cst_74 = arith.constant dense<0.000000e+00> : vector<8x16xf32>
    %168 = tpu.matmul %167, %146, %cst_74 {dimension_numbers = #tpu.dot_dimension_numbers<[1], [1], [0], [0], [0, 0, 1, 0], [], []>} : vector<8x48xf32>, vector<16x48xf32>, vector<8x16xf32> -> vector<8x16xf32>
    %cst_75 = arith.constant dense<0xFF800000> : vector<8xf32>
    %169 = vector.multi_reduction <maximumf>, %168, %cst_75 [1] : vector<8x16xf32> to vector<8xf32>
    %170 = vector.shape_cast %169 : vector<8xf32> to vector<8x1xf32>
    %171 = vector.broadcast %170 : vector<8x1xf32> to vector<8x16xf32>
    %172 = arith.subf %168, %171 : vector<8x16xf32>
    %173 = math.exp %172 : vector<8x16xf32>
    %cst_76 = arith.constant dense<0.000000e+00> : vector<8xf32>
    %174 = vector.multi_reduction <add>, %173, %cst_76 [1] : vector<8x16xf32> to vector<8xf32>
    %175 = vector.shape_cast %174 : vector<8xf32> to vector<8x1xf32>
    %176 = tpu.reciprocal %175 {approx = true} : vector<8x1xf32> -> vector<8x1xf32>
    %177 = vector.broadcast %176 : vector<8x1xf32> to vector<8x16xf32>
    %178 = arith.mulf %173, %177 : vector<8x16xf32>
    %179 = vector.broadcast %66 : vector<1x48xf32> to vector<16x48xf32>
    %180 = arith.mulf %149, %179 : vector<16x48xf32>
    %cst_77 = arith.constant dense<0.000000e+00> : vector<8x48xf32>
    %181 = tpu.matmul %178, %180, %cst_77 {dimension_numbers = #tpu.dot_dimension_numbers<[1], [0], [0], [1], [0, 0, 1, 1], [], []>} : vector<8x16xf32>, vector<16x48xf32>, vector<8x48xf32> -> vector<8x48xf32>
    %182 = arith.addf %165, %181 : vector<8x48xf32>
    %183 = vector.broadcast %73 : vector<1x48xf32> to vector<8x48xf32>
    %184 = arith.mulf %139, %183 : vector<8x48xf32>
    %cst_78 = arith.constant dense<0.000000e+00> : vector<8x16xf32>
    %185 = tpu.matmul %184, %146, %cst_78 {dimension_numbers = #tpu.dot_dimension_numbers<[1], [1], [0], [0], [0, 0, 1, 0], [], []>} : vector<8x48xf32>, vector<16x48xf32>, vector<8x16xf32> -> vector<8x16xf32>
    %cst_79 = arith.constant dense<0xFF800000> : vector<8xf32>
    %186 = vector.multi_reduction <maximumf>, %185, %cst_79 [1] : vector<8x16xf32> to vector<8xf32>
    %187 = vector.shape_cast %186 : vector<8xf32> to vector<8x1xf32>
    %188 = vector.broadcast %187 : vector<8x1xf32> to vector<8x16xf32>
    %189 = arith.subf %185, %188 : vector<8x16xf32>
    %190 = math.exp %189 : vector<8x16xf32>
    %cst_80 = arith.constant dense<0.000000e+00> : vector<8xf32>
    %191 = vector.multi_reduction <add>, %190, %cst_80 [1] : vector<8x16xf32> to vector<8xf32>
    %192 = vector.shape_cast %191 : vector<8xf32> to vector<8x1xf32>
    %193 = tpu.reciprocal %192 {approx = true} : vector<8x1xf32> -> vector<8x1xf32>
    %194 = vector.broadcast %193 : vector<8x1xf32> to vector<8x16xf32>
    %195 = arith.mulf %190, %194 : vector<8x16xf32>
    %196 = vector.broadcast %73 : vector<1x48xf32> to vector<16x48xf32>
    %197 = arith.mulf %149, %196 : vector<16x48xf32>
    %cst_81 = arith.constant dense<0.000000e+00> : vector<8x48xf32>
    %198 = tpu.matmul %195, %197, %cst_81 {dimension_numbers = #tpu.dot_dimension_numbers<[1], [0], [0], [1], [0, 0, 1, 1], [], []>} : vector<8x16xf32>, vector<16x48xf32>, vector<8x48xf32> -> vector<8x48xf32>
    %199 = arith.addf %182, %198 : vector<8x48xf32>
    %200 = vector.broadcast %80 : vector<1x48xf32> to vector<8x48xf32>
    %201 = arith.mulf %139, %200 : vector<8x48xf32>
    %cst_82 = arith.constant dense<0.000000e+00> : vector<8x16xf32>
    %202 = tpu.matmul %201, %146, %cst_82 {dimension_numbers = #tpu.dot_dimension_numbers<[1], [1], [0], [0], [0, 0, 1, 0], [], []>} : vector<8x48xf32>, vector<16x48xf32>, vector<8x16xf32> -> vector<8x16xf32>
    %cst_83 = arith.constant dense<0xFF800000> : vector<8xf32>
    %203 = vector.multi_reduction <maximumf>, %202, %cst_83 [1] : vector<8x16xf32> to vector<8xf32>
    %204 = vector.shape_cast %203 : vector<8xf32> to vector<8x1xf32>
    %205 = vector.broadcast %204 : vector<8x1xf32> to vector<8x16xf32>
    %206 = arith.subf %202, %205 : vector<8x16xf32>
    %207 = math.exp %206 : vector<8x16xf32>
    %cst_84 = arith.constant dense<0.000000e+00> : vector<8xf32>
    %208 = vector.multi_reduction <add>, %207, %cst_84 [1] : vector<8x16xf32> to vector<8xf32>
    %209 = vector.shape_cast %208 : vector<8xf32> to vector<8x1xf32>
    %210 = tpu.reciprocal %209 {approx = true} : vector<8x1xf32> -> vector<8x1xf32>
    %211 = vector.broadcast %210 : vector<8x1xf32> to vector<8x16xf32>
    %212 = arith.mulf %207, %211 : vector<8x16xf32>
    %213 = vector.broadcast %80 : vector<1x48xf32> to vector<16x48xf32>
    %214 = arith.mulf %149, %213 : vector<16x48xf32>
    %cst_85 = arith.constant dense<0.000000e+00> : vector<8x48xf32>
    %215 = tpu.matmul %212, %214, %cst_85 {dimension_numbers = #tpu.dot_dimension_numbers<[1], [0], [0], [1], [0, 0, 1, 1], [], []>} : vector<8x16xf32>, vector<16x48xf32>, vector<8x48xf32> -> vector<8x48xf32>
    %216 = arith.addf %199, %215 : vector<8x48xf32>
    %217 = vector.broadcast %87 : vector<1x48xf32> to vector<8x48xf32>
    %218 = arith.mulf %139, %217 : vector<8x48xf32>
    %cst_86 = arith.constant dense<0.000000e+00> : vector<8x16xf32>
    %219 = tpu.matmul %218, %146, %cst_86 {dimension_numbers = #tpu.dot_dimension_numbers<[1], [1], [0], [0], [0, 0, 1, 0], [], []>} : vector<8x48xf32>, vector<16x48xf32>, vector<8x16xf32> -> vector<8x16xf32>
    %cst_87 = arith.constant dense<0xFF800000> : vector<8xf32>
    %220 = vector.multi_reduction <maximumf>, %219, %cst_87 [1] : vector<8x16xf32> to vector<8xf32>
    %221 = vector.shape_cast %220 : vector<8xf32> to vector<8x1xf32>
    %222 = vector.broadcast %221 : vector<8x1xf32> to vector<8x16xf32>
    %223 = arith.subf %219, %222 : vector<8x16xf32>
    %224 = math.exp %223 : vector<8x16xf32>
    %cst_88 = arith.constant dense<0.000000e+00> : vector<8xf32>
    %225 = vector.multi_reduction <add>, %224, %cst_88 [1] : vector<8x16xf32> to vector<8xf32>
    %226 = vector.shape_cast %225 : vector<8xf32> to vector<8x1xf32>
    %227 = tpu.reciprocal %226 {approx = true} : vector<8x1xf32> -> vector<8x1xf32>
    %228 = vector.broadcast %227 : vector<8x1xf32> to vector<8x16xf32>
    %229 = arith.mulf %224, %228 : vector<8x16xf32>
    %230 = vector.broadcast %87 : vector<1x48xf32> to vector<16x48xf32>
    %231 = arith.mulf %149, %230 : vector<16x48xf32>
    %cst_89 = arith.constant dense<0.000000e+00> : vector<8x48xf32>
    %232 = tpu.matmul %229, %231, %cst_89 {dimension_numbers = #tpu.dot_dimension_numbers<[1], [0], [0], [1], [0, 0, 1, 1], [], []>} : vector<8x16xf32>, vector<16x48xf32>, vector<8x48xf32> -> vector<8x48xf32>
    %233 = arith.addf %216, %232 : vector<8x48xf32>
    %234 = vector.broadcast %94 : vector<1x48xf32> to vector<8x48xf32>
    %235 = arith.mulf %139, %234 : vector<8x48xf32>
    %cst_90 = arith.constant dense<0.000000e+00> : vector<8x16xf32>
    %236 = tpu.matmul %235, %146, %cst_90 {dimension_numbers = #tpu.dot_dimension_numbers<[1], [1], [0], [0], [0, 0, 1, 0], [], []>} : vector<8x48xf32>, vector<16x48xf32>, vector<8x16xf32> -> vector<8x16xf32>
    %cst_91 = arith.constant dense<0xFF800000> : vector<8xf32>
    %237 = vector.multi_reduction <maximumf>, %236, %cst_91 [1] : vector<8x16xf32> to vector<8xf32>
    %238 = vector.shape_cast %237 : vector<8xf32> to vector<8x1xf32>
    %239 = vector.broadcast %238 : vector<8x1xf32> to vector<8x16xf32>
    %240 = arith.subf %236, %239 : vector<8x16xf32>
    %241 = math.exp %240 : vector<8x16xf32>
    %cst_92 = arith.constant dense<0.000000e+00> : vector<8xf32>
    %242 = vector.multi_reduction <add>, %241, %cst_92 [1] : vector<8x16xf32> to vector<8xf32>
    %243 = vector.shape_cast %242 : vector<8xf32> to vector<8x1xf32>
    %244 = tpu.reciprocal %243 {approx = true} : vector<8x1xf32> -> vector<8x1xf32>
    %245 = vector.broadcast %244 : vector<8x1xf32> to vector<8x16xf32>
    %246 = arith.mulf %241, %245 : vector<8x16xf32>
    %247 = vector.broadcast %94 : vector<1x48xf32> to vector<16x48xf32>
    %248 = arith.mulf %149, %247 : vector<16x48xf32>
    %cst_93 = arith.constant dense<0.000000e+00> : vector<8x48xf32>
    %249 = tpu.matmul %246, %248, %cst_93 {dimension_numbers = #tpu.dot_dimension_numbers<[1], [0], [0], [1], [0, 0, 1, 1], [], []>} : vector<8x16xf32>, vector<16x48xf32>, vector<8x48xf32> -> vector<8x48xf32>
    %250 = arith.addf %233, %249 : vector<8x48xf32>
    %251 = vector.broadcast %101 : vector<1x48xf32> to vector<8x48xf32>
    %252 = arith.mulf %139, %251 : vector<8x48xf32>
    %cst_94 = arith.constant dense<0.000000e+00> : vector<8x16xf32>
    %253 = tpu.matmul %252, %146, %cst_94 {dimension_numbers = #tpu.dot_dimension_numbers<[1], [1], [0], [0], [0, 0, 1, 0], [], []>} : vector<8x48xf32>, vector<16x48xf32>, vector<8x16xf32> -> vector<8x16xf32>
    %cst_95 = arith.constant dense<0xFF800000> : vector<8xf32>
    %254 = vector.multi_reduction <maximumf>, %253, %cst_95 [1] : vector<8x16xf32> to vector<8xf32>
    %255 = vector.shape_cast %254 : vector<8xf32> to vector<8x1xf32>
    %256 = vector.broadcast %255 : vector<8x1xf32> to vector<8x16xf32>
    %257 = arith.subf %253, %256 : vector<8x16xf32>
    %258 = math.exp %257 : vector<8x16xf32>
    %cst_96 = arith.constant dense<0.000000e+00> : vector<8xf32>
    %259 = vector.multi_reduction <add>, %258, %cst_96 [1] : vector<8x16xf32> to vector<8xf32>
    %260 = vector.shape_cast %259 : vector<8xf32> to vector<8x1xf32>
    %261 = tpu.reciprocal %260 {approx = true} : vector<8x1xf32> -> vector<8x1xf32>
    %262 = vector.broadcast %261 : vector<8x1xf32> to vector<8x16xf32>
    %263 = arith.mulf %258, %262 : vector<8x16xf32>
    %264 = vector.broadcast %101 : vector<1x48xf32> to vector<16x48xf32>
    %265 = arith.mulf %149, %264 : vector<16x48xf32>
    %cst_97 = arith.constant dense<0.000000e+00> : vector<8x48xf32>
    %266 = tpu.matmul %263, %265, %cst_97 {dimension_numbers = #tpu.dot_dimension_numbers<[1], [0], [0], [1], [0, 0, 1, 1], [], []>} : vector<8x16xf32>, vector<16x48xf32>, vector<8x48xf32> -> vector<8x48xf32>
    %267 = arith.addf %250, %266 : vector<8x48xf32>
    %268 = vector.broadcast %108 : vector<1x48xf32> to vector<8x48xf32>
    %269 = arith.mulf %139, %268 : vector<8x48xf32>
    %cst_98 = arith.constant dense<0.000000e+00> : vector<8x16xf32>
    %270 = tpu.matmul %269, %146, %cst_98 {dimension_numbers = #tpu.dot_dimension_numbers<[1], [1], [0], [0], [0, 0, 1, 0], [], []>} : vector<8x48xf32>, vector<16x48xf32>, vector<8x16xf32> -> vector<8x16xf32>
    %cst_99 = arith.constant dense<0xFF800000> : vector<8xf32>
    %271 = vector.multi_reduction <maximumf>, %270, %cst_99 [1] : vector<8x16xf32> to vector<8xf32>
    %272 = vector.shape_cast %271 : vector<8xf32> to vector<8x1xf32>
    %273 = vector.broadcast %272 : vector<8x1xf32> to vector<8x16xf32>
    %274 = arith.subf %270, %273 : vector<8x16xf32>
    %275 = math.exp %274 : vector<8x16xf32>
    %cst_100 = arith.constant dense<0.000000e+00> : vector<8xf32>
    %276 = vector.multi_reduction <add>, %275, %cst_100 [1] : vector<8x16xf32> to vector<8xf32>
    %277 = vector.shape_cast %276 : vector<8xf32> to vector<8x1xf32>
    %278 = tpu.reciprocal %277 {approx = true} : vector<8x1xf32> -> vector<8x1xf32>
    %279 = vector.broadcast %278 : vector<8x1xf32> to vector<8x16xf32>
    %280 = arith.mulf %275, %279 : vector<8x16xf32>
    %281 = vector.broadcast %108 : vector<1x48xf32> to vector<16x48xf32>
    %282 = arith.mulf %149, %281 : vector<16x48xf32>
    %cst_101 = arith.constant dense<0.000000e+00> : vector<8x48xf32>
    %283 = tpu.matmul %280, %282, %cst_101 {dimension_numbers = #tpu.dot_dimension_numbers<[1], [0], [0], [1], [0, 0, 1, 1], [], []>} : vector<8x16xf32>, vector<16x48xf32>, vector<8x48xf32> -> vector<8x48xf32>
    %284 = arith.addf %267, %283 : vector<8x48xf32>
    %cst_102 = arith.constant dense<0.000000e+00> : vector<8x48xf32>
    %285 = tpu.matmul %284, %23, %cst_102 {dimension_numbers = #tpu.dot_dimension_numbers<[1], [0], [0], [1], [0, 0, 1, 1], [], []>} : vector<8x48xf32>, vector<48x48xf32>, vector<8x48xf32> -> vector<8x48xf32>
    %286 = vector.broadcast %26 : vector<1x48xf32> to vector<8x48xf32>
    %287 = arith.addf %285, %286 : vector<8x48xf32>
    %288 = arith.addf %110, %287 : vector<8x48xf32>
    %cst_103 = arith.constant dense<0.000000e+00> : vector<8xf32>
    %289 = vector.multi_reduction <add>, %288, %cst_103 [1] : vector<8x48xf32> to vector<8xf32>
    %290 = vector.shape_cast %289 : vector<8xf32> to vector<8x1xf32>
    %cst_104 = arith.constant 0.020833334 : f32
    %291 = vector.broadcast %cst_104 : f32 to vector<8x1xf32>
    %292 = arith.mulf %290, %291 : vector<8x1xf32>
    %293 = arith.mulf %288, %288 : vector<8x48xf32>
    %cst_105 = arith.constant dense<0.000000e+00> : vector<8xf32>
    %294 = vector.multi_reduction <add>, %293, %cst_105 [1] : vector<8x48xf32> to vector<8xf32>
    %295 = vector.shape_cast %294 : vector<8xf32> to vector<8x1xf32>
    %cst_106 = arith.constant 0.020833334 : f32
    %296 = vector.broadcast %cst_106 : f32 to vector<8x1xf32>
    %297 = arith.mulf %295, %296 : vector<8x1xf32>
    %298 = arith.mulf %292, %292 : vector<8x1xf32>
    %299 = arith.subf %297, %298 : vector<8x1xf32>
    %300 = vector.broadcast %292 : vector<8x1xf32> to vector<8x48xf32>
    %301 = arith.subf %288, %300 : vector<8x48xf32>
    %cst_107 = arith.constant 9.99999974E-6 : f32
    %302 = vector.broadcast %cst_107 : f32 to vector<8x1xf32>
    %303 = arith.addf %299, %302 : vector<8x1xf32>
    %304 = math.rsqrt %303 : vector<8x1xf32>
    %305 = vector.broadcast %304 : vector<8x1xf32> to vector<8x48xf32>
    %306 = arith.mulf %301, %305 : vector<8x48xf32>
    %307 = vector.broadcast %29 : vector<1x48xf32> to vector<8x48xf32>
    %308 = arith.mulf %306, %307 : vector<8x48xf32>
    %309 = vector.broadcast %32 : vector<1x48xf32> to vector<8x48xf32>
    %310 = arith.addf %308, %309 : vector<8x48xf32>
    %311 = vector.extract_strided_slice %122 {offsets = [2, 0], sizes = [1, 48], strides = [1, 1]} : vector<4x48xf32> to vector<1x48xf32>
    %cst_108 = arith.constant 1.000000e+00 : f32
    %312 = vector.broadcast %cst_108 : f32 to vector<1x48xf32>
    %313 = arith.addf %312, %311 : vector<1x48xf32>
    %314 = vector.broadcast %313 : vector<1x48xf32> to vector<8x48xf32>
    %315 = arith.mulf %310, %314 : vector<8x48xf32>
    %316 = vector.extract_strided_slice %122 {offsets = [3, 0], sizes = [1, 48], strides = [1, 1]} : vector<4x48xf32> to vector<1x48xf32>
    %317 = vector.broadcast %316 : vector<1x48xf32> to vector<8x48xf32>
    %318 = arith.addf %315, %317 : vector<8x48xf32>
    %cst_109 = arith.constant dense<0.000000e+00> : vector<8x48xf32>
    %319 = tpu.matmul %318, %35, %cst_109 {dimension_numbers = #tpu.dot_dimension_numbers<[1], [0], [0], [1], [0, 0, 1, 1], [], []>} : vector<8x48xf32>, vector<48x48xf32>, vector<8x48xf32> -> vector<8x48xf32>
    %320 = vector.broadcast %38 : vector<1x48xf32> to vector<8x48xf32>
    %321 = arith.addf %319, %320 : vector<8x48xf32>
    %cst_110 = arith.constant 0.000000e+00 : f32
    %322 = vector.broadcast %cst_110 : f32 to vector<8x48xf32>
    %323 = arith.maximumf %321, %322 : vector<8x48xf32>
    %cst_111 = arith.constant dense<0.000000e+00> : vector<8x48xf32>
    %324 = tpu.matmul %323, %41, %cst_111 {dimension_numbers = #tpu.dot_dimension_numbers<[1], [0], [0], [1], [0, 0, 1, 1], [], []>} : vector<8x48xf32>, vector<48x48xf32>, vector<8x48xf32> -> vector<8x48xf32>
    %325 = vector.broadcast %44 : vector<1x48xf32> to vector<8x48xf32>
    %326 = arith.addf %324, %325 : vector<8x48xf32>
    %327 = arith.addf %310, %326 : vector<8x48xf32>
    %cst_112 = arith.constant dense<0.000000e+00> : vector<8xf32>
    %328 = vector.multi_reduction <add>, %327, %cst_112 [1] : vector<8x48xf32> to vector<8xf32>
    %329 = vector.shape_cast %328 : vector<8xf32> to vector<8x1xf32>
    %cst_113 = arith.constant 0.020833334 : f32
    %330 = vector.broadcast %cst_113 : f32 to vector<8x1xf32>
    %331 = arith.mulf %329, %330 : vector<8x1xf32>
    %332 = arith.mulf %327, %327 : vector<8x48xf32>
    %cst_114 = arith.constant dense<0.000000e+00> : vector<8xf32>
    %333 = vector.multi_reduction <add>, %332, %cst_114 [1] : vector<8x48xf32> to vector<8xf32>
    %334 = vector.shape_cast %333 : vector<8xf32> to vector<8x1xf32>
    %cst_115 = arith.constant 0.020833334 : f32
    %335 = vector.broadcast %cst_115 : f32 to vector<8x1xf32>
    %336 = arith.mulf %334, %335 : vector<8x1xf32>
    %337 = arith.mulf %331, %331 : vector<8x1xf32>
    %338 = arith.subf %336, %337 : vector<8x1xf32>
    %339 = vector.broadcast %331 : vector<8x1xf32> to vector<8x48xf32>
    %340 = arith.subf %327, %339 : vector<8x48xf32>
    %cst_116 = arith.constant 9.99999974E-6 : f32
    %341 = vector.broadcast %cst_116 : f32 to vector<8x1xf32>
    %342 = arith.addf %338, %341 : vector<8x1xf32>
    %343 = math.rsqrt %342 : vector<8x1xf32>
    %344 = vector.broadcast %343 : vector<8x1xf32> to vector<8x48xf32>
    %345 = arith.mulf %340, %344 : vector<8x48xf32>
    %346 = vector.broadcast %47 : vector<1x48xf32> to vector<8x48xf32>
    %347 = arith.mulf %345, %346 : vector<8x48xf32>
    %348 = vector.broadcast %50 : vector<1x48xf32> to vector<8x48xf32>
    %349 = arith.addf %347, %348 : vector<8x48xf32>
    %c0_117 = arith.constant 0 : index
    %c0_118 = arith.constant 0 : index
    %c0_119 = arith.constant 0 : index
    %350 = vector.load %arg29[%c0_117, %c0_118, %c0_119] : memref<2x8x48xf32, #tpu.memory_space<vmem>>, vector<1x8x48xf32>
    %351 = vector.shape_cast %350 : vector<1x8x48xf32> to vector<8x48xf32>
    %352 = vector.shape_cast %349 : vector<8x48xf32> to vector<1x8x48xf32>
    tpu.vector_store %arg29[%c0_117, %c0_118, %c0_119], %352 {strides = array<i32>} : memref<2x8x48xf32, #tpu.memory_space<vmem>>, vector<1x8x48xf32>,
    %c1 = arith.constant 1 : index
    %c0_120 = arith.constant 0 : index
    %c0_121 = arith.constant 0 : index
    %353 = vector.load %arg29[%c1, %c0_120, %c0_121] : memref<2x8x48xf32, #tpu.memory_space<vmem>>, vector<1x8x48xf32>
    %354 = vector.shape_cast %353 : vector<1x8x48xf32> to vector<8x48xf32>
    %c1_122 = arith.constant 1 : index
    %c0_123 = arith.constant 0 : index
    %c0_124 = arith.constant 0 : index
    %355 = vector.load %arg5[%c1_122, %c0_123, %c0_124] : memref<2x16x48xf32, #tpu.memory_space<vmem>>, vector<1x16x48xf32>
    %356 = vector.shape_cast %355 : vector<1x16x48xf32> to vector<16x48xf32>
    %c1_125 = arith.constant 1 : index
    %c0_126 = arith.constant 0 : index
    %c0_127 = arith.constant 0 : index
    %357 = vector.load %arg6[%c1_125, %c0_126, %c0_127] : memref<2x8x48xf32, #tpu.memory_space<vmem>>, vector<1x8x48xf32>
    %358 = vector.shape_cast %357 : vector<1x8x48xf32> to vector<8x48xf32>
    %c1_128 = arith.constant 1 : index
    %c0_129 = arith.constant 0 : index
    %c0_130 = arith.constant 0 : index
    %359 = vector.load %arg7[%c1_128, %c0_129, %c0_130] : memref<2x8x48xf32, #tpu.memory_space<vmem>>, vector<1x8x48xf32>
    %360 = vector.shape_cast %359 : vector<1x8x48xf32> to vector<8x48xf32>
    %c1_131 = arith.constant 1 : index
    %c0_132 = arith.constant 0 : index
    %c0_133 = arith.constant 0 : index
    %361 = vector.load %arg8[%c1_131, %c0_132, %c0_133] : memref<2x16x48xf32, #tpu.memory_space<vmem>>, vector<1x16x48xf32>
    %362 = vector.shape_cast %361 : vector<1x16x48xf32> to vector<16x48xf32>
    %c1_134 = arith.constant 1 : index
    %c0_135 = arith.constant 0 : index
    %c0_136 = arith.constant 0 : index
    %363 = vector.load %arg9[%c1_134, %c0_135, %c0_136] : memref<2x16x48xf32, #tpu.memory_space<vmem>>, vector<1x16x48xf32>
    %364 = vector.shape_cast %363 : vector<1x16x48xf32> to vector<16x48xf32>
    %c1_137 = arith.constant 1 : index
    %c0_138 = arith.constant 0 : index
    %c0_139 = arith.constant 0 : index
    %c0_140 = arith.constant 0 : index
    %365 = vector.load %arg11[%c1_137, %c0_138, %c0_139, %c0_140] : memref<2x1x4x48xf32, #tpu.memory_space<vmem>>, vector<1x1x4x48xf32>
    %366 = vector.shape_cast %365 : vector<1x1x4x48xf32> to vector<4x48xf32>
    %367 = vector.extract_strided_slice %366 {offsets = [0, 0], sizes = [1, 48], strides = [1, 1]} : vector<4x48xf32> to vector<1x48xf32>
    %cst_141 = arith.constant 1.000000e+00 : f32
    %368 = vector.broadcast %cst_141 : f32 to vector<1x48xf32>
    %369 = arith.addf %368, %367 : vector<1x48xf32>
    %370 = vector.broadcast %369 : vector<1x48xf32> to vector<8x48xf32>
    %371 = arith.mulf %354, %370 : vector<8x48xf32>
    %372 = vector.extract_strided_slice %366 {offsets = [1, 0], sizes = [1, 48], strides = [1, 1]} : vector<4x48xf32> to vector<1x48xf32>
    %373 = vector.broadcast %372 : vector<1x48xf32> to vector<8x48xf32>
    %374 = arith.addf %371, %373 : vector<8x48xf32>
    %cst_142 = arith.constant dense<0.000000e+00> : vector<8x48xf32>
    %375 = tpu.matmul %374, %5, %cst_142 {dimension_numbers = #tpu.dot_dimension_numbers<[1], [0], [0], [1], [0, 0, 1, 1], [], []>} : vector<8x48xf32>, vector<48x48xf32>, vector<8x48xf32> -> vector<8x48xf32>
    %376 = vector.broadcast %8 : vector<1x48xf32> to vector<8x48xf32>
    %377 = arith.addf %375, %376 : vector<8x48xf32>
    %378 = arith.mulf %377, %358 : vector<8x48xf32>
    %cst_143 = arith.constant dense<0.000000e+00> : vector<8x48xf32>
    %379 = tpu.matmul %377, %51, %cst_143 {dimension_numbers = #tpu.dot_dimension_numbers<[1], [0], [0], [1], [0, 0, 1, 1], [], []>} : vector<8x48xf32>, vector<48x48xf32>, vector<8x48xf32> -> vector<8x48xf32>
    %380 = arith.mulf %379, %360 : vector<8x48xf32>
    %381 = arith.addf %378, %380 : vector<8x48xf32>
    %cst_144 = arith.constant 0.408248305 : f32
    %382 = vector.broadcast %cst_144 : f32 to vector<8x48xf32>
    %383 = arith.mulf %381, %382 : vector<8x48xf32>
    %cst_145 = arith.constant dense<0.000000e+00> : vector<16x48xf32>
    %384 = tpu.matmul %356, %11, %cst_145 {dimension_numbers = #tpu.dot_dimension_numbers<[1], [0], [0], [1], [0, 0, 1, 1], [], []>} : vector<16x48xf32>, vector<48x48xf32>, vector<16x48xf32> -> vector<16x48xf32>
    %385 = vector.broadcast %14 : vector<1x48xf32> to vector<16x48xf32>
    %386 = arith.addf %384, %385 : vector<16x48xf32>
    %387 = arith.mulf %386, %362 : vector<16x48xf32>
    %cst_146 = arith.constant dense<0.000000e+00> : vector<16x48xf32>
    %388 = tpu.matmul %386, %51, %cst_146 {dimension_numbers = #tpu.dot_dimension_numbers<[1], [0], [0], [1], [0, 0, 1, 1], [], []>} : vector<16x48xf32>, vector<48x48xf32>, vector<16x48xf32> -> vector<16x48xf32>
    %389 = arith.mulf %388, %364 : vector<16x48xf32>
    %390 = arith.addf %387, %389 : vector<16x48xf32>
    %cst_147 = arith.constant dense<0.000000e+00> : vector<16x48xf32>
    %391 = tpu.matmul %356, %17, %cst_147 {dimension_numbers = #tpu.dot_dimension_numbers<[1], [0], [0], [1], [0, 0, 1, 1], [], []>} : vector<16x48xf32>, vector<48x48xf32>, vector<16x48xf32> -> vector<16x48xf32>
    %392 = vector.broadcast %20 : vector<1x48xf32> to vector<16x48xf32>
    %393 = arith.addf %391, %392 : vector<16x48xf32>
    %394 = vector.broadcast %59 : vector<1x48xf32> to vector<8x48xf32>
    %395 = arith.mulf %383, %394 : vector<8x48xf32>
    %cst_148 = arith.constant dense<0.000000e+00> : vector<8x16xf32>
    %396 = tpu.matmul %395, %390, %cst_148 {dimension_numbers = #tpu.dot_dimension_numbers<[1], [1], [0], [0], [0, 0, 1, 0], [], []>} : vector<8x48xf32>, vector<16x48xf32>, vector<8x16xf32> -> vector<8x16xf32>
    %cst_149 = arith.constant dense<0xFF800000> : vector<8xf32>
    %397 = vector.multi_reduction <maximumf>, %396, %cst_149 [1] : vector<8x16xf32> to vector<8xf32>
    %398 = vector.shape_cast %397 : vector<8xf32> to vector<8x1xf32>
    %399 = vector.broadcast %398 : vector<8x1xf32> to vector<8x16xf32>
    %400 = arith.subf %396, %399 : vector<8x16xf32>
    %401 = math.exp %400 : vector<8x16xf32>
    %cst_150 = arith.constant dense<0.000000e+00> : vector<8xf32>
    %402 = vector.multi_reduction <add>, %401, %cst_150 [1] : vector<8x16xf32> to vector<8xf32>
    %403 = vector.shape_cast %402 : vector<8xf32> to vector<8x1xf32>
    %404 = tpu.reciprocal %403 {approx = true} : vector<8x1xf32> -> vector<8x1xf32>
    %405 = vector.broadcast %404 : vector<8x1xf32> to vector<8x16xf32>
    %406 = arith.mulf %401, %405 : vector<8x16xf32>
    %407 = vector.broadcast %59 : vector<1x48xf32> to vector<16x48xf32>
    %408 = arith.mulf %393, %407 : vector<16x48xf32>
    %cst_151 = arith.constant dense<0.000000e+00> : vector<8x48xf32>
    %409 = tpu.matmul %406, %408, %cst_151 {dimension_numbers = #tpu.dot_dimension_numbers<[1], [0], [0], [1], [0, 0, 1, 1], [], []>} : vector<8x16xf32>, vector<16x48xf32>, vector<8x48xf32> -> vector<8x48xf32>
    %410 = vector.broadcast %66 : vector<1x48xf32> to vector<8x48xf32>
    %411 = arith.mulf %383, %410 : vector<8x48xf32>
    %cst_152 = arith.constant dense<0.000000e+00> : vector<8x16xf32>
    %412 = tpu.matmul %411, %390, %cst_152 {dimension_numbers = #tpu.dot_dimension_numbers<[1], [1], [0], [0], [0, 0, 1, 0], [], []>} : vector<8x48xf32>, vector<16x48xf32>, vector<8x16xf32> -> vector<8x16xf32>
    %cst_153 = arith.constant dense<0xFF800000> : vector<8xf32>
    %413 = vector.multi_reduction <maximumf>, %412, %cst_153 [1] : vector<8x16xf32> to vector<8xf32>
    %414 = vector.shape_cast %413 : vector<8xf32> to vector<8x1xf32>
    %415 = vector.broadcast %414 : vector<8x1xf32> to vector<8x16xf32>
    %416 = arith.subf %412, %415 : vector<8x16xf32>
    %417 = math.exp %416 : vector<8x16xf32>
    %cst_154 = arith.constant dense<0.000000e+00> : vector<8xf32>
    %418 = vector.multi_reduction <add>, %417, %cst_154 [1] : vector<8x16xf32> to vector<8xf32>
    %419 = vector.shape_cast %418 : vector<8xf32> to vector<8x1xf32>
    %420 = tpu.reciprocal %419 {approx = true} : vector<8x1xf32> -> vector<8x1xf32>
    %421 = vector.broadcast %420 : vector<8x1xf32> to vector<8x16xf32>
    %422 = arith.mulf %417, %421 : vector<8x16xf32>
    %423 = vector.broadcast %66 : vector<1x48xf32> to vector<16x48xf32>
    %424 = arith.mulf %393, %423 : vector<16x48xf32>
    %cst_155 = arith.constant dense<0.000000e+00> : vector<8x48xf32>
    %425 = tpu.matmul %422, %424, %cst_155 {dimension_numbers = #tpu.dot_dimension_numbers<[1], [0], [0], [1], [0, 0, 1, 1], [], []>} : vector<8x16xf32>, vector<16x48xf32>, vector<8x48xf32> -> vector<8x48xf32>
    %426 = arith.addf %409, %425 : vector<8x48xf32>
    %427 = vector.broadcast %73 : vector<1x48xf32> to vector<8x48xf32>
    %428 = arith.mulf %383, %427 : vector<8x48xf32>
    %cst_156 = arith.constant dense<0.000000e+00> : vector<8x16xf32>
    %429 = tpu.matmul %428, %390, %cst_156 {dimension_numbers = #tpu.dot_dimension_numbers<[1], [1], [0], [0], [0, 0, 1, 0], [], []>} : vector<8x48xf32>, vector<16x48xf32>, vector<8x16xf32> -> vector<8x16xf32>
    %cst_157 = arith.constant dense<0xFF800000> : vector<8xf32>
    %430 = vector.multi_reduction <maximumf>, %429, %cst_157 [1] : vector<8x16xf32> to vector<8xf32>
    %431 = vector.shape_cast %430 : vector<8xf32> to vector<8x1xf32>
    %432 = vector.broadcast %431 : vector<8x1xf32> to vector<8x16xf32>
    %433 = arith.subf %429, %432 : vector<8x16xf32>
    %434 = math.exp %433 : vector<8x16xf32>
    %cst_158 = arith.constant dense<0.000000e+00> : vector<8xf32>
    %435 = vector.multi_reduction <add>, %434, %cst_158 [1] : vector<8x16xf32> to vector<8xf32>
    %436 = vector.shape_cast %435 : vector<8xf32> to vector<8x1xf32>
    %437 = tpu.reciprocal %436 {approx = true} : vector<8x1xf32> -> vector<8x1xf32>
    %438 = vector.broadcast %437 : vector<8x1xf32> to vector<8x16xf32>
    %439 = arith.mulf %434, %438 : vector<8x16xf32>
    %440 = vector.broadcast %73 : vector<1x48xf32> to vector<16x48xf32>
    %441 = arith.mulf %393, %440 : vector<16x48xf32>
    %cst_159 = arith.constant dense<0.000000e+00> : vector<8x48xf32>
    %442 = tpu.matmul %439, %441, %cst_159 {dimension_numbers = #tpu.dot_dimension_numbers<[1], [0], [0], [1], [0, 0, 1, 1], [], []>} : vector<8x16xf32>, vector<16x48xf32>, vector<8x48xf32> -> vector<8x48xf32>
    %443 = arith.addf %426, %442 : vector<8x48xf32>
    %444 = vector.broadcast %80 : vector<1x48xf32> to vector<8x48xf32>
    %445 = arith.mulf %383, %444 : vector<8x48xf32>
    %cst_160 = arith.constant dense<0.000000e+00> : vector<8x16xf32>
    %446 = tpu.matmul %445, %390, %cst_160 {dimension_numbers = #tpu.dot_dimension_numbers<[1], [1], [0], [0], [0, 0, 1, 0], [], []>} : vector<8x48xf32>, vector<16x48xf32>, vector<8x16xf32> -> vector<8x16xf32>
    %cst_161 = arith.constant dense<0xFF800000> : vector<8xf32>
    %447 = vector.multi_reduction <maximumf>, %446, %cst_161 [1] : vector<8x16xf32> to vector<8xf32>
    %448 = vector.shape_cast %447 : vector<8xf32> to vector<8x1xf32>
    %449 = vector.broadcast %448 : vector<8x1xf32> to vector<8x16xf32>
    %450 = arith.subf %446, %449 : vector<8x16xf32>
    %451 = math.exp %450 : vector<8x16xf32>
    %cst_162 = arith.constant dense<0.000000e+00> : vector<8xf32>
    %452 = vector.multi_reduction <add>, %451, %cst_162 [1] : vector<8x16xf32> to vector<8xf32>
    %453 = vector.shape_cast %452 : vector<8xf32> to vector<8x1xf32>
    %454 = tpu.reciprocal %453 {approx = true} : vector<8x1xf32> -> vector<8x1xf32>
    %455 = vector.broadcast %454 : vector<8x1xf32> to vector<8x16xf32>
    %456 = arith.mulf %451, %455 : vector<8x16xf32>
    %457 = vector.broadcast %80 : vector<1x48xf32> to vector<16x48xf32>
    %458 = arith.mulf %393, %457 : vector<16x48xf32>
    %cst_163 = arith.constant dense<0.000000e+00> : vector<8x48xf32>
    %459 = tpu.matmul %456, %458, %cst_163 {dimension_numbers = #tpu.dot_dimension_numbers<[1], [0], [0], [1], [0, 0, 1, 1], [], []>} : vector<8x16xf32>, vector<16x48xf32>, vector<8x48xf32> -> vector<8x48xf32>
    %460 = arith.addf %443, %459 : vector<8x48xf32>
    %461 = vector.broadcast %87 : vector<1x48xf32> to vector<8x48xf32>
    %462 = arith.mulf %383, %461 : vector<8x48xf32>
    %cst_164 = arith.constant dense<0.000000e+00> : vector<8x16xf32>
    %463 = tpu.matmul %462, %390, %cst_164 {dimension_numbers = #tpu.dot_dimension_numbers<[1], [1], [0], [0], [0, 0, 1, 0], [], []>} : vector<8x48xf32>, vector<16x48xf32>, vector<8x16xf32> -> vector<8x16xf32>
    %cst_165 = arith.constant dense<0xFF800000> : vector<8xf32>
    %464 = vector.multi_reduction <maximumf>, %463, %cst_165 [1] : vector<8x16xf32> to vector<8xf32>
    %465 = vector.shape_cast %464 : vector<8xf32> to vector<8x1xf32>
    %466 = vector.broadcast %465 : vector<8x1xf32> to vector<8x16xf32>
    %467 = arith.subf %463, %466 : vector<8x16xf32>
    %468 = math.exp %467 : vector<8x16xf32>
    %cst_166 = arith.constant dense<0.000000e+00> : vector<8xf32>
    %469 = vector.multi_reduction <add>, %468, %cst_166 [1] : vector<8x16xf32> to vector<8xf32>
    %470 = vector.shape_cast %469 : vector<8xf32> to vector<8x1xf32>
    %471 = tpu.reciprocal %470 {approx = true} : vector<8x1xf32> -> vector<8x1xf32>
    %472 = vector.broadcast %471 : vector<8x1xf32> to vector<8x16xf32>
    %473 = arith.mulf %468, %472 : vector<8x16xf32>
    %474 = vector.broadcast %87 : vector<1x48xf32> to vector<16x48xf32>
    %475 = arith.mulf %393, %474 : vector<16x48xf32>
    %cst_167 = arith.constant dense<0.000000e+00> : vector<8x48xf32>
    %476 = tpu.matmul %473, %475, %cst_167 {dimension_numbers = #tpu.dot_dimension_numbers<[1], [0], [0], [1], [0, 0, 1, 1], [], []>} : vector<8x16xf32>, vector<16x48xf32>, vector<8x48xf32> -> vector<8x48xf32>
    %477 = arith.addf %460, %476 : vector<8x48xf32>
    %478 = vector.broadcast %94 : vector<1x48xf32> to vector<8x48xf32>
    %479 = arith.mulf %383, %478 : vector<8x48xf32>
    %cst_168 = arith.constant dense<0.000000e+00> : vector<8x16xf32>
    %480 = tpu.matmul %479, %390, %cst_168 {dimension_numbers = #tpu.dot_dimension_numbers<[1], [1], [0], [0], [0, 0, 1, 0], [], []>} : vector<8x48xf32>, vector<16x48xf32>, vector<8x16xf32> -> vector<8x16xf32>
    %cst_169 = arith.constant dense<0xFF800000> : vector<8xf32>
    %481 = vector.multi_reduction <maximumf>, %480, %cst_169 [1] : vector<8x16xf32> to vector<8xf32>
    %482 = vector.shape_cast %481 : vector<8xf32> to vector<8x1xf32>
    %483 = vector.broadcast %482 : vector<8x1xf32> to vector<8x16xf32>
    %484 = arith.subf %480, %483 : vector<8x16xf32>
    %485 = math.exp %484 : vector<8x16xf32>
    %cst_170 = arith.constant dense<0.000000e+00> : vector<8xf32>
    %486 = vector.multi_reduction <add>, %485, %cst_170 [1] : vector<8x16xf32> to vector<8xf32>
    %487 = vector.shape_cast %486 : vector<8xf32> to vector<8x1xf32>
    %488 = tpu.reciprocal %487 {approx = true} : vector<8x1xf32> -> vector<8x1xf32>
    %489 = vector.broadcast %488 : vector<8x1xf32> to vector<8x16xf32>
    %490 = arith.mulf %485, %489 : vector<8x16xf32>
    %491 = vector.broadcast %94 : vector<1x48xf32> to vector<16x48xf32>
    %492 = arith.mulf %393, %491 : vector<16x48xf32>
    %cst_171 = arith.constant dense<0.000000e+00> : vector<8x48xf32>
    %493 = tpu.matmul %490, %492, %cst_171 {dimension_numbers = #tpu.dot_dimension_numbers<[1], [0], [0], [1], [0, 0, 1, 1], [], []>} : vector<8x16xf32>, vector<16x48xf32>, vector<8x48xf32> -> vector<8x48xf32>
    %494 = arith.addf %477, %493 : vector<8x48xf32>
    %495 = vector.broadcast %101 : vector<1x48xf32> to vector<8x48xf32>
    %496 = arith.mulf %383, %495 : vector<8x48xf32>
    %cst_172 = arith.constant dense<0.000000e+00> : vector<8x16xf32>
    %497 = tpu.matmul %496, %390, %cst_172 {dimension_numbers = #tpu.dot_dimension_numbers<[1], [1], [0], [0], [0, 0, 1, 0], [], []>} : vector<8x48xf32>, vector<16x48xf32>, vector<8x16xf32> -> vector<8x16xf32>
    %cst_173 = arith.constant dense<0xFF800000> : vector<8xf32>
    %498 = vector.multi_reduction <maximumf>, %497, %cst_173 [1] : vector<8x16xf32> to vector<8xf32>
    %499 = vector.shape_cast %498 : vector<8xf32> to vector<8x1xf32>
    %500 = vector.broadcast %499 : vector<8x1xf32> to vector<8x16xf32>
    %501 = arith.subf %497, %500 : vector<8x16xf32>
    %502 = math.exp %501 : vector<8x16xf32>
    %cst_174 = arith.constant dense<0.000000e+00> : vector<8xf32>
    %503 = vector.multi_reduction <add>, %502, %cst_174 [1] : vector<8x16xf32> to vector<8xf32>
    %504 = vector.shape_cast %503 : vector<8xf32> to vector<8x1xf32>
    %505 = tpu.reciprocal %504 {approx = true} : vector<8x1xf32> -> vector<8x1xf32>
    %506 = vector.broadcast %505 : vector<8x1xf32> to vector<8x16xf32>
    %507 = arith.mulf %502, %506 : vector<8x16xf32>
    %508 = vector.broadcast %101 : vector<1x48xf32> to vector<16x48xf32>
    %509 = arith.mulf %393, %508 : vector<16x48xf32>
    %cst_175 = arith.constant dense<0.000000e+00> : vector<8x48xf32>
    %510 = tpu.matmul %507, %509, %cst_175 {dimension_numbers = #tpu.dot_dimension_numbers<[1], [0], [0], [1], [0, 0, 1, 1], [], []>} : vector<8x16xf32>, vector<16x48xf32>, vector<8x48xf32> -> vector<8x48xf32>
    %511 = arith.addf %494, %510 : vector<8x48xf32>
    %512 = vector.broadcast %108 : vector<1x48xf32> to vector<8x48xf32>
    %513 = arith.mulf %383, %512 : vector<8x48xf32>
    %cst_176 = arith.constant dense<0.000000e+00> : vector<8x16xf32>
    %514 = tpu.matmul %513, %390, %cst_176 {dimension_numbers = #tpu.dot_dimension_numbers<[1], [1], [0], [0], [0, 0, 1, 0], [], []>} : vector<8x48xf32>, vector<16x48xf32>, vector<8x16xf32> -> vector<8x16xf32>
    %cst_177 = arith.constant dense<0xFF800000> : vector<8xf32>
    %515 = vector.multi_reduction <maximumf>, %514, %cst_177 [1] : vector<8x16xf32> to vector<8xf32>
    %516 = vector.shape_cast %515 : vector<8xf32> to vector<8x1xf32>
    %517 = vector.broadcast %516 : vector<8x1xf32> to vector<8x16xf32>
    %518 = arith.subf %514, %517 : vector<8x16xf32>
    %519 = math.exp %518 : vector<8x16xf32>
    %cst_178 = arith.constant dense<0.000000e+00> : vector<8xf32>
    %520 = vector.multi_reduction <add>, %519, %cst_178 [1] : vector<8x16xf32> to vector<8xf32>
    %521 = vector.shape_cast %520 : vector<8xf32> to vector<8x1xf32>
    %522 = tpu.reciprocal %521 {approx = true} : vector<8x1xf32> -> vector<8x1xf32>
    %523 = vector.broadcast %522 : vector<8x1xf32> to vector<8x16xf32>
    %524 = arith.mulf %519, %523 : vector<8x16xf32>
    %525 = vector.broadcast %108 : vector<1x48xf32> to vector<16x48xf32>
    %526 = arith.mulf %393, %525 : vector<16x48xf32>
    %cst_179 = arith.constant dense<0.000000e+00> : vector<8x48xf32>
    %527 = tpu.matmul %524, %526, %cst_179 {dimension_numbers = #tpu.dot_dimension_numbers<[1], [0], [0], [1], [0, 0, 1, 1], [], []>} : vector<8x16xf32>, vector<16x48xf32>, vector<8x48xf32> -> vector<8x48xf32>
    %528 = arith.addf %511, %527 : vector<8x48xf32>
    %cst_180 = arith.constant dense<0.000000e+00> : vector<8x48xf32>
    %529 = tpu.matmul %528, %23, %cst_180 {dimension_numbers = #tpu.dot_dimension_numbers<[1], [0], [0], [1], [0, 0, 1, 1], [], []>} : vector<8x48xf32>, vector<48x48xf32>, vector<8x48xf32> -> vector<8x48xf32>
    %530 = vector.broadcast %26 : vector<1x48xf32> to vector<8x48xf32>
    %531 = arith.addf %529, %530 : vector<8x48xf32>
    %532 = arith.addf %354, %531 : vector<8x48xf32>
    %cst_181 = arith.constant dense<0.000000e+00> : vector<8xf32>
    %533 = vector.multi_reduction <add>, %532, %cst_181 [1] : vector<8x48xf32> to vector<8xf32>
    %534 = vector.shape_cast %533 : vector<8xf32> to vector<8x1xf32>
    %cst_182 = arith.constant 0.020833334 : f32
    %535 = vector.broadcast %cst_182 : f32 to vector<8x1xf32>
    %536 = arith.mulf %534, %535 : vector<8x1xf32>
    %537 = arith.mulf %532, %532 : vector<8x48xf32>
    %cst_183 = arith.constant dense<0.000000e+00> : vector<8xf32>
    %538 = vector.multi_reduction <add>, %537, %cst_183 [1] : vector<8x48xf32> to vector<8xf32>
    %539 = vector.shape_cast %538 : vector<8xf32> to vector<8x1xf32>
    %cst_184 = arith.constant 0.020833334 : f32
    %540 = vector.broadcast %cst_184 : f32 to vector<8x1xf32>
    %541 = arith.mulf %539, %540 : vector<8x1xf32>
    %542 = arith.mulf %536, %536 : vector<8x1xf32>
    %543 = arith.subf %541, %542 : vector<8x1xf32>
    %544 = vector.broadcast %536 : vector<8x1xf32> to vector<8x48xf32>
    %545 = arith.subf %532, %544 : vector<8x48xf32>
    %cst_185 = arith.constant 9.99999974E-6 : f32
    %546 = vector.broadcast %cst_185 : f32 to vector<8x1xf32>
    %547 = arith.addf %543, %546 : vector<8x1xf32>
    %548 = math.rsqrt %547 : vector<8x1xf32>
    %549 = vector.broadcast %548 : vector<8x1xf32> to vector<8x48xf32>
    %550 = arith.mulf %545, %549 : vector<8x48xf32>
    %551 = vector.broadcast %29 : vector<1x48xf32> to vector<8x48xf32>
    %552 = arith.mulf %550, %551 : vector<8x48xf32>
    %553 = vector.broadcast %32 : vector<1x48xf32> to vector<8x48xf32>
    %554 = arith.addf %552, %553 : vector<8x48xf32>
    %555 = vector.extract_strided_slice %366 {offsets = [2, 0], sizes = [1, 48], strides = [1, 1]} : vector<4x48xf32> to vector<1x48xf32>
    %cst_186 = arith.constant 1.000000e+00 : f32
    %556 = vector.broadcast %cst_186 : f32 to vector<1x48xf32>
    %557 = arith.addf %556, %555 : vector<1x48xf32>
    %558 = vector.broadcast %557 : vector<1x48xf32> to vector<8x48xf32>
    %559 = arith.mulf %554, %558 : vector<8x48xf32>
    %560 = vector.extract_strided_slice %366 {offsets = [3, 0], sizes = [1, 48], strides = [1, 1]} : vector<4x48xf32> to vector<1x48xf32>
    %561 = vector.broadcast %560 : vector<1x48xf32> to vector<8x48xf32>
    %562 = arith.addf %559, %561 : vector<8x48xf32>
    %cst_187 = arith.constant dense<0.000000e+00> : vector<8x48xf32>
    %563 = tpu.matmul %562, %35, %cst_187 {dimension_numbers = #tpu.dot_dimension_numbers<[1], [0], [0], [1], [0, 0, 1, 1], [], []>} : vector<8x48xf32>, vector<48x48xf32>, vector<8x48xf32> -> vector<8x48xf32>
    %564 = vector.broadcast %38 : vector<1x48xf32> to vector<8x48xf32>
    %565 = arith.addf %563, %564 : vector<8x48xf32>
    %cst_188 = arith.constant 0.000000e+00 : f32
    %566 = vector.broadcast %cst_188 : f32 to vector<8x48xf32>
    %567 = arith.maximumf %565, %566 : vector<8x48xf32>
    %cst_189 = arith.constant dense<0.000000e+00> : vector<8x48xf32>
    %568 = tpu.matmul %567, %41, %cst_189 {dimension_numbers = #tpu.dot_dimension_numbers<[1], [0], [0], [1], [0, 0, 1, 1], [], []>} : vector<8x48xf32>, vector<48x48xf32>, vector<8x48xf32> -> vector<8x48xf32>
    %569 = vector.broadcast %44 : vector<1x48xf32> to vector<8x48xf32>
    %570 = arith.addf %568, %569 : vector<8x48xf32>
    %571 = arith.addf %554, %570 : vector<8x48xf32>
    %cst_190 = arith.constant dense<0.000000e+00> : vector<8xf32>
    %572 = vector.multi_reduction <add>, %571, %cst_190 [1] : vector<8x48xf32> to vector<8xf32>
    %573 = vector.shape_cast %572 : vector<8xf32> to vector<8x1xf32>
    %cst_191 = arith.constant 0.020833334 : f32
    %574 = vector.broadcast %cst_191 : f32 to vector<8x1xf32>
    %575 = arith.mulf %573, %574 : vector<8x1xf32>
    %576 = arith.mulf %571, %571 : vector<8x48xf32>
    %cst_192 = arith.constant dense<0.000000e+00> : vector<8xf32>
    %577 = vector.multi_reduction <add>, %576, %cst_192 [1] : vector<8x48xf32> to vector<8xf32>
    %578 = vector.shape_cast %577 : vector<8xf32> to vector<8x1xf32>
    %cst_193 = arith.constant 0.020833334 : f32
    %579 = vector.broadcast %cst_193 : f32 to vector<8x1xf32>
    %580 = arith.mulf %578, %579 : vector<8x1xf32>
    %581 = arith.mulf %575, %575 : vector<8x1xf32>
    %582 = arith.subf %580, %581 : vector<8x1xf32>
    %583 = vector.broadcast %575 : vector<8x1xf32> to vector<8x48xf32>
    %584 = arith.subf %571, %583 : vector<8x48xf32>
    %cst_194 = arith.constant 9.99999974E-6 : f32
    %585 = vector.broadcast %cst_194 : f32 to vector<8x1xf32>
    %586 = arith.addf %582, %585 : vector<8x1xf32>
    %587 = math.rsqrt %586 : vector<8x1xf32>
    %588 = vector.broadcast %587 : vector<8x1xf32> to vector<8x48xf32>
    %589 = arith.mulf %584, %588 : vector<8x48xf32>
    %590 = vector.broadcast %47 : vector<1x48xf32> to vector<8x48xf32>
    %591 = arith.mulf %589, %590 : vector<8x48xf32>
    %592 = vector.broadcast %50 : vector<1x48xf32> to vector<8x48xf32>
    %593 = arith.addf %591, %592 : vector<8x48xf32>
    %c1_195 = arith.constant 1 : index
    %c0_196 = arith.constant 0 : index
    %c0_197 = arith.constant 0 : index
    %594 = vector.load %arg29[%c1_195, %c0_196, %c0_197] : memref<2x8x48xf32, #tpu.memory_space<vmem>>, vector<1x8x48xf32>
    %595 = vector.shape_cast %594 : vector<1x8x48xf32> to vector<8x48xf32>
    %596 = vector.shape_cast %593 : vector<8x48xf32> to vector<1x8x48xf32>
    tpu.vector_store %arg29[%c1_195, %c0_196, %c0_197], %596 {strides = array<i32>} : memref<2x8x48xf32, #tpu.memory_space<vmem>>, vector<1x8x48xf32>,
    %c1_i32 = arith.constant 1 : i32
    %597 = arith.cmpi eq, %arg0, %c1_i32 : i32
    %598 = arith.extui %597 : i1 to i32
    %c0_i32_198 = arith.constant 0 : i32
    %599 = arith.cmpi ne, %598, %c0_i32_198 : i32
    scf.if %599 {
      %c0_199 = arith.constant 0 : index
      %c0_200 = arith.constant 0 : index
      %c0_201 = arith.constant 0 : index
      %600 = vector.load %arg28[%c0_199, %c0_200, %c0_201] : memref<2x8x48xf32, #tpu.memory_space<vmem>>, vector<1x8x48xf32>
      %601 = vector.shape_cast %600 : vector<1x8x48xf32> to vector<8x48xf32>
      %602 = vector.shape_cast %349 : vector<8x48xf32> to vector<1x8x48xf32>
      tpu.vector_store %arg28[%c0_199, %c0_200, %c0_201], %602 {strides = array<i32>} : memref<2x8x48xf32, #tpu.memory_space<vmem>>, vector<1x8x48xf32>,
      %c1_202 = arith.constant 1 : index
      %c0_203 = arith.constant 0 : index
      %c0_204 = arith.constant 0 : index
      %603 = vector.load %arg28[%c1_202, %c0_203, %c0_204] : memref<2x8x48xf32, #tpu.memory_space<vmem>>, vector<1x8x48xf32>
      %604 = vector.shape_cast %603 : vector<1x8x48xf32> to vector<8x48xf32>
      %605 = vector.shape_cast %593 : vector<8x48xf32> to vector<1x8x48xf32>
      tpu.vector_store %arg28[%c1_202, %c0_203, %c0_204], %605 {strides = array<i32>} : memref<2x8x48xf32, #tpu.memory_space<vmem>>, vector<1x8x48xf32>,
    } else {
    }
    return
  }
  func.func @transform_0(%arg0: i32) -> (i32, i32, i32) {
    %c0_i32 = arith.constant 0 : i32
    %c0_i32_0 = arith.constant 0 : i32
    %c0_i32_1 = arith.constant 0 : i32
    %c0_i32_2 = arith.constant 0 : i32
    return %c0_i32, %c0_i32_0, %c0_i32_1 : i32, i32, i32
  }
  func.func @transform_1(%arg0: i32) -> (i32, i32) {
    %c0_i32 = arith.constant 0 : i32
    %c0_i32_0 = arith.constant 0 : i32
    %c0_i32_1 = arith.constant 0 : i32
    return %c0_i32, %c0_i32_0 : i32, i32
  }
  func.func @transform_2(%arg0: i32) -> (i32, i32) {
    %c0_i32 = arith.constant 0 : i32
    %c0_i32_0 = arith.constant 0 : i32
    %c0_i32_1 = arith.constant 0 : i32
    return %c0_i32, %c0_i32_0 : i32, i32
  }
  func.func @transform_3(%arg0: i32) -> (i32, i32) {
    %c0_i32 = arith.constant 0 : i32
    %c0_i32_0 = arith.constant 0 : i32
    %c0_i32_1 = arith.constant 0 : i32
    return %c0_i32, %c0_i32_0 : i32, i32
  }
  func.func @transform_4(%arg0: i32) -> (i32, i32, i32) {
    %c0_i32 = arith.constant 0 : i32
    %c0_i32_0 = arith.constant 0 : i32
    %c0_i32_1 = arith.constant 0 : i32
    %c0_i32_2 = arith.constant 0 : i32
    return %c0_i32, %c0_i32_0, %c0_i32_1 : i32, i32, i32
  }
  func.func @transform_5(%arg0: i32) -> (i32, i32, i32) {
    %c0_i32 = arith.constant 0 : i32
    %c0_i32_0 = arith.constant 0 : i32
    %c0_i32_1 = arith.constant 0 : i32
    %c0_i32_2 = arith.constant 0 : i32
    return %c0_i32, %c0_i32_0, %c0_i32_1 : i32, i32, i32
  }
  func.func @transform_6(%arg0: i32) -> (i32, i32, i32) {
    %c0_i32 = arith.constant 0 : i32
    %c0_i32_0 = arith.constant 0 : i32
    %c0_i32_1 = arith.constant 0 : i32
    %c0_i32_2 = arith.constant 0 : i32
    return %c0_i32, %c0_i32_0, %c0_i32_1 : i32, i32, i32
  }
  func.func @transform_7(%arg0: i32) -> (i32, i32, i32) {
    %c0_i32 = arith.constant 0 : i32
    %c0_i32_0 = arith.constant 0 : i32
    %c0_i32_1 = arith.constant 0 : i32
    %c0_i32_2 = arith.constant 0 : i32
    return %c0_i32, %c0_i32_0, %c0_i32_1 : i32, i32, i32
  }
  func.func @transform_8(%arg0: i32) -> (i32, i32, i32) {
    %c0_i32 = arith.constant 0 : i32
    %c0_i32_0 = arith.constant 0 : i32
    %c0_i32_1 = arith.constant 0 : i32
    %c0_i32_2 = arith.constant 0 : i32
    return %c0_i32, %c0_i32_0, %c0_i32_1 : i32, i32, i32
  }
  func.func @transform_9(%arg0: i32) -> (i32, i32) {
    %c0_i32 = arith.constant 0 : i32
    %c0_i32_0 = arith.constant 0 : i32
    %c0_i32_1 = arith.constant 0 : i32
    return %c0_i32, %c0_i32_0 : i32, i32
  }
  func.func @transform_10(%arg0: i32) -> (i32, i32, i32, i32) {
    %c0_i32 = arith.constant 0 : i32
    %0 = arith.addi %c0_i32, %arg0 : i32
    %c0_i32_0 = arith.constant 0 : i32
    %c0_i32_1 = arith.constant 0 : i32
    %c0_i32_2 = arith.constant 0 : i32
    %c0_i32_3 = arith.constant 0 : i32
    return %c0_i32_0, %0, %c0_i32_1, %c0_i32_2 : i32, i32, i32, i32
  }
  func.func @transform_11(%arg0: i32) -> (i32, i32, i32) {
    %c0_i32 = arith.constant 0 : i32
    %c0_i32_0 = arith.constant 0 : i32
    %c0_i32_1 = arith.constant 0 : i32
    %c0_i32_2 = arith.constant 0 : i32
    return %c0_i32, %c0_i32_0, %c0_i32_1 : i32, i32, i32
  }
  func.func @transform_12(%arg0: i32) -> (i32, i32, i32) {
    %c0_i32 = arith.constant 0 : i32
    %c0_i32_0 = arith.constant 0 : i32
    %c0_i32_1 = arith.constant 0 : i32
    %c0_i32_2 = arith.constant 0 : i32
    return %c0_i32, %c0_i32_0, %c0_i32_1 : i32, i32, i32
  }
  func.func @transform_13(%arg0: i32) -> (i32, i32, i32) {
    %c0_i32 = arith.constant 0 : i32
    %c0_i32_0 = arith.constant 0 : i32
    %c0_i32_1 = arith.constant 0 : i32
    %c0_i32_2 = arith.constant 0 : i32
    return %c0_i32, %c0_i32_0, %c0_i32_1 : i32, i32, i32
  }
  func.func @transform_14(%arg0: i32) -> (i32, i32, i32) {
    %c0_i32 = arith.constant 0 : i32
    %c0_i32_0 = arith.constant 0 : i32
    %c0_i32_1 = arith.constant 0 : i32
    %c0_i32_2 = arith.constant 0 : i32
    return %c0_i32, %c0_i32_0, %c0_i32_1 : i32, i32, i32
  }
  func.func @transform_15(%arg0: i32) -> (i32, i32, i32) {
    %c0_i32 = arith.constant 0 : i32
    %c0_i32_0 = arith.constant 0 : i32
    %c0_i32_1 = arith.constant 0 : i32
    %c0_i32_2 = arith.constant 0 : i32
    return %c0_i32, %c0_i32_0, %c0_i32_1 : i32, i32, i32
  }
  func.func @transform_16(%arg0: i32) -> (i32, i32, i32) {
    %c0_i32 = arith.constant 0 : i32
    %c0_i32_0 = arith.constant 0 : i32
    %c0_i32_1 = arith.constant 0 : i32
    %c0_i32_2 = arith.constant 0 : i32
    return %c0_i32, %c0_i32_0, %c0_i32_1 : i32, i32, i32
  }
  func.func @transform_17(%arg0: i32) -> (i32, i32, i32) {
    %c0_i32 = arith.constant 0 : i32
    %c0_i32_0 = arith.constant 0 : i32
    %c0_i32_1 = arith.constant 0 : i32
    %c0_i32_2 = arith.constant 0 : i32
    return %c0_i32, %c0_i32_0, %c0_i32_1 : i32, i32, i32
  }
  func.func @transform_18(%arg0: i32) -> (i32, i32, i32) {
    %c0_i32 = arith.constant 0 : i32
    %c0_i32_0 = arith.constant 0 : i32
    %c0_i32_1 = arith.constant 0 : i32
    %c0_i32_2 = arith.constant 0 : i32
    return %c0_i32, %c0_i32_0, %c0_i32_1 : i32, i32, i32
  }
  func.func @transform_19(%arg0: i32) -> (i32, i32, i32) {
    %c0_i32 = arith.constant 0 : i32
    %c0_i32_0 = arith.constant 0 : i32
    %c0_i32_1 = arith.constant 0 : i32
    %c0_i32_2 = arith.constant 0 : i32
    return %c0_i32, %c0_i32_0, %c0_i32_1 : i32, i32, i32
  }
  func.func @transform_20(%arg0: i32) -> (i32, i32, i32) {
    %c0_i32 = arith.constant 0 : i32
    %c0_i32_0 = arith.constant 0 : i32
    %c0_i32_1 = arith.constant 0 : i32
    %c0_i32_2 = arith.constant 0 : i32
    return %c0_i32, %c0_i32_0, %c0_i32_1 : i32, i32, i32
  }
  func.func @transform_21(%arg0: i32) -> (i32, i32, i32) {
    %c0_i32 = arith.constant 0 : i32
    %c0_i32_0 = arith.constant 0 : i32
    %c0_i32_1 = arith.constant 0 : i32
    %c0_i32_2 = arith.constant 0 : i32
    return %c0_i32, %c0_i32_0, %c0_i32_1 : i32, i32, i32
  }
  func.func @transform_22(%arg0: i32) -> (i32, i32, i32) {
    %c0_i32 = arith.constant 0 : i32
    %c0_i32_0 = arith.constant 0 : i32
    %c0_i32_1 = arith.constant 0 : i32
    %c0_i32_2 = arith.constant 0 : i32
    return %c0_i32, %c0_i32_0, %c0_i32_1 : i32, i32, i32
  }
  func.func @transform_23(%arg0: i32) -> (i32, i32, i32) {
    %c0_i32 = arith.constant 0 : i32
    %c0_i32_0 = arith.constant 0 : i32
    %c0_i32_1 = arith.constant 0 : i32
    %c0_i32_2 = arith.constant 0 : i32
    return %c0_i32, %c0_i32_0, %c0_i32_1 : i32, i32, i32
  }
  func.func @transform_24(%arg0: i32) -> (i32, i32, i32) {
    %c0_i32 = arith.constant 0 : i32
    %c0_i32_0 = arith.constant 0 : i32
    %c0_i32_1 = arith.constant 0 : i32
    %c0_i32_2 = arith.constant 0 : i32
    return %c0_i32, %c0_i32_0, %c0_i32_1 : i32, i32, i32
  }
  func.func @transform_25(%arg0: i32) -> (i32, i32, i32) {
    %c0_i32 = arith.constant 0 : i32
    %c0_i32_0 = arith.constant 0 : i32
    %c0_i32_1 = arith.constant 0 : i32
    %c0_i32_2 = arith.constant 0 : i32
    return %c0_i32, %c0_i32_0, %c0_i32_1 : i32, i32, i32
  }
  func.func @transform_26(%arg0: i32) -> (i32, i32, i32) {
    %c0_i32 = arith.constant 0 : i32
    %c0_i32_0 = arith.constant 0 : i32
    %c0_i32_1 = arith.constant 0 : i32
    %c0_i32_2 = arith.constant 0 : i32
    return %c0_i32, %c0_i32_0, %c0_i32_1 : i32, i32, i32
  }
  func.func @transform_27(%arg0: i32) -> (i32, i32, i32) {
    %c0_i32 = arith.constant 0 : i32
    %c0_i32_0 = arith.constant 0 : i32
    %c0_i32_1 = arith.constant 0 : i32
    %c0_i32_2 = arith.constant 0 : i32
    return %c0_i32, %c0_i32_0, %c0_i32_1 : i32, i32, i32
  }
}

</mosaic_0001>

<bundles_post_ra>
// kernel: diffusion_head_forward.3
= control target key start
LH: loop header
LB: loop body
LE: loop exit
PB: predicated region body
PF: predicated region fallthrough
CT: control target
= control target key end

     0   :  { %17 = vsyncpa [#allocation3], 0  ;;  %s2026_s0 = inlined_call_operand.vmem [shape: f32[2,48], index: 0, kind: input, shape index: {}]   ;;  %s2027_s1 = inlined_call_operand.vmem [shape: f32[2,144], index: 1, kind: input, shape index: {}]   ;;  %s2028_s2 = inlined_call_operand.vmem [shape: f32[48,48], index: 2, kind: input, shape index: {}]   ;;  %s2029_s3 = inlined_call_operand.vmem [shape: f32[1,48], index: 3, kind: input, shape index: {}]   ;;  %s2030_s4 = inlined_call_operand.vmem [shape: f32[48,48], index: 4, kind: input, shape index: {}]   ;;  %s2031_s5 = inlined_call_operand.vmem [shape: f32[1,48], index: 5, kind: input, shape index: {}]   ;;  %s2032_s6 = inlined_call_operand.vmem [shape: f32[144,48], index: 6, kind: input, shape index: {}]   ;;  %s2033_s7 = inlined_call_operand.hbm [shape: f32[1,48], index: 7, kind: input, shape index: {}]   ;;  %s2034_s8 = inlined_call_operand.vmem [shape: f32[48,48], index: 8, kind: input, shape index: {}]   ;;  %s2035_s9 = inlined_call_operand.hbm [shape: f32[1,48], index: 9, kind: input, shape index: {}]   ;;  %s2036_s10 = inlined_call_operand.vmem [shape: f32[48,1920], index: 10, kind: input, shape index: {}]   ;;  %s2037_s11 = inlined_call_operand.vmem [shape: f32[1,1920], index: 11, kind: input, shape index: {}]   ;;  %s2038_s12 = inlined_call_operand.vmem [shape: f32[2,1920], index: 12, kind: output, shape index: {}]  }
   0x1   :  { %18 = vsyncpa [#allocation5], 0  ;;  %s1438_s21 = smov [#allocation2]   ;;  %s1439_s23 = smov [#allocation4]  }
   0x2   :  { %s39_s22 = sshll.u32 %s1438_s21, 4  ;;  %s51_s24 = sshll.u32 %s1439_s23, 4  ;;  %s40_s22 = int_to_ptr.vmem [resolvable:$true] %s39_s22  ;;  %s52_s24 = int_to_ptr.vmem [resolvable:$true] %s51_s24 }
   0x3   :  { %s1402_s25 = scalar_lea.vmem %s40_s22, 16  ;;  %s1406_s26 = scalar_lea.vmem %s40_s22, 32 }
   0x4   :  { %p1403_p0 = scmp.ne.s32.totalorder %s40_s22, %s1402_s25  ;;  %p1407_p1 = scmp.lt.s32.totalorder %s40_s22, %s40_s22 }
   0x5   :  { %p1408_p2 = scmp.lt.s32.totalorder %s1406_s26, %s1402_s25 }
   0x7   :  { %p1409_p3 = por %p1408_p2, %p1407_p1 }
   0x9   :  { %p1410_p4 = pnand %p1409_p3, %p1403_p0 }
   0xb   :  { %1413 = shalt.err (!%p1410_p4)
}
   0xc   :  { %42 = dma.hbm_to_vmem [thread:$0]  %s2033_s7, 16, %s40_s22, [#allocation3]  }
   0xd   :  { %s1422_s29 = scalar_lea.vmem %s52_s24, 16  ;;  %s1426_s30 = scalar_lea.vmem %s52_s24, 32 }
   0xe   :  { %p1423_p5 = scmp.ne.s32.totalorder %s52_s24, %s1422_s29  ;;  %p1427_p6 = scmp.lt.s32.totalorder %s52_s24, %s52_s24 }
   0xf   :  { %p1428_p7 = scmp.lt.s32.totalorder %s1426_s30, %s1422_s29 }
  0x11   :  { %p1429_p8 = por %p1428_p7, %p1427_p6 }
  0x13   :  { %p1430_p9 = pnand %p1429_p8, %p1423_p5 }
  0x15   :  { %1433 = shalt.err (!%p1430_p9)
}
  0x16   :  { %54 = dma.hbm_to_vmem [thread:$0]  %s2035_s9, 16, %s52_s24, [#allocation5]  }
  0x17   :  { %1434 = dma.done.wait [#allocation3], 16  }
  0x18   :  { %1435 = vsyncadd [#allocation3], 4294967280 }
  0x19   :  { %1436 = dma.done.wait [#allocation5], 16  }
  0x1a   :  { %1437 = vsyncadd [#allocation5], 4294967280  ;;  %v1440_v0 = vmov 0.0   ;;  %vm1441_vm0 = vmmov 0   ;;  %v71_v1 = vld [vmem:[%s2028_s2 + $0x28] sm:$0xff]  ;;  %v70_v2 = vld [vmem:[%s2028_s2 + $0x20] sm:$0xff] }
  0x1b   :  { %1325 = vmatprep.subr.mxu0 %v1440_v0  ;;  %1337 = vmatprep.mubr.msk.f32.mxu0 %vm1441_vm0, %v1440_v0  ;;  %v69_v3 = vld [vmem:[%s2028_s2 + $0x18] sm:$0xff]  ;;  %v68_v4 = vld [vmem:[%s2028_s2 + $0x10] sm:$0xff]  ;;  %v67_v5 = vld [vmem:[%s2028_s2 + $0x8] sm:$0xff]  ;;  %vm79_vm1 = vcmask 392192   ;;  %vm276_vm2 = vcmask 130048  }
  0x1c   :  { %1340 = vmatprep.subr.mxu1 %v1440_v0  ;;  %1352 = vmatprep.mubr.msk.f32.mxu1 %vm1441_vm0, %v1440_v0  ;;  %v66_v6 = vld [vmem:[%s2028_s2] sm:$0xff]  ;;  %v159_v8 = vld [vmem:[%s2030_s4 + $0x28] sm:$0xff]  ;;  %v256_v12 = vld [vmem:[%s2032_s6 + $0x78] sm:$0xff] }
  0x1d   :  { %1326 = vmatpush3.msra.mxu0 %v71_v1  ;;  %v1545_v7 = vld.sshfl [vmem:[%s2027_s1] sm:$0x33 pattern:$0x76325410]  ;;  %1341 = vmatpush3.msra.mxu1 %v159_v8  ;;  %v255_v13 = vld [vmem:[%s2032_s6 + $0x70] sm:$0xff]  ;;  %v157_v14 = vld [vmem:[%s2030_s4 + $0x18] sm:$0xff] }
  0x1e   :  { %1327 = vmatprep.subr.mxu0 %v1440_v0  ;;  %v65_v9 = vld [vmem:[%s2026_s0] sm:$0x3]  ;;  %v274_v10 = vcombine.high %v1545_v7, %v1545_v7  ;;  %1342 = vmatprep.subr.mxu1 %v1440_v0  ;;  %v254_v15 = vld [vmem:[%s2032_s6 + $0x68] sm:$0xff]  ;;  %v252_v17 = vld [vmem:[%s2032_s6 + $0x58] sm:$0xff] }
  0x1f   :  { %1328 = vmatpush3.msra.mxu0 %v70_v2  ;;  %v158_v11 = vld [vmem:[%s2030_s4 + $0x20] sm:$0xff]  ;;  %v251_v18 = vld [vmem:[%s2032_s6 + $0x50] sm:$0xff]  ;;  %v250_v19 = vld [vmem:[%s2032_s6 + $0x48] sm:$0xff] }
  0x20   :  { %1329 = vmatprep.subr.mxu0 %v1440_v0  ;;  %1343 = vmatpush3.msra.mxu1 %v158_v11  ;;  %v253_v16 = vld [vmem:[%s2032_s6 + $0x60] sm:$0xff]  ;;  %v248_v21 = vld [vmem:[%s2032_s6 + $0x38] sm:$0xff]  ;;  %v247_v22 = vld [vmem:[%s2032_s6 + $0x30] sm:$0xff] }
  0x21   :  { %1330 = vmatpush3.msra.mxu0 %v69_v3  ;;  %1344 = vmatprep.subr.mxu1 %v1440_v0  ;;  %v249_v20 = vld [vmem:[%s2032_s6 + $0x40] sm:$0xff]  ;;  %v246_v23 = vld [vmem:[%s2032_s6 + $0x28] sm:$0xff]  ;;  %v244_v25 = vld [vmem:[%s2032_s6 + $0x18] sm:$0xff] }
  0x22   :  { %1331 = vmatprep.subr.mxu0 %v1440_v0  ;;  %1345 = vmatpush3.msra.mxu1 %v157_v14  ;;  %v245_v24 = vld [vmem:[%s2032_s6 + $0x20] sm:$0xff]  ;;  %v243_v26 = vld [vmem:[%s2032_s6 + $0x10] sm:$0xff]  ;;  %v242_v27 = vld [vmem:[%s2032_s6 + $0x8] sm:$0xff] }
  0x23   :  { %1332 = vmatpush3.msra.mxu0 %v68_v4  ;;  %1346 = vmatprep.subr.mxu1 %v1440_v0  ;;  %v241_v28 = vld [vmem:[%s2032_s6] sm:$0xff]  ;;  %v258_v29 = vld [vmem:[%s2032_s6 + $0x88] sm:$0xff]  ;;  %v156_v31 = vld [vmem:[%s2030_s4 + $0x10] sm:$0xff] }
  0x24   :  { %1333 = vmatprep.subr.mxu0 %v1440_v0  ;;  %v257_v30 = vld [vmem:[%s2032_s6 + $0x80] sm:$0xff]  ;;  %1347 = vmatpush3.msra.mxu1 %v156_v31  ;;  %v155_v32 = vld [vmem:[%s2030_s4 + $0x8] sm:$0xff]  ;;  %v353_v41 = vld [vmem:[%s2034_s8 + $0x18] sm:$0xff] }
  0x25   :  { %1334 = vmatpush3.msra.mxu0 %v67_v5  ;;  %1348 = vmatprep.subr.mxu1 %v1440_v0  ;;  %v154_v33 = vld [vmem:[%s2030_s4] sm:$0xff]  ;;  %v355_v39 = vld [vmem:[%s2034_s8 + $0x28] sm:$0xff]  ;;  %v352_v42 = vld [vmem:[%s2034_s8 + $0x10] sm:$0xff] }
  0x26   :  { %1335 = vmatprep.subr.mxu0 %v1440_v0  ;;  %1349 = vmatpush3.msra.mxu1 %v155_v32  ;;  %v1279_v34 = vld [vmem:[%s2029_s3] ss:$0 sm:$0xff]  ;;  %v351_v43 = vld [vmem:[%s2034_s8 + $0x8] sm:$0xff]  ;;  %v519_v52 = vld [vmem:[%s2036_s10 + $0x258] sm:$0xff] }
  0x27   :  { %1336 = vmatpush3.msra.mxu0 %v66_v6  ;;  %1350 = vmatprep.subr.mxu1 %v1440_v0  ;;  %v354_v40 = vld [vmem:[%s2034_s8 + $0x20] sm:$0xff]  ;;  %v523_v53 = vld [vmem:[%s2036_s10 + $0x278] sm:$0xff]  ;;  %v505_v54 = vld [vmem:[%s2036_s10 + $0x1e8] sm:$0xff] }
  0x28   :  { %1338 = vmatmul.mubr.msk.f32.vlgmr.msra.gmra.mxu0 %vm79_vm1, %v65_v9  ;;  %279 = vmatprep.subr.mxu0 %v1440_v0  ;;  %v350_v44 = vld [vmem:[%s2034_s8] sm:$0xff]  ;;  %v509_v55 = vld [vmem:[%s2036_s10 + $0x208] sm:$0xff]  ;;  %v490_v58 = vld [vmem:[%s2036_s10 + $0x170] sm:$0xff] }
  0x29   :  { %280 = vmatpush1.msra.mxu0 %v256_v12  ;;  %1285 = vmatprep.mubr.msk.f32.mxu0 %vm276_vm2, %v274_v10  ;;  %v1283_v45 = vld [vmem:[#allocation2] ss:$0 sm:$0xff]  ;;  %v494_v59 = vld [vmem:[%s2036_s10 + $0x190] sm:$0xff]  ;;  %v489_v60 = vld [vmem:[%s2036_s10 + $0x168] sm:$0xff] }
  0x2a   :  { %281 = vmatprep.subr.mxu0 %v1440_v0  ;;  %1351 = vmatpush3.msra.mxu1 %v154_v33  ;;  %v520_v50 = vld [vmem:[%s2036_s10 + $0x260] sm:$0xff]  ;;  %v493_v61 = vld [vmem:[%s2036_s10 + $0x188] sm:$0xff]  ;;  %v475_v62 = vld [vmem:[%s2036_s10 + $0xf8] sm:$0xff] }
  0x2b   :  { %282 = vmatpush1.msra.mxu0 %v255_v13  ;;  %1355 = vmatprep.subr.mxu1 %v1440_v0  ;;  %v524_v51 = vld [vmem:[%s2036_s10 + $0x280] sm:$0xff]  ;;  %v479_v63 = vld [vmem:[%s2036_s10 + $0x118] sm:$0xff]  ;;  %v474_v1 = vld [vmem:[%s2036_s10 + $0xf0] sm:$0xff] }
  0x2c   :  { %283 = vmatprep.subr.mxu0 %v1440_v0  ;;  %v504_v56 = vld [vmem:[%s2036_s10 + $0x1e0] sm:$0xff]  ;;  %v478_v2 = vld [vmem:[%s2036_s10 + $0x110] sm:$0xff]  ;;  %v459_v5 = vld [vmem:[%s2036_s10 + $0x78] sm:$0xff] }
  0x2d   :  { %284 = vmatpush1.msra.mxu0 %v254_v15  ;;  %v508_v57 = vld [vmem:[%s2036_s10 + $0x200] sm:$0xff]  ;;  %v463_v6 = vld [vmem:[%s2036_s10 + $0x98] sm:$0xff]  ;;  %v449_v8 = vld [vmem:[%s2036_s10 + $0x28] sm:$0xff] }
  0x2e   :  { %285 = vmatprep.subr.mxu0 %v1440_v0  ;;  %v460_v3 = vld [vmem:[%s2036_s10 + $0x80] sm:$0xff]  ;;  %v522_v11 = vld [vmem:[%s2036_s10 + $0x270] sm:$0xff] }
  0x2f   :  { %286 = vmatpush1.msra.mxu0 %v253_v16  ;;  %v464_v4 = vld [vmem:[%s2036_s10 + $0xa0] sm:$0xff]  ;;  %v506_v31 = vld [vmem:[%s2036_s10 + $0x1f0] sm:$0xff] }
  0x30   :  { %287 = vmatprep.subr.mxu0 %v1440_v0  ;;  %v444_v9 = vld [vmem:[%s2036_s10] sm:$0xff] }
  0x31   :  { %288 = vmatpush1.msra.mxu0 %v252_v17  ;;  %v448_v10 = vld [vmem:[%s2036_s10 + $0x20] sm:$0xff] }
  0x32   :  { %289 = vmatprep.subr.mxu0 %v1440_v0  ;;  %v528_v12 = vld [vmem:[%s2036_s10 + $0x2a0] sm:$0xff] }
  0x33   :  { %290 = vmatpush1.msra.mxu0 %v251_v18  ;;  %v1281_v15 = vld [vmem:[%s2031_s5] ss:$0 sm:$0xff]  ;;  %v1286_v16 = vld [vmem:[#allocation4] ss:$0 sm:$0xff] }
  0x34   :  { %291 = vmatprep.subr.mxu0 %v1440_v0  ;;  %v512_v32 = vld [vmem:[%s2036_s10 + $0x220] sm:$0xff] }
  0x35   :  { %292 = vmatpush1.msra.mxu0 %v250_v19  ;;  %v492_v33 = vld [vmem:[%s2036_s10 + $0x180] sm:$0xff] }
  0x36   :  { %293 = vmatprep.subr.mxu0 %v1440_v0 }
  0x37   :  { %294 = vmatpush1.msra.mxu0 %v249_v20 }
  0x38   :  { %295 = vmatprep.subr.mxu0 %v1440_v0 }
  0x39   :  { %296 = vmatpush1.msra.mxu0 %v248_v21 }
  0x3a   :  { %297 = vmatprep.subr.mxu0 %v1440_v0 }
  0x3b   :  { %298 = vmatpush1.msra.mxu0 %v247_v22 }
  0x3c   :  { %299 = vmatprep.subr.mxu0 %v1440_v0 }
  0x3d   :  { %300 = vmatpush1.msra.mxu0 %v246_v23 }
  0x3e   :  { %301 = vmatprep.subr.mxu0 %v1440_v0 }
  0x3f   :  { %302 = vmatpush1.msra.mxu0 %v245_v24 }
  0x40   :  { %303 = vmatprep.subr.mxu0 %v1440_v0 }
  0x41   :  { %304 = vmatpush1.msra.mxu0 %v244_v25 }
  0x42   :  { %305 = vmatprep.subr.mxu0 %v1440_v0 }
  0x43   :  { %306 = vmatpush1.msra.mxu0 %v243_v26 }
  0x44   :  { %307 = vmatprep.subr.mxu0 %v1440_v0 }
  0x45   :  { %308 = vmatpush1.msra.mxu0 %v242_v27  ;;  %v521_v27 = vld [vmem:[%s2036_s10 + $0x268] sm:$0xff] }
  0x46   :  { %309 = vmatprep.subr.mxu0 %v1440_v0 }
  0x47   :  { %310 = vmatpush1.msra.mxu0 %v241_v28  ;;  %v527_v28 = vld [vmem:[%s2036_s10 + $0x298] sm:$0xff] }
  0x48   :  { %339 = vmatprep.subr.mxu0 %v1440_v0 }
  0x49   :  { %340 = vmatpush2.msra.mxu0 %v258_v29  ;;  %v507_v29 = vld [vmem:[%s2036_s10 + $0x1f8] sm:$0xff] }
  0x4a   :  { %341 = vmatprep.subr.mxu0 %v1440_v0 }
  0x4b   :  { %342 = vmatpush2.msra.mxu0 %v257_v30  ;;  %v513_v30 = vld [vmem:[%s2036_s10 + $0x228] sm:$0xff] }
  0x4c   :  { %344 = vmatmul.mubr.f32.vlgmr.msra.gmra.mxu0 %v1545_v7  ;;  %778 = vmatprep.subr.mxu0 %v524_v51  ;;  %v445_v7 = vld [vmem:[%s2036_s10 + $0x8] sm:$0xff] }
  0x4d   :  { %822 = vmatprep.mubr.f32.mxu0 %v1440_v0  ;;  %779 = vmatpush1.msra.mxu0 %v523_v53  ;;  %v525_v51 = vld [vmem:[%s2036_s10 + $0x288] sm:$0xff]  ;;  %v511_v53 = vld [vmem:[%s2036_s10 + $0x218] sm:$0xff] }
  0x4e   :  { %780 = vmatprep.subr.mxu0 %v509_v55  ;;  %v510_v55 = vld [vmem:[%s2036_s10 + $0x210] sm:$0xff] }
  0x4f   :  { %781 = vmatpush1.msra.mxu0 %v508_v57  ;;  %v496_v57 = vld [vmem:[%s2036_s10 + $0x1a0] sm:$0xff] }
  0x50   :  { %782 = vmatprep.subr.mxu0 %v494_v59  ;;  %v495_v59 = vld [vmem:[%s2036_s10 + $0x198] sm:$0xff] }
  0x51   :  { %783 = vmatpush1.msra.mxu0 %v493_v61  ;;  %v481_v61 = vld [vmem:[%s2036_s10 + $0x128] sm:$0xff] }
  0x52   :  { %784 = vmatprep.subr.mxu0 %v479_v63  ;;  %v480_v63 = vld [vmem:[%s2036_s10 + $0x120] sm:$0xff] }
  0x53   :  { %785 = vmatpush1.msra.mxu0 %v478_v2  ;;  %v466_v2 = vld [vmem:[%s2036_s10 + $0xb0] sm:$0xff] }
  0x54   :  { %786 = vmatprep.subr.mxu0 %v464_v4  ;;  %v465_v4 = vld [vmem:[%s2036_s10 + $0xa8] sm:$0xff] }
  0x55   :  { %787 = vmatpush1.msra.mxu0 %v463_v6  ;;  %v451_v6 = vld [vmem:[%s2036_s10 + $0x38] sm:$0xff] }
  0x56   :  { %788 = vmatprep.subr.mxu0 %v449_v8  ;;  %v450_v8 = vld [vmem:[%s2036_s10 + $0x30] sm:$0xff] }
  0x57   :  { %789 = vmatpush1.msra.mxu0 %v448_v10  ;;  %v530_v10 = vld [vmem:[%s2036_s10 + $0x2b0] sm:$0xff] }
  0x58   :  { %920 = vmatprep.subr.mxu0 %v528_v12  ;;  %v515_v12 = vld [vmem:[%s2036_s10 + $0x238] sm:$0xff] }
  0xe8   :  { %v149_v35 = vpop.f32.mrf.mxu0 }
  0xe9   :  { %v150_v36 = vadd.f32 %v1279_v34, %v149_v35  ;;  %v498_v34 = vld [vmem:[%s2036_s10 + $0x1b0] sm:$0xff]  ;;  %v491_v35 = vld [vmem:[%s2036_s10 + $0x178] sm:$0xff] }
  0xea   :  { %v1339_v37 = vpop.f32.mrf.mxu0 }
  0xeb   :  { %v153_v38 = vmax.f32 %v150_v36, 0.0  ;;  %v497_v36 = vld [vmem:[%s2036_s10 + $0x1a8] sm:$0xff] }
  0xec   :  { %v477_v37 = vld [vmem:[%s2036_s10 + $0x108] sm:$0xff] }
  0xed   :  { %1353 = vmatmul.mubr.msk.f32.vlgmr.msra.gmra.mxu1 %vm79_vm1, %v153_v38  ;;  %v483_v38 = vld [vmem:[%s2036_s10 + $0x138] sm:$0xff] }
  0xee   :  { %1356 = vmatpush3.msra.mxu1 %v355_v39  ;;  %1367 = vmatprep.mubr.msk.f32.mxu1 %vm1441_vm0, %v1440_v0  ;;  %v476_v39 = vld [vmem:[%s2036_s10 + $0x100] sm:$0xff] }
  0xef   :  { %1357 = vmatprep.subr.mxu1 %v1440_v0 }
  0xf0   :  { %1358 = vmatpush3.msra.mxu1 %v354_v40  ;;  %v482_v40 = vld [vmem:[%s2036_s10 + $0x130] sm:$0xff] }
  0xf1   :  { %1359 = vmatprep.subr.mxu1 %v1440_v0 }
  0xf2   :  { %1360 = vmatpush3.msra.mxu1 %v353_v41  ;;  %v462_v41 = vld [vmem:[%s2036_s10 + $0x90] sm:$0xff] }
  0xf3   :  { %1361 = vmatprep.subr.mxu1 %v1440_v0 }
  0xf4   :  { %1362 = vmatpush3.msra.mxu1 %v352_v42  ;;  %v468_v42 = vld [vmem:[%s2036_s10 + $0xc0] sm:$0xff] }
  0xf5   :  { %1363 = vmatprep.subr.mxu1 %v1440_v0 }
  0xf6   :  { %1364 = vmatpush3.msra.mxu1 %v351_v43  ;;  %v461_v43 = vld [vmem:[%s2036_s10 + $0x88] sm:$0xff] }
  0xf7   :  { %1365 = vmatprep.subr.mxu1 %v1440_v0 }
  0xf8   :  { %1366 = vmatpush3.msra.mxu1 %v350_v44  ;;  %v467_v44 = vld [vmem:[%s2036_s10 + $0xb8] sm:$0xff] }
  0xf9   :  { %636 = vmatprep.subr.mxu1 %v520_v50  ;;  %v532_v50 = vld [vmem:[%s2036_s10 + $0x2c0] sm:$0xff] }
 0x10c   :  { %v345_v46 = vpop.f32.mrf.mxu0 }
 0x10d   :  { %v346_v47 = vadd.f32 %v1283_v45, %v345_v46  ;;  %v447_v45 = vld [vmem:[%s2036_s10 + $0x18] sm:$0xff]  ;;  %v453_v46 = vld [vmem:[%s2036_s10 + $0x48] sm:$0xff] }
 0x10e   :  { %v347_v48 = vpop.f32.mrf.mxu0 }
 0x10f   :  { %v349_v49 = vmax.f32 %v346_v47, 0.0  ;;  %v446_v47 = vld [vmem:[%s2036_s10 + $0x10] sm:$0xff]  ;;  %v452_v48 = vld [vmem:[%s2036_s10 + $0x40] sm:$0xff] }
 0x111   :  { %1368 = vmatmul.mubr.msk.f32.vlgmr.msra.gmra.mxu1 %vm79_vm1, %v349_v49  ;;  %v526_v49 = vld [vmem:[%s2036_s10 + $0x290] sm:$0xff] }
 0x112   :  { %680 = vmatprep.mubr.f32.mxu1 %v1440_v0  ;;  %637 = vmatpush1.msra.mxu1 %v519_v52  ;;  %v531_v52 = vld [vmem:[%s2036_s10 + $0x2b8] sm:$0xff] }
 0x113   :  { %638 = vmatprep.subr.mxu1 %v505_v54  ;;  %v517_v54 = vld [vmem:[%s2036_s10 + $0x248] sm:$0xff] }
 0x114   :  { %639 = vmatpush1.msra.mxu1 %v504_v56  ;;  %v516_v56 = vld [vmem:[%s2036_s10 + $0x240] sm:$0xff] }
 0x115   :  { %640 = vmatprep.subr.mxu1 %v490_v58  ;;  %v502_v58 = vld [vmem:[%s2036_s10 + $0x1d0] sm:$0xff] }
 0x116   :  { %641 = vmatpush1.msra.mxu1 %v489_v60  ;;  %v501_v60 = vld [vmem:[%s2036_s10 + $0x1c8] sm:$0xff] }
 0x117   :  { %642 = vmatprep.subr.mxu1 %v475_v62  ;;  %v487_v62 = vld [vmem:[%s2036_s10 + $0x158] sm:$0xff] }
 0x118   :  { %643 = vmatpush1.msra.mxu1 %v474_v1  ;;  %v486_v1 = vld [vmem:[%s2036_s10 + $0x150] sm:$0xff] }
 0x119   :  { %644 = vmatprep.subr.mxu1 %v460_v3  ;;  %v472_v3 = vld [vmem:[%s2036_s10 + $0xe0] sm:$0xff] }
 0x11a   :  { %645 = vmatpush1.msra.mxu1 %v459_v5  ;;  %v471_v5 = vld [vmem:[%s2036_s10 + $0xd8] sm:$0xff] }
 0x11b   :  { %646 = vmatprep.subr.mxu1 %v445_v7  ;;  %v457_v7 = vld [vmem:[%s2036_s10 + $0x68] sm:$0xff] }
 0x11c   :  { %647 = vmatpush1.msra.mxu1 %v444_v9  ;;  %v456_v9 = vld [vmem:[%s2036_s10 + $0x60] sm:$0xff] }
 0x11d   :  { %707 = vmatprep.subr.mxu1 %v522_v11  ;;  %v529_v11 = vld [vmem:[%s2036_s10 + $0x2a8] sm:$0xff] }
 0x1ad   :  { %v236_v13 = vpop.f32.mrf.mxu1 }
 0x1ae   :  { %v237_v18 = vadd.f32 %v1281_v15, %v236_v13  ;;  %v514_v13 = vld [vmem:[%s2036_s10 + $0x230] sm:$0xff]  ;;  %v499_v15 = vld [vmem:[%s2036_s10 + $0x1b8] sm:$0xff] }
 0x1af   :  { %v1354_v14 = vpop.f32.mrf.mxu1 }
 0x1b0   :  { %v500_v14 = vld [vmem:[%s2036_s10 + $0x1c0] sm:$0xff] }
 0x1d1   :  { %v432_v17 = vpop.f32.mrf.mxu1 }
 0x1d2   :  { %v433_v19 = vadd.f32 %v1286_v16, %v432_v17  ;;  %v485_v16 = vld [vmem:[%s2036_s10 + $0x148] sm:$0xff]  ;;  %v484_v17 = vld [vmem:[%s2036_s10 + $0x140] sm:$0xff] }
 0x1d3   :  { %v1369_v20 = vpop.f32.mrf.mxu1 }
 0x1d4   :  { %v436_v21 = vadd.f32 %v433_v19, %v237_v18  ;;  %v470_v18 = vld [vmem:[%s2036_s10 + $0xd0] sm:$0xff]  ;;  %v469_v19 = vld [vmem:[%s2036_s10 + $0xc8] sm:$0xff]  ;;  %v455_v20 = vld [vmem:[%s2036_s10 + $0x58] sm:$0xff] }
 0x1d6   :  { %v1288_v22 = vmul.f32 -1.442695, %v436_v21 }
 0x1d8   :  { %1390 = vpow2.f32 %v1288_v22  ;;  %v533_v22 = vld [vmem:[%s2036_s10 + $0x2c8] sm:$0xff] }
 0x1e5   :  { %v1391_v23 = vpop.eup %1390 }
 0x1e6   :  { %v440_v24 = vadd.f32 1.0, %v1391_v23  ;;  %v518_v23 = vld [vmem:[%s2036_s10 + $0x250] sm:$0xff] }
 0x1e8   :  { %1392 = vrcp.f32 %v440_v24  ;;  %v503_v24 = vld [vmem:[%s2036_s10 + $0x1d8] sm:$0xff] }
 0x1f5   :  { %v1393_v25 = vpop.eup %1392 }
 0x1f6   :  { %v1764_v26 = vmul.f32 %v1393_v25, %v436_v21  ;;  %v454_v21 = vld [vmem:[%s2036_s10 + $0x50] sm:$0xff]  ;;  %v488_v25 = vld [vmem:[%s2036_s10 + $0x160] sm:$0xff] }
 0x1f8   :  { %1289 = vmatmul.mubr.msk.f32.vlgmr.msra.gmra.mxu1 %vm79_vm1, %v1764_v26  ;;  %1291 = vmatmul.mubr.msk.f32.vlgmr.msra.gmra.mxu0 %vm79_vm1, %v1764_v26 }
 0x1f9   :  { %708 = vmatpush1.msra.mxu1 %v521_v27  ;;  %921 = vmatpush1.msra.mxu0 %v527_v28  ;;  %v473_v27 = vld [vmem:[%s2036_s10 + $0xe8] sm:$0xff]  ;;  %v458_v28 = vld [vmem:[%s2036_s10 + $0x70] sm:$0xff] }
 0x1fa   :  { %709 = vmatprep.subr.mxu1 %v507_v29  ;;  %922 = vmatprep.subr.mxu0 %v513_v30  ;;  %v538_v29 = vlaneseq }
 0x1fb   :  { %710 = vmatpush1.msra.mxu1 %v506_v31  ;;  %923 = vmatpush1.msra.mxu0 %v512_v32 }
 0x1fc   :  { %711 = vmatprep.subr.mxu1 %v492_v33  ;;  %924 = vmatprep.subr.mxu0 %v498_v34  ;;  %v1987_v30 = vshrl.u32 %v538_v29, 7  ;;  %v534_v34 = vld [vmem:[%s2037_s11] sm:$0xff] }
 0x1fd   :  { %712 = vmatpush1.msra.mxu1 %v491_v35  ;;  %925 = vmatpush1.msra.mxu0 %v497_v36  ;;  %v1442_v36 = vmov 1983009808  }
 0x1fe   :  { %713 = vmatprep.subr.mxu1 %v477_v37  ;;  %926 = vmatprep.subr.mxu0 %v483_v38  ;;  %v544_v31 = vsub.s32 1, %v1987_v30  ;;  %v540_v33 = vsub.s32 0, %v1987_v30  ;;  %v1201_v37 = vunpack.c.l.s4 %v1442_v36  ;;  %v552_v38 = vsub.s32 3, %v1987_v30 }
 0x1ff   :  { %714 = vmatpush1.msra.mxu1 %v476_v39  ;;  %927 = vmatpush1.msra.mxu0 %v482_v40 }
 0x200   :  { %715 = vmatprep.subr.mxu1 %v462_v41  ;;  %928 = vmatprep.subr.mxu0 %v468_v42  ;;  %v545_v35 = vrot.slane %v534_v34, %v544_v31  ;;  %v541_v39 = vrot.slane %v534_v34, %v540_v33  ;;  %v1202_v41 = vunpack.c.0.s8 %v1201_v37 }
 0x201   :  { %716 = vmatpush1.msra.mxu1 %v461_v43  ;;  %929 = vmatpush1.msra.mxu0 %v467_v44  ;;  %v553_v43 = vrot.slane %v534_v34, %v552_v38 }
 0x202   :  { %717 = vmatprep.subr.mxu1 %v447_v45  ;;  %930 = vmatprep.subr.mxu0 %v453_v46 }
 0x203   :  { %718 = vmatpush1.msra.mxu1 %v446_v47  ;;  %751 = vmatprep.mubr.f32.mxu1 %v1440_v0 }
 0x204   :  { %931 = vmatpush1.msra.mxu0 %v452_v48  ;;  %964 = vmatprep.mubr.f32.mxu0 %v1440_v0  ;;  %v1997_v48 = vsub.s32 %v1202_v41, %v1987_v30 }
 0x205   :  { %1290 = vmatmul.mubr.msk.f32.vlgmr.msra.gmra.mxu1 %vm79_vm1, %v1764_v26  ;;  %849 = vmatprep.subr.mxu1 %v526_v49 }
 0x206   :  { %1293 = vmatmul.mubr.msk.f32.vlgmr.msra.gmra.mxu0 %vm79_vm1, %v1764_v26  ;;  %1062 = vmatprep.subr.mxu0 %v532_v50 }
 0x207   :  { %850 = vmatpush1.msra.mxu1 %v525_v51  ;;  %1063 = vmatpush1.msra.mxu0 %v531_v52  ;;  %v560_v51 = vsub.s32 5, %v1987_v30 }
 0x208   :  { %851 = vmatprep.subr.mxu1 %v511_v53  ;;  %1064 = vmatprep.subr.mxu0 %v517_v54  ;;  %v556_v54 = vsub.s32 4, %v1987_v30 }
 0x209   :  { %852 = vmatpush1.msra.mxu1 %v510_v55  ;;  %1065 = vmatpush1.msra.mxu0 %v516_v56 }
 0x20a   :  { %853 = vmatprep.subr.mxu1 %v496_v57  ;;  %1066 = vmatprep.subr.mxu0 %v502_v58  ;;  %v561_v57 = vrot.slane %v534_v34, %v560_v51 }
 0x20b   :  { %854 = vmatpush1.msra.mxu1 %v495_v59  ;;  %1067 = vmatpush1.msra.mxu0 %v501_v60  ;;  %v564_v59 = vsub.s32 6, %v1987_v30  ;;  %v568_v60 = vsub.s32 7, %v1987_v30 }
 0x20c   :  { %855 = vmatprep.subr.mxu1 %v481_v61  ;;  %1068 = vmatprep.subr.mxu0 %v487_v62  ;;  %v557_v62 = vrot.slane %v534_v34, %v556_v54 }
 0x20d   :  { %856 = vmatpush1.msra.mxu1 %v480_v63  ;;  %1069 = vmatpush1.msra.mxu0 %v486_v1  ;;  %v565_v1 = vrot.slane %v534_v34, %v564_v59 }
 0x20e   :  { %857 = vmatprep.subr.mxu1 %v466_v2  ;;  %1070 = vmatprep.subr.mxu0 %v472_v3  ;;  %v569_v2 = vrot.slane %v534_v34, %v568_v60 }
 0x20f   :  { %858 = vmatpush1.msra.mxu1 %v465_v4  ;;  %1071 = vmatpush1.msra.mxu0 %v471_v5 }
 0x210   :  { %859 = vmatprep.subr.mxu1 %v451_v6  ;;  %1072 = vmatprep.subr.mxu0 %v457_v7 }
 0x211   :  { %860 = vmatpush1.msra.mxu1 %v450_v8  ;;  %893 = vmatprep.mubr.f32.mxu1 %v1440_v0 }
 0x212   :  { %1073 = vmatpush1.msra.mxu0 %v456_v9  ;;  %1106 = vmatprep.mubr.f32.mxu0 %v1440_v0 }
 0x213   :  { %1292 = vmatmul.mubr.msk.f32.vlgmr.msra.gmra.mxu1 %vm79_vm1, %v1764_v26  ;;  %991 = vmatprep.subr.mxu1 %v530_v10 }
 0x214   :  { %1295 = vmatmul.mubr.msk.f32.vlgmr.msra.gmra.mxu0 %vm79_vm1, %v1764_v26  ;;  %992 = vmatpush1.msra.mxu1 %v529_v11  ;;  %v535_v11 = vld [vmem:[%s2037_s11 + $0x8] sm:$0xff] }
 0x215   :  { %993 = vmatprep.subr.mxu1 %v515_v12  ;;  %1035 = vmatprep.mubr.f32.mxu1 %v1440_v0 }
 0x216   :  { %994 = vmatpush1.msra.mxu1 %v514_v13  ;;  %v577_v13 = vrot.slane %v535_v11, %v544_v31  ;;  %v589_v31 = vrot.slane %v535_v11, %v556_v54 }
 0x217   :  { %995 = vmatprep.subr.mxu1 %v500_v14 }
 0x218   :  { %996 = vmatpush1.msra.mxu1 %v499_v15 }
 0x219   :  { %997 = vmatprep.subr.mxu1 %v485_v16  ;;  %v573_v16 = vrot.slane %v535_v11, %v540_v33 }
 0x21a   :  { %998 = vmatpush1.msra.mxu1 %v484_v17 }
 0x21b   :  { %999 = vmatprep.subr.mxu1 %v470_v18 }
 0x21c   :  { %1000 = vmatpush1.msra.mxu1 %v469_v19 }
 0x21d   :  { %1001 = vmatprep.subr.mxu1 %v455_v20  ;;  %v585_v20 = vrot.slane %v535_v11, %v552_v38 }
 0x21e   :  { %1002 = vmatpush1.msra.mxu1 %v454_v21 }
 0x21f   :  { %1294 = vmatmul.mubr.msk.f32.vlgmr.msra.gmra.mxu1 %vm79_vm1, %v1764_v26  ;;  %1370 = vmatprep.subr.mxu1 %v1440_v0 }
 0x220   :  { %1371 = vmatpush3.msra.mxu1 %v533_v22  ;;  %1382 = vmatprep.mubr.msk.f32.mxu1 %vm1441_vm0, %v1440_v0 }
 0x221   :  { %1372 = vmatprep.subr.mxu1 %v1440_v0 }
 0x222   :  { %1373 = vmatpush3.msra.mxu1 %v518_v23 }
 0x223   :  { %1374 = vmatprep.subr.mxu1 %v1440_v0 }
 0x224   :  { %1375 = vmatpush3.msra.mxu1 %v503_v24 }
 0x225   :  { %1376 = vmatprep.subr.mxu1 %v1440_v0 }
 0x226   :  { %1377 = vmatpush3.msra.mxu1 %v488_v25 }
 0x227   :  { %1378 = vmatprep.subr.mxu1 %v1440_v0 }
 0x228   :  { %1379 = vmatpush3.msra.mxu1 %v473_v27  ;;  %v593_v27 = vrot.slane %v535_v11, %v560_v51 }
 0x229   :  { %1380 = vmatprep.subr.mxu1 %v1440_v0  ;;  %v548_v0 = vsub.s32 2, %v1987_v30 }
 0x22a   :  { %1381 = vmatpush3.msra.mxu1 %v458_v28 }
 0x22b   :  { %1383 = vmatmul.mubr.msk.f32.vlgmr.msra.gmra.mxu1 %vm79_vm1, %v1764_v26  ;;  %v549_v42 = vrot.slane %v534_v34, %v548_v0  ;;  %v581_v19 = vrot.slane %v535_v11, %v548_v0  ;;  %v597_v0 = vrot.slane %v535_v11, %v564_v59 }
 0x2b8   :  { %v682_v32 = vpop.f32.mrf.mxu1  ;;  %v824_v53 = vpop.f32.mrf.mxu0 }
 0x2b9   :  { %v683_v45 = vadd.f32 %v682_v32, %v541_v39  ;;  %v825_v4 = vadd.f32 %v824_v53, %v557_v62 }
 0x2ba   :  { %v684_v26 = vpop.f32.mrf.mxu1  ;;  %v826_v61 = vpop.f32.mrf.mxu0 }
 0x2bb   :  { %v685_v40 = vadd.f32 %v684_v26, %v545_v35  ;;  %v827_v63 = vadd.f32 %v826_v61, %v561_v57 }
 0x2bd   :  { %v1198_v47 = vcombine.low %v683_v45, %v685_v40  ;;  %v1215_v6 = vcombine.low %v825_v4, %v827_v63 }
 0x2bf   :  { %v1206_v55 = vrot.slane %v1198_v47, %v1997_v48  ;;  %v1223_v12 = vrot.slane %v1215_v6, %v1997_v48 }
 0x2c5   :  { %v753_v44 = vpop.f32.mrf.mxu1 }
 0x2c6   :  { %v754_v49 = vadd.f32 %v753_v44, %v549_v42  ;;  %v966_v9 = vpop.f32.mrf.mxu0 }
 0x2c7   :  { %v755_v46 = vpop.f32.mrf.mxu1  ;;  %v967_v23 = vadd.f32 %v966_v9, %v573_v16 }
 0x2c8   :  { %v756_v50 = vadd.f32 %v755_v46, %v553_v43  ;;  %v968_v15 = vpop.f32.mrf.mxu0 }
 0x2c9   :  { %v969_v18 = vadd.f32 %v968_v15, %v577_v13 }
 0x2ca   :  { %v1199_v52 = vcombine.low %v754_v49, %v756_v50 }
 0x2cb   :  { %v1232_v25 = vcombine.low %v967_v23, %v969_v18 }
 0x2cc   :  { %v1213_v56 = vrot.slane %v1199_v52, %v1997_v48 }
 0x2cd   :  { %v1240_v33 = vrot.slane %v1232_v25, %v1997_v48 }
 0x2ce   :  { %v1214_v58 = vcombine.low %v1206_v55, %v1213_v56 }
 0x2d0   :  { %1269 = vst [vmem:[%s2038_s12] sm:$0xff] %v1214_v58 }
 0x2d3   :  { %v895_v3 = vpop.f32.mrf.mxu1 }
 0x2d4   :  { %v896_v7 = vadd.f32 %v895_v3, %v565_v1  ;;  %v1108_v21 = vpop.f32.mrf.mxu0 }
 0x2d5   :  { %v897_v5 = vpop.f32.mrf.mxu1  ;;  %v1109_v36 = vadd.f32 %v1108_v21, %v589_v31 }
 0x2d6   :  { %v898_v8 = vadd.f32 %v897_v5, %v569_v2  ;;  %v1110_v30 = vpop.f32.mrf.mxu0 }
 0x2d7   :  { %v1111_v34 = vadd.f32 %v1110_v30, %v593_v27 }
 0x2d8   :  { %v1216_v10 = vcombine.low %v896_v7, %v898_v8 }
 0x2d9   :  { %v1249_v38 = vcombine.low %v1109_v36, %v1111_v34 }
 0x2da   :  { %v1230_v14 = vrot.slane %v1216_v10, %v1997_v48 }
 0x2db   :  { %v1256_v41 = vrot.slane %v1249_v38, %v1997_v48 }
 0x2dc   :  { %v1231_v17 = vcombine.low %v1223_v12, %v1230_v14 }
 0x2de   :  { %1270 = vst [vmem:[%s2038_s12 + $0x8] sm:$0xff] %v1231_v17 }
 0x2df   :  { %v1037_v22 = vpop.f32.mrf.mxu1 }
 0x2e0   :  { %v1038_v28 = vadd.f32 %v1037_v22, %v581_v19 }
 0x2e1   :  { %v1039_v24 = vpop.f32.mrf.mxu1 }
 0x2e2   :  { %v1040_v29 = vadd.f32 %v1039_v24, %v585_v20 }
 0x2e4   :  { %v1233_v32 = vcombine.low %v1038_v28, %v1040_v29 }
 0x2e6   :  { %v1247_v35 = vrot.slane %v1233_v32, %v1997_v48 }
 0x2e8   :  { %v1248_v37 = vcombine.low %v1240_v33, %v1247_v35 }
 0x2ea   :  { %1271 = vst [vmem:[%s2038_s12 + $0x10] sm:$0xff] %v1248_v37 }
 0x2eb   :  { %v1179_v26 = vpop.f32.mrf.mxu1 }
 0x2ec   :  { %v1180_v39 = vadd.f32 %v1179_v26, %v597_v0 }
 0x2ed   :  { %v1384_v40 = vpop.f32.mrf.mxu1 }
 0x2ee   :  { %v1263_v42 = vrot.slane %v1180_v39, %v1997_v48 }
 0x2f0   :  { %v1264_v43 = vcombine.low %v1256_v41, %v1263_v42 }
 0x2f2   :  { %1272 = vst [vmem:[%s2038_s12 + $0x18] sm:$0x3f] %v1264_v43 }
 0x2f3   :  { %1277 = vsyncpa [#allocation3], 1 }
 0x2f4   :  { %1278 = vsyncpa [#allocation5], 1 }

// kernel: diffusion_head_forward.4
= control target key start
LH: loop header
LB: loop body
LE: loop exit
PB: predicated region body
PF: predicated region fallthrough
CT: control target
= control target key end

     0   :  { %s8203_s0 = inlined_call_operand.vmem [shape: f32[2,8,12], index: 0, kind: input, shape index: {}]   ;;  %s8204_s1 = inlined_call_operand.vmem [shape: f32[12,48], index: 1, kind: input, shape index: {}]   ;;  %s8205_s2 = inlined_call_operand.hbm [shape: f32[1,48], index: 2, kind: input, shape index: {}]   ;;  %s8206_s3 = inlined_call_operand.vmem [shape: f32[8,48], index: 3, kind: input, shape index: {}]   ;;  %s8207_s4 = inlined_call_operand.vmem [shape: f32[2,16,48], index: 4, kind: input, shape index: {}]   ;;  %s8208_s5 = inlined_call_operand.vmem [shape: f32[2,8,48], index: 5, kind: input, shape index: {}]   ;;  %s8209_s6 = inlined_call_operand.vmem [shape: f32[2,8,48], index: 6, kind: input, shape index: {}]   ;;  %s8210_s7 = inlined_call_operand.vmem [shape: f32[2,16,48], index: 7, kind: input, shape index: {}]   ;;  %s8211_s8 = inlined_call_operand.vmem [shape: f32[2,16,48], index: 8, kind: input, shape index: {}]   ;;  %s8212_s9 = inlined_call_operand.vmem [shape: f32[48,48], index: 9, kind: input, shape index: {}]   ;;  %s8213_s10 = inlined_call_operand.vmem [shape: f32[2,10,4,48], index: 10, kind: input, shape index: {}]   ;;  %s8214_s11 = inlined_call_operand.vmem [shape: f32[2,48,48], index: 11, kind: input, shape index: {}]   ;;  %s8215_s12 = inlined_call_operand.vmem [shape: f32[2,1,48], index: 12, kind: input, shape index: {}]   ;;  %s8216_s13 = inlined_call_operand.vmem [shape: f32[2,48,48], index: 13, kind: input, shape index: {}]   ;;  %s8217_s14 = inlined_call_operand.hbm [shape: f32[2,1,48], index: 14, kind: input, shape index: {}]   ;;  %s8218_s15 = inlined_call_operand.vmem [shape: f32[2,48,48], index: 15, kind: input, shape index: {}]   ;;  %s8219_s16 = inlined_call_operand.hbm [shape: f32[2,1,48], index: 16, kind: input, shape index: {}]   ;;  %s8220_s17 = inlined_call_operand.vmem [shape: f32[2,48,48], index: 17, kind: input, shape index: {}]   ;;  %s8221_s18 = inlined_call_operand.hbm [shape: f32[2,1,48], index: 18, kind: input, shape index: {}]   ;;  %s8222_s19 = inlined_call_operand.hbm [shape: f32[2,1,48], index: 19, kind: input, shape index: {}]   ;;  %s8223_s20 = inlined_call_operand.hbm [shape: f32[2,1,48], index: 20, kind: input, shape index: {}]   ;;  %s8224_s21 = inlined_call_operand.vmem [shape: f32[2,48,48], index: 21, kind: input, shape index: {}]   ;;  %s8225_s22 = inlined_call_operand.hbm [shape: f32[2,1,48], index: 22, kind: input, shape index: {}]   ;;  %s8226_s23 = inlined_call_operand.vmem [shape: f32[2,48,48], index: 23, kind: input, shape index: {}]   ;;  %s8227_s24 = inlined_call_operand.hbm [shape: f32[2,1,48], index: 24, kind: input, shape index: {}]   ;;  %s8228_s25 = inlined_call_operand.hbm [shape: f32[2,1,48], index: 25, kind: input, shape index: {}]   ;;  %s8229_s26 = inlined_call_operand.hbm [shape: f32[2,1,48], index: 26, kind: input, shape index: {}]   ;;  %s8230_s27 = inlined_call_operand.vmem [shape: f32[2,8,48], index: 27, kind: output, shape index: {}]  }
   0x1   :  { %8248 = sst [smem:[#allocation28_spill]] %s8203_s0 }
   0x2   :  { %8249 = sst [smem:[#allocation29_spill]] %s8204_s1 }
   0x3   :  { %8250 = sst [smem:[#allocation30_spill]] %s8205_s2 }
   0x4   :  { %8251 = sst [smem:[#allocation31_spill]] %s8206_s3 }
   0x5   :  { %8252 = sst [smem:[#allocation32_spill]] %s8207_s4 }
   0x6   :  { %8253 = sst [smem:[#allocation33_spill]] %s8208_s5 }
   0x7   :  { %8254 = sst [smem:[#allocation34_spill]] %s8209_s6 }
   0x8   :  { %8255 = sst [smem:[#allocation35_spill]] %s8210_s7 }
   0x9   :  { %8256 = sst [smem:[#allocation36_spill]] %s8211_s8 }
   0xa   :  { %8257 = sst [smem:[#allocation37_spill]] %s8212_s9 }
   0xb   :  { %8258 = sst [smem:[#allocation38_spill]] %s8213_s10 }
   0xc   :  { %8259 = sst [smem:[#allocation39_spill]] %s8214_s11 }
   0xd   :  { %8260 = sst [smem:[#allocation40_spill]] %s8215_s12 }
   0xe   :  { %8261 = sst [smem:[#allocation41_spill]] %s8216_s13 }
   0xf   :  { %8262 = sst [smem:[#allocation42_spill]] %s8217_s14 }
  0x10   :  { %8263 = sst [smem:[#allocation43_spill]] %s8219_s16 }
  0x11   :  { %8264 = sst [smem:[#allocation44_spill]] %s8221_s18 }
  0x12   :  { %8265 = sst [smem:[#allocation45_spill]] %s8224_s21 }
  0x13   :  { %8266 = sst [smem:[#allocation46_spill]] %s8226_s23 }
  0x14   :  { %8267 = sst [smem:[#allocation47_spill]] %s8230_s27 }
  0x15   :  { %32 = vsyncpa [#allocation4], 0 }
  0x16   :  { %33 = vsyncpa [#allocation7], 0 }
  0x17   :  { %34 = vsyncpa [#allocation10], 0 }
  0x18   :  { %35 = vsyncpa [#allocation13], 0 }
  0x19   :  { %36 = vsyncpa [#allocation16], 0 }
  0x1a   :  { %37 = vsyncpa [#allocation19], 0  ;;  %s7047_s7 = smov 0   ;;  %s7049_s4 = smov 0  }
  0x1b   :  { %s7051_s8 = smov 0  }
  0x1c LB: > { %s7063_s30 = sadd.s32 4294967295, %s6889_s8   ;;  %s7066_s9 = sadd.s32 1, %s6889_s8   ;;  %s6889_s8 = sphi %s7051_s8, %s8298_s8   ;;  %s6885_s4 = sphi %s7049_s4, %s8301_s4   ;;  %s6881_s7 = sphi %s7047_s7, %s8300_s7  }
  0x1d   : > { %8268 = sst [smem:[#allocation26_spill]] %s7066_s9  ;;  %s257_s5 = ssub.s32 %s6889_s8, %s7066_s9 }
  0x1e   : > { %s260_s28 = sadd.s32 1, %s6885_s4  ;;  %p258_p0 = scmp.eq.s32.totalorder %s257_s5, 0 }
  0x1f   : > { %p267_p1 = scmp.ne.s32.totalorder %s6885_s4, %s6881_s7  ;;  %p268_p2 = scmp.eq.s32.totalorder %s6889_s8, 0 }
  0x20   : > { %p5470_p3 = scmp.ge.s32.totalorder %s6889_s8, 1  ;;  %p641_p5 = scmp.lt.s32.totalorder %s6889_s8, 3 }
  0x21   : > { %s7076_s0 = scalar_select %p258_p0, %s6885_s4, %s260_s28  }
  0x22   : > { %p7078_p4 = por %p268_p2, %p267_p1  ;;  %p6435_p7 = scmp.eq.s32.totalorder %s7063_s30, 0 }
  0x23   : > { %8269 = sst [smem:[#allocation27_spill]] %s7076_s0  ;;  %p7085_p8 = pnand %p5470_p3, %p641_p5 }
  0x24   : > { %s6891_s1 = smov [#allocation6]   ;;  %s6892_s2 = smov [#allocation9]  }
  0x25   : > { %s700_s6 = sshll.u32 %s6891_s1, 4  ;;  %p6404_p9 = pneg %p7085_p8  ;;  %s701_s6 = int_to_ptr.vmem [resolvable:$true] %s700_s6 }
  0x26   : > { %s732_s3 = sshll.u32 %s6892_s2, 4  ;;  %s6893_s5 = smov [#allocation12]   ;;  %s733_s3 = int_to_ptr.vmem [resolvable:$true] %s732_s3 }
  0x27   : > { %p7093_p10 = pnand %p6435_p7, %p6404_p9  ;;  %s758_s28 = sshll.u32 %s6893_s5, 4  ;;  %s759_s28 = int_to_ptr.vmem [resolvable:$true] %s758_s28 }
  0x28   : > { %s6594_s1 = scalar_lea.vmem %s701_s6, 32  ;;  %p6602_p1 = scmp.lt.s32.totalorder %s701_s6, %s701_s6 }
  0x29   : > { %p7099_p11 = pneg %p7093_p10  ;;  %p6595_p12 = scmp.ne.s32.totalorder %s701_s6, %s6594_s1 }
  0x2a   : > { %p6603_p2 = scmp.lt.s32.totalorder %s6594_s1, %s6594_s1 }
  0x2b   : > { %p6597_p13 = pnand %p6595_p12, %p7099_p11 }
  0x2c   : > { %p6604_p3 = por %p6603_p2, %p6602_p1 }
  0x2d   : > { %p6598_p0 = pneg %p6597_p13 }
  0x2f   : > { %p6605_p5 = pnand %p6604_p3, %p6598_p0 }
  0x31   : > { %6608 = shalt.err (!%p6605_p5)
}
  0x32   : > { %s8242_s2 = smov 16   ;;  %s8244_s5 = smov 1  }
  0x33   : > { %s8274_s14 = sld [smem:[#allocation42_spill]]  ;;  %s6620_s23 = scalar_lea.vmem %s733_s3, 32 }
  0x34   : > { %p6621_p9 = scmp.ne.s32.totalorder %s733_s3, %s6620_s23  ;;  %p6628_p1 = scmp.lt.s32.totalorder %s733_s3, %s733_s3 }
  0x35   : > { %p6629_p0 = scmp.lt.s32.totalorder %s6620_s23, %s6620_s23 }
  0x36   : > { %p6623_p12 = pnand %p6621_p9, %p7099_p11 }
  0x37   : > { %p6630_p2 = por %p6629_p0, %p6628_p1 }
  0x38   : > { %p6624_p13 = pneg %p6623_p12 }
  0x39   : > { %6410 = dma.hbm_to_vmem [thread:$0]  (!%p7093_p10), %s8274_s14, 32, %s701_s6, [#allocation7], %s8242_s2, %s8242_s2, %s8244_s5  }
  0x3a   : > { %p6631_p3 = pnand %p6630_p2, %p6624_p13 }
  0x3c   : > { %6634 = shalt.err (!%p6631_p3)
}
  0x3d   : > { %s8275_s18 = sld [smem:[#allocation44_spill]]  ;;  %s6646_s27 = scalar_lea.vmem %s759_s28, 32 }
  0x3e   : > { %p6647_p5 = scmp.ne.s32.totalorder %s759_s28, %s6646_s27  ;;  %p6654_p6 = scmp.lt.s32.totalorder %s759_s28, %s759_s28 }
  0x3f   : > { %p6655_p1 = scmp.lt.s32.totalorder %s6646_s27, %s6646_s27 }
  0x40   : > { %p6649_p9 = pnand %p6647_p5, %p7099_p11 }
  0x41   : > { %p6656_p13 = por %p6655_p1, %p6654_p6 }
  0x42   : > { %p6650_p12 = pneg %p6649_p9 }
  0x43   : > { %6416 = dma.hbm_to_vmem [thread:$0]  (!%p7093_p10), %s8275_s18, 32, %s733_s3, [#allocation10], %s8242_s2, %s8242_s2, %s8244_s5  }
  0x44   : > { %p6657_p0 = pnand %p6656_p13, %p6650_p12 }
  0x46   : > { %6660 = shalt.err (!%p6657_p0)
}
  0x47   : > { %6422 = dma.hbm_to_vmem [thread:$0]  (!%p7093_p10), %s8223_s20, 32, %s759_s28, [#allocation13], %s8242_s2, %s8242_s2, %s8244_s5  }
  0x48   : > { %s6896_s9 = smov [#allocation15]   ;;  %s6897_s3 = smov [#allocation3]  }
  0x49   : > { %s790_s6 = sshll.u32 %s6896_s9, 4  ;;  %s660_s1 = sshll.u32 %s6897_s3, 4  ;;  %s791_s6 = int_to_ptr.vmem [resolvable:$true] %s790_s6  ;;  %s661_s1 = int_to_ptr.vmem [resolvable:$true] %s660_s1 }
  0x4a   : > { %s6672_s14 = scalar_lea.vmem %s791_s6, 32  ;;  %p6680_p5 = scmp.lt.s32.totalorder %s791_s6, %s791_s6 }
  0x4b   : > { %p6673_p2 = scmp.ne.s32.totalorder %s791_s6, %s6672_s14  ;;  %p6681_p9 = scmp.lt.s32.totalorder %s6672_s14, %s6672_s14 }
  0x4d   : > { %p6675_p6 = pnand %p6673_p2, %p7099_p11  ;;  %p6682_p12 = por %p6681_p9, %p6680_p5 }
  0x4f   : > { %p6676_p3 = pneg %p6675_p6 }
  0x51   : > { %p6683_p1 = pnand %p6682_p12, %p6676_p3 }
  0x53   : > { %6686 = shalt.err (!%p6683_p1)
}
  0x54   : > { %6428 = dma.hbm_to_vmem [thread:$0]  (!%p7093_p10), %s8227_s24, 32, %s791_s6, [#allocation16], %s8242_s2, %s8242_s2, %s8244_s5  }
  0x55   : > { %s6698_s23 = scalar_lea.vmem %s661_s1, 16  ;;  %s6705_s14 = scalar_lea.vmem %s661_s1, 32 }
  0x56   : > { %p6699_p13 = scmp.ne.s32.totalorder %s661_s1, %s6698_s23  ;;  %p6706_p6 = scmp.lt.s32.totalorder %s661_s1, %s661_s1 }
  0x57   : > { %p6707_p3 = scmp.lt.s32.totalorder %s6705_s14, %s6698_s23 }
  0x58   : > { %p6701_p0 = pnand %p6699_p13, %p7099_p11 }
  0x59   : > { %p6708_p5 = por %p6707_p3, %p6706_p6 }
  0x5a   : > { %p6702_p2 = pneg %p6701_p0 }
  0x5c   : > { %p6709_p9 = pnand %p6708_p5, %p6702_p2 }
  0x5e   : > { %6712 = shalt.err (!%p6709_p9)
}
  0x5f   : > { %s8276_s3 = sld [smem:[#allocation30_spill]]  ;;  %s6898_s6 = smov [#allocation8]  }
  0x60   : > { %s716_s28 = sshll.u32 %s6898_s6, 4  ;;  %s6899_s27 = smov [#allocation11]   ;;  %s717_s28 = int_to_ptr.vmem [resolvable:$true] %s716_s28 }
  0x61   : > { %s745_s2 = sshll.u32 %s6899_s27, 4  ;;  %s6724_s5 = scalar_lea.vmem %s717_s28, 32  ;;  %s746_s2 = int_to_ptr.vmem [resolvable:$true] %s745_s2 }
  0x62   : > { %p6725_p12 = scmp.ne.s32.totalorder %s717_s28, %s6724_s5  ;;  %p6732_p0 = scmp.lt.s32.totalorder %s717_s28, %s717_s28 }
  0x63   : > { %p6733_p2 = scmp.lt.s32.totalorder %s6724_s5, %s6724_s5 }
  0x64   : > { %p6727_p1 = pnand %p6725_p12, %p7099_p11 }
  0x65   : > { %6407 = dma.hbm_to_vmem [thread:$0]  (!%p7093_p10), %s8276_s3, 16, %s661_s1, [#allocation4]  }
  0x66   : > { %p6728_p13 = pneg %p6727_p1  ;;  %p6734_p6 = por %p6733_p2, %p6732_p0 }
  0x68   : > { %p6735_p3 = pnand %p6734_p6, %p6728_p13 }
  0x6a   : > { %6738 = shalt.err (!%p6735_p3)
}
  0x6b   : > { %s8277_s23 = smov 1   ;;  %s8278_s14 = smov 16  }
  0x6c   : > { %s8279_s16 = sld [smem:[#allocation43_spill]]  ;;  %s6750_s9 = scalar_lea.vmem %s746_s2, 32 }
  0x6d   : > { %p6751_p5 = scmp.ne.s32.totalorder %s746_s2, %s6750_s9  ;;  %p6758_p1 = scmp.lt.s32.totalorder %s746_s2, %s746_s2 }
  0x6e   : > { %p6759_p0 = scmp.lt.s32.totalorder %s6750_s9, %s6750_s9 }
  0x6f   : > { %p6753_p9 = pnand %p6751_p5, %p7099_p11 }
  0x70   : > { %p6760_p13 = por %p6759_p0, %p6758_p1 }
  0x71   : > { %p6754_p12 = pneg %p6753_p9 }
  0x72   : > { %6413 = dma.hbm_to_vmem [thread:$0]  (!%p7093_p10), %s8279_s16, 32, %s717_s28, [#allocation7], %s8278_s14, %s8278_s14, %s8277_s23  }
  0x73   : > { %p6761_p2 = pnand %p6760_p13, %p6754_p12 }
  0x75   : > { %6764 = shalt.err (!%p6761_p2)
}
  0x76   : > { %6419 = dma.hbm_to_vmem [thread:$0]  (!%p7093_p10), %s8222_s19, 32, %s746_s2, [#allocation10], %s8278_s14, %s8278_s14, %s8277_s23  }
  0x77   : > { %s6900_s6 = smov [#allocation14]   ;;  %s6901_s27 = smov [#allocation17]  }
  0x78   : > { %s774_s28 = sshll.u32 %s6900_s6, 4  ;;  %s803_s1 = sshll.u32 %s6901_s27, 4  ;;  %s775_s28 = int_to_ptr.vmem [resolvable:$true] %s774_s28  ;;  %s804_s1 = int_to_ptr.vmem [resolvable:$true] %s803_s1 }
  0x79   : > { %s6776_s21 = scalar_lea.vmem %s775_s28, 32  ;;  %p6784_p9 = scmp.lt.s32.totalorder %s775_s28, %s775_s28 }
  0x7a   : > { %p6777_p6 = scmp.ne.s32.totalorder %s775_s28, %s6776_s21  ;;  %p6785_p12 = scmp.lt.s32.totalorder %s6776_s21, %s6776_s21 }
  0x7c   : > { %p6779_p3 = pnand %p6777_p6, %p7099_p11  ;;  %p6786_p1 = por %p6785_p12, %p6784_p9 }
  0x7e   : > { %p6780_p5 = pneg %p6779_p3 }
  0x80   : > { %p6787_p0 = pnand %p6786_p1, %p6780_p5 }
  0x82   : > { %6790 = shalt.err (!%p6787_p0)
}
  0x83   : > { %6425 = dma.hbm_to_vmem [thread:$0]  (!%p7093_p10), %s8225_s22, 32, %s775_s28, [#allocation13], %s8278_s14, %s8278_s14, %s8277_s23  }
  0x84   : > { %s6802_s5 = scalar_lea.vmem %s804_s1, 32  ;;  %p6810_p3 = scmp.lt.s32.totalorder %s804_s1, %s804_s1 }
  0x85   : > { %p6803_p13 = scmp.ne.s32.totalorder %s804_s1, %s6802_s5  ;;  %p6811_p9 = scmp.lt.s32.totalorder %s6802_s5, %s6802_s5 }
  0x87   : > { %p6805_p2 = pnand %p6803_p13, %p7099_p11  ;;  %p6812_p5 = por %p6811_p9, %p6810_p3 }
  0x89   : > { %p6806_p6 = pneg %p6805_p2 }
  0x8b   : > { %p6813_p12 = pnand %p6812_p5, %p6806_p6 }
  0x8d   : > { %6816 = shalt.err (!%p6813_p12)
}
  0x8e   : > { %6431 = dma.hbm_to_vmem [thread:$0]  (!%p7093_p10), %s8228_s25, 32, %s804_s1, [#allocation16], %s8278_s14, %s8278_s14, %s8277_s23  }
  0x8f   : > { %s6902_s28 = smov [#allocation18]  }
  0x90   : > { %s816_s27 = sshll.u32 %s6902_s28, 4  ;;  %s817_s27 = int_to_ptr.vmem [resolvable:$true] %s816_s27 }
  0x91   : > { %s6828_s21 = scalar_lea.vmem %s817_s27, 32  ;;  %p6836_p2 = scmp.lt.s32.totalorder %s817_s27, %s817_s27 }
  0x92   : > { %p6829_p1 = scmp.ne.s32.totalorder %s817_s27, %s6828_s21  ;;  %p6837_p6 = scmp.lt.s32.totalorder %s6828_s21, %s6828_s21 }
  0x94   : > { %p6831_p0 = pnand %p6829_p1, %p7099_p11  ;;  %p6838_p3 = por %p6837_p6, %p6836_p2 }
  0x96   : > { %p6832_p13 = pneg %p6831_p0 }
  0x98   : > { %p6839_p9 = pnand %p6838_p3, %p6832_p13 }
  0x9a   : > { %6842 = shalt.err (!%p6839_p9)
}
  0x9b   : > { %6434 = dma.hbm_to_vmem [thread:$0]  (!%p7093_p10), %s8229_s26, 32, %s817_s27, [#allocation19], %s8278_s14, %s8278_s14, %s8277_s23  }
  0x9c   : > { %p5481_p5 = scmp.ge.s32.totalorder %s6889_s8, 2 }
  0x9e   : > { %826 = sbr.rel (%p5481_p5) target bundleno = 174 (0xae), region = 120 }
  0xa3   : > { %829 = sbr.rel (!%p7078_p4) target bundleno = 174 (0xae), region = 124  ;;  %s831_s0 = sand.u32 (%p7078_p4), 1, %s6885_s4  }
  0xa4   : > { %s5483_s9 = sshll.u32 (%p7078_p4), %s6889_s8, 2  ;;  %s5482_s5 = sshll.u32 (%p7078_p4), %s831_s0, 3 }
  0xa5   : > { %s8280_s6 = sld [smem:[#allocation38_spill]] (%p7078_p4)  ;;  %s833_s21 = scalar_lea.vmem (%p7078_p4), [#allocation5], %s5482_s5 }
  0xab   : > { %s835_s28 = scalar_lea.vmem %s8280_s6, %s5483_s9 }
  0xac   : > { %v852_v0 = vld [vmem:[%s835_s28] sm:$0xf]  ;;  %v854_v1 = vld [vmem:[%s835_s28 + $0x28] sm:$0xf] }
  0xad   : > { %853 = vst [vmem:[%s833_s21] sm:$0xf] %v852_v0  ;;  %855 = vst [vmem:[%s833_s21 + $0x4] sm:$0xf] %v854_v1 }
  0xae PF: > { %886 = sbr.rel (%p7085_p8) target bundleno = 9114 (0x239a), region = 165 }
  0xb3   : > { %6856 = dma.done.wait (%p6435_p7), [#allocation4], 16  }
  0xb4   : > { %6858 = vsyncadd (%p6435_p7), [#allocation4], 4294967280  ;;  %s893_s10 = sand.u32 1, %s6881_s7  }
  0xb5   : > { %s5486_s23 = sshll.u32 %s893_s10, 3 }
  0xb6   : > { %s7215_s14 = scalar_lea.vmem [#allocation5], %s5486_s23 }
  0xb7   : > { %6860 = dma.done.wait (%p6435_p7), [#allocation7], 64  }
  0xb8   : > { %6862 = vsyncadd (%p6435_p7), [#allocation7], 4294967232 }
  0xb9   : > { %6864 = dma.done.wait (%p6435_p7), [#allocation10], 64  }
  0xba   : > { %6866 = vsyncadd (%p6435_p7), [#allocation10], 4294967232 }
  0xbb   : > { %6868 = dma.done.wait (%p6435_p7), [#allocation13], 64  }
  0xbc   : > { %6870 = vsyncadd (%p6435_p7), [#allocation13], 4294967232 }
  0xbd   : > { %6872 = dma.done.wait (%p6435_p7), [#allocation16], 64  }
  0xbe   : > { %6874 = vsyncadd (%p6435_p7), [#allocation16], 4294967232 }
  0xbf   : > { %6876 = dma.done.wait (%p6435_p7), [#allocation19], 32  }
  0xc0   : > { %6878 = vsyncadd (%p6435_p7), [#allocation19], 4294967264  ;;  %p8281_p4 = scmp.ne.s32.totalorder %s7063_s30, 0 }
  0xc1   : > { %s8282_s27 = sld [smem:[#allocation29_spill]] (!%p8281_p4) }
  0xc2   : > { %998 = sbr.rel (%p8281_p4) target bundleno = 403 (0x193), region = 213  ;;  %s8283_s11 = sld [smem:[#allocation28_spill]] (!%p8281_p4) }
  0xc3   : > { %s8284_s23 = sld [smem:[#allocation31_spill]] (!%p8281_p4) }
  0xc7   : > { %v1001_v2 = vld [vmem:[%s8282_s27 + $0x8] sm:$0xf]  ;;  %vm1013_vm0 = vcmask 1043456   ;;  %v6903_v4 = vmov 0.0   ;;  %v1000_v5 = vld [vmem:[%s8282_s27] sm:$0xff]  ;;  %vm1009_vm1 = vcmask 97280  }
  0xc8   : > { %v1094_v3 = vld [vmem:[%s8282_s27 + $0x8] sm:$0xf]  ;;  %5886 = vmatprep.subr.mxu0 %v6903_v4  ;;  %5893 = vmatprep.subr.mxu1 %v6903_v4  ;;  %v999_v6 = vld [vmem:[%s8283_s11] sm:$0xff]  ;;  %vm6904_vm2 = vmmov 0   ;;  %v5497_v8 = vld [vmem:[#allocation3] ss:$0 sm:$0xff] }
  0xc9   : > { %5887 = vmatpush3.msk.msra.mxu0 %vm1013_vm0, %v1001_v2  ;;  %5894 = vmatpush3.msk.msra.mxu1 %vm1013_vm0, %v1094_v3  ;;  %v5500_v7 = vld [vmem:[%s8283_s11 + $0x8] sm:$0xff]  ;;  %v1087_v10 = vld [vmem:[%s8284_s23] sm:$0xff]  ;;  %vm1089_vm3 = vcmask 392192  }
  0xca   : > { %5888 = vmatprep.subr.mxu0 %v6903_v4  ;;  %5895 = vmatprep.subr.mxu1 %v6903_v4 }
  0xcb   : > { %5889 = vmatpush3.msra.mxu0 %v1000_v5  ;;  %5890 = vmatprep.mubr.msk.f32.mxu0 %vm6904_vm2, %v6903_v4 }
  0xcc   : > { %5896 = vmatpush3.msra.mxu1 %v1000_v5  ;;  %5897 = vmatprep.mubr.msk.f32.mxu1 %vm6904_vm2, %v6903_v4 }
  0xcd   : > { %5891 = vmatmul.mubr.msk.f32.vlgmr.msra.gmra.mxu0 %vm1009_vm1, %v999_v6  ;;  %5898 = vmatmul.mubr.msk.f32.vlgmr.msra.gmra.mxu1 %vm1009_vm1, %v5500_v7 }
 0x18d   : > { %v1083_v9 = vpop.f32.mrf.mxu0  ;;  %v1174_v11 = vpop.f32.mrf.mxu1 }
 0x18e   : > { %v1084_v12 = vadd.f32 %v5497_v8, %v1083_v9  ;;  %v1175_v13 = vadd.f32 %v5497_v8, %v1174_v11 }
 0x18f   : > { %v5892_v14 = vpop.f32.mrf.mxu0  ;;  %v5899_v15 = vpop.f32.mrf.mxu1 }
 0x190   : > { %v1088_v16 = vadd.f32 %v1087_v10, %v1084_v12  ;;  %v1179_v17 = vadd.f32 %v1175_v13, %v1087_v10 }
 0x192   : > { %1090 = vst.msk [vmem:[#allocation2] sm:$0xff] %vm1089_vm3, %v1088_v16  ;;  %1181 = vst.msk [vmem:[#allocation2 + $0x8] sm:$0xff] %vm1089_vm3, %v1179_v17 }
 0x193 PF: > { %s7258_s7 = smul.u32 48, %s7063_s30  ;;  %v1251_v18 = vlaneseq  ;;  %v1302_v19 = vld [vmem:[%s7215_s14] sm:$0xf]  ;;  %v6905_v20 = vmov 0.0   ;;  %vm6906_vm4 = vmmov 0   ;;  %s8285_s1 = sld [smem:[#allocation39_spill]] }
 0x194   : > { %5900 = vmatprep.subr.mxu0 %v6905_v20  ;;  %5912 = vmatprep.mubr.msk.f32.mxu0 %vm6906_vm4, %v6905_v20  ;;  %v7270_v21 = vadd.f32 1.0, %v1302_v19  ;;  %s8286_s3 = sld [smem:[#allocation37_spill]]  ;;  %vm1320_vm5 = vcmask 392192   ;;  %s8246_s10 = scalar_lea.vmem [#allocation6], %s6889_s8  ;;  %vm1806_vm0 = vcmask 130048  }
 0x195   : > { %v7273_v22 = vshrl.u32 %v1251_v18, 7  ;;  %5915 = vmatprep.subr.mxu1 %v6905_v20  ;;  %5927 = vmatprep.mubr.msk.f32.mxu1 %vm6906_vm4, %v6905_v20  ;;  %s8287_s13 = sld [smem:[#allocation41_spill]]  ;;  %v5633_v55 = vld [vmem:[%s8246_s10 - $0x1] ss:$0 sm:$0xff]  ;;  %v7415_v2 = vand.u32 127, %v1251_v18  ;;  %s1201_s11 = scalar_lea.vmem %s8218_s15, %s7258_s7 }
 0x196   : > { %s8288_s28 = sld [smem:[#allocation32_spill]]  ;;  %s5634_s10 = scalar_lea.vmem [#allocation8], %s6889_s8 }
 0x197   : > { %v1306_v27 = vsub.s32 0, %v7273_v22  ;;  %v1311_v28 = vsub.s32 1, %v7273_v22  ;;  %s8289_s12 = sld [smem:[#allocation40_spill]]  ;;  %vm1254_vm6 = vcmp.lt.s32.totalorder %v7415_v2, 6  ;;  %vm1258_vm7 = vcmp.ge.s32.totalorder %v7415_v2, 6  ;;  %s5638_s5 = scalar_lea.vmem [#allocation9], %s6889_s8 }
 0x198   : > { %s8290_s2 = sld [smem:[#allocation34_spill]]  ;;  %v7434_v16 = vsel %vm1254_vm6, 1.0, %v6905_v20  ;;  %vm1259_vm8 = vcmp.lt.s32.totalorder %v7415_v2, 12  ;;  %vm1263_vm10 = vcmp.ge.s32.totalorder %v7415_v2, 12  ;;  %vm1264_vm11 = vcmp.lt.s32.totalorder %v7415_v2, 18  ;;  %s5662_s23 = scalar_lea.vmem [#allocation18], %s6889_s8 }
 0x199   : > { %s7268_s0 = scalar_lea.vmem %s8285_s1, %s7258_s7  ;;  %v7296_v30 = vld [vmem:[#allocation2] sm:$0xff]  ;;  %v1307_v32 = vrot.slane %v7270_v21, %v1306_v27  ;;  %v1312_v34 = vrot.slane %v1302_v19, %v1311_v28  ;;  %s8291_s6 = sld [smem:[#allocation33_spill]]  ;;  %vm1260_vm9 = vmand %vm1258_vm7, %vm1259_vm8  ;;  %vm1273_vm13 = vcmp.ge.s32.totalorder %v7415_v2, 24  ;;  %vm1274_vm14 = vcmp.lt.s32.totalorder %v7415_v2, 30 }
 0x19a   : > { %v7279_v23 = vld [vmem:[%s8286_s3 + $0x28] sm:$0xff]  ;;  %v7284_v24 = vld [vmem:[%s8286_s3 + $0x20] sm:$0xff]  ;;  %v1187_v29 = vld [vmem:[%s7268_s0 + $0x18] sm:$0xff]  ;;  %s8293_s18 = sld [smem:[#allocation36_spill]]  ;;  %v7450_v18 = vsel %vm1260_vm9, 1.0, %v6905_v20  ;;  %vm1278_vm1 = vcmp.ge.s32.totalorder %v7415_v2, 30  ;;  %s1210_s1 = scalar_lea.vmem %s8220_s17, %s7258_s7 }
 0x19b   : > { %v1189_v25 = vld [vmem:[%s7268_s0 + $0x28] sm:$0xff]  ;;  %v1188_v26 = vld [vmem:[%s7268_s0 + $0x20] sm:$0xff]  ;;  %5916 = vmatpush3.msra.mxu1 %v7279_v23  ;;  %v7302_v31 = vld [vmem:[%s8286_s3 + $0x18] sm:$0xff]  ;;  %v1308_v36 = vmul.f32 %v1307_v32, %v7296_v30  ;;  %s7323_s9 = scalar_lea.vmem %s8287_s13, %s7258_s7  ;;  %vm1279_vm2 = vcmp.lt.s32.totalorder %v7415_v2, 36  ;;  %vm1268_vm6 = vcmp.ge.s32.totalorder %v7415_v2, 18  ;;  %vm1269_vm7 = vcmp.lt.s32.totalorder %v7415_v2, 24 }
 0x19c   : > { %5901 = vmatpush3.msra.mxu0 %v1189_v25  ;;  %5917 = vmatprep.subr.mxu1 %v6905_v20  ;;  %v1186_v33 = vld [vmem:[%s7268_s0 + $0x10] sm:$0xff]  ;;  %v1185_v37 = vld [vmem:[%s7268_s0 + $0x8] sm:$0xff]  ;;  %v1184_v38 = vld [vmem:[%s7268_s0] sm:$0xff]  ;;  %vm1283_vm9 = vcmp.ge.s32.totalorder %v7415_v2, 36  ;;  %s5646_s13 = scalar_lea.vmem [#allocation12], %s6889_s8  ;;  %p5626_p7 = scmp.ne.s32.totalorder %s7063_s30, 1 }
 0x19d   : > { %5902 = vmatprep.subr.mxu0 %v6905_v20  ;;  %5918 = vmatpush3.msra.mxu1 %v7284_v24  ;;  %v1247_v35 = vld [vmem:[%s8286_s3 + $0x10] sm:$0xff]  ;;  %v1313_v39 = vadd.f32 %v1312_v34, %v1308_v36  ;;  %v7330_v40 = vld [vmem:[%s7323_s9 + $0x28] sm:$0xff]  ;;  %v1294_v41 = vld [vmem:[%s8288_s28] sm:$0xff]  ;;  %s7385_s21 = scalar_lea.vmem %s8289_s12, %s7063_s30  ;;  %s8292_s12 = sld [smem:[#allocation35_spill]] }
 0x19e   : > { %5903 = vmatpush3.msra.mxu0 %v1188_v26  ;;  %5919 = vmatprep.subr.mxu1 %v6905_v20  ;;  %v7337_v42 = vld [vmem:[%s7323_s9 + $0x20] sm:$0xff]  ;;  %v7343_v43 = vld [vmem:[%s7323_s9 + $0x18] sm:$0xff]  ;;  %v7349_v44 = vld [vmem:[%s7323_s9 + $0x10] sm:$0xff] }
 0x19f   : > { %5904 = vmatprep.subr.mxu0 %v6905_v20  ;;  %5920 = vmatpush3.msra.mxu1 %v7302_v31  ;;  %v7354_v45 = vld [vmem:[%s7323_s9 + $0x8] sm:$0xff]  ;;  %v7359_v46 = vld [vmem:[%s7323_s9] sm:$0xff]  ;;  %vm1265_vm12 = vmand %vm1263_vm10, %vm1264_vm11  ;;  %vm1284_vm10 = vcmp.lt.s32.totalorder %v7415_v2, 42 }
 0x1a0   : > { %5905 = vmatpush3.msra.mxu0 %v1187_v29  ;;  %5921 = vmatprep.subr.mxu1 %v6905_v20  ;;  %v7366_v47 = vld [vmem:[%s8288_s28 + $0x8] sm:$0xff]  ;;  %v1245_v49 = vld [vmem:[%s8286_s3] sm:$0xff]  ;;  %vm1275_vm15 = vmand %vm1273_vm13, %vm1274_vm14  ;;  %vm1289_vm13 = vcmp.lt.s32.totalorder %v7415_v2, 48 }
 0x1a1   : > { %5906 = vmatprep.subr.mxu0 %v6905_v20  ;;  %5922 = vmatpush3.msra.mxu1 %v1247_v35  ;;  %v1246_v48 = vld [vmem:[%s8286_s3 + $0x8] sm:$0xff]  ;;  %v5521_v50 = vld [vmem:[%s7385_s21] ss:$0 sm:$0xff]  ;;  %v7482_v25 = vsel %vm1275_vm15, 1.0, %v6905_v20  ;;  %v7502_v32 = vld [vmem:[%s1201_s11 + $0x18] sm:$0xff] }
 0x1a2   : > { %5907 = vmatpush3.msra.mxu0 %v1186_v33  ;;  %5923 = vmatprep.subr.mxu1 %v6905_v20  ;;  %v1297_v61 = vld [vmem:[%s8290_s2] sm:$0xff]  ;;  %v1301_v1 = vld [vmem:[%s8293_s18 + $0x8] sm:$0xff]  ;;  %v7506_v33 = vld [vmem:[%s1201_s11 + $0x10] sm:$0xff] }
 0x1a3   : > { %5908 = vmatprep.subr.mxu0 %v6905_v20  ;;  %5924 = vmatpush3.msra.mxu1 %v1246_v48  ;;  %v1296_v62 = vld [vmem:[%s8291_s6] sm:$0xff]  ;;  %v1299_v63 = vld [vmem:[%s8292_s12 + $0x8] sm:$0xff]  ;;  %vm1280_vm3 = vmand %vm1278_vm1, %vm1279_vm2 }
 0x1a4   : > { %5909 = vmatpush3.msra.mxu0 %v1185_v37  ;;  %5925 = vmatprep.subr.mxu1 %v6905_v20  ;;  %v1300_v5 = vld [vmem:[%s8293_s18] sm:$0xff]  ;;  %v7496_v29 = vld [vmem:[%s1201_s11 + $0x28] sm:$0xff]  ;;  %vm1270_vm8 = vmand %vm1268_vm6, %vm1269_vm7 }
 0x1a5   : > { %5910 = vmatprep.subr.mxu0 %v6905_v20  ;;  %5926 = vmatpush3.msra.mxu1 %v1245_v49  ;;  %v1298_v8 = vld [vmem:[%s8292_s12] sm:$0xff]  ;;  %v7510_v34 = vld [vmem:[%s1201_s11 + $0x8] sm:$0xff]  ;;  %vm1285_vm11 = vmand %vm1283_vm9, %vm1284_vm10 }
 0x1a6   : > { %5911 = vmatpush3.msra.mxu0 %v1184_v38  ;;  %5945 = vmatprep.subr.mxu1 %v7279_v23 }
 0x1a7   : > { %5913 = vmatmul.mubr.msk.f32.vlgmr.msra.gmra.mxu0 %vm1320_vm5, %v1313_v39  ;;  %5930 = vmatprep.subr.mxu0 %v7330_v40 }
 0x1a8   : > { %5931 = vmatpush3.msra.mxu0 %v7330_v40  ;;  %5942 = vmatprep.mubr.msk.f32.mxu0 %vm1320_vm5, %v1294_v41 }
 0x1a9   : > { %5932 = vmatprep.subr.mxu0 %v7337_v42 }
 0x1aa   : > { %5933 = vmatpush3.msra.mxu0 %v7337_v42 }
 0x1ab   : > { %5934 = vmatprep.subr.mxu0 %v7343_v43 }
 0x1ac   : > { %5935 = vmatpush3.msra.mxu0 %v7343_v43 }
 0x1ad   : > { %5936 = vmatprep.subr.mxu0 %v7349_v44 }
 0x1ae   : > { %5937 = vmatpush3.msra.mxu0 %v7349_v44 }
 0x1af   : > { %5938 = vmatprep.subr.mxu0 %v7354_v45 }
 0x1b0   : > { %5939 = vmatpush3.msra.mxu0 %v7354_v45 }
 0x1b1   : > { %5940 = vmatprep.subr.mxu0 %v7359_v46 }
 0x1b2   : > { %5941 = vmatpush3.msra.mxu0 %v7359_v46 }
 0x1b3   : > { %5943 = vmatmul.mubr.msk.f32.vlgmr.msra.gmra.mxu0 %vm1320_vm5, %v7366_v47  ;;  %5960 = vmatprep.subr.mxu0 %v7496_v29 }
 0x1b4   : > { %5972 = vmatprep.mubr.msk.f32.mxu0 %vm1320_vm5, %v1294_v41  ;;  %5961 = vmatpush3.msra.mxu0 %v7496_v29 }
 0x267   : > { %v1390_v51 = vpop.f32.mrf.mxu0 }
 0x268   : > { %v1391_v52 = vadd.f32 %v5521_v50, %v1390_v51 }
 0x269   : > { %v5914_v53 = vpop.f32.mrf.mxu0 }
 0x26a   : > { %5928 = vmatmul.mubr.msk.f32.vlgmr.msra.gmra.mxu1 %vm1320_vm5, %v1391_v52  ;;  %v1394_v3 = vmul.f32 %v1391_v52, %v1296_v62 }
 0x26b   : > { %5946 = vmatpush3.msra.mxu1 %v7279_v23  ;;  %v7466_v23 = vsel %vm1265_vm12, 1.0, %v6905_v20  ;;  %vm1288_vm12 = vcmp.ge.s32.totalorder %v7415_v2, 42 }
 0x26c   : > { %5947 = vmatprep.subr.mxu1 %v7284_v24  ;;  %vm1290_vm14 = vmand %vm1288_vm12, %vm1289_vm13 }
 0x26d   : > { %5948 = vmatpush3.msra.mxu1 %v7284_v24 }
 0x26e   : > { %5949 = vmatprep.subr.mxu1 %v7302_v31 }
 0x26f   : > { %5950 = vmatpush3.msra.mxu1 %v7302_v31  ;;  %v7498_v31 = vld [vmem:[%s1201_s11 + $0x20] sm:$0xff] }
 0x270   : > { %5951 = vmatprep.subr.mxu1 %v1247_v35  ;;  %5962 = vmatprep.subr.mxu0 %v7498_v31 }
 0x271   : > { %5952 = vmatpush3.msra.mxu1 %v1247_v35  ;;  %5963 = vmatpush3.msra.mxu0 %v7498_v31  ;;  %v7514_v35 = vld [vmem:[%s1201_s11] sm:$0xff]  ;;  %s8294_s11 = sld [smem:[#allocation45_spill]] }
 0x272   : > { %5953 = vmatprep.subr.mxu1 %v1246_v48  ;;  %5964 = vmatprep.subr.mxu0 %v7502_v32 }
 0x273   : > { %v5944_v54 = vpop.f32.mrf.mxu0  ;;  %5954 = vmatpush3.msra.mxu1 %v1246_v48  ;;  %5965 = vmatpush3.msra.mxu0 %v7502_v32 }
 0x274   : > { %5955 = vmatprep.subr.mxu1 %v1245_v49  ;;  %v1555_v58 = vadd.f32 %v5944_v54, %v5633_v55  ;;  %5966 = vmatprep.subr.mxu0 %v7506_v33 }
 0x275   : > { %v1549_v56 = vpop.f32.mrf.mxu0  ;;  %5956 = vmatpush3.msra.mxu1 %v1245_v49  ;;  %5967 = vmatpush3.msra.mxu0 %v7506_v33 }
 0x276   : > { %v1550_v57 = vadd.f32 %v5633_v55, %v1549_v56  ;;  %5975 = vmatprep.subr.mxu1 %v6905_v20  ;;  %v1559_v6 = vmul.f32 %v1555_v58, %v1299_v63  ;;  %5968 = vmatprep.subr.mxu0 %v7510_v34 }
 0x277   : > { %5969 = vmatpush3.msra.mxu0 %v7510_v34 }
 0x278   : > { %5957 = vmatprep.mubr.msk.f32.mxu1 %vm1320_vm5, %v1550_v57  ;;  %v1558_v13 = vmul.f32 %v1550_v57, %v1298_v8  ;;  %5970 = vmatprep.subr.mxu0 %v7514_v35 }
 0x279   : > { %5958 = vmatmul.mubr.msk.f32.vlgmr.msra.gmra.mxu1 %vm1320_vm5, %v1555_v58  ;;  %5971 = vmatpush3.msra.mxu0 %v7514_v35 }
 0x27a   : > { %5979 = vmatprep.mubr.msk.f32.mxu1 %vm6906_vm4, %v6905_v20  ;;  %5973 = vmatmul.mubr.msk.f32.vlgmr.msra.gmra.mxu0 %vm1320_vm5, %v7366_v47 }
 0x27b   : > { %5989 = vmatprep.subr.mxu0 %v6905_v20  ;;  %5993 = vmatprep.mubr.msk.f32.mxu0 %vm6906_vm4, %v6905_v20 }
 0x32a   : > { %v1464_v59 = vpop.f32.mrf.mxu1 }
 0x32b   : > { %v1468_v0 = vmul.f32 %v1464_v59, %v1297_v61 }
 0x32c   : > { %v5929_v60 = vpop.f32.mrf.mxu1 }
 0x32d   : > { %v1469_v9 = vadd.f32 %v1468_v0, %v1394_v3 }
 0x32f   : > { %v7428_v14 = vmul.f32 0.4082483, %v1469_v9 }
 0x331   : > { %v1726_v17 = vmul.f32 %v7434_v16, %v7428_v14  ;;  %v1820_v19 = vmul.f32 %v7450_v18, %v7428_v14  ;;  %v2053_v24 = vmul.f32 %v7466_v23, %v7428_v14  ;;  %v2375_v26 = vmul.f32 %v7482_v25, %v7428_v14 }
 0x339   : > { %v5959_v4 = vpop.f32.mrf.mxu1 }
 0x33a   : > { %v1642_v7 = vmul.f32 %v5959_v4, %v1301_v1 }
 0x33b   : > { %v1632_v10 = vpop.f32.mrf.mxu1 }
 0x33c   : > { %v7423_v11 = vadd.f32 %v1642_v7, %v1559_v6  ;;  %v1641_v12 = vmul.f32 %v1632_v10, %v1300_v5  ;;  %v5974_v6 = vpop.f32.mrf.mxu0  ;;  %v7535_v7 = vld [vmem:[%s5634_s10 - $0x1] ss:$0 sm:$0xff]  ;;  %s1223_s10 = scalar_lea.vmem %s8294_s11, %s7258_s7  ;;  %s5650_s11 = scalar_lea.vmem [#allocation14], %s6889_s8 }
 0x33d   : > { %v7538_v8 = vadd.f32 %v5974_v6, %v7535_v7 }
 0x33e   : > { %5976 = vmatpush3.xpose.msk.msra.mxu1 %vm1320_vm5, %v7423_v11  ;;  %v7431_v15 = vadd.f32 %v1641_v12, %v1558_v13  ;;  %v1717_v9 = vpop.f32.mrf.mxu0  ;;  %v7544_v12 = vsel %vm1280_vm3, 1.0, %v6905_v20 }
 0x33f   : > { %5977 = vmatprep.subr.mxu1 %v6905_v20  ;;  %v7541_v10 = vadd.f32 %v7535_v7, %v1717_v9  ;;  %v1906_v13 = vmul.f32 %v7450_v18, %v7538_v8 }
 0x341   : > { %5990 = vmatpush3.msra.mxu0 %v1906_v13 }
 0x342   : > { %5978 = vmatpush3.xpose.msk.msra.mxu1 %vm1320_vm5, %v7431_v15  ;;  %5991 = vmatprep.subr.mxu0 %v6905_v20 }
 0x343   : > { %5982 = vmatprep.subr.mxu1 %v6905_v20 }
 0x345   : > { %5980 = vmatmul.mubr.msk.f32.vlgmr.msra.gmra.mxu1 %vm1320_vm5, %v1726_v17  ;;  %v2622_v17 = vmul.f32 %v7544_v12, %v7538_v8 }
 0x346   : > { %5983 = vmatpush3.xpose.msk.msra.mxu1 %vm1320_vm5, %v7423_v11  ;;  %5986 = vmatprep.mubr.msk.f32.mxu1 %vm6906_vm4, %v6905_v20 }
 0x347   : > { %5984 = vmatprep.subr.mxu1 %v6905_v20 }
 0x34a   : > { %5985 = vmatpush3.xpose.msk.msra.mxu1 %vm1320_vm5, %v7431_v15 }
 0x34b   : > { %6003 = vmatprep.subr.mxu1 %v6905_v20 }
 0x34d   : > { %5987 = vmatmul.mubr.msk.f32.vlgmr.msra.gmra.mxu1 %vm1320_vm5, %v1820_v19  ;;  %v1905_v19 = vmul.f32 %v7450_v18, %v7541_v10 }
 0x34e   : > { %6004 = vmatpush3.xpose.msk.msra.mxu1 %vm1320_vm5, %v7423_v11  ;;  %6007 = vmatprep.mubr.msk.f32.mxu1 %vm6906_vm4, %v6905_v20 }
 0x34f   : > { %6005 = vmatprep.subr.mxu1 %v6905_v20  ;;  %5992 = vmatpush3.msra.mxu0 %v1905_v19 }
 0x350   : > { %5996 = vmatprep.subr.mxu0 %v6905_v20 }
 0x352   : > { %6006 = vmatpush3.xpose.msk.msra.mxu1 %vm1320_vm5, %v7431_v15 }
 0x353   : > { %6031 = vmatprep.subr.mxu1 %v6905_v20 }
 0x355   : > { %6008 = vmatmul.mubr.msk.f32.vlgmr.msra.gmra.mxu1 %vm1320_vm5, %v2053_v24  ;;  %v2621_v24 = vmul.f32 %v7544_v12, %v7541_v10 }
 0x356   : > { %6032 = vmatpush3.xpose.msk.msra.mxu1 %vm1320_vm5, %v7423_v11  ;;  %6035 = vmatprep.mubr.msk.f32.mxu1 %vm6906_vm4, %v6905_v20 }
 0x357   : > { %6033 = vmatprep.subr.mxu1 %v6905_v20 }
 0x35a   : > { %6034 = vmatpush3.xpose.msk.msra.mxu1 %vm1320_vm5, %v7431_v15 }
 0x35b   : > { %6052 = vmatprep.subr.mxu1 %v6905_v20 }
 0x35d   : > { %6036 = vmatmul.mubr.msk.f32.vlgmr.msra.gmra.mxu1 %vm1320_vm5, %v2375_v26 }
 0x35e   : > { %6056 = vmatprep.mubr.msk.f32.mxu1 %vm6906_vm4, %v6905_v20  ;;  %6053 = vmatpush3.msra.mxu1 %v2622_v17 }
 0x35f   : > { %6054 = vmatprep.subr.mxu1 %v6905_v20 }
 0x360   : > { %6055 = vmatpush3.msra.mxu1 %v2621_v24 }
 0x361   : > { %6059 = vmatprep.subr.mxu1 %v6905_v20 }
 0x405   : > { %v1802_v36 = vpop.f32.mrf.mxu1 }
 0x406   : > { %v1807_v48 = vsel %vm1806_vm0, %v1802_v36, -inf }
 0x407   : > { %v5981_v37 = vpop.f32.mrf.mxu1 }
 0x40d   : > { %v1890_v38 = vpop.f32.mrf.mxu1 }
 0x40e   : > { %v1894_v39 = vsel %vm1806_vm0, %v1890_v38, -inf }
 0x40f   : > { %1895 = vmax.xlane.f32.xlu0 %v1894_v39  ;;  %v5988_v41 = vpop.f32.mrf.mxu1 }
 0x413   : > { %1808 = vmax.xlane.f32.xlu0 %v1807_v48 }
 0x415   : > { %v2123_v49 = vpop.f32.mrf.mxu1 }
 0x416   : > { %v2127_v50 = vsel %vm1806_vm0, %v2123_v49, -inf }
 0x417   : > { %2128 = vmax.xlane.f32.xlu1 %v2127_v50  ;;  %v6009_v47 = vpop.f32.mrf.mxu1  ;;  %v1819_v50 = vmul.f32 %v7434_v16, %v7538_v8 }
 0x41d   : > { %v2445_v51 = vpop.f32.mrf.mxu1 }
 0x41e   : > { %v2449_v5 = vsel %vm1806_vm0, %v2445_v51, -inf }
 0x41f   : > { %v6037_v52 = vpop.f32.mrf.mxu1 }
 0x420   : > { %v1818_v52 = vmul.f32 %v7434_v16, %v7541_v10 }
 0x498   : > { %v1896_v53 = vpop.xlane.xlu0 %1895 }
 0x499   : > { %v1897_v54 = vsub.f32 %v1890_v38, %v1896_v53  ;;  %v2139_v53 = vmul.f32 %v7466_v23, %v7538_v8 }
 0x49b   : > { %v1898_v55 = vmul.f32 1.442695, %v1897_v54 }
 0x49c   : > { %v1809_v56 = vpop.xlane.xlu0 %1808 }
 0x49d   : > { %6495 = vpow2.f32 %v1898_v55  ;;  %v1810_v57 = vsub.f32 %v1802_v36, %v1809_v56  ;;  %v2138_v55 = vmul.f32 %v7466_v23, %v7541_v10 }
 0x49f   : > { %v1811_v58 = vmul.f32 1.442695, %v1810_v57  ;;  %v7585_v57 = vsel %vm1270_vm8, 1.0, %v6905_v20 }
 0x4a0   : > { %v2129_v59 = vpop.xlane.xlu1 %2128 }
 0x4a1   : > { %6497 = vpow2.f32 %v1811_v58  ;;  %v2130_v60 = vsub.f32 %v2123_v49, %v2129_v59  ;;  %v2214_v59 = vmul.f32 %v7585_v57, %v7428_v14 }
 0x4a3   : > { %v2131_v61 = vmul.f32 1.442695, %v2130_v60 }
 0x4a5   : > { %6499 = vpow2.f32 %v2131_v61  ;;  %v2300_v61 = vmul.f32 %v7585_v57, %v7538_v8 }
 0x4aa   : > { %v6496_v62 = vpop.eup %6495 }
 0x4ab   : > { %v1900_v63 = vsel %vm1806_vm0, %v6496_v62, 0.0 }
 0x4ac   : > { %1901 = vadd.xlane.f32.xlu1 %v1900_v63 }
 0x4ae   : > { %v6498_v0 = vpop.eup %6497 }
 0x4af   : > { %v1813_v1 = vsel %vm1806_vm0, %v6498_v0, 0.0 }
 0x4b0   : > { %1814 = vadd.xlane.f32.xlu0 %v1813_v1 }
 0x4b2   : > { %v6500_v3 = vpop.eup %6499 }
 0x4b3   : > { %v2133_v4 = vsel %vm1806_vm0, %v6500_v3, 0.0 }
 0x4b4   : > { %2134 = vadd.xlane.f32.xlu1 %v2133_v4 }
 0x4b8   : > { %2450 = vmax.xlane.f32.xlu1 %v2449_v5 }
 0x535   : > { %v1902_v26 = vpop.xlane.xlu1 %1901 }
 0x536   : > { %6501 = vrcp.f32 %v1902_v26 }
 0x539   : > { %v1815_v36 = vpop.xlane.xlu0 %1814 }
 0x53a   : > { %6503 = vrcp.f32 %v1815_v36 }
 0x53d   : > { %v2135_v37 = vpop.xlane.xlu1 %2134 }
 0x53e   : > { %6505 = vrcp.f32 %v2135_v37 }
 0x541   : > { %v2451_v38 = vpop.xlane.xlu1 %2450 }
 0x542   : > { %v2452_v39 = vsub.f32 %v2445_v51, %v2451_v38 }
 0x543   : > { %v6502_v41 = vpop.eup %6501 }
 0x544   : > { %v2453_v48 = vmul.f32 1.442695, %v2452_v39  ;;  %v1904_v49 = vmul.f32 %v6502_v41, %v6496_v62  ;;  %v2299_v62 = vmul.f32 %v7585_v57, %v7541_v10 }
 0x546   : > { %6507 = vpow2.f32 %v2453_v48  ;;  %5994 = vmatmul.mubr.msk.f32.vlgmr.msra.gmra.mxu0 %vm1806_vm0, %v1904_v49 }
 0x547   : > { %v6504_v47 = vpop.eup %6503  ;;  %5997 = vmatpush3.msra.mxu0 %v1819_v50  ;;  %6000 = vmatprep.mubr.msk.f32.mxu0 %vm6906_vm4, %v6905_v20 }
 0x548   : > { %5998 = vmatprep.subr.mxu0 %v6905_v20  ;;  %v1817_v51 = vmul.f32 %v6504_v47, %v6498_v0  ;;  %v2461_v47 = vmul.f32 %v7482_v25, %v7538_v8 }
 0x549   : > { %5999 = vmatpush3.msra.mxu0 %v1818_v52  ;;  %v2460_v52 = vmul.f32 %v7482_v25, %v7541_v10 }
 0x54a   : > { %6010 = vmatprep.subr.mxu0 %v6905_v20  ;;  %6001 = vmatmul.mubr.msk.f32.vlgmr.msra.gmra.mxu0 %vm1806_vm0, %v1817_v51 }
 0x54b   : > { %v6506_v54 = vpop.eup %6505  ;;  %6011 = vmatpush3.msra.mxu0 %v2139_v53  ;;  %6014 = vmatprep.mubr.msk.f32.mxu0 %vm6906_vm4, %v6905_v20  ;;  %v2536_v53 = vmul.f32 %v7544_v12, %v7428_v14 }
 0x54c   : > { %6012 = vmatprep.subr.mxu0 %v6905_v20  ;;  %v2137_v56 = vmul.f32 %v6506_v54, %v6500_v3  ;;  %v7627_v54 = vsel %vm1285_vm11, 1.0, %v6905_v20 }
 0x54d   : > { %6013 = vmatpush3.msra.mxu0 %v2138_v55  ;;  %v2783_v55 = vmul.f32 %v7627_v54, %v7538_v8 }
 0x54e   : > { %6017 = vmatprep.subr.mxu0 %v6905_v20  ;;  %6015 = vmatmul.mubr.msk.f32.vlgmr.msra.gmra.mxu0 %vm1806_vm0, %v2137_v56  ;;  %v2782_v56 = vmul.f32 %v7627_v54, %v7541_v10 }
 0x54f   : > { %6018 = vmatpush3.xpose.msk.msra.mxu0 %vm1320_vm5, %v7423_v11  ;;  %6021 = vmatprep.mubr.msk.f32.mxu0 %vm6906_vm4, %v6905_v20 }
 0x550   : > { %6019 = vmatprep.subr.mxu0 %v6905_v20 }
 0x553   : > { %v6508_v58 = vpop.eup %6507  ;;  %6020 = vmatpush3.xpose.msk.msra.mxu0 %vm1320_vm5, %v7431_v15 }
 0x554   : > { %6024 = vmatprep.subr.mxu0 %v6905_v20  ;;  %v2455_v60 = vsel %vm1806_vm0, %v6508_v58, 0.0 }
 0x555   : > { %2456 = vadd.xlane.f32.xlu1 %v2455_v60 }
 0x556   : > { %6022 = vmatmul.mubr.msk.f32.vlgmr.msra.gmra.mxu0 %vm1320_vm5, %v2214_v59 }
 0x557   : > { %6025 = vmatpush3.msra.mxu0 %v2300_v61  ;;  %6028 = vmatprep.mubr.msk.f32.mxu0 %vm6906_vm4, %v6905_v20 }
 0x558   : > { %6026 = vmatprep.subr.mxu0 %v6905_v20 }
 0x559   : > { %6027 = vmatpush3.msra.mxu0 %v2299_v62 }
 0x55a   : > { %6038 = vmatprep.subr.mxu0 %v6905_v20 }
 0x5de   : > { %v2457_v39 = vpop.xlane.xlu1 %2456 }
 0x606   : > { %v1976_v63 = vpop.f32.mrf.mxu0 }
 0x608   : > { %v5995_v0 = vpop.f32.mrf.mxu0 }
 0x60a   : > { %v2049_v1 = vpop.f32.mrf.mxu0 }
 0x60b   : > { %v2050_v3 = vadd.f32 %v2049_v1, %v1976_v63 }
 0x60c   : > { %v6002_v4 = vpop.f32.mrf.mxu0 }
 0x60e   : > { %v2209_v5 = vpop.f32.mrf.mxu0 }
 0x60f   : > { %v2213_v6 = vadd.f32 %v2209_v5, %v2050_v3 }
 0x610   : > { %v6016_v9 = vpop.f32.mrf.mxu0 }
 0x616   : > { %v2284_v13 = vpop.f32.mrf.mxu0 }
 0x617   : > { %v2288_v17 = vsel %vm1806_vm0, %v2284_v13, -inf }
 0x618   : > { %2289 = vmax.xlane.f32.xlu0 %v2288_v17  ;;  %v6023_v19 = vpop.f32.mrf.mxu0 }
 0x6a1   : > { %v2290_v24 = vpop.xlane.xlu0 %2289 }
 0x6a2   : > { %v2291_v26 = vsub.f32 %v2284_v13, %v2290_v24 }
 0x6a4   : > { %v2292_v36 = vmul.f32 1.442695, %v2291_v26  ;;  %v2697_v26 = vmul.f32 %v7627_v54, %v7428_v14 }
 0x6a6   : > { %6509 = vpow2.f32 %v2292_v36  ;;  %v7654_v36 = vsel %vm1290_vm14, 1.0, %v6905_v20 }
 0x6a7   : > { %v2944_v2 = vmul.f32 %v7654_v36, %v7538_v8 }
 0x6b3   : > { %v6510_v37 = vpop.eup %6509 }
 0x6b4   : > { %v2294_v38 = vsel %vm1806_vm0, %v6510_v37, 0.0 }
 0x6b5   : > { %2295 = vadd.xlane.f32.xlu0 %v2294_v38 }
 0x73e   : > { %v2296_v41 = vpop.xlane.xlu0 %2295 }
 0x73f   : > { %6511 = vrcp.f32 %v2296_v41 }
 0x740   : > { %6513 = vrcp.f32 %v2457_v39 }
 0x74c   : > { %v6512_v48 = vpop.eup %6511 }
 0x74d   : > { %v2298_v49 = vmul.f32 %v6512_v48, %v6510_v37  ;;  %v6514_v50 = vpop.eup %6513  ;;  %v2943_v37 = vmul.f32 %v7654_v36, %v7541_v10 }
 0x74e   : > { %v2459_v51 = vmul.f32 %v6514_v50, %v6508_v58 }
 0x74f   : > { %6029 = vmatmul.mubr.msk.f32.vlgmr.msra.gmra.mxu0 %vm1806_vm0, %v2298_v49 }
 0x750   : > { %6039 = vmatpush3.msra.mxu0 %v2461_v47  ;;  %6042 = vmatprep.mubr.msk.f32.mxu0 %vm6906_vm4, %v6905_v20 }
 0x751   : > { %6040 = vmatprep.subr.mxu0 %v6905_v20 }
 0x752   : > { %6041 = vmatpush3.msra.mxu0 %v2460_v52 }
 0x753   : > { %6045 = vmatprep.subr.mxu0 %v6905_v20  ;;  %6043 = vmatmul.mubr.msk.f32.vlgmr.msra.gmra.mxu0 %vm1806_vm0, %v2459_v51 }
 0x754   : > { %6046 = vmatpush3.xpose.msk.msra.mxu0 %vm1320_vm5, %v7423_v11  ;;  %6049 = vmatprep.mubr.msk.f32.mxu0 %vm6906_vm4, %v6905_v20 }
 0x755   : > { %6047 = vmatprep.subr.mxu0 %v6905_v20 }
 0x758   : > { %6048 = vmatpush3.xpose.msk.msra.mxu0 %vm1320_vm5, %v7431_v15 }
 0x759   : > { %6066 = vmatprep.subr.mxu0 %v6905_v20 }
 0x75b   : > { %6050 = vmatmul.mubr.msk.f32.vlgmr.msra.gmra.mxu0 %vm1320_vm5, %v2536_v53 }
 0x75c   : > { %6067 = vmatpush3.msra.mxu0 %v2783_v55  ;;  %6070 = vmatprep.mubr.msk.f32.mxu0 %vm6906_vm4, %v6905_v20 }
 0x75d   : > { %6068 = vmatprep.subr.mxu0 %v6905_v20 }
 0x75e   : > { %6069 = vmatpush3.msra.mxu0 %v2782_v56 }
 0x75f   : > { %6073 = vmatprep.subr.mxu0 %v6905_v20 }
 0x80f   : > { %v2370_v58 = vpop.f32.mrf.mxu0 }
 0x810   : > { %v2374_v59 = vadd.f32 %v2370_v58, %v2213_v6  ;;  %v2858_v58 = vmul.f32 %v7654_v36, %v7428_v14 }
 0x811   : > { %v6030_v60 = vpop.f32.mrf.mxu0 }
 0x813   : > { %v2531_v61 = vpop.f32.mrf.mxu0 }
 0x814   : > { %v2535_v62 = vadd.f32 %v2531_v61, %v2374_v59 }
 0x815   : > { %v6044_v63 = vpop.f32.mrf.mxu0 }
 0x81b   : > { %v2606_v0 = vpop.f32.mrf.mxu0 }
 0x81c   : > { %v2610_v1 = vsel %vm1806_vm0, %v2606_v0, -inf }
 0x81d   : > { %2611 = vmax.xlane.f32.xlu0 %v2610_v1  ;;  %v6051_v3 = vpop.f32.mrf.mxu0 }
 0x8a6   : > { %v2612_v4 = vpop.xlane.xlu0 %2611 }
 0x8a7   : > { %v2613_v5 = vsub.f32 %v2606_v0, %v2612_v4 }
 0x8a9   : > { %v2614_v9 = vmul.f32 1.442695, %v2613_v5 }
 0x8ab   : > { %6515 = vpow2.f32 %v2614_v9 }
 0x8b8   : > { %v6516_v13 = vpop.eup %6515 }
 0x8b9   : > { %v2616_v17 = vsel %vm1806_vm0, %v6516_v13, 0.0 }
 0x8ba   : > { %2617 = vadd.xlane.f32.xlu1 %v2616_v17  ;;  %v7690_v17 = vld [vmem:[%s1210_s1 + $0x20] sm:$0xff] }
 0x943   : > { %v2618_v19 = vpop.xlane.xlu1 %2617 }
 0x944   : > { %6517 = vrcp.f32 %v2618_v19  ;;  %v7696_v19 = vld [vmem:[%s1210_s1 + $0x18] sm:$0xff] }
 0x951   : > { %v6518_v6 = vpop.eup %6517 }
 0x952   : > { %v2620_v24 = vmul.f32 %v6518_v6, %v6516_v13  ;;  %v7687_v13 = vld [vmem:[%s1210_s1 + $0x28] sm:$0xff]  ;;  %v7700_v6 = vld [vmem:[%s1210_s1 + $0x10] sm:$0xff] }
 0x954   : > { %6057 = vmatmul.mubr.msk.f32.vlgmr.msra.gmra.mxu1 %vm1806_vm0, %v2620_v24  ;;  %v7706_v24 = vld [vmem:[%s1210_s1 + $0x8] sm:$0xff] }
 0x955   : > { %6060 = vmatpush3.xpose.msk.msra.mxu1 %vm1320_vm5, %v7423_v11  ;;  %6063 = vmatprep.mubr.msk.f32.mxu1 %vm6906_vm4, %v6905_v20 }
 0x956   : > { %6061 = vmatprep.subr.mxu1 %v6905_v20 }
 0x959   : > { %6062 = vmatpush3.xpose.msk.msra.mxu1 %vm1320_vm5, %v7431_v15 }
 0x95a   : > { %6080 = vmatprep.subr.mxu1 %v6905_v20 }
 0x95c   : > { %6064 = vmatmul.mubr.msk.f32.vlgmr.msra.gmra.mxu1 %vm1320_vm5, %v2697_v26  ;;  %v7710_v26 = vld [vmem:[%s1210_s1] sm:$0xff]  ;;  %s8295_s1 = sld [smem:[#allocation46_spill]] }
 0x95d   : > { %6081 = vmatpush3.msra.mxu1 %v2944_v2  ;;  %6084 = vmatprep.mubr.msk.f32.mxu1 %vm6906_vm4, %v6905_v20 }
 0x95e   : > { %6082 = vmatprep.subr.mxu1 %v6905_v20 }
 0x95f   : > { %6083 = vmatpush3.msra.mxu1 %v2943_v37 }
 0x960   : > { %6087 = vmatprep.subr.mxu1 %v6905_v20 }
 0xa14   : > { %v2692_v38 = vpop.f32.mrf.mxu1 }
 0xa15   : > { %v2696_v39 = vadd.f32 %v2692_v38, %v2535_v62 }
 0xa16   : > { %v6058_v41 = vpop.f32.mrf.mxu1 }
 0xa1c   : > { %v2767_v48 = vpop.f32.mrf.mxu1 }
 0xa1d   : > { %v2771_v8 = vsel %vm1806_vm0, %v2767_v48, -inf }
 0xa1e   : > { %2772 = vmax.xlane.f32.xlu0 %v2771_v8  ;;  %v6065_v49 = vpop.f32.mrf.mxu1 }
 0xaa7   : > { %v2773_v50 = vpop.xlane.xlu0 %2772 }
 0xaa8   : > { %v2774_v47 = vsub.f32 %v2767_v48, %v2773_v50 }
 0xaaa   : > { %v2775_v52 = vmul.f32 1.442695, %v2774_v47 }
 0xaac   : > { %6519 = vpow2.f32 %v2775_v52 }
 0xab9   : > { %v6520_v10 = vpop.eup %6519 }
 0xaba   : > { %v2777_v51 = vsel %vm1806_vm0, %v6520_v10, 0.0 }
 0xabb   : > { %2778 = vadd.xlane.f32.xlu1 %v2777_v51  ;;  %v7732_v51 = vld [vmem:[%s1223_s10 + $0x20] sm:$0xff] }
 0xb44   : > { %v2779_v53 = vpop.xlane.xlu1 %2778 }
 0xb45   : > { %6521 = vrcp.f32 %v2779_v53  ;;  %v7738_v53 = vld [vmem:[%s1223_s10 + $0x10] sm:$0xff] }
 0xb52   : > { %v6522_v55 = vpop.eup %6521 }
 0xb53   : > { %v2781_v56 = vmul.f32 %v6522_v55, %v6520_v10  ;;  %v7728_v10 = vld [vmem:[%s1223_s10 + $0x28] sm:$0xff] }
 0xb54   : > { %v7742_v55 = vld [vmem:[%s1223_s10 + $0x8] sm:$0xff] }
 0xb55   : > { %6071 = vmatmul.mubr.msk.f32.vlgmr.msra.gmra.mxu0 %vm1806_vm0, %v2781_v56  ;;  %v7746_v56 = vld [vmem:[%s1223_s10] sm:$0xff] }
 0xb56   : > { %6074 = vmatpush3.xpose.msk.msra.mxu0 %vm1320_vm5, %v7423_v11  ;;  %6077 = vmatprep.mubr.msk.f32.mxu0 %vm6906_vm4, %v6905_v20 }
 0xb57   : > { %6075 = vmatprep.subr.mxu0 %v6905_v20 }
 0xb5a   : > { %6076 = vmatpush3.xpose.msk.msra.mxu0 %vm1320_vm5, %v7431_v15 }
 0xb5b   : > { %6102 = vmatprep.subr.mxu0 %v6905_v20 }
 0xb5d   : > { %6078 = vmatmul.mubr.msk.f32.vlgmr.msra.gmra.mxu0 %vm1320_vm5, %v2858_v58  ;;  %v7750_v58 = vld [vmem:[%s7215_s14 + $0x4] sm:$0xf] }
 0xb5e   : > { %6114 = vmatprep.mubr.msk.f32.mxu0 %vm6906_vm4, %v6905_v20  ;;  %6103 = vmatpush3.msra.mxu0 %v7728_v10 }
 0xb5f   : > { %6104 = vmatprep.subr.mxu0 %v6905_v20 }
 0xb60   : > { %6105 = vmatpush3.msra.mxu0 %v7732_v51 }
 0xb61   : > { %6106 = vmatprep.subr.mxu0 %v6905_v20 }
 0xc15   : > { %v2853_v59 = vpop.f32.mrf.mxu0 }
 0xc16   : > { %v2857_v11 = vadd.f32 %v2853_v59, %v2696_v39  ;;  %v7718_v39 = vld [vmem:[%s5638_s5 - $0x1] ss:$0 sm:$0xff]  ;;  %v7756_v59 = vadd.f32 1.0, %v7750_v58  ;;  %s7771_s5 = scalar_lea.vmem %s8295_s1, %s7258_s7  ;;  %s5642_s7 = scalar_lea.vmem [#allocation11], %s6889_s8 }
 0xc17   : > { %v6072_v60 = vpop.f32.mrf.mxu0  ;;  %s8297_s1 = sld [smem:[#allocation47_spill]] (!%p5626_p7) }
 0xc18   : > { %v3354_v60 = vrot.slane %v7750_v58, %v1311_v28  ;;  %v7782_v28 = vld [vmem:[%s7771_s5 + $0x18] sm:$0xff] }
 0xc1d   : > { %v2928_v61 = vpop.f32.mrf.mxu0 }
 0xc1e   : > { %v2932_v62 = vsel %vm1806_vm0, %v2928_v61, -inf }
 0xc1f   : > { %2933 = vmax.xlane.f32.xlu0 %v2932_v62  ;;  %v6079_v63 = vpop.f32.mrf.mxu0 }
 0xca8   : > { %v2934_v15 = vpop.xlane.xlu0 %2933 }
 0xca9   : > { %v2935_v0 = vsub.f32 %v2928_v61, %v2934_v15  ;;  %v7764_v61 = vld [vmem:[#allocation2 + $0x8] sm:$0xff] }
 0xcaa   : > { %v7774_v15 = vld [vmem:[%s7771_s5 + $0x28] sm:$0xff] }
 0xcab   : > { %v2936_v1 = vmul.f32 1.442695, %v2935_v0  ;;  %v7787_v0 = vld [vmem:[%s7771_s5 + $0x10] sm:$0xff] }
 0xcad   : > { %6523 = vpow2.f32 %v2936_v1 }
 0xcba   : > { %v6524_v14 = vpop.eup %6523 }
 0xcbb   : > { %v2938_v3 = vsel %vm1806_vm0, %v6524_v14, 0.0 }
 0xcbc   : > { %2939 = vadd.xlane.f32.xlu1 %v2938_v3 }
 0xd45   : > { %v2940_v4 = vpop.xlane.xlu1 %2939 }
 0xd46   : > { %6525 = vrcp.f32 %v2940_v4 }
 0xd53   : > { %v6526_v5 = vpop.eup %6525 }
 0xd54   : > { %v2942_v9 = vmul.f32 %v6526_v5, %v6524_v14 }
 0xd56   : > { %6085 = vmatmul.mubr.msk.f32.vlgmr.msra.gmra.mxu1 %vm1806_vm0, %v2942_v9 }
 0xd57   : > { %6088 = vmatpush3.msra.mxu1 %v7687_v13  ;;  %6099 = vmatprep.mubr.msk.f32.mxu1 %vm6906_vm4, %v6905_v20 }
 0xd58   : > { %6089 = vmatprep.subr.mxu1 %v6905_v20 }
 0xd59   : > { %6090 = vmatpush3.msra.mxu1 %v7690_v17 }
 0xd5a   : > { %6091 = vmatprep.subr.mxu1 %v6905_v20 }
 0xd5b   : > { %6092 = vmatpush3.msra.mxu1 %v7696_v19 }
 0xd5c   : > { %6093 = vmatprep.subr.mxu1 %v6905_v20 }
 0xd5d   : > { %6094 = vmatpush3.msra.mxu1 %v7700_v6 }
 0xd5e   : > { %6095 = vmatprep.subr.mxu1 %v6905_v20 }
 0xd5f   : > { %6096 = vmatpush3.msra.mxu1 %v7706_v24 }
 0xd60   : > { %6097 = vmatprep.subr.mxu1 %v6905_v20 }
 0xd61   : > { %6098 = vmatpush3.msra.mxu1 %v7710_v26 }
 0xd62   : > { %6117 = vmatprep.subr.mxu1 %v6905_v20 }
 0xe16   : > { %v3014_v2 = vpop.f32.mrf.mxu1 }
 0xe17   : > { %v3018_v37 = vadd.f32 %v3014_v2, %v2857_v11  ;;  %v3349_v11 = vrot.slane %v7756_v59, %v1306_v27  ;;  %v7777_v27 = vld [vmem:[%s7771_s5 + $0x20] sm:$0xff] }
 0xe18   : > { %v6086_v38 = vpop.f32.mrf.mxu1 }
 0xe19   : > { %6100 = vmatmul.mubr.msk.f32.vlgmr.msra.gmra.mxu1 %vm1320_vm5, %v3018_v37  ;;  %v3350_v62 = vmul.f32 %v3349_v11, %v7764_v61  ;;  %v3130_v37 = vsub.s32 2, %v7273_v22 }
 0xe1a   : > { %6129 = vmatprep.mubr.msk.f32.mxu1 %vm6906_vm4, %v6905_v20  ;;  %6118 = vmatpush3.msra.mxu1 %v7774_v15 }
 0xe1b   : > { %v3355_v63 = vadd.f32 %v3354_v60, %v3350_v62  ;;  %6119 = vmatprep.subr.mxu1 %v6905_v20  ;;  %v6567_v60 = vld [vmem:[%s7215_s14] sm:$0xf] }
 0xe1c   : > { %6120 = vmatpush3.msra.mxu1 %v7777_v27 }
 0xe1d   : > { %6121 = vmatprep.subr.mxu1 %v6905_v20 }
 0xe1e   : > { %6122 = vmatpush3.msra.mxu1 %v7782_v28 }
 0xe1f   : > { %6123 = vmatprep.subr.mxu1 %v6905_v20 }
 0xe20   : > { %6124 = vmatpush3.msra.mxu1 %v7787_v0 }
 0xe21   : > { %6125 = vmatprep.subr.mxu1 %v6905_v20 }
 0xed9   : > { %v3094_v41 = vpop.f32.mrf.mxu1 }
 0xeda   : > { %v3095_v48 = vadd.f32 %v7718_v39, %v3094_v41 }
 0xedb   : > { %v6101_v8 = vpop.f32.mrf.mxu1 }
 0xedc   : > { %v3098_v49 = vadd.f32 %v3095_v48, %v7296_v30  ;;  %v7735_v30 = vld [vmem:[%s1223_s10 + $0x18] sm:$0xff]  ;;  %s5658_s10 = scalar_lea.vmem [#allocation17], %s6889_s8 }
 0xedd   : > { %6107 = vmatpush3.msra.mxu0 %v7735_v30  ;;  %v7795_v48 = vld [vmem:[%s5642_s7 - $0x1] ss:$0 sm:$0xff] }
 0xede   : > { %v3099_v50 = vsel %vm1320_vm5, %v3098_v49, 0.0  ;;  %v3103_v47 = vmul.f32 %v3098_v49, %v3098_v49  ;;  %6108 = vmatprep.subr.mxu0 %v6905_v20 }
 0xedf   : > { %3100 = vadd.xlane.f32.xlu0 %v3099_v50  ;;  %6109 = vmatpush3.msra.mxu0 %v7738_v53  ;;  %v3135_v50 = vsub.s32 3, %v7273_v22 }
 0xee0   : > { %v3104_v52 = vsel %vm1320_vm5, %v3103_v47, 0.0  ;;  %6110 = vmatprep.subr.mxu0 %v6905_v20  ;;  %v7799_v47 = vld [vmem:[%s5646_s13 - $0x1] ss:$0 sm:$0xff] }
 0xee1   : > { %3105 = vadd.xlane.f32.xlu1 %v3104_v52  ;;  %6111 = vmatpush3.msra.mxu0 %v7742_v55  ;;  %v3131_v52 = vrot.slane %v7270_v21, %v3130_v37  ;;  %v3136_v62 = vrot.slane %v6567_v60, %v3135_v50  ;;  %v6569_v21 = vld [vmem:[%s7268_s0 + $0x20] sm:$0xff]  ;;  %v6580_v60 = vld [vmem:[%s8286_s3 + $0x8] sm:$0xff] }
 0xee2   : > { %6112 = vmatprep.subr.mxu0 %v6905_v20 }
 0xee3   : > { %6113 = vmatpush3.msra.mxu0 %v7746_v56 }
 0xee4   : > { %6132 = vmatprep.subr.mxu0 %v6905_v20 }
 0xf68   : > { %v3101_v1 = vpop.xlane.xlu0 %3100 }
 0xf69   : > { %v3102_v14 = vmul.f32 0.020833334, %v3101_v1 }
 0xf6a   : > { %v3106_v3 = vpop.xlane.xlu1 %3105 }
 0xf6b   : > { %v3108_v4 = vmul.f32 %v3102_v14, %v3102_v14  ;;  %v3107_v5 = vmul.f32 0.020833334, %v3106_v3  ;;  %v3110_v38 = vsub.f32 %v3098_v49, %v3102_v14  ;;  %v6568_v3 = vld [vmem:[%s7268_s0 + $0x28] sm:$0xff] }
 0xf6d   : > { %v3109_v9 = vsub.f32 %v3107_v5, %v3108_v4  ;;  %v6570_v4 = vld [vmem:[%s7268_s0 + $0x18] sm:$0xff]  ;;  %v6571_v5 = vld [vmem:[%s7268_s0 + $0x10] sm:$0xff] }
 0xf6f   : > { %v3111_v2 = vadd.f32 1e-05, %v3109_v9  ;;  %v6572_v9 = vld [vmem:[%s7268_s0 + $0x8] sm:$0xff] }
 0xf71   : > { %6527 = vrsqrt.f32 %v3111_v2  ;;  %v5574_v2 = vld [vmem:[%s8288_s28 + $0x10] sm:$0xff] }
 0xf7e   : > { %v6528_v41 = vpop.eup %6527 }
 0xf7f   : > { %v3113_v8 = vmul.f32 %v6528_v41, %v3110_v38  ;;  %v6573_v38 = vld [vmem:[%s7268_s0] sm:$0xff]  ;;  %v6574_v41 = vld [vmem:[%s7323_s9 + $0x28] sm:$0xff] }
 0xf81   : > { %v3120_v11 = vmul.f32 %v7795_v48, %v3113_v8  ;;  %v6579_v8 = vld [vmem:[%s7385_s21] ss:$0 sm:$0xff]  ;;  %s8296_s21 = scalar_lea.vmem [#allocation6], %s6889_s8 }
 0xf83   : > { %v7806_v49 = vadd.f32 %v7799_v47, %v3120_v11 }
 0xf85   : > { %v3132_v1 = vmul.f32 %v3131_v52, %v7806_v49 }
 0xf87   : > { %v3137_v14 = vadd.f32 %v3136_v62, %v3132_v1  ;;  %v6581_v62 = vld [vmem:[%s8286_s3] sm:$0xff] }
 0xf89   : > { %6115 = vmatmul.mubr.msk.f32.vlgmr.msra.gmra.mxu0 %vm1320_vm5, %v3137_v14 }
 0xf8a   : > { %6133 = vmatpush3.msra.mxu0 %v6568_v3  ;;  %6144 = vmatprep.mubr.msk.f32.mxu0 %vm6906_vm4, %v6905_v20  ;;  %v6582_v3 = vld [vmem:[%s8296_s21 - $0x1] ss:$0 sm:$0xff]  ;;  %s5654_s21 = scalar_lea.vmem [#allocation15], %s6889_s8 }
 0xf8b   : > { %6134 = vmatprep.subr.mxu0 %v6905_v20 }
 0xf8c   : > { %6135 = vmatpush3.msra.mxu0 %v6569_v21 }
 0xf8d   : > { %6136 = vmatprep.subr.mxu0 %v6905_v20 }
 0xf8e   : > { %6137 = vmatpush3.msra.mxu0 %v6570_v4 }
 0xf8f   : > { %6138 = vmatprep.subr.mxu0 %v6905_v20 }
 0xf90   : > { %6139 = vmatpush3.msra.mxu0 %v6571_v5 }
 0xf91   : > { %6140 = vmatprep.subr.mxu0 %v6905_v20 }
 0xf92   : > { %6141 = vmatpush3.msra.mxu0 %v6572_v9 }
 0xf93   : > { %6142 = vmatprep.subr.mxu0 %v6905_v20 }
 0xf94   : > { %6143 = vmatpush3.msra.mxu0 %v6573_v38 }
 0xf95   : > { %6145 = vmatmul.mubr.msk.f32.vlgmr.msra.gmra.mxu0 %vm1320_vm5, %v3355_v63  ;;  %6162 = vmatprep.subr.mxu0 %v7330_v40  ;;  %v5575_v40 = vld [vmem:[%s8288_s28 + $0x18] sm:$0xff]  ;;  %v6578_v63 = vld [vmem:[%s8286_s3 + $0x10] sm:$0xff] }
 0xf96   : > { %6163 = vmatpush3.msra.mxu0 %v6574_v41  ;;  %6174 = vmatprep.mubr.msk.f32.mxu0 %vm1320_vm5, %v5574_v2  ;;  %v5577_v41 = vld [vmem:[%s8290_s2 + $0x8] sm:$0xff] }
 0xf97   : > { %6164 = vmatprep.subr.mxu0 %v7337_v42 }
 0xf98   : > { %6165 = vmatpush3.msra.mxu0 %v7337_v42  ;;  %v7865_v42 = vld [vmem:[%s7771_s5 + $0x8] sm:$0xff] }
 0xf99   : > { %6166 = vmatprep.subr.mxu0 %v7343_v43  ;;  %6126 = vmatpush3.msra.mxu1 %v7865_v42 }
 0xf9a   : > { %6167 = vmatpush3.msra.mxu0 %v7343_v43  ;;  %6127 = vmatprep.subr.mxu1 %v6905_v20  ;;  %v7870_v43 = vld [vmem:[%s7771_s5] sm:$0xff] }
 0xf9b   : > { %6168 = vmatprep.subr.mxu0 %v7349_v44  ;;  %6128 = vmatpush3.msra.mxu1 %v7870_v43 }
 0xf9c   : > { %6169 = vmatpush3.msra.mxu0 %v7349_v44  ;;  %6147 = vmatprep.subr.mxu1 %v6905_v20  ;;  %v7875_v44 = vld [vmem:[%s5650_s11 - $0x1] ss:$0 sm:$0xff] }
 0xf9d   : > { %6170 = vmatprep.subr.mxu0 %v7354_v45 }
 0xf9e   : > { %6171 = vmatpush3.msra.mxu0 %v7354_v45 }
 0xf9f   : > { %6172 = vmatprep.subr.mxu0 %v7359_v46 }
 0xfa0   : > { %6173 = vmatpush3.msra.mxu0 %v7359_v46 }
 0xfa1   : > { %6175 = vmatmul.mubr.msk.f32.vlgmr.msra.gmra.mxu0 %vm1320_vm5, %v5575_v40  ;;  %6192 = vmatprep.subr.mxu0 %v7496_v29 }
 0xfa2   : > { %6193 = vmatpush3.msra.mxu0 %v7496_v29  ;;  %6204 = vmatprep.mubr.msk.f32.mxu0 %vm1320_vm5, %v5574_v2 }
 0xfa3   : > { %6194 = vmatprep.subr.mxu0 %v7498_v31 }
 0xfa4   : > { %6195 = vmatpush3.msra.mxu0 %v7498_v31 }
 0xfa5   : > { %6196 = vmatprep.subr.mxu0 %v7502_v32 }
 0xfa6   : > { %6197 = vmatpush3.msra.mxu0 %v7502_v32  ;;  %v6575_v32 = vld [vmem:[%s8286_s3 + $0x28] sm:$0xff] }
 0xfa7   : > { %6198 = vmatprep.subr.mxu0 %v7506_v33 }
 0xfa8   : > { %6199 = vmatpush3.msra.mxu0 %v7506_v33  ;;  %v6576_v33 = vld [vmem:[%s8286_s3 + $0x20] sm:$0xff] }
 0xfa9   : > { %6200 = vmatprep.subr.mxu0 %v7510_v34 }
 0xfaa   : > { %6201 = vmatpush3.msra.mxu0 %v7510_v34  ;;  %v6577_v34 = vld [vmem:[%s8286_s3 + $0x18] sm:$0xff] }
 0xfab   : > { %6202 = vmatprep.subr.mxu0 %v7514_v35 }
 0xfac   : > { %6203 = vmatpush3.msra.mxu0 %v7514_v35 }
 0xfad   : > { %6205 = vmatmul.mubr.msk.f32.vlgmr.msra.gmra.mxu0 %vm1320_vm5, %v5575_v40  ;;  %6214 = vmatprep.subr.mxu0 %v6905_v20  ;;  %v5576_v40 = vld [vmem:[%s8291_s6 + $0x8] sm:$0xff] }
 0xfae   : > { %6218 = vmatprep.mubr.msk.f32.mxu0 %vm6906_vm4, %v6905_v20 }
0x1049   : > { %v3213_v45 = vpop.f32.mrf.mxu0 }
0x104a   : > { %v3214_v46 = vadd.f32 %v7875_v44, %v3213_v45  ;;  %v5579_v45 = vld [vmem:[%s8292_s12 + $0x18] sm:$0xff] }
0x104b   : > { %v6116_v29 = vpop.f32.mrf.mxu0 }
0x104c   : > { %v3217_v31 = vmax.f32 %v3214_v46, 0.0  ;;  %v5581_v29 = vld [vmem:[%s8293_s18 + $0x18] sm:$0xff] }
0x104e   : > { %6130 = vmatmul.mubr.msk.f32.vlgmr.msra.gmra.mxu1 %vm1320_vm5, %v3217_v31 }
0x104f   : > { %6148 = vmatpush3.msra.mxu1 %v6575_v32  ;;  %6159 = vmatprep.mubr.msk.f32.mxu1 %vm6906_vm4, %v6905_v20 }
0x1050   : > { %6149 = vmatprep.subr.mxu1 %v6905_v20 }
0x1051   : > { %6150 = vmatpush3.msra.mxu1 %v6576_v33 }
0x1052   : > { %6151 = vmatprep.subr.mxu1 %v6905_v20 }
0x1053   : > { %6152 = vmatpush3.msra.mxu1 %v6577_v34 }
0x1054   : > { %6153 = vmatprep.subr.mxu1 %v6905_v20 }
0x1055   : > { %v3425_v35 = vpop.f32.mrf.mxu0  ;;  %6154 = vmatpush3.msra.mxu1 %v6578_v63 }
0x1056   : > { %v3426_v52 = vadd.f32 %v6579_v8, %v3425_v35  ;;  %6155 = vmatprep.subr.mxu1 %v6905_v20  ;;  %v5578_v8 = vld [vmem:[%s8292_s12 + $0x10] sm:$0xff] }
0x1057   : > { %v6146_v11 = vpop.f32.mrf.mxu0  ;;  %6156 = vmatpush3.msra.mxu1 %v6580_v60 }
0x1058   : > { %6157 = vmatprep.subr.mxu1 %v6905_v20  ;;  %v3429_v31 = vmul.f32 %v5576_v40, %v3426_v52 }
0x1059   : > { %6158 = vmatpush3.msra.mxu1 %v6581_v62 }
0x105a   : > { %6160 = vmatmul.mubr.msk.f32.vlgmr.msra.gmra.mxu1 %vm1320_vm5, %v3426_v52  ;;  %6177 = vmatprep.subr.mxu1 %v6575_v32 }
0x105b   : > { %6178 = vmatpush3.msra.mxu1 %v6575_v32 }
0x105c   : > { %6179 = vmatprep.subr.mxu1 %v6576_v33 }
0x105d   : > { %6180 = vmatpush3.msra.mxu1 %v6576_v33  ;;  %v5580_v33 = vld [vmem:[%s8293_s18 + $0x10] sm:$0xff] }
0x105e   : > { %6181 = vmatprep.subr.mxu1 %v6577_v34 }
0x105f   : > { %6182 = vmatpush3.msra.mxu1 %v6577_v34 }
0x1060   : > { %6183 = vmatprep.subr.mxu1 %v6578_v63 }
0x1061   : > { %v6176_v1 = vpop.f32.mrf.mxu0  ;;  %6184 = vmatpush3.msra.mxu1 %v6578_v63 }
0x1062   : > { %6185 = vmatprep.subr.mxu1 %v6580_v60  ;;  %v3584_v4 = vadd.f32 %v6582_v3, %v6176_v1 }
0x1063   : > { %v3578_v14 = vpop.f32.mrf.mxu0  ;;  %6186 = vmatpush3.msra.mxu1 %v6580_v60 }
0x1064   : > { %v3579_v21 = vadd.f32 %v6582_v3, %v3578_v14  ;;  %6187 = vmatprep.subr.mxu1 %v6581_v62  ;;  %v3588_v35 = vmul.f32 %v5579_v45, %v3584_v4 }
0x1065   : > { %6188 = vmatpush3.msra.mxu1 %v6581_v62 }
0x1066   : > { %6189 = vmatprep.mubr.msk.f32.mxu1 %vm1320_vm5, %v3579_v21  ;;  %6207 = vmatprep.subr.mxu1 %v6905_v20  ;;  %v3587_v3 = vmul.f32 %v5578_v8, %v3579_v21 }
0x1067   : > { %6190 = vmatmul.mubr.msk.f32.vlgmr.msra.gmra.mxu1 %vm1320_vm5, %v3584_v4 }
0x1068   : > { %6211 = vmatprep.mubr.msk.f32.mxu1 %vm6906_vm4, %v6905_v20 }
0x106d   : > { %v6206_v34 = vpop.f32.mrf.mxu0 }
0x106e   : > { %v7940_v52 = vadd.f32 %v6206_v34, %v7535_v7 }
0x106f   : > { %v3740_v14 = vpop.f32.mrf.mxu0 }
0x1070   : > { %v3928_v21 = vmul.f32 %v7450_v18, %v7940_v52 }
0x110e   : > { %v7913_v5 = vpop.f32.mrf.mxu1 }
0x1110   : > { %v6131_v9 = vpop.f32.mrf.mxu1 }
0x111a   : > { %v3499_v2 = vpop.f32.mrf.mxu1 }
0x111b   : > { %v3503_v46 = vmul.f32 %v5577_v41, %v3499_v2  ;;  %v7949_v2 = vadd.f32 %v7535_v7, %v3740_v14 }
0x111c   : > { %v6161_v38 = vpop.f32.mrf.mxu1 }
0x111d   : > { %v3504_v11 = vadd.f32 %v3503_v46, %v3429_v31  ;;  %v3841_v38 = vmul.f32 %v7434_v16, %v7940_v52  ;;  %v3927_v7 = vmul.f32 %v7450_v18, %v7949_v2  ;;  %v3840_v45 = vmul.f32 %v7434_v16, %v7949_v2 }
0x111f   : > { %v7942_v4 = vmul.f32 0.4082483, %v3504_v11 }
0x1121   : > { %v3749_v41 = vmul.f32 %v7434_v16, %v7942_v4  ;;  %v3842_v40 = vmul.f32 %v7450_v18, %v7942_v4 }
0x1127   : > { %v6191_v32 = vpop.f32.mrf.mxu1 }
0x1128   : > { %v3671_v63 = vmul.f32 %v6191_v32, %v5581_v29 }
0x1129   : > { %v3661_v60 = vpop.f32.mrf.mxu1 }
0x112a   : > { %v7933_v62 = vadd.f32 %v3671_v63, %v3588_v35  ;;  %v3670_v1 = vmul.f32 %v5580_v33, %v3661_v60 }
0x112c   : > { %6208 = vmatpush3.xpose.msk.msra.mxu1 %vm1320_vm5, %v7933_v62  ;;  %6215 = vmatpush3.xpose.msk.msra.mxu0 %vm1320_vm5, %v7933_v62  ;;  %v7946_v9 = vadd.f32 %v3670_v1, %v3587_v3 }
0x112d   : > { %6209 = vmatprep.subr.mxu1 %v6905_v20  ;;  %6216 = vmatprep.subr.mxu0 %v6905_v20 }
0x1130   : > { %6210 = vmatpush3.xpose.msk.msra.mxu1 %vm1320_vm5, %v7946_v9  ;;  %6217 = vmatpush3.xpose.msk.msra.mxu0 %vm1320_vm5, %v7946_v9 }
0x1131   : > { %6221 = vmatprep.subr.mxu1 %v6905_v20  ;;  %6228 = vmatprep.subr.mxu0 %v6905_v20 }
0x1133   : > { %6212 = vmatmul.mubr.msk.f32.vlgmr.msra.gmra.mxu1 %vm1320_vm5, %v3749_v41  ;;  %6219 = vmatmul.mubr.msk.f32.vlgmr.msra.gmra.mxu0 %vm1320_vm5, %v3842_v40 }
0x1134   : > { %6222 = vmatpush3.msra.mxu1 %v3928_v21  ;;  %6229 = vmatpush3.msra.mxu0 %v3841_v38 }
0x1135   : > { %6223 = vmatprep.subr.mxu1 %v6905_v20  ;;  %6230 = vmatprep.subr.mxu0 %v6905_v20 }
0x1136   : > { %6224 = vmatpush3.msra.mxu1 %v3927_v7  ;;  %6231 = vmatpush3.msra.mxu0 %v3840_v45 }
0x1137   : > { %6225 = vmatprep.mubr.msk.f32.mxu1 %vm6906_vm4, %v6905_v20  ;;  %6235 = vmatprep.subr.mxu1 %v6905_v20 }
0x1138   : > { %6232 = vmatprep.mubr.msk.f32.mxu0 %vm6906_vm4, %v6905_v20  ;;  %6242 = vmatprep.subr.mxu0 %v6905_v20 }
0x11f3   : > { %v3825_v16 = vpop.f32.mrf.mxu1  ;;  %v3912_v18 = vpop.f32.mrf.mxu0 }
0x11f4   : > { %v3916_v46 = vsel %vm1806_vm0, %v3912_v18, -inf  ;;  %v3829_v32 = vsel %vm1806_vm0, %v3825_v16, -inf }
0x11f5   : > { %3917 = vmax.xlane.f32.xlu0 %v3916_v46  ;;  %v6213_v29 = vpop.f32.mrf.mxu1  ;;  %v6220_v31 = vpop.f32.mrf.mxu0  ;;  %v4075_v46 = vmul.f32 %v7466_v23, %v7942_v4 }
0x11f6   : > { %v4322_v29 = vmul.f32 %v7585_v57, %v7940_v52  ;;  %v4321_v31 = vmul.f32 %v7585_v57, %v7949_v2 }
0x11f9   : > { %3830 = vmax.xlane.f32.xlu0 %v3829_v32 }
0x127e   : > { %v3918_v33 = vpop.xlane.xlu0 %3917 }
0x127f   : > { %v3919_v34 = vsub.f32 %v3912_v18, %v3918_v33  ;;  %v4160_v18 = vmul.f32 %v7466_v23, %v7949_v2 }
0x1281   : > { %v3920_v35 = vmul.f32 1.442695, %v3919_v34 }
0x1282   : > { %v3831_v63 = vpop.xlane.xlu0 %3830 }
0x1283   : > { %6529 = vpow2.f32 %v3920_v35  ;;  %v3832_v8 = vsub.f32 %v3825_v16, %v3831_v63  ;;  %v4161_v16 = vmul.f32 %v7466_v23, %v7940_v52 }
0x1285   : > { %v3833_v11 = vmul.f32 1.442695, %v3832_v8 }
0x1287   : > { %6531 = vpow2.f32 %v3833_v11 }
0x1290   : > { %v6530_v60 = vpop.eup %6529 }
0x1291   : > { %v3922_v1 = vsel %vm1806_vm0, %v6530_v60, 0.0 }
0x1292   : > { %3923 = vadd.xlane.f32.xlu1 %v3922_v1 }
0x1294   : > { %v6532_v14 = vpop.eup %6531 }
0x1295   : > { %v3835_v3 = vsel %vm1806_vm0, %v6532_v14, 0.0 }
0x1296   : > { %3836 = vadd.xlane.f32.xlu0 %v3835_v3 }
0x131b   : > { %v3924_v21 = vpop.xlane.xlu1 %3923 }
0x131c   : > { %6533 = vrcp.f32 %v3924_v21 }
0x131f   : > { %v3837_v38 = vpop.xlane.xlu0 %3836 }
0x1320   : > { %6535 = vrcp.f32 %v3837_v38 }
0x1329   : > { %v6534_v41 = vpop.eup %6533 }
0x132a   : > { %v3926_v40 = vmul.f32 %v6534_v41, %v6530_v60 }
0x132c   : > { %6226 = vmatmul.mubr.msk.f32.vlgmr.msra.gmra.mxu1 %vm1806_vm0, %v3926_v40 }
0x132d   : > { %v6536_v7 = vpop.eup %6535  ;;  %6236 = vmatpush3.xpose.msk.msra.mxu1 %vm1320_vm5, %v7933_v62  ;;  %6239 = vmatprep.mubr.msk.f32.mxu1 %vm6906_vm4, %v6905_v20 }
0x132e   : > { %6237 = vmatprep.subr.mxu1 %v6905_v20  ;;  %v3839_v45 = vmul.f32 %v6536_v7, %v6532_v14  ;;  %v4236_v7 = vmul.f32 %v7585_v57, %v7942_v4 }
0x1330   : > { %6233 = vmatmul.mubr.msk.f32.vlgmr.msra.gmra.mxu0 %vm1806_vm0, %v3839_v45  ;;  %v4483_v45 = vmul.f32 %v7482_v25, %v7940_v52 }
0x1331   : > { %6238 = vmatpush3.xpose.msk.msra.mxu1 %vm1320_vm5, %v7946_v9  ;;  %6243 = vmatpush3.msra.mxu0 %v4161_v16  ;;  %v4482_v16 = vmul.f32 %v7482_v25, %v7949_v2 }
0x1332   : > { %6244 = vmatprep.subr.mxu0 %v6905_v20  ;;  %6256 = vmatprep.subr.mxu1 %v6905_v20 }
0x1333   : > { %6245 = vmatpush3.msra.mxu0 %v4160_v18  ;;  %6246 = vmatprep.mubr.msk.f32.mxu0 %vm6906_vm4, %v6905_v20 }
0x1334   : > { %6240 = vmatmul.mubr.msk.f32.vlgmr.msra.gmra.mxu1 %vm1320_vm5, %v4075_v46  ;;  %6249 = vmatprep.subr.mxu0 %v6905_v20 }
0x1335   : > { %6257 = vmatpush3.msra.mxu1 %v4322_v29  ;;  %6260 = vmatprep.mubr.msk.f32.mxu1 %vm6906_vm4, %v6905_v20 }
0x1336   : > { %6258 = vmatprep.subr.mxu1 %v6905_v20 }
0x1337   : > { %6259 = vmatpush3.msra.mxu1 %v4321_v31 }
0x1338   : > { %6263 = vmatprep.subr.mxu1 %v6905_v20 }
0x13ec   : > { %v3998_v23 = vpop.f32.mrf.mxu1 }
0x13ee   : > { %v6227_v32 = vpop.f32.mrf.mxu1 }
0x13f0   : > { %v4071_v33 = vpop.f32.mrf.mxu0 }
0x13f1   : > { %v4072_v34 = vadd.f32 %v4071_v33, %v3998_v23 }
0x13f2   : > { %v6234_v35 = vpop.f32.mrf.mxu0 }
0x13f4   : > { %v4145_v63 = vpop.f32.mrf.mxu1 }
0x13f5   : > { %v4149_v8 = vsel %vm1806_vm0, %v4145_v63, -inf }
0x13f6   : > { %4150 = vmax.xlane.f32.xlu1 %v4149_v8  ;;  %v6241_v11 = vpop.f32.mrf.mxu1 }
0x147f   : > { %v4151_v60 = vpop.xlane.xlu1 %4150 }
0x1480   : > { %v4152_v1 = vsub.f32 %v4145_v63, %v4151_v60 }
0x1482   : > { %v4153_v14 = vmul.f32 1.442695, %v4152_v1 }
0x1484   : > { %6537 = vpow2.f32 %v4153_v14  ;;  %v4644_v14 = vmul.f32 %v7544_v12, %v7940_v52 }
0x1491   : > { %v6538_v3 = vpop.eup %6537 }
0x1492   : > { %v4155_v21 = vsel %vm1806_vm0, %v6538_v3, 0.0 }
0x1493   : > { %4156 = vadd.xlane.f32.xlu1 %v4155_v21 }
0x151c   : > { %v4157_v38 = vpop.xlane.xlu1 %4156 }
0x151d   : > { %6539 = vrcp.f32 %v4157_v38 }
0x152a   : > { %v6540_v41 = vpop.eup %6539 }
0x152b   : > { %v4159_v40 = vmul.f32 %v6540_v41, %v6538_v3  ;;  %v4643_v3 = vmul.f32 %v7544_v12, %v7949_v2 }
0x152d   : > { %6247 = vmatmul.mubr.msk.f32.vlgmr.msra.gmra.mxu0 %vm1806_vm0, %v4159_v40 }
0x152e   : > { %6250 = vmatpush3.xpose.msk.msra.mxu0 %vm1320_vm5, %v7933_v62  ;;  %6253 = vmatprep.mubr.msk.f32.mxu0 %vm6906_vm4, %v6905_v20 }
0x152f   : > { %6251 = vmatprep.subr.mxu0 %v6905_v20 }
0x1532   : > { %6252 = vmatpush3.xpose.msk.msra.mxu0 %vm1320_vm5, %v7946_v9 }
0x1533   : > { %6270 = vmatprep.subr.mxu0 %v6905_v20 }
0x1535   : > { %6254 = vmatmul.mubr.msk.f32.vlgmr.msra.gmra.mxu0 %vm1320_vm5, %v4236_v7 }
0x1536   : > { %6271 = vmatpush3.msra.mxu0 %v4483_v45  ;;  %6274 = vmatprep.mubr.msk.f32.mxu0 %vm6906_vm4, %v6905_v20 }
0x1537   : > { %6272 = vmatprep.subr.mxu0 %v6905_v20 }
0x1538   : > { %6273 = vmatpush3.msra.mxu0 %v4482_v16 }
0x1539   : > { %6277 = vmatprep.subr.mxu0 %v6905_v20 }
0x15ed   : > { %v4231_v57 = vpop.f32.mrf.mxu0 }
0x15ee   : > { %v4235_v18 = vadd.f32 %v4231_v57, %v4072_v34  ;;  %v4397_v34 = vmul.f32 %v7482_v25, %v7942_v4 }
0x15ef   : > { %v6248_v46 = vpop.f32.mrf.mxu0 }
0x15f5   : > { %v4306_v29 = vpop.f32.mrf.mxu0 }
0x15f6   : > { %v4310_v31 = vsel %vm1806_vm0, %v4306_v29, -inf }
0x15f7   : > { %4311 = vmax.xlane.f32.xlu0 %v4310_v31  ;;  %v6255_v23 = vpop.f32.mrf.mxu0 }
0x1680   : > { %v4312_v32 = vpop.xlane.xlu0 %4311 }
0x1681   : > { %v4313_v33 = vsub.f32 %v4306_v29, %v4312_v32 }
0x1683   : > { %v4314_v35 = vmul.f32 1.442695, %v4313_v33  ;;  %v4805_v33 = vmul.f32 %v7627_v54, %v7940_v52 }
0x1685   : > { %6541 = vpow2.f32 %v4314_v35  ;;  %v4804_v35 = vmul.f32 %v7627_v54, %v7949_v2 }
0x1692   : > { %v6542_v63 = vpop.eup %6541 }
0x1693   : > { %v4316_v8 = vsel %vm1806_vm0, %v6542_v63, 0.0 }
0x1694   : > { %4317 = vadd.xlane.f32.xlu1 %v4316_v8 }
0x171d   : > { %v4318_v11 = vpop.xlane.xlu1 %4317 }
0x171e   : > { %6543 = vrcp.f32 %v4318_v11 }
0x172b   : > { %v6544_v60 = vpop.eup %6543 }
0x172c   : > { %v4320_v1 = vmul.f32 %v6544_v60, %v6542_v63 }
0x172e   : > { %6261 = vmatmul.mubr.msk.f32.vlgmr.msra.gmra.mxu1 %vm1806_vm0, %v4320_v1 }
0x172f   : > { %6264 = vmatpush3.xpose.msk.msra.mxu1 %vm1320_vm5, %v7933_v62  ;;  %6267 = vmatprep.mubr.msk.f32.mxu1 %vm6906_vm4, %v6905_v20 }
0x1730   : > { %6265 = vmatprep.subr.mxu1 %v6905_v20 }
0x1733   : > { %6266 = vmatpush3.xpose.msk.msra.mxu1 %vm1320_vm5, %v7946_v9 }
0x1734   : > { %6284 = vmatprep.subr.mxu1 %v6905_v20 }
0x1736   : > { %6268 = vmatmul.mubr.msk.f32.vlgmr.msra.gmra.mxu1 %vm1320_vm5, %v4397_v34 }
0x1737   : > { %6285 = vmatpush3.msra.mxu1 %v4644_v14  ;;  %6288 = vmatprep.mubr.msk.f32.mxu1 %vm6906_vm4, %v6905_v20 }
0x1738   : > { %6286 = vmatprep.subr.mxu1 %v6905_v20 }
0x1739   : > { %6287 = vmatpush3.msra.mxu1 %v4643_v3 }
0x173a   : > { %6291 = vmatprep.subr.mxu1 %v6905_v20 }
0x17ee   : > { %v4392_v25 = vpop.f32.mrf.mxu1 }
0x17ef   : > { %v4396_v21 = vadd.f32 %v4392_v25, %v4235_v18  ;;  %v4558_v18 = vmul.f32 %v7544_v12, %v7942_v4 }
0x17f0   : > { %v6262_v38 = vpop.f32.mrf.mxu1 }
0x17f6   : > { %v4467_v41 = vpop.f32.mrf.mxu1 }
0x17f7   : > { %v4471_v40 = vsel %vm1806_vm0, %v4467_v41, -inf }
0x17f8   : > { %4472 = vmax.xlane.f32.xlu0 %v4471_v40  ;;  %v6269_v7 = vpop.f32.mrf.mxu1 }
0x1881   : > { %v4473_v45 = vpop.xlane.xlu0 %4472 }
0x1882   : > { %v4474_v16 = vsub.f32 %v4467_v41, %v4473_v45  ;;  %v4966_v45 = vmul.f32 %v7654_v36, %v7940_v52 }
0x1884   : > { %v4475_v57 = vmul.f32 1.442695, %v4474_v16  ;;  %v4965_v16 = vmul.f32 %v7654_v36, %v7949_v2 }
0x1886   : > { %6545 = vpow2.f32 %v4475_v57 }
0x1893   : > { %v6546_v46 = vpop.eup %6545 }
0x1894   : > { %v4477_v29 = vsel %vm1806_vm0, %v6546_v46, 0.0 }
0x1895   : > { %4478 = vadd.xlane.f32.xlu1 %v4477_v29 }
0x191e   : > { %v4479_v31 = vpop.xlane.xlu1 %4478 }
0x191f   : > { %6547 = vrcp.f32 %v4479_v31 }
0x192c   : > { %v6548_v23 = vpop.eup %6547 }
0x192d   : > { %v4481_v32 = vmul.f32 %v6548_v23, %v6546_v46 }
0x192f   : > { %6275 = vmatmul.mubr.msk.f32.vlgmr.msra.gmra.mxu0 %vm1806_vm0, %v4481_v32 }
0x1930   : > { %6278 = vmatpush3.xpose.msk.msra.mxu0 %vm1320_vm5, %v7933_v62  ;;  %6281 = vmatprep.mubr.msk.f32.mxu0 %vm6906_vm4, %v6905_v20 }
0x1931   : > { %6279 = vmatprep.subr.mxu0 %v6905_v20 }
0x1934   : > { %6280 = vmatpush3.xpose.msk.msra.mxu0 %vm1320_vm5, %v7946_v9 }
0x1935   : > { %6298 = vmatprep.subr.mxu0 %v6905_v20 }
0x1937   : > { %6282 = vmatmul.mubr.msk.f32.vlgmr.msra.gmra.mxu0 %vm1320_vm5, %v4558_v18 }
0x1938   : > { %6299 = vmatpush3.msra.mxu0 %v4805_v33  ;;  %6302 = vmatprep.mubr.msk.f32.mxu0 %vm6906_vm4, %v6905_v20 }
0x1939   : > { %6300 = vmatprep.subr.mxu0 %v6905_v20 }
0x193a   : > { %6301 = vmatpush3.msra.mxu0 %v4804_v35 }
0x193b   : > { %6305 = vmatprep.subr.mxu0 %v6905_v20 }
0x19ef   : > { %v4553_v12 = vpop.f32.mrf.mxu0 }
0x19f0   : > { %v4557_v63 = vadd.f32 %v4553_v12, %v4396_v21  ;;  %v4719_v21 = vmul.f32 %v7627_v54, %v7942_v4 }
0x19f1   : > { %v6276_v8 = vpop.f32.mrf.mxu0 }
0x19f7   : > { %v4628_v11 = vpop.f32.mrf.mxu0 }
0x19f8   : > { %v4632_v60 = vsel %vm1806_vm0, %v4628_v11, -inf }
0x19f9   : > { %4633 = vmax.xlane.f32.xlu0 %v4632_v60  ;;  %v6283_v1 = vpop.f32.mrf.mxu0 }
0x1a82   : > { %v4634_v34 = vpop.xlane.xlu0 %4633 }
0x1a83   : > { %v4635_v14 = vsub.f32 %v4628_v11, %v4634_v34 }
0x1a85   : > { %v4636_v3 = vmul.f32 1.442695, %v4635_v14 }
0x1a87   : > { %6549 = vpow2.f32 %v4636_v3 }
0x1a94   : > { %v6550_v25 = vpop.eup %6549 }
0x1a95   : > { %v4638_v38 = vsel %vm1806_vm0, %v6550_v25, 0.0 }
0x1a96   : > { %4639 = vadd.xlane.f32.xlu1 %v4638_v38 }
0x1b1f   : > { %v4640_v41 = vpop.xlane.xlu1 %4639 }
0x1b20   : > { %6551 = vrcp.f32 %v4640_v41 }
0x1b2d   : > { %v6552_v40 = vpop.eup %6551 }
0x1b2e   : > { %v4642_v7 = vmul.f32 %v6552_v40, %v6550_v25 }
0x1b30   : > { %6289 = vmatmul.mubr.msk.f32.vlgmr.msra.gmra.mxu1 %vm1806_vm0, %v4642_v7 }
0x1b31   : > { %6292 = vmatpush3.xpose.msk.msra.mxu1 %vm1320_vm5, %v7933_v62  ;;  %6295 = vmatprep.mubr.msk.f32.mxu1 %vm6906_vm4, %v6905_v20 }
0x1b32   : > { %6293 = vmatprep.subr.mxu1 %v6905_v20 }
0x1b35   : > { %6294 = vmatpush3.xpose.msk.msra.mxu1 %vm1320_vm5, %v7946_v9 }
0x1b36   : > { %6312 = vmatprep.subr.mxu1 %v6905_v20 }
0x1b38   : > { %6296 = vmatmul.mubr.msk.f32.vlgmr.msra.gmra.mxu1 %vm1320_vm5, %v4719_v21 }
0x1b39   : > { %6313 = vmatpush3.msra.mxu1 %v4966_v45  ;;  %6316 = vmatprep.mubr.msk.f32.mxu1 %vm6906_vm4, %v6905_v20 }
0x1b3a   : > { %6314 = vmatprep.subr.mxu1 %v6905_v20 }
0x1b3b   : > { %6315 = vmatpush3.msra.mxu1 %v4965_v16 }
0x1b3c   : > { %6319 = vmatprep.subr.mxu1 %v6905_v20 }
0x1bf0   : > { %v4714_v54 = vpop.f32.mrf.mxu1 }
0x1bf1   : > { %v4718_v57 = vadd.f32 %v4714_v54, %v4557_v63  ;;  %v4880_v63 = vmul.f32 %v7654_v36, %v7942_v4 }
0x1bf2   : > { %v6290_v46 = vpop.f32.mrf.mxu1 }
0x1bf8   : > { %v4789_v29 = vpop.f32.mrf.mxu1 }
0x1bf9   : > { %v4793_v52 = vsel %vm1806_vm0, %v4789_v29, -inf }
0x1bfa   : > { %4794 = vmax.xlane.f32.xlu0 %v4793_v52  ;;  %v6297_v31 = vpop.f32.mrf.mxu1 }
0x1c83   : > { %v4795_v23 = vpop.xlane.xlu0 %4794 }
0x1c84   : > { %v4796_v32 = vsub.f32 %v4789_v29, %v4795_v23 }
0x1c86   : > { %v4797_v18 = vmul.f32 1.442695, %v4796_v32  ;;  %v5135_v32 = vrot.slane %v7756_v59, %v3130_v37 }
0x1c88   : > { %6553 = vpow2.f32 %v4797_v18 }
0x1c95   : > { %v6554_v2 = vpop.eup %6553 }
0x1c96   : > { %v4799_v33 = vsel %vm1806_vm0, %v6554_v2, 0.0 }
0x1c97   : > { %4800 = vadd.xlane.f32.xlu1 %v4799_v33  ;;  %v5140_v33 = vrot.slane %v7750_v58, %v3135_v50 }
0x1d20   : > { %v4801_v35 = vpop.xlane.xlu1 %4800 }
0x1d21   : > { %6555 = vrcp.f32 %v4801_v35 }
0x1d2e   : > { %v6556_v12 = vpop.eup %6555 }
0x1d2f   : > { %v4803_v8 = vmul.f32 %v6556_v12, %v6554_v2  ;;  %v5661_v12 = vld [vmem:[%s5658_s10 - $0x1] ss:$0 sm:$0xff] }
0x1d31   : > { %6303 = vmatmul.mubr.msk.f32.vlgmr.msra.gmra.mxu0 %vm1806_vm0, %v4803_v8 }
0x1d32   : > { %6306 = vmatpush3.xpose.msk.msra.mxu0 %vm1320_vm5, %v7933_v62  ;;  %6309 = vmatprep.mubr.msk.f32.mxu0 %vm6906_vm4, %v6905_v20 }
0x1d33   : > { %6307 = vmatprep.subr.mxu0 %v6905_v20 }
0x1d36   : > { %6308 = vmatpush3.xpose.msk.msra.mxu0 %vm1320_vm5, %v7946_v9 }
0x1d37   : > { %6334 = vmatprep.subr.mxu0 %v6905_v20 }
0x1d39   : > { %6310 = vmatmul.mubr.msk.f32.vlgmr.msra.gmra.mxu0 %vm1320_vm5, %v4880_v63 }
0x1d3a   : > { %6335 = vmatpush3.msra.mxu0 %v7728_v10  ;;  %6346 = vmatprep.mubr.msk.f32.mxu0 %vm6906_vm4, %v6905_v20 }
0x1d3b   : > { %6336 = vmatprep.subr.mxu0 %v6905_v20 }
0x1d3c   : > { %6337 = vmatpush3.msra.mxu0 %v7732_v51 }
0x1d3d   : > { %6338 = vmatprep.subr.mxu0 %v6905_v20 }
0x1d3e   : > { %6339 = vmatpush3.msra.mxu0 %v7735_v30 }
0x1d3f   : > { %6340 = vmatprep.subr.mxu0 %v6905_v20 }
0x1d40   : > { %6341 = vmatpush3.msra.mxu0 %v7738_v53 }
0x1d41   : > { %6342 = vmatprep.subr.mxu0 %v6905_v20 }
0x1d42   : > { %6343 = vmatpush3.msra.mxu0 %v7742_v55 }
0x1d43   : > { %6344 = vmatprep.subr.mxu0 %v6905_v20 }
0x1d44   : > { %6345 = vmatpush3.msra.mxu0 %v7746_v56 }
0x1df1   : > { %v4875_v36 = vpop.f32.mrf.mxu0 }
0x1df2   : > { %v4879_v10 = vadd.f32 %v4875_v36, %v4718_v57  ;;  %v5665_v36 = vld [vmem:[%s5662_s23 - $0x1] ss:$0 sm:$0xff] }
0x1df3   : > { %v6304_v62 = vpop.f32.mrf.mxu0 }
0x1df9   : > { %v4950_v51 = vpop.f32.mrf.mxu0 }
0x1dfa   : > { %v4954_v4 = vsel %vm1806_vm0, %v4950_v51, -inf }
0x1dfb   : > { %4955 = vmax.xlane.f32.xlu0 %v4954_v4  ;;  %v6311_v30 = vpop.f32.mrf.mxu0 }
0x1e84   : > { %v4956_v9 = vpop.xlane.xlu0 %4955 }
0x1e85   : > { %v4957_v11 = vsub.f32 %v4950_v51, %v4956_v9 }
0x1e87   : > { %v4958_v60 = vmul.f32 1.442695, %v4957_v11 }
0x1e89   : > { %6557 = vpow2.f32 %v4958_v60 }
0x1e96   : > { %v6558_v53 = vpop.eup %6557 }
0x1e97   : > { %v4960_v1 = vsel %vm1806_vm0, %v6558_v53, 0.0 }
0x1e98   : > { %4961 = vadd.xlane.f32.xlu1 %v4960_v1 }
0x1f21   : > { %v4962_v55 = vpop.xlane.xlu1 %4961 }
0x1f22   : > { %6559 = vrcp.f32 %v4962_v55 }
0x1f2f   : > { %v6560_v34 = vpop.eup %6559 }
0x1f30   : > { %v4964_v56 = vmul.f32 %v6560_v34, %v6558_v53 }
0x1f32   : > { %6317 = vmatmul.mubr.msk.f32.vlgmr.msra.gmra.mxu1 %vm1806_vm0, %v4964_v56 }
0x1f33   : > { %6320 = vmatpush3.msra.mxu1 %v7687_v13  ;;  %6331 = vmatprep.mubr.msk.f32.mxu1 %vm6906_vm4, %v6905_v20 }
0x1f34   : > { %6321 = vmatprep.subr.mxu1 %v6905_v20 }
0x1f35   : > { %6322 = vmatpush3.msra.mxu1 %v7690_v17 }
0x1f36   : > { %6323 = vmatprep.subr.mxu1 %v6905_v20 }
0x1f37   : > { %6324 = vmatpush3.msra.mxu1 %v7696_v19  ;;  %v5657_v19 = vld [vmem:[%s5654_s21 - $0x1] ss:$0 sm:$0xff] }
0x1f38   : > { %6325 = vmatprep.subr.mxu1 %v6905_v20 }
0x1f39   : > { %6326 = vmatpush3.msra.mxu1 %v7700_v6 }
0x1f3a   : > { %6327 = vmatprep.subr.mxu1 %v6905_v20 }
0x1f3b   : > { %6328 = vmatpush3.msra.mxu1 %v7706_v24  ;;  %v3294_v24 = vadd.f32 %v5657_v19, %v7913_v5 }
0x1f3c   : > { %6329 = vmatprep.subr.mxu1 %v6905_v20 }
0x1f3d   : > { %6330 = vmatpush3.msra.mxu1 %v7710_v26 }
0x1f3e   : > { %6349 = vmatprep.subr.mxu1 %v6905_v20 }
0x1ff2   : > { %v5036_v13 = vpop.f32.mrf.mxu1 }
0x1ff3   : > { %v5040_v17 = vadd.f32 %v5036_v13, %v4879_v10 }
0x1ff4   : > { %v6318_v14 = vpop.f32.mrf.mxu1 }
0x1ff5   : > { %6332 = vmatmul.mubr.msk.f32.vlgmr.msra.gmra.mxu1 %vm1320_vm5, %v5040_v17 }
0x1ff6   : > { %6350 = vmatpush3.msra.mxu1 %v7774_v15  ;;  %6361 = vmatprep.mubr.msk.f32.mxu1 %vm6906_vm4, %v6905_v20 }
0x1ff7   : > { %6351 = vmatprep.subr.mxu1 %v6905_v20 }
0x1ff8   : > { %6352 = vmatpush3.msra.mxu1 %v7777_v27 }
0x1ff9   : > { %6353 = vmatprep.subr.mxu1 %v6905_v20 }
0x1ffa   : > { %6354 = vmatpush3.msra.mxu1 %v7782_v28  ;;  %v3297_v28 = vadd.f32 %v3294_v24, %v7806_v49 }
0x1ffb   : > { %6355 = vmatprep.subr.mxu1 %v6905_v20 }
0x1ffc   : > { %6356 = vmatpush3.msra.mxu1 %v7787_v0 }
0x1ffd   : > { %6357 = vmatprep.subr.mxu1 %v6905_v20 }
0x1ffe   : > { %6358 = vmatpush3.msra.mxu1 %v7865_v42  ;;  %v3298_v42 = vsel %vm1320_vm5, %v3297_v28, 0.0 }
0x1fff   : > { %6359 = vmatprep.subr.mxu1 %v6905_v20 }
0x2000   : > { %6360 = vmatpush3.msra.mxu1 %v7870_v43  ;;  %v3302_v43 = vmul.f32 %v3297_v28, %v3297_v28 }
0x2002   : > { %v3303_v5 = vsel %vm1320_vm5, %v3302_v43, 0.0 }
0x20b5   : > { %v5110_v6 = vpop.f32.mrf.mxu1 }
0x20b6   : > { %v5111_v26 = vadd.f32 %v7718_v39, %v5110_v6 }
0x20b7   : > { %v6333_v15 = vpop.f32.mrf.mxu1 }
0x20b8   : > { %v5114_v27 = vadd.f32 %v5111_v26, %v7764_v61 }
0x20ba   : > { %v5115_v0 = vsel %vm1320_vm5, %v5114_v27, 0.0  ;;  %v5119_v3 = vmul.f32 %v5114_v27, %v5114_v27 }
0x20bb   : > { %5116 = vadd.xlane.f32.xlu0 %v5115_v0 }
0x20bc   : > { %v5120_v20 = vsel %vm1320_vm5, %v5119_v3, 0.0 }
0x20bd   : > { %5121 = vadd.xlane.f32.xlu1 %v5120_v20 }
0x20bf   : > { %3299 = vadd.xlane.f32.xlu0 %v3298_v42 }
0x20c3   : > { %3304 = vadd.xlane.f32.xlu0 %v3303_v5 }
0x2144   : > { %v5117_v39 = vpop.xlane.xlu0 %5116 }
0x2145   : > { %v5118_v25 = vmul.f32 0.020833334, %v5117_v39 }
0x2146   : > { %v5122_v38 = vpop.xlane.xlu1 %5121 }
0x2147   : > { %v5124_v61 = vmul.f32 %v5118_v25, %v5118_v25  ;;  %v5123_v41 = vmul.f32 0.020833334, %v5122_v38  ;;  %v5126_v29 = vsub.f32 %v5114_v27, %v5118_v25 }
0x2148   : > { %v3300_v49 = vpop.xlane.xlu0 %3299 }
0x2149   : > { %v5125_v40 = vsub.f32 %v5123_v41, %v5124_v61  ;;  %v3301_v7 = vmul.f32 0.020833334, %v3300_v49 }
0x214b   : > { %v5127_v21 = vadd.f32 1e-05, %v5125_v40  ;;  %v3307_v16 = vmul.f32 %v3301_v7, %v3301_v7  ;;  %v3309_v18 = vsub.f32 %v3297_v28, %v3301_v7 }
0x214c   : > { %v3305_v45 = vpop.xlane.xlu0 %3304 }
0x214d   : > { %6561 = vrsqrt.f32 %v5127_v21  ;;  %v3306_v54 = vmul.f32 0.020833334, %v3305_v45 }
0x214f   : > { %v3308_v57 = vsub.f32 %v3306_v54, %v3307_v16 }
0x2151   : > { %v3310_v46 = vadd.f32 1e-05, %v3308_v57 }
0x2153   : > { %6563 = vrsqrt.f32 %v3310_v46 }
0x215a   : > { %v6562_v52 = vpop.eup %6561 }
0x215b   : > { %v5129_v31 = vmul.f32 %v6562_v52, %v5126_v29 }
0x215d   : > { %v5130_v23 = vmul.f32 %v7795_v48, %v5129_v31 }
0x215f   : > { %v5131_v2 = vadd.f32 %v7799_v47, %v5130_v23 }
0x2160   : > { %v6564_v35 = vpop.eup %6563 }
0x2161   : > { %v3312_v8 = vmul.f32 %v6564_v35, %v3309_v18  ;;  %v5136_v63 = vmul.f32 %v5135_v32, %v5131_v2 }
0x2163   : > { %v3319_v10 = vmul.f32 %v5661_v12, %v3312_v8  ;;  %v5141_v48 = vadd.f32 %v5140_v33, %v5136_v63 }
0x2165   : > { %v3326_v62 = vadd.f32 %v5665_v36, %v3319_v10  ;;  %6347 = vmatmul.mubr.msk.f32.vlgmr.msra.gmra.mxu0 %vm1320_vm5, %v5141_v48 }
0x2167   : > { %3327 = vst.msk [vmem:[#allocation2] sm:$0xff] %vm1320_vm5, %v3326_v62 }
0x2225   : > { %v5211_v59 = vpop.f32.mrf.mxu0 }
0x2226   : > { %v5212_v37 = vadd.f32 %v7875_v44, %v5211_v59 }
0x2227   : > { %v6348_v22 = vpop.f32.mrf.mxu0 }
0x2228   : > { %v5215_v47 = vmax.f32 %v5212_v37, 0.0 }
0x222a   : > { %6362 = vmatmul.mubr.msk.f32.vlgmr.msra.gmra.mxu1 %vm1320_vm5, %v5215_v47 }
0x22ea   : > { %v5285_v58 = vpop.f32.mrf.mxu1 }
0x22eb   : > { %v5286_v50 = vadd.f32 %v5657_v19, %v5285_v58 }
0x22ec   : > { %v6363_v51 = vpop.f32.mrf.mxu1 }
0x22ed   : > { %v5289_v4 = vadd.f32 %v5286_v50, %v5131_v2 }
0x22ef   : > { %v5290_v30 = vsel %vm1320_vm5, %v5289_v4, 0.0  ;;  %v5294_v9 = vmul.f32 %v5289_v4, %v5289_v4 }
0x22f0   : > { %5291 = vadd.xlane.f32.xlu1 %v5290_v30 }
0x22f1   : > { %v5295_v11 = vsel %vm1320_vm5, %v5294_v9, 0.0 }
0x22f4   : > { %5296 = vadd.xlane.f32.xlu1 %v5295_v11 }
0x2379   : > { %v5292_v60 = vpop.xlane.xlu1 %5291 }
0x237a   : > { %v5293_v53 = vmul.f32 0.020833334, %v5292_v60 }
0x237c   : > { %v5299_v55 = vmul.f32 %v5293_v53, %v5293_v53  ;;  %v5301_v13 = vsub.f32 %v5289_v4, %v5293_v53 }
0x237d   : > { %v5297_v1 = vpop.xlane.xlu1 %5296 }
0x237e   : > { %v5298_v44 = vmul.f32 0.020833334, %v5297_v1 }
0x2380   : > { %v5300_v34 = vsub.f32 %v5298_v44, %v5299_v55 }
0x2382   : > { %v5302_v56 = vadd.f32 1e-05, %v5300_v34 }
0x2384   : > { %6565 = vrsqrt.f32 %v5302_v56 }
0x2391   : > { %v6566_v17 = vpop.eup %6565 }
0x2392   : > { %v5304_v14 = vmul.f32 %v6566_v17, %v5301_v13 }
0x2394   : > { %v5305_v19 = vmul.f32 %v5661_v12, %v5304_v14  ;;  %5311 = sbr.rel (%p5626_p7) target bundleno = 9114 (0x239a), region = 217 }
0x2396   : > { %v5306_v6 = vadd.f32 %v5665_v36, %v5305_v19 }
0x2398   : > { %5307 = vst.msk [vmem:[#allocation2 + $0x8] sm:$0xff] %vm1320_vm5, %v5306_v6 }
0x2399   : > { %5312 = vst.msk [vmem:[%s8297_s1] sm:$0xff] %vm1320_vm5, %v3326_v62  ;;  %5627 = vst.msk [vmem:[%s8297_s1 + $0x8] sm:$0xff] %vm1320_vm5, %v5306_v6 }
0x239a PF: > { %s8298_s8 = sld [smem:[#allocation26_spill]]  ;;  %s8300_s7 = smov %s6885_s4 }
0x239b   : > { %s8299_s13 = sld [smem:[#allocation27_spill]] }
0x23a0   : > { %p40_p8 = scmp.ge.s32.totalorder %s8298_s8, 4  }
0x23a1   : > { %s8301_s4 = smov %s8299_s13 }
0x23a2   :  { %42 = sbr.rel (!%p40_p8) target bundleno = 28 (0x1c), region = 275 }
0x23a7   :  { %5326 = vsyncpa [#allocation4], 1 }
0x23a8   :  { %5328 = vsyncpa [#allocation4 + $0x1], 1 }
0x23a9   :  { %5329 = vsyncpa [#allocation7], 1 }
0x23aa   :  { %5330 = vsyncpa [#allocation10], 1 }
0x23ab   :  { %5331 = vsyncpa [#allocation13], 1 }
0x23ac   :  { %5332 = vsyncpa [#allocation16], 1 }
0x23ad   :  { %5333 = vsyncpa [#allocation19], 1 }

// kernel: diffusion_head_forward.5
= control target key start
LH: loop header
LB: loop body
LE: loop exit
PB: predicated region body
PF: predicated region fallthrough
CT: control target
= control target key end

     0   :  { %s9288_s6 = smov 1   ;;  %s9289_s10 = smov 2   ;;  %s10949_s0 = inlined_call_operand.smem [shape: u32[37], index: -1, kind: input, shape index: {}] }
   0x1   :  { %s9341_s5 = sld [smem:[%s10949_s0]]   ;;  %s9290_s14 = smov 3  }
   0x2   :  { %s9346_s9 = sld [smem:[%s10949_s0 + %s9288_s6]]   ;;  %s9291_s18 = smov 4  }
   0x3   :  { %s9351_s13 = sld [smem:[%s10949_s0 + %s9289_s10]]   ;;  %s9292_s22 = smov 5  }
   0x4   :  { %s9356_s17 = sld [smem:[%s10949_s0 + %s9290_s14]]   ;;  %s9293_s26 = smov 6  }
   0x5   :  { %s9361_s21 = sld [smem:[%s10949_s0 + %s9291_s18]]   ;;  %s9294_s30 = smov 7  }
   0x6   :  { %s9366_s25 = sld [smem:[%s10949_s0 + %s9292_s22]]   ;;  %s9295_s4 = smov 8  }
   0x7   :  { %10965 = sst [smem:[#allocation20_spill]] %s9341_s5  ;;  %s9296_s10 = smov 9  }
   0x8   :  { %s9371_s29 = sld [smem:[%s10949_s0 + %s9293_s26]]   ;;  %s9297_s15 = smov 10  }
   0x9   :  { %s9376_s3 = sld [smem:[%s10949_s0 + %s9294_s30]]   ;;  %s9298_s20 = smov 11  }
   0xa   :  { %10966 = sst [smem:[#allocation21_spill]] %s9356_s17  ;;  %s9299_s26 = smov 12  }
   0xb   :  { %s9381_s8 = sld [smem:[%s10949_s0 + %s9295_s4]]   ;;  %s9300_s1 = smov 13  }
   0xc   :  { %s9386_s14 = sld [smem:[%s10949_s0 + %s9296_s10]]   ;;  %s9301_s7 = smov 14  }
   0xd   :  { %s9391_s19 = sld [smem:[%s10949_s0 + %s9297_s15]]   ;;  %s9302_s15 = smov 15  }
   0xe   :  { %s9396_s24 = sld [smem:[%s10949_s0 + %s9298_s20]]   ;;  %s9303_s22 = smov 16  }
   0xf   :  { %10967 = sst [smem:[#allocation22_spill]] %s9376_s3  ;;  %s9304_s28 = smov 17  }
  0x10   :  { %s9401_s30 = sld [smem:[%s10949_s0 + %s9299_s26]]  }
  0x11   :  { %s9406_s6 = sld [smem:[%s10949_s0 + %s9300_s1]]  }
  0x12   :  { %s9411_s12 = sld [smem:[%s10949_s0 + %s9301_s7]]   ;;  %s9305_s7 = smov 18  }
  0x13   :  { %s9416_s20 = sld [smem:[%s10949_s0 + %s9302_s15]]   ;;  %s9306_s15 = smov 19  }
  0x14   :  { %10968 = sst [smem:[#allocation23_spill]] %s9396_s24 }
  0x15   :  { %s9421_s27 = sld [smem:[%s10949_s0 + %s9303_s22]]   ;;  %s9307_s22 = smov 20  }
  0x16   :  { %10969 = sst [smem:[#allocation24_spill]] %s9401_s30 }
  0x17   :  { %10970 = sst [smem:[#allocation25_spill]] %s9406_s6 }
  0x18   :  { %10971 = sst [smem:[#allocation26_spill]] %s9411_s12 }
  0x19   :  { %10972 = sst [smem:[#allocation27_spill]] %s9416_s20 }
  0x1a   :  { %s9426_s4 = sld [smem:[%s10949_s0 + %s9304_s28]]   ;;  %s9308_s28 = smov 21  }
  0x1b   :  { %10973 = sst [smem:[#allocation28_spill]] %s9421_s27 }
  0x1c   :  { %s9431_s12 = sld [smem:[%s10949_s0 + %s9305_s7]]   ;;  %s9309_s7 = smov 22  }
  0x1d   :  { %s9436_s20 = sld [smem:[%s10949_s0 + %s9306_s15]]   ;;  %s9310_s15 = smov 23  }
  0x1e   :  { %s9441_s27 = sld [smem:[%s10949_s0 + %s9307_s22]]   ;;  %s9311_s22 = smov 24  }
  0x20   :  { %10974 = sst [smem:[#allocation29_spill]] %s9426_s4 }
  0x21   :  { %s9446_s4 = sld [smem:[%s10949_s0 + %s9308_s28]]   ;;  %s9312_s28 = smov 25  }
  0x22   :  { %10975 = sst [smem:[#allocation30_spill]] %s9431_s12 }
  0x23   :  { %10976 = sst [smem:[#allocation31_spill]] %s9436_s20 }
  0x24   :  { %10977 = sst [smem:[#allocation32_spill]] %s9441_s27 }
  0x25   :  { %s9451_s12 = sld [smem:[%s10949_s0 + %s9309_s7]]   ;;  %s9313_s7 = smov 26  }
  0x26   :  { %s9456_s20 = sld [smem:[%s10949_s0 + %s9310_s15]]   ;;  %s9314_s15 = smov 27  }
  0x27   :  { %10978 = sst [smem:[#allocation33_spill]] %s9446_s4 }
  0x28   :  { %s9461_s27 = sld [smem:[%s10949_s0 + %s9311_s22]]   ;;  %s9315_s22 = smov 28  }
  0x29   :  { %s9466_s4 = sld [smem:[%s10949_s0 + %s9312_s28]]   ;;  %s9316_s28 = smov 29  }
  0x2a   :  { %s9476_s6 = sld [smem:[%s10949_s0 + %s9314_s15]]   ;;  %s9318_s15 = smov 31  }
  0x2b   :  { %10979 = sst [smem:[#allocation34_spill]] %s9451_s12 }
  0x2c   :  { %s9471_s12 = sld [smem:[%s10949_s0 + %s9313_s7]]   ;;  %s9317_s7 = smov 30  }
  0x2d   :  { %s9486_s30 = sld [smem:[%s10949_s0 + %s9316_s28]]   ;;  %s9320_s28 = smov 33  }
  0x2e   :  { %10980 = sst [smem:[#allocation35_spill]] %s9461_s27 }
  0x2f   :  { %10981 = sst [smem:[#allocation36_spill]] %s9466_s4 }
  0x30   :  { %10983 = sst [smem:[#allocation38_spill]] %s9476_s6 }
  0x31   :  { %s9481_s27 = sld [smem:[%s10949_s0 + %s9315_s22]]   ;;  %s9319_s22 = smov 32  }
  0x32   :  { %10982 = sst [smem:[#allocation37_spill]] %s9471_s12 }
  0x33   :  { %10984 = sst [smem:[#allocation39_spill]] %s9486_s30 }
  0x34   :  { %s9491_s12 = sld [smem:[%s10949_s0 + %s9317_s7]]   ;;  %s9321_s7 = smov 34  }
  0x35   :  { %s9496_s6 = sld [smem:[%s10949_s0 + %s9318_s15]]   ;;  %s9322_s15 = smov 35  }
  0x36   :  { %s9501_s24 = sld [smem:[%s10949_s0 + %s9319_s22]]   ;;  %s9323_s22 = smov 36  }
  0x37   :  { %s9506_s30 = sld [smem:[%s10949_s0 + %s9320_s28]]  }
  0x38   :  { %s9511_s17 = sld [smem:[%s10949_s0 + %s9321_s7]]  }
  0x3b   :  { %10985 = sst [smem:[#allocation40_spill]] %s9496_s6 }
  0x3c   :  { %10986 = sst [smem:[#allocation41_spill]] %s9501_s24 }
  0x3d   :  { %s9516_s6 = sld [smem:[%s10949_s0 + %s9322_s15]]  }
  0x3e   :  { %10987 = sst [smem:[#allocation42_spill]] %s9511_s17 }
  0x3f   :  { %s9521_s24 = sld [smem:[%s10949_s0 + %s9323_s22]]  }
  0x45   :  { %10988 = sst [smem:[#allocation43_spill]] %s9521_s24 }
  0x46   :  { %78 = vsyncpa [#allocation7], 0 }
  0x47   :  { %79 = vsyncpa [#allocation9], 0 }
  0x48   :  { %80 = vsyncpa [#allocation12], 0 }
  0x49   :  { %81 = vsyncpa [#allocation15], 0  ;;  %s9523_s28 = smov 0   ;;  %s9525_s1 = smov 0  }
  0x4a   :  { %s9527_s2 = smov 0  }
  0x4b LB: > { %s10989_s5 = sld [smem:[#allocation20_spill]]  ;;  %s9539_s0 = sadd.s32 4294967295, %s9286_s2   ;;  %s9278_s28 = sphi %s9523_s28, %s11034_s28   ;;  %s9286_s2 = sphi %s9527_s2, %s11032_s2   ;;  %s9282_s1 = sphi %s9525_s1, %s11035_s1  }
  0x4c   : > { %s9542_s7 = sadd.s32 1, %s9286_s2   ;;  %s196_s10 = sadd.s32 2, %s9286_s2 }
  0x4d   : > { %10990 = sst [smem:[#allocation44_spill]] %s9542_s7  ;;  %s197_s11 = sadd.s32 2, %s9542_s7 }
  0x4e   : > { %s198_s15 = ssub.s32 %s196_s10, %s197_s11  ;;  %s201_s16 = sadd.s32 1, %s9282_s1 }
  0x4f   : > { %p199_p0 = scmp.eq.s32.totalorder %s198_s15, 0  ;;  %p208_p1 = scmp.ne.s32.totalorder %s9282_s1, %s9278_s28 }
  0x50   : > { %p209_p2 = scmp.eq.s32.totalorder %s9286_s2, 0  ;;  %p7483_p3 = scmp.ge.s32.totalorder %s9286_s2, 1 }
  0x51   : > { %s9552_s18 = scalar_select %p199_p0, %s9282_s1, %s201_s16  }
  0x52   : > { %p9554_p4 = por %p209_p2, %p208_p1  ;;  %p876_p5 = scmp.lt.s32.totalorder %s9286_s2, 9 }
  0x53   : > { %10991 = sst [smem:[#allocation45_spill]] %s9552_s18  ;;  %p10961_p7 = scmp.eq.s32.totalorder %s9539_s0, 0 }
  0x54   : > { %s10992_s22 = scalar_select %p9554_p4, 1, 0 }
  0x55   : > { %p9561_p8 = pnand %p7483_p3, %p876_p5  ;;  %s9324_s26 = smov [#allocation8]  }
  0x56   : > { %s969_s10 = sshll.u32 %s9324_s26, 4  ;;  %s9325_s11 = smov [#allocation11]   ;;  %s970_s10 = int_to_ptr.vmem [resolvable:$true] %s969_s10 }
  0x57   : > { %s10993_s23 = scalar_select %p9561_p8, 1, 0 }
  0x58   : > { %p8795_p9 = pneg %p9561_p8  ;;  %s1000_s15 = sshll.u32 %s9325_s11, 4  ;;  %s1001_s15 = int_to_ptr.vmem [resolvable:$true] %s1000_s15 }
  0x59   : > { %s9326_s18 = smov [#allocation6]   ;;  %s9103_s26 = scalar_lea.vmem %s970_s10, 16 }
  0x5a   : > { %p9569_p10 = pnand %p10961_p7, %p8795_p9  ;;  %s955_s7 = sshll.u32 %s9326_s18, 4  ;;  %s9573_s7 = int_to_ptr.vmem [resolvable:$true] %s955_s7 }
  0x5b   : > { %p9104_p12 = scmp.ne.s32.totalorder %s970_s10, %s9103_s26  ;;  %s9110_s11 = scalar_lea.vmem %s970_s10, 32 }
  0x5c   : > { %p9577_p11 = pneg %p9569_p10  ;;  %p9111_p1 = scmp.lt.s32.totalorder %s970_s10, %s970_s10 }
  0x5d   : > { %p9112_p2 = scmp.lt.s32.totalorder %s9110_s11, %s9103_s26 }
  0x5e   : > { %p9106_p13 = pnand %p9104_p12, %p9577_p11 }
  0x5f   : > { %p9113_p3 = por %p9112_p2, %p9111_p1 }
  0x60   : > { %p9107_p0 = pneg %p9106_p13 }
  0x62   : > { %p9114_p5 = pnand %p9113_p3, %p9107_p0 }
  0x64   : > { %9117 = shalt.err (!%p9114_p5)
}
  0x65   : > { %s10996_s4 = sld [smem:[#allocation36_spill]]  ;;  %s9129_s18 = scalar_lea.vmem %s1001_s15, 16 }
  0x66   : > { %p9130_p9 = scmp.ne.s32.totalorder %s1001_s15, %s9129_s18  ;;  %s9136_s17 = scalar_lea.vmem %s1001_s15, 32 }
  0x67   : > { %p9137_p8 = scmp.lt.s32.totalorder %s1001_s15, %s1001_s15  ;;  %p9138_p12 = scmp.lt.s32.totalorder %s9136_s17, %s9129_s18 }
  0x68   : > { %p9132_p6 = pnand %p9130_p9, %p9577_p11 }
  0x69   : > { %p9139_p13 = por %p9138_p12, %p9137_p8 }
  0x6a   : > { %p9133_p7 = pneg %p9132_p6 }
  0x6b   : > { %8801 = dma.hbm_to_vmem [thread:$0]  (!%p9569_p10), %s10996_s4, 16, %s970_s10, [#allocation9]  }
  0x6c   : > { %p9140_p4 = pnand %p9139_p13, %p9133_p7 }
  0x6e   : > { %9143 = shalt.err (!%p9140_p4)
}
  0x6f   : > { %8807 = dma.hbm_to_vmem [thread:$0]  (!%p9569_p10), %s9491_s12, 16, %s1001_s15, [#allocation12]  }
  0x70   : > { %s9155_s10 = scalar_lea.vmem %s9573_s7, 16  ;;  %s9162_s26 = scalar_lea.vmem %s9573_s7, 32 }
  0x71   : > { %p9156_p0 = scmp.ne.s32.totalorder %s9573_s7, %s9155_s10  ;;  %p9163_p2 = scmp.lt.s32.totalorder %s9573_s7, %s9573_s7 }
  0x72   : > { %p9164_p8 = scmp.lt.s32.totalorder %s9162_s26, %s9155_s10 }
  0x73   : > { %p9158_p1 = pnand %p9156_p0, %p9577_p11 }
  0x74   : > { %p9165_p7 = por %p9164_p8, %p9163_p2 }
  0x75   : > { %p9159_p6 = pneg %p9158_p1 }
  0x77   : > { %p9166_p4 = pnand %p9165_p7, %p9159_p6 }
  0x79   : > { %9169 = shalt.err (!%p9166_p4)
}
  0x7a   : > { %8798 = dma.hbm_to_vmem [thread:$0]  (!%p9569_p10), %s9456_s20, 16, %s9573_s7, [#allocation7]  }
  0x7b   : > { %s9327_s17 = smov [#allocation10]   ;;  %s9328_s11 = smov [#allocation13]  }
  0x7c   : > { %s986_s15 = sshll.u32 %s9327_s17, 4  ;;  %s1017_s18 = sshll.u32 %s9328_s11, 4  ;;  %s987_s15 = int_to_ptr.vmem [resolvable:$true] %s986_s15  ;;  %s1018_s18 = int_to_ptr.vmem [resolvable:$true] %s1017_s18 }
  0x7d   : > { %s9181_s4 = scalar_lea.vmem %s987_s15, 16  ;;  %s9188_s10 = scalar_lea.vmem %s987_s15, 32 }
  0x7e   : > { %p9182_p3 = scmp.ne.s32.totalorder %s987_s15, %s9181_s4  ;;  %p9189_p12 = scmp.lt.s32.totalorder %s987_s15, %s987_s15 }
  0x7f   : > { %p9190_p13 = scmp.lt.s32.totalorder %s9188_s10, %s9181_s4 }
  0x80   : > { %p9184_p5 = pnand %p9182_p3, %p9577_p11 }
  0x81   : > { %p9191_p0 = por %p9190_p13, %p9189_p12 }
  0x82   : > { %p9185_p9 = pneg %p9184_p5 }
  0x84   : > { %p9192_p1 = pnand %p9191_p0, %p9185_p9 }
  0x86   : > { %9195 = shalt.err (!%p9192_p1)
}
  0x87   : > { %8804 = dma.hbm_to_vmem [thread:$0]  (!%p9569_p10), %s9481_s27, 16, %s987_s15, [#allocation9]  }
  0x88   : > { %s9207_s7 = scalar_lea.vmem %s1018_s18, 16  ;;  %s9214_s26 = scalar_lea.vmem %s1018_s18, 32 }
  0x89   : > { %p9208_p6 = scmp.ne.s32.totalorder %s1018_s18, %s9207_s7  ;;  %p9215_p7 = scmp.lt.s32.totalorder %s1018_s18, %s1018_s18 }
  0x8a   : > { %p9216_p4 = scmp.lt.s32.totalorder %s9214_s26, %s9207_s7 }
  0x8b   : > { %p9210_p2 = pnand %p9208_p6, %p9577_p11 }
  0x8c   : > { %p9217_p3 = por %p9216_p4, %p9215_p7 }
  0x8d   : > { %p9211_p8 = pneg %p9210_p2 }
  0x8f   : > { %p9218_p5 = pnand %p9217_p3, %p9211_p8 }
  0x91   : > { %9221 = shalt.err (!%p9218_p5)
}
  0x92   : > { %8810 = dma.hbm_to_vmem [thread:$0]  (!%p9569_p10), %s9506_s30, 16, %s1018_s18, [#allocation12]  }
  0x93   : > { %s9329_s4 = smov [#allocation14]  }
  0x94   : > { %s1031_s17 = sshll.u32 %s9329_s4, 4  ;;  %s1032_s17 = int_to_ptr.vmem [resolvable:$true] %s1031_s17 }
  0x95   : > { %s9233_s15 = scalar_lea.vmem %s1032_s17, 16  ;;  %s9240_s11 = scalar_lea.vmem %s1032_s17, 32 }
  0x96   : > { %p9234_p9 = scmp.ne.s32.totalorder %s1032_s17, %s9233_s15  ;;  %p9241_p0 = scmp.lt.s32.totalorder %s1032_s17, %s1032_s17 }
  0x97   : > { %p9242_p1 = scmp.lt.s32.totalorder %s9240_s11, %s9233_s15 }
  0x98   : > { %p9236_p12 = pnand %p9234_p9, %p9577_p11 }
  0x99   : > { %p9243_p6 = por %p9242_p1, %p9241_p0 }
  0x9a   : > { %p9237_p13 = pneg %p9236_p12 }
  0x9c   : > { %p9244_p2 = pnand %p9243_p6, %p9237_p13 }
  0x9e   : > { %9247 = shalt.err (!%p9244_p2)
}
  0x9f   : > { %8813 = dma.hbm_to_vmem [thread:$0]  (!%p9569_p10), %s9516_s6, 16, %s1032_s17, [#allocation15]  }
  0xa0   : > { %p7490_p8 = scmp.ge.s32.totalorder %s9286_s2, 8 }
  0xa1   : > { %p10997_p7 = scmp.ne.s32.totalorder (!%p7490_p8), %s10992_s22, 0 }
  0xa2   : > { %1038 = sbr.rel (%p7490_p8) target bundleno = 172 (0xac), region = 156 }
  0xa7   : > { %1041 = sbr.rel (!%p10997_p7) target bundleno = 172 (0xac), region = 160  ;;  %s1043_s24 = sand.u32 (%p10997_p7), 1, %s9282_s1  }
  0xa8   : > { %s7492_s18 = sshll.u32 (%p10997_p7), %s9286_s2, 2  ;;  %s7491_s10 = sshll.u32 (%p10997_p7), %s1043_s24, 3 }
  0xa9   : > { %s7349_s7 = scalar_lea.vmem (%p10997_p7), %s9366_s25, %s7492_s18  ;;  %s1045_s26 = scalar_lea.vmem (%p10997_p7), [#allocation5], %s7491_s10 }
  0xaa   : > { %v7493_v0 = vld [vmem:[%s7349_s7 + $0x8] sm:$0xf] (%p10997_p7)  ;;  %v7494_v1 = vld [vmem:[%s7349_s7 + $0x30] sm:$0xf] (%p10997_p7) }
  0xab   : > { %1066 = vst [vmem:[%s1045_s26] sm:$0xf] (%p10997_p7), %v7493_v0  ;;  %1068 = vst [vmem:[%s1045_s26 + $0x4] sm:$0xf] (%p10997_p7), %v7494_v1 }
  0xac PF: > { %p10998_p10 = scmp.ne.s32.totalorder %s10993_s23, 0 }
  0xad   : > { %s1102_s22 = sand.u32 (!%p10998_p10), 1, %s9278_s28   ;;  %p10999_p11 = scmp.eq.s32.totalorder (!%p10998_p10), %s9539_s0, 0 }
  0xae   : > { %1099 = sbr.rel (%p10998_p10) target bundleno = 10025 (0x2729), region = 201  ;;  %s7496_s16 = sshll.u32 (!%p10998_p10), %s1102_s22, 3 }
  0xaf   : > { %s9626_s4 = scalar_lea.vmem (!%p10998_p10), [#allocation5], %s7496_s16 }
  0xb3   : > { %9261 = dma.done.wait (%p10999_p11), [#allocation7], 16   ;;  %p11000_p4 = pmov %p10999_p11 }
  0xb5   : > { %9263 = vsyncadd (%p11000_p4), [#allocation7], 4294967280  ;;  %p11001_p3 = pmov %p11000_p4 }
  0xb7   : > { %9265 = dma.done.wait (%p11001_p3), [#allocation9], 32   ;;  %p11002_p5 = pmov %p11001_p3 }
  0xb8   : > { %p11003_p9 = pmov %p11001_p3 }
  0xb9   : > { %9267 = vsyncadd (%p11002_p5), [#allocation9], 4294967264 }
  0xba   : > { %9269 = dma.done.wait (%p11003_p9), [#allocation12], 32   ;;  %p11004_p12 = pmov %p11001_p3 }
  0xbb   : > { %p11005_p13 = pmov %p11001_p3 }
  0xbc   : > { %9271 = vsyncadd (%p11004_p12), [#allocation12], 4294967264 }
  0xbd   : > { %9273 = dma.done.wait (%p11005_p13), [#allocation15], 16   ;;  %p11006_p0 = pmov %p11001_p3 }
  0xbe   : > { %p11007_p1 = scmp.ne.s32.totalorder %s9539_s0, 0 }
  0xbf   : > { %9275 = vsyncadd (%p11006_p0), [#allocation15], 4294967280 }
  0xc0   : > { %1214 = sbr.rel (%p11007_p1) target bundleno = 200 (0xc8), region = 233 }
  0xc5   : > { %v1215_v2 = vld [vmem:[%s10989_s5] sm:$0xff]  ;;  %vm1217_vm0 = vcmask 392192   ;;  %v1216_v3 = vld [vmem:[%s10989_s5 + $0x8] sm:$0xff]  ;;  %vm1222_vm1 = vcmask 388096  }
  0xc6   : > { %v1220_v4 = vld [vmem:[%s9346_s9] sm:$0xf]  ;;  %1218 = vst.msk [vmem:[#allocation2] sm:$0xff] %vm1217_vm0, %v1215_v2  ;;  %1219 = vst.msk [vmem:[#allocation2 + $0x10] sm:$0xff] %vm1217_vm0, %v1216_v3  ;;  %v1221_v5 = vld [vmem:[%s9346_s9 + $0x4] sm:$0xf] }
  0xc7   : > { %1223 = vst.msk [vmem:[#allocation2 + $0x8] sm:$0xf] %vm1222_vm1, %v1220_v4  ;;  %1224 = vst.msk [vmem:[#allocation2 + $0x18] sm:$0xf] %vm1222_vm1, %v1221_v5 }
  0xc8 PF: > { %p7504_p6 = scmp.ne.s32.totalorder %s9539_s0, 4 }
  0xca   : > { %1228 = sbr.rel (%p7504_p6) target bundleno = 210 (0xd2), region = 237 }
  0xcf   : > { %v1229_v6 = vld [vmem:[#allocation2] sm:$0xff]  ;;  %vm1233_vm2 = vcmask 392192   ;;  %v1230_v7 = vld [vmem:[#allocation2 + $0x8] sm:$0xf]  ;;  %vm1235_vm3 = vcmask 388096   ;;  %v1231_v8 = vld [vmem:[#allocation2 + $0x10] sm:$0xff] }
  0xd0   : > { %1234 = vst.msk [vmem:[#allocation3] sm:$0xff] %vm1233_vm2, %v1229_v6  ;;  %1237 = vst.msk [vmem:[#allocation3 + $0x10] sm:$0xff] %vm1233_vm2, %v1231_v8  ;;  %v1232_v9 = vld [vmem:[#allocation2 + $0x18] sm:$0xf] }
  0xd1   : > { %1236 = vst.msk [vmem:[#allocation3 + $0x8] sm:$0xf] %vm1235_vm3, %v1230_v7  ;;  %1238 = vst.msk [vmem:[#allocation3 + $0x18] sm:$0xf] %vm1235_vm3, %v1232_v9 }
  0xd2 PF: > { %p7505_p2 = scmp.ne.s32.totalorder %s9539_s0, 6 }
  0xd4   : > { %1242 = sbr.rel (%p7505_p2) target bundleno = 221 (0xdd), region = 241 }
  0xd9   : > { %v1243_v10 = vld [vmem:[#allocation2] sm:$0xff]  ;;  %vm1245_vm4 = vcmask 392192   ;;  %v1244_v11 = vld [vmem:[#allocation2 + $0x10] sm:$0xff]  ;;  %vm1253_vm5 = vcmask 388096   ;;  %v1249_v13 = vld [vmem:[#allocation3 + $0x8] sm:$0xf] }
  0xda   : > { %v1248_v12 = vld [vmem:[#allocation3] sm:$0xff]  ;;  %1246 = vst.msk [vmem:[#allocation4] sm:$0xff] %vm1245_vm4, %v1243_v10  ;;  %1247 = vst.msk [vmem:[#allocation4 + $0x8] sm:$0xff] %vm1245_vm4, %v1244_v11  ;;  %v1250_v14 = vld [vmem:[#allocation3 + $0x10] sm:$0xff] }
  0xdb   : > { %1252 = vst.msk [vmem:[#allocation2] sm:$0xff] %vm1245_vm4, %v1248_v12  ;;  %v1251_v15 = vld [vmem:[#allocation3 + $0x18] sm:$0xf]  ;;  %1255 = vst.msk [vmem:[#allocation2 + $0x10] sm:$0xff] %vm1245_vm4, %v1250_v14 }
  0xdc   : > { %1254 = vst.msk [vmem:[#allocation2 + $0x8] sm:$0xf] %vm1253_vm5, %v1249_v13  ;;  %1256 = vst.msk [vmem:[#allocation2 + $0x18] sm:$0xf] %vm1253_vm5, %v1251_v15 }
  0xdd PF: > { %s9653_s28 = smul.u32 48, %s9539_s0  ;;  %v1326_v16 = vlaneseq  ;;  %v1374_v17 = vld [vmem:[%s9626_s4] sm:$0xf]  ;;  %v7600_v18 = vld [vmem:[%s9626_s4 + $0x4] sm:$0xf]  ;;  %v9669_v22 = vld [vmem:[%s9361_s21 + $0x28] sm:$0xff]  ;;  %s9749_s11 = scalar_lea.vmem %s9386_s14, %s9539_s0 }
  0xde   : > { %v9661_v19 = vadd.f32 1.0, %v1374_v17  ;;  %v9666_v21 = vadd.f32 1.0, %v7600_v18  ;;  %v9672_v23 = vld [vmem:[%s9361_s21 + $0x20] sm:$0xff]  ;;  %8082 = vmatprep.subr.mxu1 %v9669_v22  ;;  %v9685_v32 = vld [vmem:[%s9361_s21 + $0x18] sm:$0xff]  ;;  %vm1394_vm6 = vcmask 392192   ;;  %v1322_v52 = vld [vmem:[%s9361_s21 + $0x10] sm:$0xff] }
  0xdf   : > { %s9659_s2 = scalar_lea.vmem %s9371_s29, %s9653_s28  ;;  %v9664_v20 = vshrl.u32 %v1326_v16, 7  ;;  %8083 = vmatpush3.msra.mxu1 %v9669_v22  ;;  %s9705_s23 = scalar_lea.vmem %s9381_s8, %s9653_s28  ;;  %v1321_v53 = vld [vmem:[%s9361_s21 + $0x8] sm:$0xff]  ;;  %v1320_v54 = vld [vmem:[%s9361_s21] sm:$0xff]  ;;  %v9756_v7 = vand.u32 127, %v1326_v16  ;;  %v9330_v8 = vmov 0.0  }
  0xe0   : > { %v1264_v24 = vld [vmem:[%s9659_s2 + $0x28] sm:$0xff]  ;;  %v1263_v25 = vld [vmem:[%s9659_s2 + $0x20] sm:$0xff]  ;;  %v1262_v30 = vld [vmem:[%s9659_s2 + $0x18] sm:$0xff]  ;;  %8084 = vmatprep.subr.mxu1 %v9672_v23  ;;  %s9726_s17 = scalar_lea.vmem %s9391_s19, %s9653_s28  ;;  %s11008_s3 = sld [smem:[#allocation22_spill]] }
  0xe1   : > { %8067 = vmatprep.subr.mxu0 %v1264_v24  ;;  %v1378_v28 = vsub.s32 0, %v9664_v20  ;;  %v1384_v29 = vsub.s32 1, %v9664_v20  ;;  %v1261_v36 = vld [vmem:[%s9659_s2 + $0x10] sm:$0xff]  ;;  %8085 = vmatpush3.msra.mxu1 %v9672_v23  ;;  %v1260_v41 = vld [vmem:[%s9659_s2 + $0x8] sm:$0xff]  ;;  %v1259_v44 = vld [vmem:[%s9659_s2] sm:$0xff]  ;;  %s11009_s24 = sld [smem:[#allocation21_spill]] }
  0xe2   : > { %v1368_v26 = vld [vmem:[#allocation2] sm:$0xff]  ;;  %8068 = vmatpush3.msra.mxu0 %v1264_v24  ;;  %8086 = vmatprep.subr.mxu1 %v9685_v32  ;;  %v1273_v46 = vld [vmem:[%s9705_s23 + $0x28] sm:$0xff]  ;;  %v1271_v48 = vld [vmem:[%s9705_s23 + $0x18] sm:$0xff]  ;;  %vm1343_vm7 = vcmp.ge.s32.totalorder %v9756_v7, 18  ;;  %vm1344_vm8 = vcmp.lt.s32.totalorder %v9756_v7, 24  ;;  %vm1358_vm9 = vcmp.ge.s32.totalorder %v9756_v7, 36 }
  0xe3   : > { %v9677_v27 = vld [vmem:[#allocation2 + $0x8] sm:$0xf]  ;;  %v3745_v31 = vld [vmem:[#allocation2 + $0x18] sm:$0xf]  ;;  %8069 = vmatprep.subr.mxu0 %v1263_v25  ;;  %v1379_v33 = vrot.slane %v9661_v19, %v1378_v28  ;;  %v1385_v34 = vrot.slane %v1374_v17, %v1384_v29  ;;  %v9689_v35 = vrot.slane %v9666_v21, %v1378_v28  ;;  %v9692_v37 = vrot.slane %v7600_v18, %v1384_v29  ;;  %v1272_v47 = vld [vmem:[%s9705_s23 + $0x20] sm:$0xff]  ;;  %s11010_s18 = sld [smem:[#allocation23_spill]] }
  0xe4   : > { %8070 = vmatpush3.msra.mxu0 %v1263_v25  ;;  %8087 = vmatpush3.msra.mxu1 %v9685_v32  ;;  %v1270_v49 = vld [vmem:[%s9705_s23 + $0x10] sm:$0xff]  ;;  %v1269_v50 = vld [vmem:[%s9705_s23 + $0x8] sm:$0xff]  ;;  %v1268_v51 = vld [vmem:[%s9705_s23] sm:$0xff]  ;;  %vm1359_vm10 = vcmp.lt.s32.totalorder %v9756_v7, 42  ;;  %vm1363_vm11 = vcmp.ge.s32.totalorder %v9756_v7, 42  ;;  %vm1364_vm12 = vcmp.lt.s32.totalorder %v9756_v7, 48 }
  0xe5   : > { %8071 = vmatprep.subr.mxu0 %v1262_v30  ;;  %v1380_v38 = vmul.f32 %v1379_v33, %v1368_v26  ;;  %v1381_v39 = vmul.f32 %v1379_v33, %v9677_v27  ;;  %v3760_v40 = vmul.f32 %v9689_v35, %v3745_v31  ;;  %8088 = vmatprep.subr.mxu1 %v1322_v52  ;;  %v1282_v55 = vld [vmem:[%s9726_s17 + $0x28] sm:$0xff]  ;;  %v1281_v56 = vld [vmem:[%s9726_s17 + $0x20] sm:$0xff]  ;;  %v1280_v57 = vld [vmem:[%s9726_s17 + $0x18] sm:$0xff]  ;;  %vm1329_vm0 = vcmp.lt.s32.totalorder %v9756_v7, 6  ;;  %s11011_s7 = sld [smem:[#allocation24_spill]]  ;;  %p7673_p8 = scmp.ne.s32.totalorder %s9539_s0, 7 }
  0xe6   : > { %8072 = vmatpush3.msra.mxu0 %v1262_v30  ;;  %8089 = vmatpush3.msra.mxu1 %v1322_v52  ;;  %v1279_v58 = vld [vmem:[%s9726_s17 + $0x10] sm:$0xff]  ;;  %v1278_v59 = vld [vmem:[%s9726_s17 + $0x8] sm:$0xff]  ;;  %v1277_v60 = vld [vmem:[%s9726_s17] sm:$0xff]  ;;  %s9738_s15 = scalar_lea.vmem %s11008_s3, %s9539_s0  ;;  %v9780_v24 = vsel %vm1329_vm0, 1.0, %v9330_v8  ;;  %vm1333_vm1 = vcmp.ge.s32.totalorder %v9756_v7, 6  ;;  %vm1334_vm2 = vcmp.lt.s32.totalorder %v9756_v7, 12 }
  0xe7   : > { %8073 = vmatprep.subr.mxu0 %v1261_v36  ;;  %v1386_v42 = vadd.f32 %v1385_v34, %v1380_v38  ;;  %v9701_v43 = vadd.f32 %v9692_v37, %v3760_v40  ;;  %v1387_v45 = vadd.f32 %v1385_v34, %v1381_v39  ;;  %8090 = vmatprep.subr.mxu1 %v1321_v53  ;;  %v7514_v62 = vld [vmem:[%s9738_s15] ss:$0 sm:$0xff]  ;;  %vm1345_vm13 = vmand %vm1343_vm7, %vm1344_vm8  ;;  %vm1338_vm4 = vcmp.ge.s32.totalorder %v9756_v7, 12  ;;  %s11012_s22 = sld [smem:[#allocation25_spill]] }
  0xe8   : > { %8074 = vmatpush3.msra.mxu0 %v1261_v36  ;;  %8091 = vmatpush3.msra.mxu1 %v1321_v53  ;;  %v7519_v3 = vld [vmem:[%s9749_s11] ss:$0 sm:$0xff]  ;;  %v9765_v9 = vsel %vm1345_vm13, 1.0, %v9330_v8  ;;  %vm1360_vm14 = vmand %vm1358_vm9, %vm1359_vm10  ;;  %vm1339_vm5 = vcmp.lt.s32.totalorder %v9756_v7, 18  ;;  %vm1348_vm8 = vcmp.ge.s32.totalorder %v9756_v7, 24  ;;  %vm1349_vm9 = vcmp.lt.s32.totalorder %v9756_v7, 30 }
  0xe9   : > { %8075 = vmatprep.subr.mxu0 %v1260_v41  ;;  %8079 = vmatprep.mubr.msk.f32.mxu0 %vm1394_vm6, %v1386_v42  ;;  %v9768_v10 = vsel %vm1360_vm14, 1.0, %v9330_v8  ;;  %vm1365_vm15 = vmand %vm1363_vm11, %vm1364_vm12  ;;  %v1370_v12 = vld [vmem:[%s9351_s13] sm:$0xff]  ;;  %s9835_s10 = scalar_lea.vmem %s11010_s18, %s9539_s0  ;;  %vm1353_vm11 = vcmp.ge.s32.totalorder %v9756_v7, 30  ;;  %vm1354_vm12 = vcmp.lt.s32.totalorder %v9756_v7, 36  ;;  %vm2048_vm14 = vcmask 1043456   ;;  %s11013_s18 = sld [smem:[#allocation28_spill]] }
  0xea   : > { %8076 = vmatpush3.msra.mxu0 %v1260_v41  ;;  %8092 = vmatprep.subr.mxu1 %v1320_v54  ;;  %v9771_v11 = vsel %vm1365_vm15, 1.0, %v9330_v8  ;;  %v1372_v14 = vld [vmem:[%s11009_s24] sm:$0xff]  ;;  %vm1335_vm3 = vmand %vm1333_vm1, %vm1334_vm2  ;;  %vm1909_vm15 = vcmask 97280   ;;  %vm1913_vm0 = vcmask 93184   ;;  %vm3461_vm1 = vcmask 388096   ;;  %s11015_s3 = sld [smem:[#allocation26_spill]] }
  0xeb   : > { %8077 = vmatprep.subr.mxu0 %v1259_v44  ;;  %8093 = vmatpush3.msra.mxu1 %v1320_v54  ;;  %v9807_v42 = vsel %vm1335_vm3, 1.0, %v9330_v8  ;;  %vm1340_vm7 = vmand %vm1338_vm4, %vm1339_vm5  ;;  %s10036_s26 = scalar_lea.vmem %s11011_s7, %s9653_s28 }
  0xec   : > { %8078 = vmatpush3.msra.mxu0 %v1259_v44  ;;  %8112 = vmatprep.subr.mxu1 %v9669_v22  ;;  %vm1350_vm10 = vmand %vm1348_vm8, %vm1349_vm9 }
  0xed   : > { %8080 = vmatmul.mubr.msk.f32.vlgmr.msra.gmra.mxu0 %vm1394_vm6, %v1387_v45  ;;  %8097 = vmatprep.subr.mxu0 %v1273_v46  ;;  %vm1355_vm13 = vmand %vm1353_vm11, %vm1354_vm12  ;;  %s10050_s16 = scalar_lea.vmem %s11012_s22, %s9539_s0  ;;  %s11014_s22 = sld [smem:[#allocation30_spill]] }
  0xee   : > { %8098 = vmatpush3.msra.mxu0 %v1273_v46  ;;  %8109 = vmatprep.mubr.msk.f32.mxu0 %vm1394_vm6, %v1368_v26  ;;  %v9826_v46 = vsel %vm1340_vm7, 1.0, %v9330_v8 }
  0xef   : > { %8099 = vmatprep.subr.mxu0 %v1272_v47  ;;  %s10069_s7 = scalar_lea.vmem %s11013_s18, %s9653_s28 }
  0xf0   : > { %8100 = vmatpush3.msra.mxu0 %v1272_v47 }
  0xf1   : > { %8101 = vmatprep.subr.mxu0 %v1271_v48 }
  0xf2   : > { %8102 = vmatpush3.msra.mxu0 %v1271_v48 }
  0xf3   : > { %8103 = vmatprep.subr.mxu0 %v1270_v49  ;;  %s10085_s18 = scalar_lea.vmem %s11014_s22, %s9653_s28  ;;  %s11016_s28 = sld [smem:[#allocation27_spill]] }
  0xf4   : > { %8104 = vmatpush3.msra.mxu0 %v1270_v49  ;;  %v7524_v49 = vld [vmem:[%s9835_s10] ss:$0 sm:$0xff]  ;;  %s10092_s22 = scalar_lea.vmem %s11015_s3, %s9539_s0  ;;  %s11017_s3 = sld [smem:[#allocation29_spill]] }
  0xf5   : > { %8105 = vmatprep.subr.mxu0 %v1269_v50 }
  0xf6   : > { %8106 = vmatpush3.msra.mxu0 %v1269_v50 }
  0xf7   : > { %8107 = vmatprep.subr.mxu0 %v1268_v51 }
  0xf8   : > { %8108 = vmatpush3.msra.mxu0 %v1268_v51  ;;  %v9852_v51 = vsel %vm1350_vm10, 1.0, %v9330_v8 }
  0xf9   : > { %8110 = vmatmul.mubr.msk.f32.vlgmr.msra.gmra.mxu0 %vm1394_vm6, %v9677_v27  ;;  %8127 = vmatprep.subr.mxu0 %v1282_v55  ;;  %s10098_s5 = scalar_lea.vmem %s11016_s28, %s9539_s0  ;;  %s11027_s28 = sld [smem:[#allocation40_spill]] (!%p7673_p8) }
  0xfa   : > { %8139 = vmatprep.mubr.msk.f32.mxu0 %vm1394_vm6, %v1368_v26  ;;  %8128 = vmatpush3.msra.mxu0 %v1282_v55  ;;  %v1371_v26 = vld [vmem:[%s9351_s13 + $0x8] sm:$0xf]  ;;  %v9863_v55 = vsel %vm1355_vm13, 1.0, %v9330_v8 }
  0xfb   : > { %8129 = vmatprep.subr.mxu0 %v1281_v56 }
  0xfc   : > { %8130 = vmatpush3.msra.mxu0 %v1281_v56 }
  0xfd   : > { %8131 = vmatprep.subr.mxu0 %v1280_v57 }
  0xfe   : > { %8132 = vmatpush3.msra.mxu0 %v1280_v57 }
  0xff   : > { %8133 = vmatprep.subr.mxu0 %v1279_v58 }
 0x100   : > { %8134 = vmatpush3.msra.mxu0 %v1279_v58 }
 0x101   : > { %8135 = vmatprep.subr.mxu0 %v1278_v59 }
 0x102   : > { %8136 = vmatpush3.msra.mxu0 %v1278_v59 }
 0x103   : > { %8137 = vmatprep.subr.mxu0 %v1277_v60 }
 0x104   : > { %8138 = vmatpush3.msra.mxu0 %v1277_v60 }
 0x105   : > { %8140 = vmatmul.mubr.msk.f32.vlgmr.msra.gmra.mxu0 %vm1394_vm6, %v9677_v27 }
 0x1ad   : > { %v8081_v61 = vpop.f32.mrf.mxu0 }
 0x1ae   : > { %v1473_v1 = vadd.f32 %v8081_v61, %v7514_v62 }
 0x1af   : > { %v1467_v63 = vpop.f32.mrf.mxu0 }
 0x1b0   : > { %v1468_v0 = vadd.f32 %v7514_v62, %v1467_v63  ;;  %v1477_v29 = vmul.f32 %v1473_v1, %v1371_v26 }
 0x1b2   : > { %8094 = vmatprep.mubr.msk.f32.mxu1 %vm1394_vm6, %v1468_v0  ;;  %v1476_v16 = vmul.f32 %v1468_v0, %v1370_v12 }
 0x1b3   : > { %8095 = vmatmul.mubr.msk.f32.vlgmr.msra.gmra.mxu1 %vm1394_vm6, %v1473_v1 }
 0x1b4   : > { %8113 = vmatpush3.msra.mxu1 %v9669_v22 }
 0x1b5   : > { %8114 = vmatprep.subr.mxu1 %v9672_v23 }
 0x1b6   : > { %8115 = vmatpush3.msra.mxu1 %v9672_v23  ;;  %v1373_v23 = vld [vmem:[%s11009_s24 + $0x8] sm:$0xf] }
 0x1b7   : > { %8116 = vmatprep.subr.mxu1 %v9685_v32 }
 0x1b8   : > { %8117 = vmatpush3.msra.mxu1 %v9685_v32 }
 0x1b9   : > { %v8111_v2 = vpop.f32.mrf.mxu0  ;;  %8118 = vmatprep.subr.mxu1 %v1322_v52 }
 0x1ba   : > { %8119 = vmatpush3.msra.mxu1 %v1322_v52  ;;  %v1649_v6 = vadd.f32 %v8111_v2, %v7519_v3 }
 0x1bb   : > { %v1643_v4 = vpop.f32.mrf.mxu0  ;;  %8120 = vmatprep.subr.mxu1 %v1321_v53 }
 0x1bc   : > { %v1644_v5 = vadd.f32 %v7519_v3, %v1643_v4  ;;  %8121 = vmatpush3.msra.mxu1 %v1321_v53  ;;  %v1653_v30 = vmul.f32 %v1649_v6, %v1371_v26 }
 0x1bd   : > { %8122 = vmatprep.subr.mxu1 %v1320_v54 }
 0x1be   : > { %8123 = vmatpush3.msra.mxu1 %v1320_v54  ;;  %8124 = vmatprep.mubr.msk.f32.mxu1 %vm1394_vm6, %v1644_v5  ;;  %v1652_v33 = vmul.f32 %v1644_v5, %v1370_v12 }
 0x1bf   : > { %8125 = vmatmul.mubr.msk.f32.vlgmr.msra.gmra.mxu1 %vm1394_vm6, %v1649_v6 }
 0x1c5   : > { %v8141_v48 = vpop.f32.mrf.mxu0 }
 0x1c6   : > { %v9854_v52 = vadd.f32 %v8141_v48, %v7524_v49 }
 0x1c7   : > { %v1811_v54 = vpop.f32.mrf.mxu0 }
 0x1c8   : > { %v9867_v56 = vadd.f32 %v7524_v49, %v1811_v54  ;;  %v2896_v57 = vmul.f32 %v9863_v55, %v9854_v52 }
 0x1ca   : > { %v2895_v59 = vmul.f32 %v9863_v55, %v9867_v56 }
 0x273   : > { %v8096_v13 = vpop.f32.mrf.mxu1 }
 0x274   : > { %v1560_v27 = vmul.f32 %v8096_v13, %v1373_v23 }
 0x275   : > { %v1550_v15 = vpop.f32.mrf.mxu1 }
 0x276   : > { %v1559_v17 = vmul.f32 %v1550_v15, %v1372_v14  ;;  %v1562_v34 = vadd.f32 %v1560_v27, %v1477_v29 }
 0x278   : > { %v1561_v18 = vadd.f32 %v1559_v17, %v1476_v16  ;;  %v9796_v40 = vmul.f32 0.4082483, %v1562_v34 }
 0x27a   : > { %v9776_v22 = vmul.f32 0.4082483, %v1561_v18  ;;  %v1821_v41 = vmul.f32 %v9780_v24, %v9796_v40  ;;  %v1936_v45 = vmul.f32 %v9807_v42, %v9796_v40  ;;  %v2212_v50 = vmul.f32 %v9826_v46, %v9796_v40 }
 0x27b   : > { %v2598_v58 = vmul.f32 %v9852_v51, %v9796_v40 }
 0x27c   : > { %v1820_v25 = vmul.f32 %v9780_v24, %v9776_v22  ;;  %v1935_v44 = vmul.f32 %v9807_v42, %v9776_v22  ;;  %v2211_v47 = vmul.f32 %v9826_v46, %v9776_v22  ;;  %v2597_v53 = vmul.f32 %v9852_v51, %v9776_v22 }
 0x27e   : > { %8146 = vmatprep.mubr.msk.f32.mxu1 %vm1394_vm6, %v1820_v25 }
 0x27f   : > { %v8126_v28 = vpop.f32.mrf.mxu1 }
 0x280   : > { %v1736_v31 = vmul.f32 %v8126_v28, %v1373_v23 }
 0x281   : > { %v1726_v32 = vpop.f32.mrf.mxu1 }
 0x282   : > { %v9786_v36 = vadd.f32 %v1736_v31, %v1653_v30  ;;  %v1735_v38 = vmul.f32 %v1726_v32, %v1372_v14 }
 0x284   : > { %v9788_v39 = vadd.f32 %v1735_v38, %v1652_v33  ;;  %8142 = vmatprep.subr.msk.mxu1 %vm1394_vm6, %v9786_v36 }
 0x285   : > { %8143 = vmatpush3.xpose.msk.msra.mxu1 %vm1394_vm6, %v9786_v36 }
 0x286   : > { %8144 = vmatprep.subr.msk.mxu1 %vm1394_vm6, %v9788_v39 }
 0x289   : > { %8145 = vmatpush3.xpose.msk.msra.mxu1 %vm1394_vm6, %v9788_v39 }
 0x28a   : > { %8149 = vmatprep.subr.msk.mxu1 %vm1394_vm6, %v9786_v36 }
 0x28c   : > { %8147 = vmatmul.mubr.msk.f32.vlgmr.msra.gmra.mxu1 %vm1394_vm6, %v1821_v41 }
 0x28d   : > { %8150 = vmatpush3.xpose.msk.msra.mxu1 %vm1394_vm6, %v9786_v36  ;;  %8153 = vmatprep.mubr.msk.f32.mxu1 %vm1394_vm6, %v1935_v44 }
 0x28e   : > { %8151 = vmatprep.subr.msk.mxu1 %vm1394_vm6, %v9788_v39 }
 0x291   : > { %8152 = vmatpush3.xpose.msk.msra.mxu1 %vm1394_vm6, %v9788_v39 }
 0x292   : > { %8170 = vmatprep.subr.msk.mxu1 %vm1394_vm6, %v9786_v36 }
 0x294   : > { %8154 = vmatmul.mubr.msk.f32.vlgmr.msra.gmra.mxu1 %vm1394_vm6, %v1936_v45 }
 0x295   : > { %8171 = vmatpush3.xpose.msk.msra.mxu1 %vm1394_vm6, %v9786_v36  ;;  %8174 = vmatprep.mubr.msk.f32.mxu1 %vm1394_vm6, %v2211_v47 }
 0x296   : > { %8172 = vmatprep.subr.msk.mxu1 %vm1394_vm6, %v9788_v39 }
 0x299   : > { %8173 = vmatpush3.xpose.msk.msra.mxu1 %vm1394_vm6, %v9788_v39 }
 0x29a   : > { %8198 = vmatprep.subr.msk.mxu1 %vm1394_vm6, %v9786_v36 }
 0x29c   : > { %8175 = vmatmul.mubr.msk.f32.vlgmr.msra.gmra.mxu1 %vm1394_vm6, %v2212_v50 }
 0x29d   : > { %8199 = vmatpush3.xpose.msk.msra.mxu1 %vm1394_vm6, %v9786_v36  ;;  %8202 = vmatprep.mubr.msk.f32.mxu1 %vm1394_vm6, %v2597_v53 }
 0x29e   : > { %8200 = vmatprep.subr.msk.mxu1 %vm1394_vm6, %v9788_v39 }
 0x2a1   : > { %8201 = vmatpush3.xpose.msk.msra.mxu1 %vm1394_vm6, %v9788_v39 }
 0x2a2   : > { %8219 = vmatprep.subr.msk.mxu1 %vm2048_vm14, %v2896_v57 }
 0x2a4   : > { %8203 = vmatmul.mubr.msk.f32.vlgmr.msra.gmra.mxu1 %vm1394_vm6, %v2598_v58  ;;  %v2041_v58 = vmul.f32 %v9807_v42, %v9854_v52 }
 0x2a5   : > { %8220 = vmatpush3.msk.msra.mxu1 %vm2048_vm14, %v2896_v57 }
 0x2a6   : > { %8221 = vmatprep.subr.mxu1 %v2895_v59  ;;  %8156 = vmatprep.subr.msk.mxu0 %vm2048_vm14, %v2041_v58 }
 0x2a7   : > { %8222 = vmatpush3.msra.mxu1 %v2895_v59  ;;  %8157 = vmatpush3.msk.msra.mxu0 %vm2048_vm14, %v2041_v58  ;;  %v2040_v59 = vmul.f32 %v9807_v42, %v9867_v56 }
 0x2a8   : > { %8226 = vmatprep.subr.msk.mxu1 %vm1394_vm6, %v9786_v36 }
 0x2a9   : > { %8158 = vmatprep.subr.mxu0 %v2040_v59 }
 0x2aa   : > { %8159 = vmatpush3.msra.mxu0 %v2040_v59 }
 0x34c   : > { %v8148_v60 = vpop.f32.mrf.mxu1 }
 0x34d   : > { %v1914_v63 = vsel %vm1913_vm0, %v8148_v60, -inf }
 0x34e   : > { %v1900_v61 = vpop.f32.mrf.mxu1 }
 0x34f   : > { %v1910_v62 = vsel %vm1909_vm15, %v1900_v61, -inf }
 0x350   : > { %1911 = vmax.xlane.f32.xlu1 %v1910_v62 }
 0x354   : > { %v8155_v0 = vpop.f32.mrf.mxu1  ;;  %1915 = vmax.xlane.f32.xlu1 %v1914_v63 }
 0x355   : > { %v2021_v3 = vsel %vm1913_vm0, %v8155_v0, -inf }
 0x356   : > { %v2009_v1 = vpop.f32.mrf.mxu1 }
 0x357   : > { %v2018_v2 = vsel %vm1909_vm15, %v2009_v1, -inf }
 0x358   : > { %2019 = vmax.xlane.f32.xlu0 %v2018_v2 }
 0x35c   : > { %v8176_v4 = vpop.f32.mrf.mxu1  ;;  %2022 = vmax.xlane.f32.xlu0 %v2021_v3 }
 0x35d   : > { %v2297_v5 = vsel %vm1913_vm0, %v8176_v4, -inf }
 0x35e   : > { %v2285_v6 = vpop.f32.mrf.mxu1  ;;  %2298 = vmax.xlane.f32.xlu1 %v2297_v5 }
 0x35f   : > { %v2294_v7 = vsel %vm1909_vm15, %v2285_v6, -inf }
 0x360   : > { %2295 = vmax.xlane.f32.xlu0 %v2294_v7 }
 0x3d9   : > { %v1912_v8 = vpop.xlane.xlu1 %1911 }
 0x3da   : > { %v1917_v12 = vsub.f32 %v1900_v61, %v1912_v8 }
 0x3dc   : > { %v1919_v16 = vmul.f32 1.442695, %v1917_v12 }
 0x3dd   : > { %v1916_v13 = vpop.xlane.xlu1 %1915 }
 0x3de   : > { %v1918_v17 = vsub.f32 %v8148_v60, %v1916_v13  ;;  %v1934_v60 = vmul.f32 %v9780_v24, %v9854_v52  ;;  %v1933_v13 = vmul.f32 %v9780_v24, %v9867_v56 }
 0x3e0   : > { %v1921_v27 = vmul.f32 1.442695, %v1918_v17  ;;  %8163 = vmatprep.subr.msk.mxu0 %vm2048_vm14, %v1934_v60 }
 0x3e1   : > { %v2020_v14 = vpop.xlane.xlu0 %2019 }
 0x3e2   : > { %v2024_v15 = vsub.f32 %v2009_v1, %v2020_v14 }
 0x3e4   : > { %v2026_v18 = vmul.f32 1.442695, %v2024_v15 }
 0x3e5   : > { %v2023_v23 = vpop.xlane.xlu0 %2022 }
 0x3e6   : > { %8895 = vpow2.f32 %v2026_v18  ;;  %v2025_v25 = vsub.f32 %v8155_v0, %v2023_v23  ;;  %v2316_v23 = vmul.f32 %v9826_v46, %v9867_v56 }
 0x3e7   : > { %v2299_v26 = vpop.xlane.xlu1 %2298  ;;  %8897 = vpow2.f32 %v1919_v16  ;;  %v2317_v16 = vmul.f32 %v9826_v46, %v9854_v52 }
 0x3e8   : > { %v2028_v28 = vmul.f32 1.442695, %v2025_v25  ;;  %v2301_v29 = vsub.f32 %v8176_v4, %v2299_v26  ;;  %v2404_v26 = vmul.f32 %v9765_v9, %v9776_v22 }
 0x3e9   : > { %v2296_v30 = vpop.xlane.xlu0 %2295 }
 0x3ea   : > { %8899 = vpow2.f32 %v2028_v28  ;;  %v2300_v31 = vsub.f32 %v2285_v6, %v2296_v30  ;;  %v2304_v32 = vmul.f32 1.442695, %v2301_v29  ;;  %v2405_v28 = vmul.f32 %v9765_v9, %v9796_v40 }
 0x3eb   : > { %8901 = vpow2.f32 %v1921_v27  ;;  %v2510_v27 = vmul.f32 %v9765_v9, %v9854_v52  ;;  %v2509_v29 = vmul.f32 %v9765_v9, %v9867_v56  ;;  %v9940_v30 = vmul.f32 %v9852_v51, %v9854_v52 }
 0x3ec   : > { %v2302_v33 = vmul.f32 1.442695, %v2300_v31 }
 0x3ee   : > { %8903 = vpow2.f32 %v2302_v33 }
 0x3ef   : > { %8905 = vpow2.f32 %v2304_v32 }
 0x3f3   : > { %v8896_v34 = vpop.eup %8895 }
 0x3f4   : > { %v2030_v38 = vsel %vm1909_vm15, %v8896_v34, 0.0  ;;  %v8898_v41 = vpop.eup %8897 }
 0x3f5   : > { %2031 = vadd.xlane.f32.xlu0 %v2030_v38  ;;  %v1923_v47 = vsel %vm1909_vm15, %v8898_v41, 0.0 }
 0x3f7   : > { %v8900_v44 = vpop.eup %8899 }
 0x3f8   : > { %v2033_v45 = vsel %vm1913_vm0, %v8900_v44, 0.0  ;;  %v8902_v48 = vpop.eup %8901 }
 0x3f9   : > { %2034 = vadd.xlane.f32.xlu1 %v2033_v45  ;;  %1924 = vadd.xlane.f32.xlu0 %v1923_v47  ;;  %v1926_v53 = vsel %vm1913_vm0, %v8902_v48, 0.0 }
 0x3fb   : > { %v8904_v49 = vpop.eup %8903 }
 0x3fc   : > { %v2306_v50 = vsel %vm1909_vm15, %v8904_v49, 0.0  ;;  %v8906_v54 = vpop.eup %8905 }
 0x3fd   : > { %2307 = vadd.xlane.f32.xlu0 %v2306_v50  ;;  %1927 = vadd.xlane.f32.xlu1 %v1926_v53  ;;  %v2309_v57 = vsel %vm1913_vm0, %v8906_v54, 0.0 }
 0x401   : > { %2310 = vadd.xlane.f32.xlu1 %v2309_v57 }
 0x47e   : > { %v2032_v61 = vpop.xlane.xlu0 %2031 }
 0x47f   : > { %8907 = vrcp.f32 %v2032_v61 }
 0x482   : > { %v1925_v62 = vpop.xlane.xlu0 %1924  ;;  %v2035_v63 = vpop.xlane.xlu1 %2034 }
 0x483   : > { %8909 = vrcp.f32 %v1925_v62 }
 0x484   : > { %8911 = vrcp.f32 %v2035_v63 }
 0x486   : > { %v2308_v0 = vpop.xlane.xlu0 %2307  ;;  %v1928_v1 = vpop.xlane.xlu1 %1927 }
 0x487   : > { %8913 = vrcp.f32 %v2308_v0 }
 0x488   : > { %8915 = vrcp.f32 %v1928_v1 }
 0x48a   : > { %v2311_v2 = vpop.xlane.xlu1 %2310 }
 0x48b   : > { %8917 = vrcp.f32 %v2311_v2 }
 0x48c   : > { %v8908_v3 = vpop.eup %8907 }
 0x48d   : > { %v2038_v4 = vmul.f32 %v8908_v3, %v8896_v34 }
 0x48f   : > { %8160 = vmatprep.mubr.msk.f32.mxu0 %vm1909_vm15, %v2038_v4 }
 0x490   : > { %v8910_v5 = vpop.eup %8909 }
 0x491   : > { %v8912_v6 = vpop.eup %8911  ;;  %v1931_v7 = vmul.f32 %v8910_v5, %v8898_v41 }
 0x492   : > { %v2039_v8 = vmul.f32 %v8912_v6, %v8900_v44 }
 0x494   : > { %v8914_v12 = vpop.eup %8913  ;;  %8161 = vmatmul.mubr.msk.f32.vlgmr.msra.gmra.mxu0 %vm1909_vm15, %v2039_v8 }
 0x495   : > { %v8916_v14 = vpop.eup %8915  ;;  %8164 = vmatpush3.msk.msra.mxu0 %vm2048_vm14, %v1934_v60  ;;  %8167 = vmatprep.mubr.msk.f32.mxu0 %vm1909_vm15, %v1931_v7  ;;  %v2314_v15 = vmul.f32 %v8914_v12, %v8904_v49  ;;  %v8204_v49 = vpop.f32.mrf.mxu1 }
 0x496   : > { %8165 = vmatprep.subr.mxu0 %v1933_v13  ;;  %v1932_v17 = vmul.f32 %v8916_v14, %v8902_v48  ;;  %v2683_v59 = vsel %vm1913_vm0, %v8204_v49, -inf }
 0x497   : > { %8166 = vmatpush3.msra.mxu0 %v1933_v13  ;;  %v2671_v58 = vpop.f32.mrf.mxu1 }
 0x498   : > { %v8918_v18 = vpop.eup %8917  ;;  %8177 = vmatprep.subr.msk.mxu0 %vm2048_vm14, %v2317_v16  ;;  %8168 = vmatmul.mubr.msk.f32.vlgmr.msra.gmra.mxu0 %vm1909_vm15, %v1932_v17  ;;  %v2680_v60 = vsel %vm1909_vm15, %v2671_v58, -inf }
 0x499   : > { %8178 = vmatpush3.msk.msra.mxu0 %vm2048_vm14, %v2317_v16  ;;  %8181 = vmatprep.mubr.msk.f32.mxu0 %vm1909_vm15, %v2314_v15  ;;  %v2315_v25 = vmul.f32 %v8918_v18, %v8906_v54 }
 0x49a   : > { %8179 = vmatprep.subr.mxu0 %v2316_v23 }
 0x49b   : > { %8180 = vmatpush3.msra.mxu0 %v2316_v23 }
 0x49c   : > { %8184 = vmatprep.subr.msk.mxu0 %vm1394_vm6, %v9786_v36  ;;  %8182 = vmatmul.mubr.msk.f32.vlgmr.msra.gmra.mxu0 %vm1909_vm15, %v2315_v25 }
 0x49d   : > { %8185 = vmatpush3.xpose.msk.msra.mxu0 %vm1394_vm6, %v9786_v36  ;;  %8188 = vmatprep.mubr.msk.f32.mxu0 %vm1394_vm6, %v2404_v26 }
 0x49e   : > { %8186 = vmatprep.subr.msk.mxu0 %vm1394_vm6, %v9788_v39 }
 0x4a1   : > { %8187 = vmatpush3.xpose.msk.msra.mxu0 %vm1394_vm6, %v9788_v39 }
 0x4a2   : > { %8191 = vmatprep.subr.msk.mxu0 %vm2048_vm14, %v2510_v27 }
 0x4a4   : > { %8189 = vmatmul.mubr.msk.f32.vlgmr.msra.gmra.mxu0 %vm1394_vm6, %v2405_v28 }
 0x4a5   : > { %8192 = vmatpush3.msk.msra.mxu0 %vm2048_vm14, %v2510_v27 }
 0x4a6   : > { %8193 = vmatprep.subr.mxu0 %v2509_v29 }
 0x4a7   : > { %8194 = vmatpush3.msra.mxu0 %v2509_v29 }
 0x4a8   : > { %8205 = vmatprep.subr.msk.mxu0 %vm2048_vm14, %v9940_v30 }
 0x554   : > { %v8162_v31 = vpop.f32.mrf.mxu0 }
 0x556   : > { %v2118_v32 = vpop.f32.mrf.mxu0 }
 0x558   : > { %v8169_v33 = vpop.f32.mrf.mxu0 }
 0x559   : > { %v2208_v34 = vadd.f32 %v8169_v33, %v8162_v31 }
 0x55a   : > { %v2202_v38 = vpop.f32.mrf.mxu0 }
 0x55b   : > { %v2203_v41 = vadd.f32 %v2202_v38, %v2118_v32 }
 0x55c   : > { %v8183_v44 = vpop.f32.mrf.mxu0 }
 0x55d   : > { %v9944_v45 = vadd.f32 %v8183_v44, %v2208_v34 }
 0x55e   : > { %v2393_v47 = vpop.f32.mrf.mxu0 }
 0x55f   : > { %v9946_v48 = vadd.f32 %v2393_v47, %v2203_v41  ;;  %v2702_v41 = vmul.f32 %v9852_v51, %v9867_v56 }
 0x564   : > { %v8190_v50 = vpop.f32.mrf.mxu0 }
 0x565   : > { %v2490_v53 = vsel %vm1913_vm0, %v8190_v50, -inf }
 0x566   : > { %2491 = vmax.xlane.f32.xlu1 %v2490_v53  ;;  %v2478_v54 = vpop.f32.mrf.mxu0  ;;  %v3088_v53 = vmul.f32 %v9768_v10, %v9867_v56 }
 0x567   : > { %v2487_v57 = vsel %vm1909_vm15, %v2478_v54, -inf }
 0x568   : > { %2488 = vmax.xlane.f32.xlu0 %v2487_v57 }
 0x56a   : > { %2684 = vmax.xlane.f32.xlu1 %v2683_v59 }
 0x56c   : > { %2681 = vmax.xlane.f32.xlu0 %v2680_v60 }
 0x5ef   : > { %v2492_v61 = vpop.xlane.xlu1 %2491 }
 0x5f0   : > { %v2494_v62 = vsub.f32 %v8190_v50, %v2492_v61  ;;  %v2791_v50 = vmul.f32 %v9863_v55, %v9796_v40 }
 0x5f1   : > { %v2489_v63 = vpop.xlane.xlu0 %2488 }
 0x5f2   : > { %v2497_v0 = vmul.f32 1.442695, %v2494_v62  ;;  %v2493_v1 = vsub.f32 %v2478_v54, %v2489_v63 }
 0x5f3   : > { %v2685_v2 = vpop.xlane.xlu1 %2684 }
 0x5f4   : > { %8919 = vpow2.f32 %v2497_v0  ;;  %v2495_v3 = vmul.f32 1.442695, %v2493_v1  ;;  %v2687_v4 = vsub.f32 %v8204_v49, %v2685_v2  ;;  %v2790_v49 = vmul.f32 %v9863_v55, %v9776_v22 }
 0x5f5   : > { %v2682_v5 = vpop.xlane.xlu0 %2681 }
 0x5f6   : > { %8921 = vpow2.f32 %v2495_v3  ;;  %v2690_v6 = vmul.f32 1.442695, %v2687_v4  ;;  %v2686_v7 = vsub.f32 %v2671_v58, %v2682_v5 }
 0x5f8   : > { %8923 = vpow2.f32 %v2690_v6  ;;  %v2688_v8 = vmul.f32 1.442695, %v2686_v7 }
 0x5fa   : > { %8925 = vpow2.f32 %v2688_v8 }
 0x601   : > { %v8920_v12 = vpop.eup %8919 }
 0x602   : > { %v2502_v13 = vsel %vm1913_vm0, %v8920_v12, 0.0 }
 0x603   : > { %v8922_v14 = vpop.eup %8921  ;;  %2503 = vadd.xlane.f32.xlu1 %v2502_v13 }
 0x604   : > { %v2499_v15 = vsel %vm1909_vm15, %v8922_v14, 0.0 }
 0x605   : > { %v8924_v16 = vpop.eup %8923  ;;  %2500 = vadd.xlane.f32.xlu0 %v2499_v15 }
 0x606   : > { %v2695_v17 = vsel %vm1913_vm0, %v8924_v16, 0.0 }
 0x607   : > { %v8926_v18 = vpop.eup %8925  ;;  %2696 = vadd.xlane.f32.xlu1 %v2695_v17 }
 0x608   : > { %v2692_v23 = vsel %vm1909_vm15, %v8926_v18, 0.0 }
 0x609   : > { %2693 = vadd.xlane.f32.xlu0 %v2692_v23 }
 0x68c   : > { %v2504_v25 = vpop.xlane.xlu1 %2503 }
 0x68d   : > { %8927 = vrcp.f32 %v2504_v25 }
 0x68e   : > { %v2501_v26 = vpop.xlane.xlu0 %2500 }
 0x68f   : > { %8929 = vrcp.f32 %v2501_v26  ;;  %v2983_v26 = vmul.f32 %v9768_v10, %v9776_v22 }
 0x690   : > { %v2697_v27 = vpop.xlane.xlu1 %2696 }
 0x691   : > { %8931 = vrcp.f32 %v2697_v27  ;;  %v3282_v27 = vmul.f32 %v9771_v11, %v9854_v52 }
 0x692   : > { %v2694_v28 = vpop.xlane.xlu0 %2693 }
 0x693   : > { %8933 = vrcp.f32 %v2694_v28  ;;  %v2984_v28 = vmul.f32 %v9768_v10, %v9796_v40 }
 0x69a   : > { %v8928_v29 = vpop.eup %8927 }
 0x69b   : > { %v2508_v33 = vmul.f32 %v8928_v29, %v8920_v12  ;;  %v3281_v29 = vmul.f32 %v9771_v11, %v9867_v56 }
 0x69c   : > { %v8930_v31 = vpop.eup %8929 }
 0x69d   : > { %v2507_v32 = vmul.f32 %v8930_v31, %v8922_v14 }
 0x69e   : > { %v8932_v34 = vpop.eup %8931 }
 0x69f   : > { %8195 = vmatprep.mubr.msk.f32.mxu0 %vm1909_vm15, %v2507_v32  ;;  %v2701_v47 = vmul.f32 %v8932_v34, %v8924_v16 }
 0x6a0   : > { %v8934_v38 = vpop.eup %8933  ;;  %8196 = vmatmul.mubr.msk.f32.vlgmr.msra.gmra.mxu0 %vm1909_vm15, %v2508_v33 }
 0x6a1   : > { %8206 = vmatpush3.msk.msra.mxu0 %vm2048_vm14, %v9940_v30  ;;  %v2700_v44 = vmul.f32 %v8934_v38, %v8926_v18  ;;  %v3089_v30 = vmul.f32 %v9768_v10, %v9854_v52 }
 0x6a2   : > { %8207 = vmatprep.subr.mxu0 %v2702_v41 }
 0x6a3   : > { %8208 = vmatpush3.msra.mxu0 %v2702_v41  ;;  %8209 = vmatprep.mubr.msk.f32.mxu0 %vm1909_vm15, %v2700_v44 }
 0x6a4   : > { %8212 = vmatprep.subr.msk.mxu0 %vm1394_vm6, %v9786_v36  ;;  %8210 = vmatmul.mubr.msk.f32.vlgmr.msra.gmra.mxu0 %vm1909_vm15, %v2701_v47 }
 0x6a5   : > { %8213 = vmatpush3.xpose.msk.msra.mxu0 %vm1394_vm6, %v9786_v36  ;;  %8216 = vmatprep.mubr.msk.f32.mxu0 %vm1394_vm6, %v2790_v49 }
 0x6a6   : > { %8214 = vmatprep.subr.msk.mxu0 %vm1394_vm6, %v9788_v39 }
 0x6a9   : > { %8215 = vmatpush3.xpose.msk.msra.mxu0 %vm1394_vm6, %v9788_v39 }
 0x6aa   : > { %8233 = vmatprep.subr.msk.mxu0 %vm2048_vm14, %v3089_v30 }
 0x6ac   : > { %8217 = vmatmul.mubr.msk.f32.vlgmr.msra.gmra.mxu0 %vm1394_vm6, %v2791_v50 }
 0x6ad   : > { %8234 = vmatpush3.msk.msra.mxu0 %vm2048_vm14, %v3089_v30 }
 0x6ae   : > { %8235 = vmatprep.subr.mxu0 %v3088_v53 }
 0x6af   : > { %8236 = vmatpush3.msra.mxu0 %v3088_v53 }
 0x6b0   : > { %8240 = vmatprep.subr.msk.mxu0 %vm1394_vm6, %v9786_v36 }
 0x760   : > { %v8197_v54 = vpop.f32.mrf.mxu0 }
 0x761   : > { %v2596_v57 = vadd.f32 %v8197_v54, %v9944_v45 }
 0x762   : > { %v2586_v58 = vpop.f32.mrf.mxu0 }
 0x763   : > { %v2595_v59 = vadd.f32 %v2586_v58, %v9946_v48 }
 0x764   : > { %v8211_v60 = vpop.f32.mrf.mxu0 }
 0x765   : > { %v2789_v61 = vadd.f32 %v8211_v60, %v2596_v57 }
 0x766   : > { %v2779_v62 = vpop.f32.mrf.mxu0 }
 0x767   : > { %v2788_v63 = vadd.f32 %v2779_v62, %v2595_v59 }
 0x76c   : > { %v8218_v0 = vpop.f32.mrf.mxu0 }
 0x76d   : > { %v2876_v1 = vsel %vm1913_vm0, %v8218_v0, -inf }
 0x76e   : > { %2877 = vmax.xlane.f32.xlu1 %v2876_v1  ;;  %v2864_v2 = vpop.f32.mrf.mxu0 }
 0x76f   : > { %v2873_v3 = vsel %vm1909_vm15, %v2864_v2, -inf }
 0x770   : > { %2874 = vmax.xlane.f32.xlu0 %v2873_v3  ;;  %v3177_v3 = vmul.f32 %v9771_v11, %v9796_v40 }
 0x7f7   : > { %v2878_v4 = vpop.xlane.xlu1 %2877 }
 0x7f8   : > { %v2880_v5 = vsub.f32 %v8218_v0, %v2878_v4 }
 0x7f9   : > { %v2875_v6 = vpop.xlane.xlu0 %2874 }
 0x7fa   : > { %v2883_v7 = vmul.f32 1.442695, %v2880_v5  ;;  %v2879_v45 = vsub.f32 %v2864_v2, %v2875_v6  ;;  %v3176_v2 = vmul.f32 %v9771_v11, %v9776_v22 }
 0x7fc   : > { %8935 = vpow2.f32 %v2883_v7  ;;  %v2881_v8 = vmul.f32 1.442695, %v2879_v45 }
 0x7fe   : > { %8937 = vpow2.f32 %v2881_v8 }
 0x809   : > { %v8936_v48 = vpop.eup %8935 }
 0x80a   : > { %v2888_v12 = vsel %vm1913_vm0, %v8936_v48, 0.0 }
 0x80b   : > { %v8938_v13 = vpop.eup %8937  ;;  %2889 = vadd.xlane.f32.xlu1 %v2888_v12 }
 0x80c   : > { %v2885_v14 = vsel %vm1909_vm15, %v8938_v13, 0.0 }
 0x80d   : > { %2886 = vadd.xlane.f32.xlu0 %v2885_v14 }
 0x894   : > { %v2890_v15 = vpop.xlane.xlu1 %2889 }
 0x895   : > { %8939 = vrcp.f32 %v2890_v15 }
 0x896   : > { %v2887_v16 = vpop.xlane.xlu0 %2886 }
 0x897   : > { %8941 = vrcp.f32 %v2887_v16 }
 0x8a2   : > { %v8940_v17 = vpop.eup %8939 }
 0x8a3   : > { %v2894_v25 = vmul.f32 %v8940_v17, %v8936_v48 }
 0x8a4   : > { %v8942_v18 = vpop.eup %8941 }
 0x8a5   : > { %v2893_v23 = vmul.f32 %v8942_v18, %v8938_v13 }
 0x8a7   : > { %8223 = vmatprep.mubr.msk.f32.mxu1 %vm1909_vm15, %v2893_v23  ;;  %v1291_v23 = vld [vmem:[%s10036_s26 + $0x28] sm:$0xff] }
 0x8a8   : > { %8224 = vmatmul.mubr.msk.f32.vlgmr.msra.gmra.mxu1 %vm1909_vm15, %v2894_v25 }
 0x8a9   : > { %8227 = vmatpush3.xpose.msk.msra.mxu1 %vm1394_vm6, %v9786_v36  ;;  %8230 = vmatprep.mubr.msk.f32.mxu1 %vm1394_vm6, %v2983_v26 }
 0x8aa   : > { %8228 = vmatprep.subr.msk.mxu1 %vm1394_vm6, %v9788_v39 }
 0x8ad   : > { %8229 = vmatpush3.xpose.msk.msra.mxu1 %vm1394_vm6, %v9788_v39 }
 0x8ae   : > { %8247 = vmatprep.subr.msk.mxu1 %vm2048_vm14, %v3282_v27 }
 0x8b0   : > { %8231 = vmatmul.mubr.msk.f32.vlgmr.msra.gmra.mxu1 %vm1394_vm6, %v2984_v28 }
 0x8b1   : > { %8248 = vmatpush3.msk.msra.mxu1 %vm2048_vm14, %v3282_v27 }
 0x8b2   : > { %8249 = vmatprep.subr.mxu1 %v3281_v29 }
 0x8b3   : > { %8250 = vmatpush3.msra.mxu1 %v3281_v29 }
 0x8b4   : > { %8254 = vmatprep.subr.mxu1 %v1291_v23 }
 0x968   : > { %v8225_v31 = vpop.f32.mrf.mxu1 }
 0x969   : > { %v2982_v32 = vadd.f32 %v8225_v31, %v2789_v61 }
 0x96a   : > { %v2972_v52 = vpop.f32.mrf.mxu1 }
 0x96b   : > { %v2981_v33 = vadd.f32 %v2972_v52, %v2788_v63  ;;  %v1289_v52 = vld [vmem:[%s10036_s26 + $0x18] sm:$0xff] }
 0x970   : > { %v8232_v34 = vpop.f32.mrf.mxu1 }
 0x971   : > { %v3069_v38 = vsel %vm1913_vm0, %v8232_v34, -inf }
 0x972   : > { %3070 = vmax.xlane.f32.xlu1 %v3069_v38  ;;  %v3057_v41 = vpop.f32.mrf.mxu1  ;;  %v1286_v38 = vld [vmem:[%s10036_s26] sm:$0xff] }
 0x973   : > { %v3066_v44 = vsel %vm1909_vm15, %v3057_v41, -inf }
 0x974   : > { %3067 = vmax.xlane.f32.xlu0 %v3066_v44 }
 0x9fb   : > { %v3071_v47 = vpop.xlane.xlu1 %3070 }
 0x9fc   : > { %v3073_v49 = vsub.f32 %v8232_v34, %v3071_v47  ;;  %v1287_v34 = vld [vmem:[%s10036_s26 + $0x8] sm:$0xff] }
 0x9fd   : > { %v3068_v30 = vpop.xlane.xlu0 %3067 }
 0x9fe   : > { %v3076_v56 = vmul.f32 1.442695, %v3073_v49  ;;  %v3072_v50 = vsub.f32 %v3057_v41, %v3068_v30  ;;  %v7583_v30 = vld [vmem:[%s10050_s16] ss:$0 sm:$0xff] }
 0xa00   : > { %8943 = vpow2.f32 %v3076_v56  ;;  %v3074_v53 = vmul.f32 1.442695, %v3072_v50 }
 0xa02   : > { %8945 = vpow2.f32 %v3074_v53 }
 0xa0d   : > { %v8944_v54 = vpop.eup %8943 }
 0xa0e   : > { %v3081_v57 = vsel %vm1913_vm0, %v8944_v54, 0.0 }
 0xa0f   : > { %v8946_v58 = vpop.eup %8945  ;;  %3082 = vadd.xlane.f32.xlu1 %v3081_v57 }
 0xa10   : > { %v3078_v59 = vsel %vm1909_vm15, %v8946_v58, 0.0 }
 0xa11   : > { %3079 = vadd.xlane.f32.xlu0 %v3078_v59  ;;  %v9040_v59 = vld [vmem:[#allocation2] sm:$0xff] }
 0xa98   : > { %v3083_v60 = vpop.xlane.xlu1 %3082 }
 0xa99   : > { %8947 = vrcp.f32 %v3083_v60 }
 0xa9a   : > { %v3080_v61 = vpop.xlane.xlu0 %3079 }
 0xa9b   : > { %8949 = vrcp.f32 %v3080_v61 }
 0xaa6   : > { %v8948_v62 = vpop.eup %8947 }
 0xaa7   : > { %v3087_v1 = vmul.f32 %v8948_v62, %v8944_v54  ;;  %v9039_v54 = vld [vmem:[#allocation2 + $0x8] sm:$0xf] }
 0xaa8   : > { %v8950_v63 = vpop.eup %8949 }
 0xaa9   : > { %v3086_v0 = vmul.f32 %v8950_v63, %v8946_v58 }
 0xaab   : > { %8237 = vmatprep.mubr.msk.f32.mxu0 %vm1909_vm15, %v3086_v0 }
 0xaac   : > { %8238 = vmatmul.mubr.msk.f32.vlgmr.msra.gmra.mxu0 %vm1909_vm15, %v3087_v1 }
 0xaad   : > { %8241 = vmatpush3.xpose.msk.msra.mxu0 %vm1394_vm6, %v9786_v36  ;;  %8244 = vmatprep.mubr.msk.f32.mxu0 %vm1394_vm6, %v3176_v2 }
 0xaae   : > { %8242 = vmatprep.subr.msk.mxu0 %vm1394_vm6, %v9788_v39 }
 0xab1   : > { %8243 = vmatpush3.xpose.msk.msra.mxu0 %vm1394_vm6, %v9788_v39 }
 0xab4   : > { %8245 = vmatmul.mubr.msk.f32.vlgmr.msra.gmra.mxu0 %vm1394_vm6, %v3177_v3  ;;  %v1304_v3 = vld [vmem:[%s10069_s7 + $0x28] sm:$0xff] }
 0xab5   : > { %8269 = vmatprep.subr.mxu0 %v1304_v3 }
 0xab6   : > { %8270 = vmatpush3.msra.mxu0 %v1304_v3  ;;  %v9048_v3 = vld [vmem:[%s9705_s23 + $0x28] sm:$0xff] }
 0xb6c   : > { %v8239_v4 = vpop.f32.mrf.mxu0 }
 0xb6d   : > { %v3175_v22 = vadd.f32 %v8239_v4, %v2982_v32  ;;  %v1290_v32 = vld [vmem:[%s10036_s26 + $0x20] sm:$0xff] }
 0xb6e   : > { %v3165_v5 = vpop.f32.mrf.mxu0  ;;  %v1303_v4 = vld [vmem:[%s10069_s7 + $0x20] sm:$0xff] }
 0xb6f   : > { %v3174_v6 = vadd.f32 %v3165_v5, %v2981_v33  ;;  %v1288_v33 = vld [vmem:[%s10036_s26 + $0x10] sm:$0xff]  ;;  %8271 = vmatprep.subr.mxu0 %v1303_v4 }
 0xb70   : > { %8272 = vmatpush3.msra.mxu0 %v1303_v4  ;;  %v1301_v5 = vld [vmem:[%s10069_s7 + $0x10] sm:$0xff]  ;;  %v9049_v4 = vld [vmem:[%s9705_s23 + $0x20] sm:$0xff] }
 0xb74   : > { %v8246_v7 = vpop.f32.mrf.mxu0 }
 0xb75   : > { %v3262_v36 = vsel %vm1913_vm0, %v8246_v7, -inf }
 0xb76   : > { %3263 = vmax.xlane.f32.xlu1 %v3262_v36  ;;  %v3250_v45 = vpop.f32.mrf.mxu0  ;;  %v9041_v36 = vld [vmem:[%s9659_s2 + $0x28] sm:$0xff] }
 0xb77   : > { %v3259_v8 = vsel %vm1909_vm15, %v3250_v45, -inf }
 0xb78   : > { %3260 = vmax.xlane.f32.xlu0 %v3259_v8 }
 0xbff   : > { %v3264_v39 = vpop.xlane.xlu1 %3263 }
 0xc00   : > { %v3266_v48 = vsub.f32 %v8246_v7, %v3264_v39  ;;  %v1299_v7 = vld [vmem:[%s10069_s7] sm:$0xff] }
 0xc01   : > { %v3261_v12 = vpop.xlane.xlu0 %3260 }
 0xc02   : > { %v3269_v40 = vmul.f32 1.442695, %v3266_v48  ;;  %v3265_v13 = vsub.f32 %v3250_v45, %v3261_v12  ;;  %v10078_v45 = vld [vmem:[#allocation2 + $0x10] sm:$0xff]  ;;  %v1313_v48 = vld [vmem:[%s10085_s18 + $0x28] sm:$0xff]  ;;  %v1312_v12 = vld [vmem:[%s10085_s18 + $0x20] sm:$0xff] }
 0xc03   : > { %v3759_v8 = vmul.f32 %v9689_v35, %v10078_v45 }
 0xc04   : > { %8951 = vpow2.f32 %v3269_v40  ;;  %v3267_v14 = vmul.f32 1.442695, %v3265_v13  ;;  %v1311_v40 = vld [vmem:[%s10085_s18 + $0x18] sm:$0xff] }
 0xc05   : > { %v3765_v39 = vadd.f32 %v9692_v37, %v3759_v8  ;;  %v9056_v8 = vld [vmem:[%s9726_s17 + $0x20] sm:$0xff] }
 0xc06   : > { %8953 = vpow2.f32 %v3267_v14 }
 0xc11   : > { %v8952_v15 = vpop.eup %8951 }
 0xc12   : > { %v3274_v16 = vsel %vm1913_vm0, %v8952_v15, 0.0 }
 0xc13   : > { %v8954_v17 = vpop.eup %8953  ;;  %3275 = vadd.xlane.f32.xlu1 %v3274_v16 }
 0xc14   : > { %v3271_v18 = vsel %vm1909_vm15, %v8954_v17, 0.0 }
 0xc15   : > { %3272 = vadd.xlane.f32.xlu0 %v3271_v18 }
 0xc9c   : > { %v3276_v25 = vpop.xlane.xlu1 %3275 }
 0xc9d   : > { %8955 = vrcp.f32 %v3276_v25 }
 0xc9e   : > { %v3273_v26 = vpop.xlane.xlu0 %3272 }
 0xc9f   : > { %8957 = vrcp.f32 %v3273_v26 }
 0xcaa   : > { %v8956_v27 = vpop.eup %8955 }
 0xcab   : > { %v3280_v31 = vmul.f32 %v8956_v27, %v8952_v15 }
 0xcac   : > { %v8958_v28 = vpop.eup %8957 }
 0xcad   : > { %v3279_v29 = vmul.f32 %v8958_v28, %v8954_v17 }
 0xcaf   : > { %8251 = vmatprep.mubr.msk.f32.mxu1 %vm1909_vm15, %v3279_v29 }
 0xcb0   : > { %8252 = vmatmul.mubr.msk.f32.vlgmr.msra.gmra.mxu1 %vm1909_vm15, %v3280_v31  ;;  %v3507_v31 = vsub.s32 2, %v9664_v20 }
 0xcb1   : > { %8255 = vmatpush3.msra.mxu1 %v1291_v23 }
 0xcb2   : > { %8256 = vmatprep.subr.mxu1 %v1290_v32 }
 0xcb3   : > { %8257 = vmatpush3.msra.mxu1 %v1290_v32 }
 0xcb4   : > { %8258 = vmatprep.subr.mxu1 %v1289_v52 }
 0xcb5   : > { %8259 = vmatpush3.msra.mxu1 %v1289_v52 }
 0xcb6   : > { %8260 = vmatprep.subr.mxu1 %v1288_v33 }
 0xcb7   : > { %8261 = vmatpush3.msra.mxu1 %v1288_v33  ;;  %v7586_v33 = vld [vmem:[%s10092_s22] ss:$0 sm:$0xff] }
 0xcb8   : > { %8262 = vmatprep.subr.mxu1 %v1287_v34 }
 0xcb9   : > { %8263 = vmatpush3.msra.mxu1 %v1287_v34  ;;  %v3513_v34 = vsub.s32 3, %v9664_v20 }
 0xcba   : > { %8264 = vmatprep.subr.mxu1 %v1286_v38 }
 0xcbb   : > { %8265 = vmatpush3.msra.mxu1 %v1286_v38 }
 0xcbc   : > { %8284 = vmatprep.subr.mxu1 %v1313_v48 }
 0xd70   : > { %v8253_v41 = vpop.f32.mrf.mxu1 }
 0xd71   : > { %v3368_v49 = vadd.f32 %v8253_v41, %v3175_v22  ;;  %v1302_v22 = vld [vmem:[%s10069_s7 + $0x18] sm:$0xff] }
 0xd72   : > { %v3358_v44 = vpop.f32.mrf.mxu1  ;;  %8273 = vmatprep.subr.mxu0 %v1302_v22 }
 0xd73   : > { %v3367_v47 = vadd.f32 %v3358_v44, %v3174_v6  ;;  %8274 = vmatpush3.msra.mxu0 %v1302_v22  ;;  %v1300_v6 = vld [vmem:[%s10069_s7 + $0x8] sm:$0xff]  ;;  %v9050_v22 = vld [vmem:[%s9705_s23 + $0x18] sm:$0xff] }
 0xd74   : > { %8275 = vmatprep.subr.mxu0 %v1301_v5 }
 0xd75   : > { %8266 = vmatprep.mubr.msk.f32.mxu1 %vm1394_vm6, %v3367_v47  ;;  %8276 = vmatpush3.msra.mxu0 %v1301_v5  ;;  %v7587_v47 = vld [vmem:[%s10098_s5] ss:$0 sm:$0xff]  ;;  %v9051_v5 = vld [vmem:[%s9705_s23 + $0x10] sm:$0xff] }
 0xd76   : > { %8267 = vmatmul.mubr.msk.f32.vlgmr.msra.gmra.mxu1 %vm1394_vm6, %v3368_v49  ;;  %8277 = vmatprep.subr.mxu0 %v1300_v6  ;;  %v3508_v49 = vrot.slane %v9661_v19, %v3507_v31 }
 0xd77   : > { %8278 = vmatpush3.msra.mxu0 %v1300_v6  ;;  %8285 = vmatpush3.msra.mxu1 %v1313_v48  ;;  %v9052_v6 = vld [vmem:[%s9705_s23 + $0x8] sm:$0xff]  ;;  %v9058_v48 = vld [vmem:[%s9726_s17 + $0x10] sm:$0xff] }
 0xd78   : > { %8279 = vmatprep.subr.mxu0 %v1299_v7  ;;  %8286 = vmatprep.subr.mxu1 %v1312_v12 }
 0xd79   : > { %8280 = vmatpush3.msra.mxu0 %v1299_v7  ;;  %8287 = vmatpush3.msra.mxu1 %v1312_v12  ;;  %v9054_v7 = vld [vmem:[#allocation2 + $0x18] sm:$0xf]  ;;  %v9059_v12 = vld [vmem:[%s9726_s17 + $0x8] sm:$0xff] }
 0xd7a   : > { %8299 = vmatprep.subr.mxu0 %v9041_v36  ;;  %8288 = vmatprep.subr.mxu1 %v1311_v40 }
 0xd7b   : > { %8289 = vmatpush3.msra.mxu1 %v1311_v40  ;;  %v9060_v40 = vld [vmem:[%s9726_s17] sm:$0xff] }
 0xe36   : > { %v8268_v56 = vpop.f32.mrf.mxu1 }
 0xe37   : > { %v3453_v50 = vadd.f32 %v8268_v56, %v7583_v30 }
 0xe38   : > { %v3447_v53 = vpop.f32.mrf.mxu1 }
 0xe39   : > { %v10053_v57 = vadd.f32 %v9039_v54, %v3453_v50  ;;  %v3448_v58 = vadd.f32 %v7583_v30, %v3447_v53  ;;  %v9042_v50 = vld [vmem:[%s9626_s4] sm:$0xf] }
 0xe3a   : > { %v3514_v53 = vrot.slane %v9042_v50, %v3513_v34 }
 0xe3b   : > { %v10055_v60 = vadd.f32 %v9040_v59, %v3448_v58  ;;  %v3462_v61 = vsel %vm3461_vm1, %v10053_v57, 0.0  ;;  %v3468_v62 = vmul.f32 %v10053_v57, %v10053_v57 }
 0xe3c   : > { %3463 = vadd.xlane.f32.xlu1 %v3462_v61 }
 0xe3d   : > { %v3458_v63 = vsel %vm1394_vm6, %v10055_v60, 0.0  ;;  %v3467_v0 = vmul.f32 %v10055_v60, %v10055_v60  ;;  %v3472_v1 = vsel %vm3461_vm1, %v3468_v62, 0.0  ;;  %v9043_v62 = vld [vmem:[%s9659_s2 + $0x20] sm:$0xff] }
 0xe3e   : > { %3459 = vadd.xlane.f32.xlu0 %v3458_v63  ;;  %v9044_v63 = vld [vmem:[%s9659_s2 + $0x18] sm:$0xff] }
 0xe3f   : > { %v3469_v2 = vsel %vm1394_vm6, %v3467_v0, 0.0  ;;  %v9045_v0 = vld [vmem:[%s9659_s2 + $0x10] sm:$0xff] }
 0xe40   : > { %3473 = vadd.xlane.f32.xlu1 %v3472_v1  ;;  %v9046_v1 = vld [vmem:[%s9659_s2 + $0x8] sm:$0xff] }
 0xe42   : > { %3470 = vadd.xlane.f32.xlu0 %v3469_v2  ;;  %v9047_v2 = vld [vmem:[%s9659_s2] sm:$0xff]  ;;  %s10162_s2 = scalar_lea.vmem %s11017_s3, %s9539_s0  ;;  %s11029_s3 = sld [smem:[#allocation42_spill]] (!%p7673_p8) }
 0xec5   : > { %v3464_v13 = vpop.xlane.xlu1 %3463 }
 0xec6   : > { %v3466_v35 = vmul.f32 0.020833334, %v3464_v13  ;;  %v10150_v13 = vld [vmem:[%s10085_s18 + $0x8] sm:$0xff] }
 0xec7   : > { %v3460_v14 = vpop.xlane.xlu0 %3459 }
 0xec8   : > { %v3465_v37 = vmul.f32 0.020833334, %v3460_v14  ;;  %v3478_v16 = vmul.f32 %v3466_v35, %v3466_v35  ;;  %v3482_v32 = vsub.f32 %v10053_v57, %v3466_v35  ;;  %v10155_v35 = vld [vmem:[%s10085_s18] sm:$0xff]  ;;  %v9061_v14 = vld [vmem:[%s9361_s21 + $0x28] sm:$0xff] }
 0xec9   : > { %v3474_v15 = vpop.xlane.xlu1 %3473 }
 0xeca   : > { %v3476_v17 = vmul.f32 0.020833334, %v3474_v15  ;;  %v3477_v23 = vmul.f32 %v3465_v37, %v3465_v37  ;;  %v3481_v38 = vsub.f32 %v10055_v60, %v3465_v37  ;;  %v7588_v37 = vld [vmem:[%s10162_s2] ss:$0 sm:$0xff] }
 0xecb   : > { %v3471_v18 = vpop.xlane.xlu0 %3470 }
 0xecc   : > { %v3480_v25 = vsub.f32 %v3476_v17, %v3478_v16  ;;  %v3475_v26 = vmul.f32 0.020833334, %v3471_v18 }
 0xece   : > { %v3484_v27 = vadd.f32 1e-05, %v3480_v25  ;;  %v3479_v28 = vsub.f32 %v3475_v26, %v3477_v23  ;;  %v9062_v26 = vld [vmem:[%s9361_s21 + $0x20] sm:$0xff] }
 0xed0   : > { %8959 = vrsqrt.f32 %v3484_v27  ;;  %v3483_v29 = vadd.f32 1e-05, %v3479_v28  ;;  %v9063_v27 = vld [vmem:[%s9361_s21 + $0x18] sm:$0xff] }
 0xed2   : > { %8961 = vrsqrt.f32 %v3483_v29  ;;  %v9064_v29 = vld [vmem:[%s9361_s21 + $0x10] sm:$0xff] }
 0xedd   : > { %v8960_v52 = vpop.eup %8959 }
 0xede   : > { %v3488_v41 = vmul.f32 %v8960_v52, %v3482_v32  ;;  %v9065_v52 = vld [vmem:[%s9738_s15] ss:$0 sm:$0xff]  ;;  %s11019_s15 = sld [smem:[#allocation32_spill]] }
 0xedf   : > { %v8962_v44 = vpop.eup %8961 }
 0xee0   : > { %v3487_v30 = vmul.f32 %v8962_v44, %v3481_v38  ;;  %v3496_v56 = vmul.f32 %v7586_v33, %v3488_v41  ;;  %v9066_v38 = vld [vmem:[%s9361_s21 + $0x8] sm:$0xff]  ;;  %v9067_v44 = vld [vmem:[%s9361_s21] sm:$0xff] }
 0xee2   : > { %v3495_v54 = vmul.f32 %v7586_v33, %v3487_v30  ;;  %v10110_v57 = vadd.f32 %v7587_v47, %v3496_v56  ;;  %v9068_v30 = vld [vmem:[%s9749_s11] ss:$0 sm:$0xff]  ;;  %s11020_s11 = sld [smem:[#allocation33_spill]] }
 0xee4   : > { %v10112_v58 = vadd.f32 %v7587_v47, %v3495_v54  ;;  %v3510_v59 = vmul.f32 %v3508_v49, %v10110_v57 }
 0xee6   : > { %v3509_v60 = vmul.f32 %v3508_v49, %v10112_v58  ;;  %v3516_v19 = vadd.f32 %v3514_v53, %v3510_v59  ;;  %v7596_v59 = vld [vmem:[%s9351_s13 + $0x10] sm:$0xff] }
 0xee8   : > { %v3515_v61 = vadd.f32 %v3514_v53, %v3509_v60 }
 0xeea   : > { %8281 = vmatprep.mubr.msk.f32.mxu0 %vm1394_vm6, %v3515_v61 }
 0xeeb   : > { %8282 = vmatmul.mubr.msk.f32.vlgmr.msra.gmra.mxu0 %vm1394_vm6, %v3516_v19  ;;  %v7598_v19 = vld [vmem:[%s11009_s24 + $0x10] sm:$0xff] }
 0xeec   : > { %8300 = vmatpush3.msra.mxu0 %v9041_v36  ;;  %8311 = vmatprep.mubr.msk.f32.mxu0 %vm1394_vm6, %v3765_v39  ;;  %v9055_v36 = vld [vmem:[%s9726_s17 + $0x28] sm:$0xff]  ;;  %v9057_v39 = vld [vmem:[%s9726_s17 + $0x18] sm:$0xff] }
 0xeed   : > { %8301 = vmatprep.subr.mxu0 %v9043_v62 }
 0xeee   : > { %8302 = vmatpush3.msra.mxu0 %v9043_v62 }
 0xeef   : > { %8303 = vmatprep.subr.mxu0 %v9044_v63 }
 0xef0   : > { %8304 = vmatpush3.msra.mxu0 %v9044_v63 }
 0xef1   : > { %8305 = vmatprep.subr.mxu0 %v9045_v0 }
 0xef2   : > { %8306 = vmatpush3.msra.mxu0 %v9045_v0 }
 0xef3   : > { %8307 = vmatprep.subr.mxu0 %v9046_v1 }
 0xef4   : > { %8308 = vmatpush3.msra.mxu0 %v9046_v1 }
 0xef5   : > { %8309 = vmatprep.subr.mxu0 %v9047_v2 }
 0xef6   : > { %8310 = vmatpush3.msra.mxu0 %v9047_v2  ;;  %v7599_v2 = vld [vmem:[%s11009_s24 + $0x18] sm:$0xf] }
 0xef7   : > { %8329 = vmatprep.subr.mxu0 %v9048_v3  ;;  %8312 = vmatmul.mubr.msk.f32.vlgmr.msra.gmra.mxu0 %vm1394_vm6, %v9701_v43  ;;  %v9053_v43 = vld [vmem:[%s9705_s23] sm:$0xff]  ;;  %s11018_s23 = sld [smem:[#allocation31_spill]] }
 0xef8   : > { %8330 = vmatpush3.msra.mxu0 %v9048_v3  ;;  %8341 = vmatprep.mubr.msk.f32.mxu0 %vm1394_vm6, %v10078_v45 }
 0xef9   : > { %8331 = vmatprep.subr.mxu0 %v9049_v4 }
 0xefa   : > { %8332 = vmatpush3.msra.mxu0 %v9049_v4 }
 0xefb   : > { %8333 = vmatprep.subr.mxu0 %v9050_v22 }
 0xefc   : > { %8334 = vmatpush3.msra.mxu0 %v9050_v22  ;;  %v7597_v22 = vld [vmem:[%s9351_s13 + $0x18] sm:$0xf] }
 0xefd   : > { %8335 = vmatprep.subr.mxu0 %v9051_v5  ;;  %s1314_s17 = scalar_lea.vmem %s11018_s23, %s9539_s0 }
 0xefe   : > { %8336 = vmatpush3.msra.mxu0 %v9051_v5 }
 0xeff   : > { %8337 = vmatprep.subr.mxu0 %v9052_v6 }
 0xf00   : > { %8338 = vmatpush3.msra.mxu0 %v9052_v6 }
 0xf01   : > { %8339 = vmatprep.subr.mxu0 %v9053_v43 }
 0xf02   : > { %8340 = vmatpush3.msra.mxu0 %v9053_v43 }
 0xf03   : > { %8342 = vmatmul.mubr.msk.f32.vlgmr.msra.gmra.mxu0 %vm1394_vm6, %v9054_v7  ;;  %8359 = vmatprep.subr.mxu0 %v9055_v36 }
 0xf04   : > { %8360 = vmatpush3.msra.mxu0 %v9055_v36  ;;  %8371 = vmatprep.mubr.msk.f32.mxu0 %vm1394_vm6, %v10078_v45  ;;  %v10145_v45 = vld [vmem:[%s10085_s18 + $0x10] sm:$0xff] }
 0xf05   : > { %8361 = vmatprep.subr.mxu0 %v9056_v8  ;;  %8290 = vmatprep.subr.mxu1 %v10145_v45 }
 0xf06   : > { %8362 = vmatpush3.msra.mxu0 %v9056_v8  ;;  %8291 = vmatpush3.msra.mxu1 %v10145_v45 }
 0xf07   : > { %8363 = vmatprep.subr.mxu0 %v9057_v39  ;;  %8292 = vmatprep.subr.mxu1 %v10150_v13 }
 0xf08   : > { %8364 = vmatpush3.msra.mxu0 %v9057_v39  ;;  %8293 = vmatpush3.msra.mxu1 %v10150_v13 }
 0xf09   : > { %8365 = vmatprep.subr.mxu0 %v9058_v48  ;;  %8294 = vmatprep.subr.mxu1 %v10155_v35 }
 0xf0a   : > { %8366 = vmatpush3.msra.mxu0 %v9058_v48  ;;  %8295 = vmatpush3.msra.mxu1 %v10155_v35 }
 0xf0b   : > { %8367 = vmatprep.subr.mxu0 %v9059_v12  ;;  %8314 = vmatprep.subr.mxu1 %v9061_v14 }
 0xf0c   : > { %8368 = vmatpush3.msra.mxu0 %v9059_v12 }
 0xf0d   : > { %8369 = vmatprep.subr.mxu0 %v9060_v40 }
 0xf0e   : > { %8370 = vmatpush3.msra.mxu0 %v9060_v40 }
 0xf0f   : > { %8372 = vmatmul.mubr.msk.f32.vlgmr.msra.gmra.mxu0 %vm1394_vm6, %v9054_v7 }
 0xfab   : > { %v8283_v15 = vpop.f32.mrf.mxu0 }
 0xfac   : > { %v3601_v16 = vadd.f32 %v8283_v15, %v7588_v37 }
 0xfad   : > { %v3595_v17 = vpop.f32.mrf.mxu0 }
 0xfae   : > { %v3596_v18 = vadd.f32 %v7588_v37, %v3595_v17  ;;  %v3605_v25 = vmax.f32 %v3601_v16, 0.0  ;;  %v9069_v37 = vld [vmem:[%s9835_s10] ss:$0 sm:$0xff]  ;;  %s1316_s10 = scalar_lea.vmem %s11019_s15, %s9539_s0 }
 0xfb0   : > { %v3604_v23 = vmax.f32 %v3596_v18, 0.0 }
 0xfb2   : > { %8296 = vmatprep.mubr.msk.f32.mxu1 %vm1394_vm6, %v3604_v23 }
 0xfb3   : > { %8297 = vmatmul.mubr.msk.f32.vlgmr.msra.gmra.mxu1 %vm1394_vm6, %v3605_v25 }
 0xfb4   : > { %8315 = vmatpush3.msra.mxu1 %v9061_v14 }
 0xfb5   : > { %8316 = vmatprep.subr.mxu1 %v9062_v26 }
 0xfb6   : > { %8317 = vmatpush3.msra.mxu1 %v9062_v26 }
 0xfb7   : > { %8318 = vmatprep.subr.mxu1 %v9063_v27  ;;  %v8313_v28 = vpop.f32.mrf.mxu0 }
 0xfb8   : > { %8319 = vmatpush3.msra.mxu1 %v9063_v27  ;;  %v3845_v41 = vadd.f32 %v9065_v52, %v8313_v28 }
 0xfb9   : > { %8320 = vmatprep.subr.mxu1 %v9064_v29  ;;  %v3839_v32 = vpop.f32.mrf.mxu0 }
 0xfba   : > { %v3840_v33 = vadd.f32 %v9065_v52, %v3839_v32  ;;  %8321 = vmatpush3.msra.mxu1 %v9064_v29  ;;  %v3849_v7 = vmul.f32 %v7597_v22, %v3845_v41 }
 0xfbb   : > { %8322 = vmatprep.subr.mxu1 %v9066_v38 }
 0xfbc   : > { %8323 = vmatpush3.msra.mxu1 %v9066_v38  ;;  %8326 = vmatprep.mubr.msk.f32.mxu1 %vm1394_vm6, %v3840_v33  ;;  %v3848_v62 = vmul.f32 %v7596_v59, %v3840_v33 }
 0xfbd   : > { %8324 = vmatprep.subr.mxu1 %v9067_v44 }
 0xfbe   : > { %8325 = vmatpush3.msra.mxu1 %v9067_v44 }
 0xfbf   : > { %8327 = vmatmul.mubr.msk.f32.vlgmr.msra.gmra.mxu1 %vm1394_vm6, %v3845_v41  ;;  %8344 = vmatprep.subr.mxu1 %v9061_v14 }
 0xfc0   : > { %8345 = vmatpush3.msra.mxu1 %v9061_v14 }
 0xfc1   : > { %8346 = vmatprep.subr.mxu1 %v9062_v26 }
 0xfc2   : > { %8347 = vmatpush3.msra.mxu1 %v9062_v26 }
 0xfc3   : > { %v8343_v47 = vpop.f32.mrf.mxu0  ;;  %8348 = vmatprep.subr.mxu1 %v9063_v27 }
 0xfc4   : > { %8349 = vmatpush3.msra.mxu1 %v9063_v27  ;;  %v4015_v50 = vadd.f32 %v9068_v30, %v8343_v47 }
 0xfc5   : > { %v4009_v49 = vpop.f32.mrf.mxu0  ;;  %8350 = vmatprep.subr.mxu1 %v9064_v29 }
 0xfc6   : > { %v4010_v56 = vadd.f32 %v9068_v30, %v4009_v49  ;;  %8351 = vmatpush3.msra.mxu1 %v9064_v29  ;;  %v4019_v36 = vmul.f32 %v7597_v22, %v4015_v50 }
 0xfc7   : > { %8352 = vmatprep.subr.mxu1 %v9066_v38 }
 0xfc8   : > { %8353 = vmatpush3.msra.mxu1 %v9066_v38  ;;  %8356 = vmatprep.mubr.msk.f32.mxu1 %vm1394_vm6, %v4010_v56  ;;  %v4018_v39 = vmul.f32 %v7596_v59, %v4010_v56 }
 0xfc9   : > { %8354 = vmatprep.subr.mxu1 %v9067_v44 }
 0xfca   : > { %8355 = vmatpush3.msra.mxu1 %v9067_v44 }
 0xfcb   : > { %8357 = vmatmul.mubr.msk.f32.vlgmr.msra.gmra.mxu1 %vm1394_vm6, %v4015_v50 }
 0xfcf   : > { %v8373_v6 = vpop.f32.mrf.mxu0 }
 0xfd0   : > { %v10197_v15 = vadd.f32 %v9069_v37, %v8373_v6 }
 0xfd1   : > { %v4171_v16 = vpop.f32.mrf.mxu0 }
 0xfd2   : > { %v10209_v18 = vadd.f32 %v9069_v37, %v4171_v16  ;;  %v4399_v25 = vmul.f32 %v9807_v42, %v10197_v15  ;;  %v4292_v26 = vmul.f32 %v9780_v24, %v10197_v15  ;;  %v10239_v52 = vmul.f32 %v9826_v46, %v10197_v15 }
 0xfd4   : > { %v4398_v27 = vmul.f32 %v9807_v42, %v10209_v18  ;;  %v4291_v32 = vmul.f32 %v9780_v24, %v10209_v18 }
0x1073   : > { %v10178_v53 = vpop.f32.mrf.mxu1 }
0x1075   : > { %v10180_v54 = vpop.f32.mrf.mxu1 }
0x107f   : > { %v8328_v60 = vpop.f32.mrf.mxu1 }
0x1080   : > { %v3932_v5 = vmul.f32 %v8328_v60, %v7599_v2 }
0x1081   : > { %v3922_v61 = vpop.f32.mrf.mxu1 }
0x1082   : > { %v3931_v63 = vmul.f32 %v7598_v19, %v3922_v61  ;;  %v3934_v12 = vadd.f32 %v3932_v5, %v3849_v7  ;;  %v4867_v7 = vmul.f32 %v9765_v9, %v10197_v15 }
0x1084   : > { %v3933_v0 = vadd.f32 %v3931_v63, %v3848_v62  ;;  %v10211_v23 = vmul.f32 0.4082483, %v3934_v12 }
0x1086   : > { %v10184_v1 = vmul.f32 0.4082483, %v3933_v0  ;;  %v4181_v28 = vmul.f32 %v9780_v24, %v10211_v23  ;;  %v4294_v29 = vmul.f32 %v9807_v42, %v10211_v23 }
0x1088   : > { %v4180_v3 = vmul.f32 %v9780_v24, %v10184_v1  ;;  %v4293_v4 = vmul.f32 %v9807_v42, %v10184_v1 }
0x108a   : > { %8378 = vmatprep.mubr.msk.f32.mxu1 %vm1394_vm6, %v4180_v3  ;;  %8385 = vmatprep.mubr.msk.f32.mxu0 %vm1394_vm6, %v4293_v4 }
0x108b   : > { %v8358_v43 = vpop.f32.mrf.mxu1 }
0x108c   : > { %v4102_v8 = vmul.f32 %v8358_v43, %v7599_v2  ;;  %v4568_v43 = vmul.f32 %v9826_v46, %v10184_v1 }
0x108d   : > { %v4092_v48 = vpop.f32.mrf.mxu1 }
0x108e   : > { %v10194_v40 = vadd.f32 %v4102_v8, %v4019_v36  ;;  %v4101_v14 = vmul.f32 %v7598_v19, %v4092_v48  ;;  %v4569_v36 = vmul.f32 %v9826_v46, %v10211_v23  ;;  %v4866_v8 = vmul.f32 %v9765_v9, %v10209_v18 }
0x1090   : > { %v10199_v17 = vadd.f32 %v4101_v14, %v4018_v39  ;;  %8374 = vmatprep.subr.msk.mxu1 %vm1394_vm6, %v10194_v40  ;;  %8381 = vmatprep.subr.msk.mxu0 %vm1394_vm6, %v10194_v40 }
0x1091   : > { %8375 = vmatpush3.xpose.msk.msra.mxu1 %vm1394_vm6, %v10194_v40  ;;  %8382 = vmatpush3.xpose.msk.msra.mxu0 %vm1394_vm6, %v10194_v40 }
0x1092   : > { %8376 = vmatprep.subr.msk.mxu1 %vm1394_vm6, %v10199_v17  ;;  %8383 = vmatprep.subr.msk.mxu0 %vm1394_vm6, %v10199_v17 }
0x1095   : > { %8377 = vmatpush3.xpose.msk.msra.mxu1 %vm1394_vm6, %v10199_v17  ;;  %8384 = vmatpush3.xpose.msk.msra.mxu0 %vm1394_vm6, %v10199_v17 }
0x1096   : > { %8388 = vmatprep.subr.msk.mxu1 %vm2048_vm14, %v4399_v25  ;;  %8395 = vmatprep.subr.msk.mxu0 %vm2048_vm14, %v4292_v26 }
0x1098   : > { %8379 = vmatmul.mubr.msk.f32.vlgmr.msra.gmra.mxu1 %vm1394_vm6, %v4181_v28  ;;  %8386 = vmatmul.mubr.msk.f32.vlgmr.msra.gmra.mxu0 %vm1394_vm6, %v4294_v29 }
0x1099   : > { %8389 = vmatpush3.msk.msra.mxu1 %vm2048_vm14, %v4399_v25  ;;  %8396 = vmatpush3.msk.msra.mxu0 %vm2048_vm14, %v4292_v26 }
0x109a   : > { %8390 = vmatprep.subr.mxu1 %v4398_v27  ;;  %8397 = vmatprep.subr.mxu0 %v4291_v32 }
0x109b   : > { %8391 = vmatpush3.msra.mxu1 %v4398_v27  ;;  %8398 = vmatpush3.msra.mxu0 %v4291_v32 }
0x109c   : > { %8402 = vmatprep.subr.msk.mxu1 %vm1394_vm6, %v10194_v40  ;;  %8409 = vmatprep.subr.msk.mxu0 %vm2048_vm14, %v10239_v52 }
0x1158   : > { %v8387_v24 = vpop.f32.mrf.mxu0  ;;  %v8380_v59 = vpop.f32.mrf.mxu1 }
0x1159   : > { %v4379_v42 = vsel %vm1913_vm0, %v8387_v24, -inf  ;;  %v4272_v63 = vsel %vm1913_vm0, %v8380_v59, -inf }
0x115a   : > { %4380 = vmax.xlane.f32.xlu1 %v4379_v42  ;;  %v4367_v33 = vpop.f32.mrf.mxu0  ;;  %v4260_v62 = vpop.f32.mrf.mxu1 }
0x115b   : > { %v4376_v38 = vsel %vm1909_vm15, %v4367_v33, -inf  ;;  %v4269_v0 = vsel %vm1909_vm15, %v4260_v62, -inf }
0x115c   : > { %4377 = vmax.xlane.f32.xlu0 %v4376_v38 }
0x11e3   : > { %v4381_v41 = vpop.xlane.xlu1 %4380 }
0x11e4   : > { %v4383_v44 = vsub.f32 %v8387_v24, %v4381_v41 }
0x11e5   : > { %v4378_v47 = vpop.xlane.xlu0 %4377 }
0x11e6   : > { %v4386_v49 = vmul.f32 1.442695, %v4383_v44  ;;  %v4382_v30 = vsub.f32 %v4367_v33, %v4378_v47 }
0x11e8   : > { %8963 = vpow2.f32 %v4386_v49  ;;  %v4384_v56 = vmul.f32 1.442695, %v4382_v30 }
0x11ea   : > { %8965 = vpow2.f32 %v4384_v56 }
0x11f5   : > { %v8964_v50 = vpop.eup %8963 }
0x11f6   : > { %v4391_v60 = vsel %vm1913_vm0, %v8964_v50, 0.0 }
0x11f7   : > { %v8966_v19 = vpop.eup %8965  ;;  %4392 = vadd.xlane.f32.xlu1 %v4391_v60 }
0x11f8   : > { %v4388_v61 = vsel %vm1909_vm15, %v8966_v19, 0.0 }
0x11f9   : > { %4389 = vadd.xlane.f32.xlu0 %v4388_v61 }
0x11fb   : > { %4273 = vmax.xlane.f32.xlu1 %v4272_v63 }
0x11fd   : > { %4270 = vmax.xlane.f32.xlu0 %v4269_v0 }
0x1280   : > { %v4393_v2 = vpop.xlane.xlu1 %4392 }
0x1281   : > { %8967 = vrcp.f32 %v4393_v2 }
0x1282   : > { %v4390_v3 = vpop.xlane.xlu0 %4389 }
0x1283   : > { %8969 = vrcp.f32 %v4390_v3 }
0x1284   : > { %v4274_v39 = vpop.xlane.xlu1 %4273 }
0x1285   : > { %v4276_v12 = vsub.f32 %v8380_v59, %v4274_v39  ;;  %v5059_v39 = vmul.f32 %v9852_v51, %v10209_v18 }
0x1286   : > { %v4271_v48 = vpop.xlane.xlu0 %4270 }
0x1287   : > { %v4275_v14 = vsub.f32 %v4260_v62, %v4271_v48  ;;  %v4279_v37 = vmul.f32 1.442695, %v4276_v12 }
0x1289   : > { %v4277_v16 = vmul.f32 1.442695, %v4275_v14  ;;  %8971 = vpow2.f32 %v4279_v37 }
0x128b   : > { %8973 = vpow2.f32 %v4277_v16 }
0x128e   : > { %v8968_v4 = vpop.eup %8967 }
0x128f   : > { %v4397_v6 = vmul.f32 %v8968_v4, %v8964_v50  ;;  %v4673_v4 = vmul.f32 %v9826_v46, %v10209_v18  ;;  %v4761_v46 = vmul.f32 %v9765_v9, %v10184_v1 }
0x1290   : > { %v8970_v22 = vpop.eup %8969 }
0x1291   : > { %v4396_v5 = vmul.f32 %v8970_v22, %v8966_v19 }
0x1293   : > { %8392 = vmatprep.mubr.msk.f32.mxu1 %vm1909_vm15, %v4396_v5 }
0x1294   : > { %8393 = vmatmul.mubr.msk.f32.vlgmr.msra.gmra.mxu1 %vm1909_vm15, %v4397_v6 }
0x1295   : > { %8403 = vmatpush3.xpose.msk.msra.mxu1 %vm1394_vm6, %v10194_v40  ;;  %8406 = vmatprep.mubr.msk.f32.mxu1 %vm1394_vm6, %v4568_v43 }
0x1296   : > { %8404 = vmatprep.subr.msk.mxu1 %vm1394_vm6, %v10199_v17  ;;  %v8972_v29 = vpop.eup %8971 }
0x1297   : > { %v4284_v33 = vsel %vm1913_vm0, %v8972_v29, 0.0 }
0x1298   : > { %v8974_v42 = vpop.eup %8973 }
0x1299   : > { %8405 = vmatpush3.xpose.msk.msra.mxu1 %vm1394_vm6, %v10199_v17  ;;  %v4281_v38 = vsel %vm1909_vm15, %v8974_v42, 0.0 }
0x129a   : > { %8423 = vmatprep.subr.msk.mxu1 %vm2048_vm14, %v4867_v7 }
0x129c   : > { %8407 = vmatmul.mubr.msk.f32.vlgmr.msra.gmra.mxu1 %vm1394_vm6, %v4569_v36 }
0x129d   : > { %8424 = vmatpush3.msk.msra.mxu1 %vm2048_vm14, %v4867_v7 }
0x129e   : > { %8425 = vmatprep.subr.mxu1 %v4866_v8 }
0x129f   : > { %8426 = vmatpush3.msra.mxu1 %v4866_v8  ;;  %v4762_v8 = vmul.f32 %v9765_v9, %v10211_v23 }
0x12a0   : > { %8430 = vmatprep.subr.msk.mxu1 %vm1394_vm6, %v10194_v40 }
0x1354   : > { %v10275_v25 = vpop.f32.mrf.mxu1 }
0x1356   : > { %v10277_v26 = vpop.f32.mrf.mxu1 }
0x135c   : > { %v8408_v27 = vpop.f32.mrf.mxu1 }
0x135d   : > { %v4654_v28 = vsel %vm1913_vm0, %v8408_v27, -inf }
0x135e   : > { %4655 = vmax.xlane.f32.xlu1 %v4654_v28  ;;  %v4642_v32 = vpop.f32.mrf.mxu1 }
0x135f   : > { %v4651_v24 = vsel %vm1909_vm15, %v4642_v32, -inf }
0x1360   : > { %4652 = vmax.xlane.f32.xlu0 %v4651_v24 }
0x1362   : > { %4285 = vadd.xlane.f32.xlu1 %v4284_v33 }
0x1364   : > { %4282 = vadd.xlane.f32.xlu0 %v4281_v38 }
0x13e7   : > { %v4656_v41 = vpop.xlane.xlu1 %4655 }
0x13e8   : > { %v4658_v44 = vsub.f32 %v8408_v27, %v4656_v41 }
0x13e9   : > { %v4653_v47 = vpop.xlane.xlu0 %4652 }
0x13ea   : > { %v4661_v49 = vmul.f32 1.442695, %v4658_v44  ;;  %v4657_v30 = vsub.f32 %v4642_v32, %v4653_v47 }
0x13eb   : > { %v4286_v56 = vpop.xlane.xlu1 %4285 }
0x13ec   : > { %8975 = vpow2.f32 %v4661_v49  ;;  %v4659_v50 = vmul.f32 1.442695, %v4657_v30 }
0x13ed   : > { %8977 = vrcp.f32 %v4286_v56  ;;  %v4283_v59 = vpop.xlane.xlu0 %4282 }
0x13ee   : > { %8979 = vpow2.f32 %v4659_v50 }
0x13ef   : > { %8981 = vrcp.f32 %v4283_v59 }
0x13f9   : > { %v8976_v60 = vpop.eup %8975 }
0x13fa   : > { %v8978_v19 = vpop.eup %8977  ;;  %v4666_v61 = vsel %vm1913_vm0, %v8976_v60, 0.0 }
0x13fb   : > { %v8980_v62 = vpop.eup %8979  ;;  %4667 = vadd.xlane.f32.xlu1 %v4666_v61  ;;  %v4290_v3 = vmul.f32 %v8978_v19, %v8972_v29 }
0x13fc   : > { %v8982_v63 = vpop.eup %8981  ;;  %v4663_v0 = vsel %vm1909_vm15, %v8980_v62, 0.0 }
0x13fd   : > { %4664 = vadd.xlane.f32.xlu0 %v4663_v0  ;;  %v4289_v2 = vmul.f32 %v8982_v63, %v8974_v42  ;;  %v5253_v63 = vmul.f32 %v9863_v55, %v10197_v15  ;;  %v4955_v0 = vmul.f32 %v9852_v51, %v10211_v23 }
0x13ff   : > { %8399 = vmatprep.mubr.msk.f32.mxu0 %vm1909_vm15, %v4289_v2  ;;  %v5252_v2 = vmul.f32 %v9863_v55, %v10209_v18 }
0x1400   : > { %8400 = vmatmul.mubr.msk.f32.vlgmr.msra.gmra.mxu0 %vm1909_vm15, %v4290_v3 }
0x1401   : > { %8410 = vmatpush3.msk.msra.mxu0 %vm2048_vm14, %v10239_v52  ;;  %v5060_v52 = vmul.f32 %v9852_v51, %v10197_v15 }
0x1402   : > { %8411 = vmatprep.subr.mxu0 %v4673_v4 }
0x1403   : > { %8412 = vmatpush3.msra.mxu0 %v4673_v4 }
0x1404   : > { %8416 = vmatprep.subr.msk.mxu0 %vm1394_vm6, %v10194_v40 }
0x1484   : > { %v4668_v22 = vpop.xlane.xlu1 %4667 }
0x1485   : > { %8983 = vrcp.f32 %v4668_v22 }
0x1486   : > { %v4665_v5 = vpop.xlane.xlu0 %4664 }
0x1487   : > { %8985 = vrcp.f32 %v4665_v5 }
0x1492   : > { %v8984_v6 = vpop.eup %8983 }
0x1493   : > { %v4672_v36 = vmul.f32 %v8984_v6, %v8976_v60 }
0x1494   : > { %v8986_v43 = vpop.eup %8985 }
0x1495   : > { %v4671_v7 = vmul.f32 %v8986_v43, %v8980_v62  ;;  %v4954_v62 = vmul.f32 %v9852_v51, %v10184_v1 }
0x1497   : > { %8413 = vmatprep.mubr.msk.f32.mxu0 %vm1909_vm15, %v4671_v7 }
0x1498   : > { %8414 = vmatmul.mubr.msk.f32.vlgmr.msra.gmra.mxu0 %vm1909_vm15, %v4672_v36 }
0x1499   : > { %8417 = vmatpush3.xpose.msk.msra.mxu0 %vm1394_vm6, %v10194_v40  ;;  %8420 = vmatprep.mubr.msk.f32.mxu0 %vm1394_vm6, %v4761_v46 }
0x149a   : > { %8418 = vmatprep.subr.msk.mxu0 %vm1394_vm6, %v10199_v17 }
0x149d   : > { %8419 = vmatpush3.xpose.msk.msra.mxu0 %vm1394_vm6, %v10199_v17 }
0x149e   : > { %8437 = vmatprep.subr.msk.mxu0 %vm2048_vm14, %v5060_v52 }
0x14a0   : > { %8421 = vmatmul.mubr.msk.f32.vlgmr.msra.gmra.mxu0 %vm1394_vm6, %v4762_v8 }
0x14a1   : > { %8438 = vmatpush3.msk.msra.mxu0 %vm2048_vm14, %v5060_v52 }
0x14a2   : > { %8439 = vmatprep.subr.mxu0 %v5059_v39 }
0x14a3   : > { %8440 = vmatpush3.msra.mxu0 %v5059_v39 }
0x14a4   : > { %8444 = vmatprep.subr.msk.mxu0 %vm1394_vm6, %v10194_v40 }
0x14c0   : > { %v8401_v48 = vpop.f32.mrf.mxu0 }
0x14c1   : > { %v4565_v14 = vadd.f32 %v8401_v48, %v10275_v25 }
0x14c2   : > { %v4559_v12 = vpop.f32.mrf.mxu0 }
0x14c3   : > { %v4560_v3 = vadd.f32 %v4559_v12, %v10277_v26 }
0x1558   : > { %v8415_v37 = vpop.f32.mrf.mxu0 }
0x1559   : > { %v4760_v16 = vadd.f32 %v8415_v37, %v4565_v14 }
0x155a   : > { %v4750_v27 = vpop.f32.mrf.mxu0 }
0x155b   : > { %v4759_v22 = vadd.f32 %v4750_v27, %v4560_v3 }
0x1560   : > { %v8422_v9 = vpop.f32.mrf.mxu0 }
0x1561   : > { %v4847_v28 = vsel %vm1913_vm0, %v8422_v9, -inf }
0x1562   : > { %4848 = vmax.xlane.f32.xlu1 %v4847_v28  ;;  %v4835_v29 = vpop.f32.mrf.mxu0 }
0x1563   : > { %v4844_v32 = vsel %vm1909_vm15, %v4835_v29, -inf }
0x1564   : > { %4845 = vmax.xlane.f32.xlu0 %v4844_v32 }
0x15eb   : > { %v4849_v24 = vpop.xlane.xlu1 %4848 }
0x15ec   : > { %v4851_v42 = vsub.f32 %v8422_v9, %v4849_v24 }
0x15ed   : > { %v4846_v33 = vpop.xlane.xlu0 %4845 }
0x15ee   : > { %v4854_v38 = vmul.f32 1.442695, %v4851_v42  ;;  %v4850_v41 = vsub.f32 %v4835_v29, %v4846_v33  ;;  %v5147_v33 = vmul.f32 %v9863_v55, %v10184_v1 }
0x15f0   : > { %8987 = vpow2.f32 %v4854_v38  ;;  %v4852_v44 = vmul.f32 1.442695, %v4850_v41  ;;  %v5446_v38 = vmul.f32 %v9768_v10, %v10197_v15  ;;  %v5148_v41 = vmul.f32 %v9863_v55, %v10211_v23 }
0x15f2   : > { %8989 = vpow2.f32 %v4852_v44  ;;  %v5445_v44 = vmul.f32 %v9768_v10, %v10209_v18 }
0x15fd   : > { %v8988_v25 = vpop.eup %8987 }
0x15fe   : > { %v4859_v47 = vsel %vm1913_vm0, %v8988_v25, 0.0 }
0x15ff   : > { %v8990_v49 = vpop.eup %8989  ;;  %4860 = vadd.xlane.f32.xlu1 %v4859_v47 }
0x1600   : > { %v4856_v30 = vsel %vm1909_vm15, %v8990_v49, 0.0 }
0x1601   : > { %4857 = vadd.xlane.f32.xlu0 %v4856_v30 }
0x1688   : > { %v4861_v56 = vpop.xlane.xlu1 %4860 }
0x1689   : > { %8991 = vrcp.f32 %v4861_v56 }
0x168a   : > { %v4858_v50 = vpop.xlane.xlu0 %4857 }
0x168b   : > { %8993 = vrcp.f32 %v4858_v50 }
0x1696   : > { %v8992_v59 = vpop.eup %8991 }
0x1697   : > { %v4865_v61 = vmul.f32 %v8992_v59, %v8988_v25 }
0x1698   : > { %v8994_v60 = vpop.eup %8993 }
0x1699   : > { %v4864_v19 = vmul.f32 %v8994_v60, %v8990_v49 }
0x169b   : > { %8427 = vmatprep.mubr.msk.f32.mxu1 %vm1909_vm15, %v4864_v19 }
0x169c   : > { %8428 = vmatmul.mubr.msk.f32.vlgmr.msra.gmra.mxu1 %vm1909_vm15, %v4865_v61 }
0x169d   : > { %8431 = vmatpush3.xpose.msk.msra.mxu1 %vm1394_vm6, %v10194_v40  ;;  %8434 = vmatprep.mubr.msk.f32.mxu1 %vm1394_vm6, %v4954_v62 }
0x169e   : > { %8432 = vmatprep.subr.msk.mxu1 %vm1394_vm6, %v10199_v17 }
0x16a1   : > { %8433 = vmatpush3.xpose.msk.msra.mxu1 %vm1394_vm6, %v10199_v17 }
0x16a2   : > { %8451 = vmatprep.subr.msk.mxu1 %vm2048_vm14, %v5253_v63 }
0x16a4   : > { %8435 = vmatmul.mubr.msk.f32.vlgmr.msra.gmra.mxu1 %vm1394_vm6, %v4955_v0 }
0x16a5   : > { %8452 = vmatpush3.msk.msra.mxu1 %vm2048_vm14, %v5253_v63 }
0x16a6   : > { %8453 = vmatprep.subr.mxu1 %v5252_v2 }
0x16a7   : > { %8454 = vmatpush3.msra.mxu1 %v5252_v2 }
0x16a8   : > { %8458 = vmatprep.subr.msk.mxu1 %vm1394_vm6, %v10194_v40 }
0x175c   : > { %v8429_v4 = vpop.f32.mrf.mxu1 }
0x175d   : > { %v4953_v5 = vadd.f32 %v8429_v4, %v4760_v16 }
0x175e   : > { %v4943_v6 = vpop.f32.mrf.mxu1 }
0x175f   : > { %v4952_v43 = vadd.f32 %v4943_v6, %v4759_v22 }
0x1764   : > { %v8436_v51 = vpop.f32.mrf.mxu1 }
0x1765   : > { %v5040_v7 = vsel %vm1913_vm0, %v8436_v51, -inf }
0x1766   : > { %5041 = vmax.xlane.f32.xlu1 %v5040_v7  ;;  %v5028_v36 = vpop.f32.mrf.mxu1 }
0x1767   : > { %v5037_v46 = vsel %vm1909_vm15, %v5028_v36, -inf }
0x1768   : > { %5038 = vmax.xlane.f32.xlu0 %v5037_v46  ;;  %v5340_v46 = vmul.f32 %v9768_v10, %v10184_v1 }
0x17ef   : > { %v5042_v52 = vpop.xlane.xlu1 %5041 }
0x17f0   : > { %v5044_v8 = vsub.f32 %v8436_v51, %v5042_v52  ;;  %v5639_v52 = vmul.f32 %v9771_v11, %v10197_v15 }
0x17f1   : > { %v5039_v39 = vpop.xlane.xlu0 %5038 }
0x17f2   : > { %v5047_v48 = vmul.f32 1.442695, %v5044_v8  ;;  %v5043_v14 = vsub.f32 %v5028_v36, %v5039_v39  ;;  %v5341_v8 = vmul.f32 %v9768_v10, %v10211_v23  ;;  %v5638_v39 = vmul.f32 %v9771_v11, %v10209_v18 }
0x17f4   : > { %8995 = vpow2.f32 %v5047_v48  ;;  %v5045_v26 = vmul.f32 1.442695, %v5043_v14  ;;  %v10394_v48 = vld [vmem:[%s10036_s26 + $0x28] sm:$0xff] }
0x17f6   : > { %8997 = vpow2.f32 %v5045_v26 }
0x1801   : > { %v8996_v12 = vpop.eup %8995 }
0x1802   : > { %v5052_v37 = vsel %vm1913_vm0, %v8996_v12, 0.0 }
0x1803   : > { %v8998_v16 = vpop.eup %8997  ;;  %5053 = vadd.xlane.f32.xlu1 %v5052_v37 }
0x1804   : > { %v5049_v27 = vsel %vm1909_vm15, %v8998_v16, 0.0 }
0x1805   : > { %5050 = vadd.xlane.f32.xlu0 %v5049_v27 }
0x188c   : > { %v5054_v9 = vpop.xlane.xlu1 %5053 }
0x188d   : > { %8999 = vrcp.f32 %v5054_v9 }
0x188e   : > { %v5051_v28 = vpop.xlane.xlu0 %5050 }
0x188f   : > { %9001 = vrcp.f32 %v5051_v28 }
0x189a   : > { %v9000_v29 = vpop.eup %8999 }
0x189b   : > { %v5058_v42 = vmul.f32 %v9000_v29, %v8996_v12 }
0x189c   : > { %v9002_v32 = vpop.eup %9001 }
0x189d   : > { %v5057_v24 = vmul.f32 %v9002_v32, %v8998_v16 }
0x189f   : > { %8441 = vmatprep.mubr.msk.f32.mxu0 %vm1909_vm15, %v5057_v24 }
0x18a0   : > { %8442 = vmatmul.mubr.msk.f32.vlgmr.msra.gmra.mxu0 %vm1909_vm15, %v5058_v42 }
0x18a1   : > { %8445 = vmatpush3.xpose.msk.msra.mxu0 %vm1394_vm6, %v10194_v40  ;;  %8448 = vmatprep.mubr.msk.f32.mxu0 %vm1394_vm6, %v5147_v33 }
0x18a2   : > { %8446 = vmatprep.subr.msk.mxu0 %vm1394_vm6, %v10199_v17 }
0x18a5   : > { %8447 = vmatpush3.xpose.msk.msra.mxu0 %vm1394_vm6, %v10199_v17 }
0x18a6   : > { %8465 = vmatprep.subr.msk.mxu0 %vm2048_vm14, %v5446_v38 }
0x18a8   : > { %8449 = vmatmul.mubr.msk.f32.vlgmr.msra.gmra.mxu0 %vm1394_vm6, %v5148_v41 }
0x18a9   : > { %8466 = vmatpush3.msk.msra.mxu0 %vm2048_vm14, %v5446_v38 }
0x18aa   : > { %8467 = vmatprep.subr.mxu0 %v5445_v44 }
0x18ab   : > { %8468 = vmatpush3.msra.mxu0 %v5445_v44 }
0x18ac   : > { %8472 = vmatprep.subr.msk.mxu0 %vm1394_vm6, %v10194_v40 }
0x1960   : > { %v8443_v25 = vpop.f32.mrf.mxu0 }
0x1961   : > { %v5146_v47 = vadd.f32 %v8443_v25, %v4953_v5 }
0x1962   : > { %v5136_v49 = vpop.f32.mrf.mxu0 }
0x1963   : > { %v5145_v30 = vadd.f32 %v5136_v49, %v4952_v43 }
0x1968   : > { %v8450_v56 = vpop.f32.mrf.mxu0 }
0x1969   : > { %v5233_v50 = vsel %vm1913_vm0, %v8450_v56, -inf }
0x196a   : > { %5234 = vmax.xlane.f32.xlu1 %v5233_v50  ;;  %v5221_v55 = vpop.f32.mrf.mxu0  ;;  %v5533_v50 = vmul.f32 %v9771_v11, %v10184_v1  ;;  %v9072_v1 = vld [vmem:[%s10069_s7 + $0x20] sm:$0xff] }
0x196b   : > { %v5230_v59 = vsel %vm1909_vm15, %v5221_v55, -inf }
0x196c   : > { %5231 = vmax.xlane.f32.xlu0 %v5230_v59  ;;  %v9071_v59 = vld [vmem:[%s10069_s7 + $0x28] sm:$0xff] }
0x19f3   : > { %v5235_v60 = vpop.xlane.xlu1 %5234 }
0x19f4   : > { %v5237_v19 = vsub.f32 %v8450_v56, %v5235_v60  ;;  %v9074_v60 = vld [vmem:[%s10069_s7 + $0x10] sm:$0xff] }
0x19f5   : > { %v5232_v61 = vpop.xlane.xlu0 %5231 }
0x19f6   : > { %v5240_v62 = vmul.f32 1.442695, %v5237_v19  ;;  %v5236_v63 = vsub.f32 %v5221_v55, %v5232_v61  ;;  %v5534_v55 = vmul.f32 %v9771_v11, %v10211_v23  ;;  %v9075_v19 = vld [vmem:[%s10069_s7 + $0x8] sm:$0xff] }
0x19f8   : > { %9003 = vpow2.f32 %v5240_v62  ;;  %v5238_v0 = vmul.f32 1.442695, %v5236_v63 }
0x19fa   : > { %9005 = vpow2.f32 %v5238_v0 }
0x1a05   : > { %v9004_v2 = vpop.eup %9003 }
0x1a06   : > { %v5245_v3 = vsel %vm1913_vm0, %v9004_v2, 0.0 }
0x1a07   : > { %v9006_v4 = vpop.eup %9005  ;;  %5246 = vadd.xlane.f32.xlu1 %v5245_v3 }
0x1a08   : > { %v5242_v22 = vsel %vm1909_vm15, %v9006_v4, 0.0 }
0x1a09   : > { %5243 = vadd.xlane.f32.xlu0 %v5242_v22 }
0x1a90   : > { %v5247_v5 = vpop.xlane.xlu1 %5246 }
0x1a91   : > { %9007 = vrcp.f32 %v5247_v5 }
0x1a92   : > { %v5244_v6 = vpop.xlane.xlu0 %5243 }
0x1a93   : > { %9009 = vrcp.f32 %v5244_v6 }
0x1a9e   : > { %v9008_v43 = vpop.eup %9007 }
0x1a9f   : > { %v5251_v36 = vmul.f32 %v9008_v43, %v9004_v2 }
0x1aa0   : > { %v9010_v51 = vpop.eup %9009 }
0x1aa1   : > { %v5250_v7 = vmul.f32 %v9010_v51, %v9006_v4 }
0x1aa3   : > { %8455 = vmatprep.mubr.msk.f32.mxu1 %vm1909_vm15, %v5250_v7 }
0x1aa4   : > { %8456 = vmatmul.mubr.msk.f32.vlgmr.msra.gmra.mxu1 %vm1909_vm15, %v5251_v36 }
0x1aa5   : > { %8459 = vmatpush3.xpose.msk.msra.mxu1 %vm1394_vm6, %v10194_v40  ;;  %8462 = vmatprep.mubr.msk.f32.mxu1 %vm1394_vm6, %v5340_v46 }
0x1aa6   : > { %8460 = vmatprep.subr.msk.mxu1 %vm1394_vm6, %v10199_v17 }
0x1aa9   : > { %8461 = vmatpush3.xpose.msk.msra.mxu1 %vm1394_vm6, %v10199_v17 }
0x1aaa   : > { %8479 = vmatprep.subr.msk.mxu1 %vm2048_vm14, %v5639_v52 }
0x1aac   : > { %8463 = vmatmul.mubr.msk.f32.vlgmr.msra.gmra.mxu1 %vm1394_vm6, %v5341_v8 }
0x1aad   : > { %8480 = vmatpush3.msk.msra.mxu1 %vm2048_vm14, %v5639_v52 }
0x1aae   : > { %8481 = vmatprep.subr.mxu1 %v5638_v39 }
0x1aaf   : > { %8482 = vmatpush3.msra.mxu1 %v5638_v39 }
0x1ab0   : > { %8486 = vmatprep.subr.mxu1 %v10394_v48 }
0x1b64   : > { %v8457_v15 = vpop.f32.mrf.mxu1 }
0x1b65   : > { %v5339_v14 = vadd.f32 %v8457_v15, %v5146_v47 }
0x1b66   : > { %v5329_v26 = vpop.f32.mrf.mxu1 }
0x1b67   : > { %v5338_v12 = vadd.f32 %v5329_v26, %v5145_v30 }
0x1b6c   : > { %v8464_v37 = vpop.f32.mrf.mxu1 }
0x1b6d   : > { %v5426_v10 = vsel %vm1913_vm0, %v8464_v37, -inf }
0x1b6e   : > { %5427 = vmax.xlane.f32.xlu1 %v5426_v10  ;;  %v5414_v16 = vpop.f32.mrf.mxu1  ;;  %v9078_v10 = vld [vmem:[%s10036_s26 + $0x18] sm:$0xff] }
0x1b6f   : > { %v5423_v27 = vsel %vm1909_vm15, %v5414_v16, -inf }
0x1b70   : > { %5424 = vmax.xlane.f32.xlu0 %v5423_v27  ;;  %v9080_v27 = vld [vmem:[%s10036_s26 + $0x8] sm:$0xff] }
0x1bf7   : > { %v5428_v18 = vpop.xlane.xlu1 %5427 }
0x1bf8   : > { %v5430_v9 = vsub.f32 %v8464_v37, %v5428_v18  ;;  %v9077_v37 = vld [vmem:[%s10036_s26 + $0x20] sm:$0xff] }
0x1bf9   : > { %v5425_v28 = vpop.xlane.xlu0 %5424  ;;  %v9081_v18 = vld [vmem:[%s10036_s26] sm:$0xff] }
0x1bfa   : > { %v5433_v29 = vmul.f32 1.442695, %v5430_v9  ;;  %v5429_v32 = vsub.f32 %v5414_v16, %v5425_v28  ;;  %v9079_v16 = vld [vmem:[%s10036_s26 + $0x10] sm:$0xff]  ;;  %v9082_v9 = vld [vmem:[%s10085_s18 + $0x28] sm:$0xff]  ;;  %s1318_s26 = scalar_lea.vmem %s11020_s11, %s9539_s0  ;;  %s11023_s0 = sld [smem:[#allocation38_spill]] (!%p7673_p8) }
0x1bfc   : > { %9011 = vpow2.f32 %v5433_v29  ;;  %v5431_v24 = vmul.f32 1.442695, %v5429_v32 }
0x1bfe   : > { %9013 = vpow2.f32 %v5431_v24  ;;  %v9083_v24 = vld [vmem:[%s10085_s18 + $0x20] sm:$0xff] }
0x1c09   : > { %v9012_v42 = vpop.eup %9011 }
0x1c0a   : > { %v5438_v33 = vsel %vm1913_vm0, %v9012_v42, 0.0 }
0x1c0b   : > { %v9014_v38 = vpop.eup %9013  ;;  %5439 = vadd.xlane.f32.xlu1 %v5438_v33 }
0x1c0c   : > { %v5435_v41 = vsel %vm1909_vm15, %v9014_v38, 0.0 }
0x1c0d   : > { %5436 = vadd.xlane.f32.xlu0 %v5435_v41 }
0x1c94   : > { %v5440_v44 = vpop.xlane.xlu1 %5439 }
0x1c95   : > { %9015 = vrcp.f32 %v5440_v44  ;;  %v10447_v44 = vld [vmem:[%s1314_s17] ss:$0 sm:$0xff] }
0x1c96   : > { %v5437_v25 = vpop.xlane.xlu0 %5436 }
0x1c97   : > { %9017 = vrcp.f32 %v5437_v25 }
0x1ca2   : > { %v9016_v47 = vpop.eup %9015 }
0x1ca3   : > { %v5444_v56 = vmul.f32 %v9016_v47, %v9012_v42  ;;  %v9084_v42 = vld [vmem:[%s10085_s18 + $0x18] sm:$0xff]  ;;  %s11026_s18 = sld [smem:[#allocation37_spill]] (!%p7673_p8) }
0x1ca4   : > { %v9018_v49 = vpop.eup %9017  ;;  %v9086_v47 = vld [vmem:[#allocation2 + $0x18] sm:$0xf] }
0x1ca5   : > { %v5443_v30 = vmul.f32 %v9018_v49, %v9014_v38  ;;  %v9085_v38 = vld [vmem:[%s10050_s16] ss:$0 sm:$0xff]  ;;  %s11024_s16 = sld [smem:[#allocation41_spill]] (!%p7673_p8) }
0x1ca7   : > { %8469 = vmatprep.mubr.msk.f32.mxu0 %vm1909_vm15, %v5443_v30 }
0x1ca8   : > { %8470 = vmatmul.mubr.msk.f32.vlgmr.msra.gmra.mxu0 %vm1909_vm15, %v5444_v56  ;;  %v9087_v56 = vld [vmem:[#allocation2 + $0x10] sm:$0xff] }
0x1ca9   : > { %8473 = vmatpush3.xpose.msk.msra.mxu0 %vm1394_vm6, %v10194_v40  ;;  %8476 = vmatprep.mubr.msk.f32.mxu0 %vm1394_vm6, %v5533_v50  ;;  %v9073_v40 = vld [vmem:[%s10069_s7 + $0x18] sm:$0xff] }
0x1caa   : > { %8474 = vmatprep.subr.msk.mxu0 %vm1394_vm6, %v10199_v17 }
0x1cad   : > { %8475 = vmatpush3.xpose.msk.msra.mxu0 %vm1394_vm6, %v10199_v17  ;;  %v9076_v17 = vld [vmem:[%s10069_s7] sm:$0xff]  ;;  %s11025_s7 = sld [smem:[#allocation39_spill]] (!%p7673_p8) }
0x1cae   : > { %8501 = vmatprep.subr.mxu0 %v9071_v59 }
0x1cb0   : > { %8477 = vmatmul.mubr.msk.f32.vlgmr.msra.gmra.mxu0 %vm1394_vm6, %v5534_v55  ;;  %v3685_v55 = vadd.f32 %v10447_v44, %v10180_v54 }
0x1cb1   : > { %8502 = vmatpush3.msra.mxu0 %v9071_v59 }
0x1cb2   : > { %8503 = vmatprep.subr.mxu0 %v9072_v1 }
0x1cb3   : > { %8504 = vmatpush3.msra.mxu0 %v9072_v1 }
0x1cb4   : > { %8505 = vmatprep.subr.mxu0 %v9073_v40 }
0x1cb5   : > { %8506 = vmatpush3.msra.mxu0 %v9073_v40 }
0x1cb6   : > { %8507 = vmatprep.subr.mxu0 %v9074_v60 }
0x1cb7   : > { %8508 = vmatpush3.msra.mxu0 %v9074_v60  ;;  %v10465_v60 = vadd.f32 %v3685_v55, %v10112_v58 }
0x1cb8   : > { %8509 = vmatprep.subr.mxu0 %v9075_v19 }
0x1cb9   : > { %8510 = vmatpush3.msra.mxu0 %v9075_v19 }
0x1cba   : > { %8511 = vmatprep.subr.mxu0 %v9076_v17 }
0x1cbb   : > { %8512 = vmatpush3.msra.mxu0 %v9076_v17 }
0x1d68   : > { %v8471_v11 = vpop.f32.mrf.mxu0 }
0x1d69   : > { %v5532_v23 = vadd.f32 %v8471_v11, %v5339_v14  ;;  %v3703_v11 = vmul.f32 %v10465_v60, %v10465_v60 }
0x1d6a   : > { %v5522_v61 = vpop.f32.mrf.mxu0 }
0x1d6b   : > { %v5531_v62 = vadd.f32 %v5522_v61, %v5338_v12 }
0x1d70   : > { %v8478_v63 = vpop.f32.mrf.mxu0 }
0x1d71   : > { %v5619_v0 = vsel %vm1913_vm0, %v8478_v63, -inf }
0x1d72   : > { %5620 = vmax.xlane.f32.xlu1 %v5619_v0  ;;  %v5607_v2 = vpop.f32.mrf.mxu0 }
0x1d73   : > { %v5616_v3 = vsel %vm1909_vm15, %v5607_v2, -inf }
0x1d74   : > { %5617 = vmax.xlane.f32.xlu0 %v5616_v3 }
0x1dfb   : > { %v5621_v4 = vpop.xlane.xlu1 %5620 }
0x1dfc   : > { %v5623_v22 = vsub.f32 %v8478_v63, %v5621_v4 }
0x1dfd   : > { %v5618_v5 = vpop.xlane.xlu0 %5617 }
0x1dfe   : > { %v5626_v6 = vmul.f32 1.442695, %v5623_v22  ;;  %v5622_v43 = vsub.f32 %v5607_v2, %v5618_v5 }
0x1e00   : > { %9019 = vpow2.f32 %v5626_v6  ;;  %v5624_v51 = vmul.f32 1.442695, %v5622_v43 }
0x1e02   : > { %9021 = vpow2.f32 %v5624_v51 }
0x1e0d   : > { %v9020_v7 = vpop.eup %9019 }
0x1e0e   : > { %v5631_v36 = vsel %vm1913_vm0, %v9020_v7, 0.0 }
0x1e0f   : > { %v9022_v46 = vpop.eup %9021  ;;  %5632 = vadd.xlane.f32.xlu1 %v5631_v36 }
0x1e10   : > { %v5628_v52 = vsel %vm1909_vm15, %v9022_v46, 0.0 }
0x1e11   : > { %5629 = vadd.xlane.f32.xlu0 %v5628_v52 }
0x1e98   : > { %v5633_v8 = vpop.xlane.xlu1 %5632 }
0x1e99   : > { %9023 = vrcp.f32 %v5633_v8 }
0x1e9a   : > { %v5630_v39 = vpop.xlane.xlu0 %5629 }
0x1e9b   : > { %9025 = vrcp.f32 %v5630_v39 }
0x1ea6   : > { %v9024_v15 = vpop.eup %9023 }
0x1ea7   : > { %v5637_v12 = vmul.f32 %v9024_v15, %v9020_v7 }
0x1ea8   : > { %v9026_v14 = vpop.eup %9025 }
0x1ea9   : > { %v5636_v26 = vmul.f32 %v9026_v14, %v9022_v46 }
0x1eab   : > { %8483 = vmatprep.mubr.msk.f32.mxu1 %vm1909_vm15, %v5636_v26 }
0x1eac   : > { %8484 = vmatmul.mubr.msk.f32.vlgmr.msra.gmra.mxu1 %vm1909_vm15, %v5637_v12 }
0x1ead   : > { %8487 = vmatpush3.msra.mxu1 %v10394_v48 }
0x1eae   : > { %8488 = vmatprep.subr.mxu1 %v9077_v37 }
0x1eaf   : > { %8489 = vmatpush3.msra.mxu1 %v9077_v37 }
0x1eb0   : > { %8490 = vmatprep.subr.mxu1 %v9078_v10 }
0x1eb1   : > { %8491 = vmatpush3.msra.mxu1 %v9078_v10 }
0x1eb2   : > { %8492 = vmatprep.subr.mxu1 %v9079_v16 }
0x1eb3   : > { %8493 = vmatpush3.msra.mxu1 %v9079_v16 }
0x1eb4   : > { %8494 = vmatprep.subr.mxu1 %v9080_v27 }
0x1eb5   : > { %8495 = vmatpush3.msra.mxu1 %v9080_v27 }
0x1eb6   : > { %8496 = vmatprep.subr.mxu1 %v9081_v18 }
0x1eb7   : > { %8497 = vmatpush3.msra.mxu1 %v9081_v18 }
0x1eb8   : > { %8516 = vmatprep.subr.mxu1 %v9082_v9 }
0x1f6c   : > { %v8485_v48 = vpop.f32.mrf.mxu1 }
0x1f6d   : > { %v5725_v32 = vadd.f32 %v8485_v48, %v5532_v23  ;;  %v3705_v23 = vsel %vm1394_vm6, %v3703_v11, 0.0 }
0x1f6e   : > { %v5715_v28 = vpop.f32.mrf.mxu1 }
0x1f6f   : > { %v5724_v29 = vadd.f32 %v5715_v28, %v5531_v62 }
0x1f71   : > { %8498 = vmatprep.mubr.msk.f32.mxu1 %vm1394_vm6, %v5724_v29 }
0x1f72   : > { %8499 = vmatmul.mubr.msk.f32.vlgmr.msra.gmra.mxu1 %vm1394_vm6, %v5725_v32 }
0x1f73   : > { %8517 = vmatpush3.msra.mxu1 %v9082_v9 }
0x1f74   : > { %8518 = vmatprep.subr.mxu1 %v9083_v24 }
0x1f75   : > { %8519 = vmatpush3.msra.mxu1 %v9083_v24 }
0x1f76   : > { %8520 = vmatprep.subr.mxu1 %v9084_v42 }
0x1f77   : > { %8521 = vmatpush3.msra.mxu1 %v9084_v42 }
0x1f78   : > { %8522 = vmatprep.subr.mxu1 %v10145_v45 }
0x1f79   : > { %8523 = vmatpush3.msra.mxu1 %v10145_v45  ;;  %v3690_v45 = vadd.f32 %v10178_v53, %v10447_v44 }
0x1f7a   : > { %8524 = vmatprep.subr.mxu1 %v10150_v13 }
0x1f7b   : > { %8525 = vmatpush3.msra.mxu1 %v10150_v13  ;;  %v10461_v40 = vadd.f32 %v3690_v45, %v10110_v57  ;;  %v3695_v57 = vsel %vm1394_vm6, %v10465_v60, 0.0 }
0x1f7c   : > { %8526 = vmatprep.subr.mxu1 %v10155_v35 }
0x1f7d   : > { %8527 = vmatpush3.msra.mxu1 %v10155_v35  ;;  %v3698_v17 = vsel %vm3461_vm1, %v10461_v40, 0.0  ;;  %v3704_v54 = vmul.f32 %v10461_v40, %v10461_v40 }
0x1f7f   : > { %v3708_v58 = vsel %vm3461_vm1, %v3704_v54, 0.0 }
0x2032   : > { %v8500_v33 = vpop.f32.mrf.mxu1 }
0x2033   : > { %v5804_v41 = vadd.f32 %v9085_v38, %v8500_v33  ;;  %v9088_v33 = vld [vmem:[%s10092_s22] ss:$0 sm:$0xff]  ;;  %s11028_s22 = smov (!%p7673_p8), %s11027_s28 }
0x2034   : > { %v5798_v25 = vpop.f32.mrf.mxu1 }
0x2035   : > { %v10449_v49 = vadd.f32 %v9086_v47, %v5804_v41  ;;  %v5799_v30 = vadd.f32 %v9085_v38, %v5798_v25  ;;  %v5846_v41 = vrot.slane %v9666_v21, %v3507_v31  ;;  %v9089_v47 = vld [vmem:[%s10098_s5] ss:$0 sm:$0xff]  ;;  %s11021_s5 = sld [smem:[#allocation34_spill]] (!%p7673_p8) }
0x2037   : > { %v5807_v13 = vadd.f32 %v9087_v56, %v5799_v30  ;;  %v5812_v50 = vsel %vm3461_vm1, %v10449_v49, 0.0  ;;  %v5818_v35 = vmul.f32 %v10449_v49, %v10449_v49 }
0x2038   : > { %5813 = vadd.xlane.f32.xlu1 %v5812_v50 }
0x2039   : > { %v5809_v59 = vsel %vm1394_vm6, %v5807_v13, 0.0  ;;  %v5817_v1 = vmul.f32 %v5807_v13, %v5807_v13  ;;  %v5822_v53 = vsel %vm3461_vm1, %v5818_v35, 0.0  ;;  %v9090_v35 = vld [vmem:[%s9626_s4 + $0x4] sm:$0xf]  ;;  %s11022_s4 = sld [smem:[#allocation35_spill]] (!%p7673_p8) }
0x203a   : > { %5810 = vadd.xlane.f32.xlu0 %v5809_v59  ;;  %v5852_v55 = vrot.slane %v9090_v35, %v3513_v34 }
0x203b   : > { %v5819_v19 = vsel %vm1394_vm6, %v5817_v1, 0.0 }
0x203c   : > { %5823 = vadd.xlane.f32.xlu1 %v5822_v53  ;;  %v10495_v53 = vld [vmem:[%s1318_s26] ss:$0 sm:$0xff] }
0x203e   : > { %5820 = vadd.xlane.f32.xlu0 %v5819_v19 }
0x2040   : > { %3699 = vadd.xlane.f32.xlu1 %v3698_v17 }
0x2042   : > { %3696 = vadd.xlane.f32.xlu0 %v3695_v57 }
0x2044   : > { %3709 = vadd.xlane.f32.xlu1 %v3708_v58 }
0x2046   : > { %3706 = vadd.xlane.f32.xlu0 %v3705_v23 }
0x20c1   : > { %v5814_v61 = vpop.xlane.xlu1 %5813 }
0x20c2   : > { %v5816_v62 = vmul.f32 0.020833334, %v5814_v61 }
0x20c3   : > { %v5811_v63 = vpop.xlane.xlu0 %5810 }
0x20c4   : > { %v5815_v0 = vmul.f32 0.020833334, %v5811_v63  ;;  %v5828_v3 = vmul.f32 %v5816_v62, %v5816_v62  ;;  %v5832_v48 = vsub.f32 %v10449_v49, %v5816_v62 }
0x20c5   : > { %v5824_v2 = vpop.xlane.xlu1 %5823 }
0x20c6   : > { %v5826_v4 = vmul.f32 0.020833334, %v5824_v2  ;;  %v5827_v5 = vmul.f32 %v5815_v0, %v5815_v0  ;;  %v5831_v29 = vsub.f32 %v5807_v13, %v5815_v0  ;;  %v10489_v13 = vld [vmem:[%s1316_s10] ss:$0 sm:$0xff] }
0x20c7   : > { %v5821_v22 = vpop.xlane.xlu0 %5820 }
0x20c8   : > { %v5830_v6 = vsub.f32 %v5826_v4, %v5828_v3  ;;  %v5825_v43 = vmul.f32 0.020833334, %v5821_v22 }
0x20c9   : > { %v3700_v51 = vpop.xlane.xlu1 %3699 }
0x20ca   : > { %v5834_v7 = vadd.f32 1e-05, %v5830_v6  ;;  %v5829_v36 = vsub.f32 %v5825_v43, %v5827_v5  ;;  %v3702_v46 = vmul.f32 0.020833334, %v3700_v51 }
0x20cb   : > { %v3697_v52 = vpop.xlane.xlu0 %3696 }
0x20cc   : > { %9027 = vrsqrt.f32 %v5834_v7  ;;  %v5833_v8 = vadd.f32 1e-05, %v5829_v36  ;;  %v3701_v39 = vmul.f32 0.020833334, %v3697_v52  ;;  %v3714_v14 = vmul.f32 %v3702_v46, %v3702_v46 }
0x20cd   : > { %v3710_v15 = vpop.xlane.xlu1 %3709  ;;  %v3718_v45 = vsub.f32 %v10461_v40, %v3702_v46 }
0x20ce   : > { %9029 = vrsqrt.f32 %v5833_v8  ;;  %v3712_v26 = vmul.f32 0.020833334, %v3710_v15  ;;  %v3713_v37 = vmul.f32 %v3701_v39, %v3701_v39  ;;  %v3717_v59 = vsub.f32 %v10465_v60, %v3701_v39  ;;  %v9091_v60 = vld [vmem:[%s10162_s2] ss:$0 sm:$0xff]  ;;  %s11030_s2 = sld [smem:[#allocation43_spill]] (!%p7673_p8) }
0x20cf   : > { %v3707_v12 = vpop.xlane.xlu0 %3706 }
0x20d0   : > { %v3716_v10 = vsub.f32 %v3712_v26, %v3714_v14  ;;  %v3711_v16 = vmul.f32 0.020833334, %v3707_v12 }
0x20d2   : > { %v3720_v27 = vadd.f32 1e-05, %v3716_v10  ;;  %v3715_v18 = vsub.f32 %v3711_v16, %v3713_v37 }
0x20d4   : > { %9031 = vrsqrt.f32 %v3720_v27  ;;  %v3719_v9 = vadd.f32 1e-05, %v3715_v18  ;;  %s11031_s23 = smov (!%p7673_p8), %s11030_s2 }
0x20d6   : > { %9033 = vrsqrt.f32 %v3719_v9 }
0x20d9   : > { %v9028_v28 = vpop.eup %9027 }
0x20da   : > { %v5838_v32 = vmul.f32 %v9028_v28, %v5832_v48 }
0x20db   : > { %v9030_v24 = vpop.eup %9029 }
0x20dc   : > { %v5837_v42 = vmul.f32 %v9030_v24, %v5831_v29  ;;  %v5840_v38 = vmul.f32 %v9088_v33, %v5838_v32 }
0x20de   : > { %v5839_v25 = vmul.f32 %v9088_v33, %v5837_v42  ;;  %v5842_v30 = vadd.f32 %v9089_v47, %v5840_v38 }
0x20e0   : > { %v5841_v49 = vadd.f32 %v9089_v47, %v5839_v25  ;;  %v5848_v50 = vmul.f32 %v5846_v41, %v5842_v30 }
0x20e1   : > { %v9032_v56 = vpop.eup %9031 }
0x20e2   : > { %v3724_v1 = vmul.f32 %v9032_v56, %v3718_v45  ;;  %v5847_v21 = vmul.f32 %v5846_v41, %v5841_v49  ;;  %v5854_v54 = vadd.f32 %v5852_v55, %v5848_v50 }
0x20e3   : > { %v9034_v31 = vpop.eup %9033 }
0x20e4   : > { %v3732_v40 = vmul.f32 %v10489_v13, %v3724_v1  ;;  %v3723_v19 = vmul.f32 %v9034_v31, %v3717_v59  ;;  %v5853_v17 = vadd.f32 %v5852_v55, %v5847_v21 }
0x20e6   : > { %v3740_v57 = vadd.f32 %v10495_v53, %v3732_v40  ;;  %v3731_v11 = vmul.f32 %v10489_v13, %v3723_v19  ;;  %8513 = vmatprep.mubr.msk.f32.mxu0 %vm1394_vm6, %v5853_v17 }
0x20e7   : > { %8514 = vmatmul.mubr.msk.f32.vlgmr.msra.gmra.mxu0 %vm1394_vm6, %v5854_v54 }
0x20e8   : > { %3742 = vst.msk [vmem:[#allocation2 + $0x8] sm:$0xf] %vm3461_vm1, %v3740_v57  ;;  %v10504_v20 = vadd.f32 %v10495_v53, %v3731_v11 }
0x20ea   : > { %3741 = vst.msk [vmem:[#allocation2] sm:$0xff] %vm1394_vm6, %v10504_v20 }
0x21a7   : > { %v8515_v34 = vpop.f32.mrf.mxu0 }
0x21a8   : > { %v5933_v58 = vadd.f32 %v9091_v60, %v8515_v34 }
0x21a9   : > { %v5927_v23 = vpop.f32.mrf.mxu0 }
0x21aa   : > { %v5928_v61 = vadd.f32 %v9091_v60, %v5927_v23  ;;  %v5937_v63 = vmax.f32 %v5933_v58, 0.0 }
0x21ac   : > { %v5936_v62 = vmax.f32 %v5928_v61, 0.0 }
0x21ae   : > { %8528 = vmatprep.mubr.msk.f32.mxu1 %vm1394_vm6, %v5936_v62 }
0x21af   : > { %8529 = vmatmul.mubr.msk.f32.vlgmr.msra.gmra.mxu1 %vm1394_vm6, %v5937_v63 }
0x226f   : > { %v8530_v0 = vpop.f32.mrf.mxu1 }
0x2270   : > { %v6016_v2 = vadd.f32 %v8530_v0, %v10447_v44 }
0x2271   : > { %v6010_v3 = vpop.f32.mrf.mxu1 }
0x2272   : > { %v6020_v4 = vadd.f32 %v6016_v2, %v5842_v30  ;;  %v6011_v22 = vadd.f32 %v10447_v44, %v6010_v3 }
0x2274   : > { %v6019_v5 = vadd.f32 %v6011_v22, %v5841_v49  ;;  %v6024_v6 = vsel %vm3461_vm1, %v6020_v4, 0.0  ;;  %v6030_v43 = vmul.f32 %v6020_v4, %v6020_v4 }
0x2275   : > { %6025 = vadd.xlane.f32.xlu1 %v6024_v6 }
0x2276   : > { %v6021_v51 = vsel %vm1394_vm6, %v6019_v5, 0.0  ;;  %v6029_v7 = vmul.f32 %v6019_v5, %v6019_v5  ;;  %v6034_v36 = vsel %vm3461_vm1, %v6030_v43, 0.0 }
0x2277   : > { %6022 = vadd.xlane.f32.xlu0 %v6021_v51 }
0x2278   : > { %v6031_v46 = vsel %vm1394_vm6, %v6029_v7, 0.0 }
0x2279   : > { %6035 = vadd.xlane.f32.xlu1 %v6034_v36 }
0x227b   : > { %6032 = vadd.xlane.f32.xlu0 %v6031_v46 }
0x22fe   : > { %v6026_v52 = vpop.xlane.xlu1 %6025 }
0x22ff   : > { %v6028_v8 = vmul.f32 0.020833334, %v6026_v52 }
0x2300   : > { %v6023_v39 = vpop.xlane.xlu0 %6022 }
0x2301   : > { %v6027_v15 = vmul.f32 0.020833334, %v6023_v39  ;;  %v6040_v14 = vmul.f32 %v6028_v8, %v6028_v8  ;;  %v6044_v48 = vsub.f32 %v6020_v4, %v6028_v8 }
0x2302   : > { %v6036_v44 = vpop.xlane.xlu1 %6035 }
0x2303   : > { %v6038_v26 = vmul.f32 0.020833334, %v6036_v44  ;;  %v6039_v37 = vmul.f32 %v6027_v15, %v6027_v15  ;;  %v6043_v29 = vsub.f32 %v6019_v5, %v6027_v15 }
0x2304   : > { %v6033_v12 = vpop.xlane.xlu0 %6032 }
0x2305   : > { %v6042_v10 = vsub.f32 %v6038_v26, %v6040_v14  ;;  %v6037_v16 = vmul.f32 0.020833334, %v6033_v12 }
0x2307   : > { %v6046_v27 = vadd.f32 1e-05, %v6042_v10  ;;  %v6041_v18 = vsub.f32 %v6037_v16, %v6039_v37 }
0x2309   : > { %9035 = vrsqrt.f32 %v6046_v27  ;;  %v6045_v9 = vadd.f32 1e-05, %v6041_v18 }
0x230b   : > { %9037 = vrsqrt.f32 %v6045_v9 }
0x2316   : > { %v9036_v28 = vpop.eup %9035 }
0x2317   : > { %v6050_v32 = vmul.f32 %v9036_v28, %v6044_v48 }
0x2318   : > { %v9038_v24 = vpop.eup %9037 }
0x2319   : > { %v6052_v42 = vmul.f32 %v10489_v13, %v6050_v32  ;;  %v6049_v33 = vmul.f32 %v9038_v24, %v6043_v29 }
0x231b   : > { %v6054_v38 = vadd.f32 %v10495_v53, %v6052_v42  ;;  %v6051_v41 = vmul.f32 %v10489_v13, %v6049_v33  ;;  %6060 = sbr.rel (%p7673_p8) target bundleno = 10025 (0x2729), region = 245 }
0x231d   : > { %6056 = vst.msk [vmem:[#allocation2 + $0x18] sm:$0xf] %vm3461_vm1, %v6054_v38  ;;  %v10522_v25 = vadd.f32 %v10495_v53, %v6051_v41 }
0x231f   : > { %6055 = vst.msk [vmem:[#allocation2 + $0x10] sm:$0xff] %vm1394_vm6, %v10522_v25 }
0x2320   : > { %v10528_v47 = vld [vmem:[%s11021_s5 + $0x28] sm:$0xff]  ;;  %v9331_v30 = vmov 0.0   ;;  %v10532_v45 = vld [vmem:[%s11021_s5 + $0x20] sm:$0xff]  ;;  %vm9332_vm2 = vmmov 0   ;;  %v10540_v49 = vld [vmem:[%s11021_s5 + $0x18] sm:$0xff] }
0x2321   : > { %8531 = vmatprep.subr.mxu0 %v9331_v30  ;;  %8543 = vmatprep.mubr.msk.f32.mxu0 %vm9332_vm2, %v9331_v30  ;;  %v10546_v56 = vld [vmem:[%s11022_s4 + $0x28] sm:$0xff]  ;;  %v10549_v13 = vld [vmem:[%s11022_s4 + $0x20] sm:$0xff]  ;;  %v10553_v50 = vld [vmem:[%s11021_s5 + $0x10] sm:$0xff] }
0x2322   : > { %8532 = vmatpush3.msra.mxu0 %v10528_v47  ;;  %8546 = vmatprep.subr.mxu1 %v9331_v30  ;;  %v10559_v35 = vld [vmem:[%s11022_s4 + $0x18] sm:$0xff]  ;;  %v10563_v55 = vld [vmem:[%s11021_s5 + $0x8] sm:$0xff]  ;;  %v10569_v59 = vld [vmem:[%s11022_s4 + $0x10] sm:$0xff] }
0x2323   : > { %8533 = vmatprep.subr.mxu0 %v9331_v30  ;;  %8558 = vmatprep.mubr.msk.f32.mxu1 %vm9332_vm2, %v9331_v30  ;;  %v10573_v1 = vld [vmem:[%s11021_s5] sm:$0xff]  ;;  %v10580_v31 = vld [vmem:[%s11023_s0 + $0x28] sm:$0xff]  ;;  %v10595_v40 = vld [vmem:[%s11023_s0 + $0x18] sm:$0xff] }
0x2324   : > { %8534 = vmatpush3.msra.mxu0 %v10532_v45  ;;  %8547 = vmatpush3.msra.mxu1 %v10546_v56  ;;  %v6115_v21 = vld [vmem:[#allocation4] sm:$0xff]  ;;  %v10600_v19 = vld [vmem:[%s11023_s0 + $0x10] sm:$0xff]  ;;  %v10605_v17 = vld [vmem:[%s11023_s0 + $0x8] sm:$0xff] }
0x2325   : > { %8535 = vmatprep.subr.mxu0 %v9331_v30  ;;  %8548 = vmatprep.subr.mxu1 %v9331_v30  ;;  %v10588_v53 = vld [vmem:[%s11023_s0 + $0x20] sm:$0xff]  ;;  %v10621_v57 = vld [vmem:[%s11022_s4 + $0x8] sm:$0xff]  ;;  %v10641_v60 = vld [vmem:[%s11024_s16 + $0x18] sm:$0xff] }
0x2326   : > { %8536 = vmatpush3.msra.mxu0 %v10540_v49  ;;  %8549 = vmatpush3.msra.mxu1 %v10549_v13  ;;  %v10610_v54 = vld [vmem:[%s11023_s0] sm:$0xff]  ;;  %v10646_v58 = vld [vmem:[%s11024_s16 + $0x10] sm:$0xff]  ;;  %v10651_v23 = vld [vmem:[%s11024_s16 + $0x8] sm:$0xff] }
0x2327   : > { %8537 = vmatprep.subr.mxu0 %v9331_v30  ;;  %8550 = vmatprep.subr.mxu1 %v9331_v30  ;;  %v10626_v11 = vld [vmem:[%s11022_s4] sm:$0xff]  ;;  %v10664_v2 = vld [vmem:[%s11025_s7 + $0x28] sm:$0xff]  ;;  %v10675_v22 = vld [vmem:[%s11025_s7 + $0x18] sm:$0xff] }
0x2328   : > { %8538 = vmatpush3.msra.mxu0 %v10553_v50  ;;  %8551 = vmatpush3.msra.mxu1 %v10559_v35  ;;  %v10636_v34 = vld [vmem:[%s11024_s16 + $0x20] sm:$0xff]  ;;  %v10680_v5 = vld [vmem:[%s11025_s7 + $0x10] sm:$0xff]  ;;  %v10685_v6 = vld [vmem:[%s11025_s7 + $0x8] sm:$0xff] }
0x2329   : > { %8539 = vmatprep.subr.mxu0 %v9331_v30  ;;  %8552 = vmatprep.subr.mxu1 %v9331_v30  ;;  %v10656_v61 = vld [vmem:[%s11024_s16] sm:$0xff]  ;;  %v10699_v52 = vld [vmem:[%s11026_s18 + $0x28] sm:$0xff]  ;;  %v10714_v39 = vld [vmem:[%s11026_s18 + $0x18] sm:$0xff] }
0x232a   : > { %8540 = vmatpush3.msra.mxu0 %v10563_v55  ;;  %8553 = vmatpush3.msra.mxu1 %v10569_v59  ;;  %v10660_v62 = vld [vmem:[#allocation6] ss:$0 sm:$0xff]  ;;  %v10688_v43 = vld [vmem:[#allocation10] ss:$0 sm:$0xff]  ;;  %v10721_v15 = vld [vmem:[%s11026_s18 + $0x10] sm:$0xff] }
0x232b   : > { %8541 = vmatprep.subr.mxu0 %v9331_v30  ;;  %8554 = vmatprep.subr.mxu1 %v9331_v30  ;;  %v10668_v4 = vld [vmem:[%s11025_s7 + $0x20] sm:$0xff]  ;;  %v10726_v44 = vld [vmem:[%s11026_s18 + $0x8] sm:$0xff]  ;;  %v10746_v37 = vld [vmem:[%s11028_s22 + $0x18] sm:$0xff] }
0x232c   : > { %8542 = vmatpush3.msra.mxu0 %v10573_v1  ;;  %8555 = vmatpush3.msra.mxu1 %v10621_v57  ;;  %v10692_v51 = vld [vmem:[%s11025_s7] sm:$0xff]  ;;  %v10735_v26 = vld [vmem:[%s11027_s28 + $0x28] sm:$0xff]  ;;  %v10751_v10 = vld [vmem:[%s11028_s22 + $0x10] sm:$0xff] }
0x232d   : > { %8544 = vmatmul.mubr.msk.f32.vlgmr.msra.gmra.mxu0 %vm1394_vm6, %v6115_v21  ;;  %8561 = vmatprep.subr.mxu0 %v9331_v30  ;;  %v10705_v8 = vld [vmem:[%s11026_s18 + $0x20] sm:$0xff]  ;;  %v10756_v16 = vld [vmem:[%s11028_s22 + $0x8] sm:$0xff]  ;;  %v10780_v42 = vld [vmem:[%s11029_s3 + $0x18] sm:$0xff] }
0x232e   : > { %8562 = vmatpush3.msra.mxu0 %v10580_v31  ;;  %8573 = vmatprep.mubr.msk.f32.mxu0 %vm9332_vm2, %v9331_v30  ;;  %v10731_v14 = vld [vmem:[%s11026_s18] sm:$0xff]  ;;  %v10769_v32 = vld [vmem:[%s11029_s3 + $0x28] sm:$0xff]  ;;  %v10785_v33 = vld [vmem:[%s11029_s3 + $0x10] sm:$0xff] }
0x232f   : > { %8563 = vmatprep.subr.mxu0 %v9331_v30  ;;  %8556 = vmatprep.subr.mxu1 %v9331_v30  ;;  %v10741_v12 = vld [vmem:[%s11028_s22 + $0x20] sm:$0xff]  ;;  %v10790_v41 = vld [vmem:[#allocation13] ss:$0 sm:$0xff] }
0x2330   : > { %8564 = vmatpush3.msra.mxu0 %v10588_v53  ;;  %8557 = vmatpush3.msra.mxu1 %v10626_v11  ;;  %v10761_v27 = vld [vmem:[%s11028_s22] sm:$0xff]  ;;  %v10794_v21 = vld [vmem:[%s11029_s3 + $0x8] sm:$0xff] }
0x2331   : > { %8565 = vmatprep.subr.mxu0 %v9331_v30  ;;  %8576 = vmatprep.subr.mxu1 %v9331_v30  ;;  %v10765_v18 = vld [vmem:[#allocation8] ss:$0 sm:$0xff]  ;;  %v10788_v38 = vld [vmem:[#allocation11] ss:$0 sm:$0xff] }
0x2332   : > { %8566 = vmatpush3.msra.mxu0 %v10595_v40  ;;  %v10773_v24 = vld [vmem:[%s11029_s3 + $0x20] sm:$0xff] }
0x2333   : > { %8567 = vmatprep.subr.mxu0 %v9331_v30 }
0x2334   : > { %8568 = vmatpush3.msra.mxu0 %v10600_v19 }
0x2335   : > { %8569 = vmatprep.subr.mxu0 %v9331_v30 }
0x2336   : > { %8570 = vmatpush3.msra.mxu0 %v10605_v17 }
0x2337   : > { %8571 = vmatprep.subr.mxu0 %v9331_v30 }
0x2338   : > { %8572 = vmatpush3.msra.mxu0 %v10610_v54 }
0x2339   : > { %8574 = vmatmul.mubr.msk.f32.vlgmr.msra.gmra.mxu0 %vm1394_vm6, %v10504_v20  ;;  %8591 = vmatprep.subr.mxu0 %v9331_v30  ;;  %v10631_v20 = vld [vmem:[%s11024_s16 + $0x28] sm:$0xff] }
0x233a   : > { %8603 = vmatprep.mubr.msk.f32.mxu0 %vm9332_vm2, %v9331_v30  ;;  %8592 = vmatpush3.msra.mxu0 %v10631_v20 }
0x233b   : > { %8593 = vmatprep.subr.mxu0 %v9331_v30 }
0x233c   : > { %8594 = vmatpush3.msra.mxu0 %v10636_v34 }
0x233d   : > { %8595 = vmatprep.subr.mxu0 %v9331_v30 }
0x233e   : > { %8596 = vmatpush3.msra.mxu0 %v10641_v60 }
0x233f   : > { %8597 = vmatprep.subr.mxu0 %v9331_v30 }
0x2340   : > { %8598 = vmatpush3.msra.mxu0 %v10646_v58 }
0x2341   : > { %8599 = vmatprep.subr.mxu0 %v9331_v30 }
0x2342   : > { %8600 = vmatpush3.msra.mxu0 %v10651_v23 }
0x2343   : > { %8601 = vmatprep.subr.mxu0 %v9331_v30 }
0x2344   : > { %8602 = vmatpush3.msra.mxu0 %v10656_v61 }
0x2345   : > { %8621 = vmatprep.subr.mxu0 %v9331_v30 }
0x23ed   : > { %v6191_v63 = vpop.f32.mrf.mxu0 }
0x23ee   : > { %v6192_v0 = vadd.f32 %v10660_v62, %v6191_v63 }
0x23ef   : > { %v8545_v3 = vpop.f32.mrf.mxu0 }
0x23f0   : > { %8559 = vmatmul.mubr.msk.f32.vlgmr.msra.gmra.mxu1 %vm1394_vm6, %v6192_v0 }
0x23f1   : > { %8577 = vmatpush3.msra.mxu1 %v10664_v2  ;;  %8588 = vmatprep.mubr.msk.f32.mxu1 %vm9332_vm2, %v9331_v30 }
0x23f2   : > { %8578 = vmatprep.subr.mxu1 %v9331_v30 }
0x23f3   : > { %8579 = vmatpush3.msra.mxu1 %v10668_v4 }
0x23f4   : > { %8580 = vmatprep.subr.mxu1 %v9331_v30 }
0x23f5   : > { %8581 = vmatpush3.msra.mxu1 %v10675_v22 }
0x23f6   : > { %8582 = vmatprep.subr.mxu1 %v9331_v30 }
0x23f7   : > { %8583 = vmatpush3.msra.mxu1 %v10680_v5 }
0x23f8   : > { %8584 = vmatprep.subr.mxu1 %v9331_v30 }
0x23f9   : > { %v6350_v7 = vpop.f32.mrf.mxu0  ;;  %8585 = vmatpush3.msra.mxu1 %v10685_v6 }
0x23fa   : > { %v6351_v36 = vadd.f32 %v10688_v43, %v6350_v7  ;;  %8586 = vmatprep.subr.mxu1 %v9331_v30 }
0x23fb   : > { %v8575_v46 = vpop.f32.mrf.mxu0  ;;  %8587 = vmatpush3.msra.mxu1 %v10692_v51 }
0x23fc   : > { %8589 = vmatmul.mubr.msk.f32.vlgmr.msra.gmra.mxu1 %vm1394_vm6, %v6351_v36  ;;  %8604 = vmatmul.mubr.msk.f32.vlgmr.msra.gmra.mxu0 %vm1394_vm6, %v6351_v36  ;;  %v10801_v36 = vld [vmem:[%s11029_s3] sm:$0xff] }
0x23fd   : > { %8606 = vmatprep.subr.mxu1 %v9331_v30  ;;  %8618 = vmatprep.mubr.msk.f32.mxu1 %vm9332_vm2, %v9331_v30 }
0x23fe   : > { %8607 = vmatpush3.msra.mxu1 %v10699_v52  ;;  %8633 = vmatprep.mubr.msk.f32.mxu0 %vm9332_vm2, %v9331_v30 }
0x23ff   : > { %8608 = vmatprep.subr.mxu1 %v9331_v30  ;;  %8622 = vmatpush3.msra.mxu0 %v10735_v26 }
0x2400   : > { %8609 = vmatpush3.msra.mxu1 %v10705_v8  ;;  %8623 = vmatprep.subr.mxu0 %v9331_v30 }
0x2401   : > { %8610 = vmatprep.subr.mxu1 %v9331_v30  ;;  %8624 = vmatpush3.msra.mxu0 %v10741_v12 }
0x2402   : > { %8611 = vmatpush3.msra.mxu1 %v10714_v39  ;;  %8625 = vmatprep.subr.mxu0 %v9331_v30 }
0x2403   : > { %8612 = vmatprep.subr.mxu1 %v9331_v30  ;;  %8626 = vmatpush3.msra.mxu0 %v10746_v37 }
0x2404   : > { %8613 = vmatpush3.msra.mxu1 %v10721_v15  ;;  %8627 = vmatprep.subr.mxu0 %v9331_v30 }
0x2405   : > { %8614 = vmatprep.subr.mxu1 %v9331_v30  ;;  %8628 = vmatpush3.msra.mxu0 %v10751_v10 }
0x2406   : > { %8615 = vmatpush3.msra.mxu1 %v10726_v44  ;;  %8629 = vmatprep.subr.mxu0 %v9331_v30 }
0x2407   : > { %8616 = vmatprep.subr.mxu1 %v9331_v30  ;;  %8630 = vmatpush3.msra.mxu0 %v10756_v16 }
0x2408   : > { %8617 = vmatpush3.msra.mxu1 %v10731_v14  ;;  %8631 = vmatprep.subr.mxu0 %v9331_v30 }
0x2409   : > { %8636 = vmatprep.subr.mxu1 %v9331_v30  ;;  %8632 = vmatpush3.msra.mxu0 %v10761_v27 }
0x240a   : > { %8651 = vmatprep.subr.mxu0 %v9331_v30 }
0x24b0   : > { %v6270_v9 = vpop.f32.mrf.mxu1 }
0x24b1   : > { %v6271_v48 = vadd.f32 %v10765_v18, %v6270_v9 }
0x24b2   : > { %v8560_v28 = vpop.f32.mrf.mxu1 }
0x24b3   : > { %v6274_v29 = vmax.f32 %v6271_v48, 0.0 }
0x24b5   : > { %8619 = vmatmul.mubr.msk.f32.vlgmr.msra.gmra.mxu1 %vm1394_vm6, %v6274_v29 }
0x24b6   : > { %8637 = vmatpush3.msra.mxu1 %v10769_v32  ;;  %8648 = vmatprep.mubr.msk.f32.mxu1 %vm9332_vm2, %v9331_v30 }
0x24b7   : > { %8638 = vmatprep.subr.mxu1 %v9331_v30 }
0x24b8   : > { %8639 = vmatpush3.msra.mxu1 %v10773_v24 }
0x24b9   : > { %8640 = vmatprep.subr.mxu1 %v9331_v30 }
0x24ba   : > { %8641 = vmatpush3.msra.mxu1 %v10780_v42 }
0x24bb   : > { %8642 = vmatprep.subr.mxu1 %v9331_v30 }
0x24bc   : > { %v6429_v63 = vpop.f32.mrf.mxu1  ;;  %v6506_v0 = vpop.f32.mrf.mxu0  ;;  %8643 = vmatpush3.msra.mxu1 %v10785_v33 }
0x24bd   : > { %v6430_v3 = vadd.f32 %v10788_v38, %v6429_v63  ;;  %v6507_v7 = vadd.f32 %v10790_v41, %v6506_v0  ;;  %8644 = vmatprep.subr.mxu1 %v9331_v30 }
0x24be   : > { %v8590_v46 = vpop.f32.mrf.mxu1  ;;  %v8605_v9 = vpop.f32.mrf.mxu0  ;;  %8645 = vmatpush3.msra.mxu1 %v10794_v21 }
0x24bf   : > { %v6433_v48 = vmax.f32 %v6430_v3, 0.0  ;;  %v6510_v28 = vmax.f32 %v6507_v7, 0.0  ;;  %8646 = vmatprep.subr.mxu1 %v9331_v30 }
0x24c0   : > { %8647 = vmatpush3.msra.mxu1 %v10801_v36 }
0x24c1   : > { %8634 = vmatmul.mubr.msk.f32.vlgmr.msra.gmra.mxu0 %vm1394_vm6, %v6433_v48  ;;  %8649 = vmatmul.mubr.msk.f32.vlgmr.msra.gmra.mxu1 %vm1394_vm6, %v6510_v28 }
0x24c2   : > { %8652 = vmatpush3.msra.mxu0 %v10528_v47  ;;  %8663 = vmatprep.mubr.msk.f32.mxu0 %vm9332_vm2, %v9331_v30  ;;  %v6740_v47 = vld [vmem:[#allocation4 + $0x8] sm:$0xff] }
0x24c3   : > { %8653 = vmatprep.subr.mxu0 %v9331_v30  ;;  %8666 = vmatprep.subr.mxu1 %v9331_v30 }
0x24c4   : > { %8654 = vmatpush3.msra.mxu0 %v10532_v45  ;;  %8667 = vmatpush3.msra.mxu1 %v10546_v56 }
0x24c5   : > { %8655 = vmatprep.subr.mxu0 %v9331_v30  ;;  %8668 = vmatprep.subr.mxu1 %v9331_v30 }
0x24c6   : > { %8656 = vmatpush3.msra.mxu0 %v10540_v49  ;;  %8669 = vmatpush3.msra.mxu1 %v10549_v13 }
0x24c7   : > { %8657 = vmatprep.subr.mxu0 %v9331_v30  ;;  %8670 = vmatprep.subr.mxu1 %v9331_v30 }
0x24c8   : > { %8658 = vmatpush3.msra.mxu0 %v10553_v50  ;;  %8671 = vmatpush3.msra.mxu1 %v10559_v35  ;;  %v10868_v50 = vld [vmem:[#allocation14] ss:$0 sm:$0xff] }
0x24c9   : > { %8659 = vmatprep.subr.mxu0 %v9331_v30  ;;  %8672 = vmatprep.subr.mxu1 %v9331_v30 }
0x24ca   : > { %8660 = vmatpush3.msra.mxu0 %v10563_v55  ;;  %8673 = vmatpush3.msra.mxu1 %v10569_v59 }
0x24cb   : > { %8661 = vmatprep.subr.mxu0 %v9331_v30  ;;  %8674 = vmatprep.subr.mxu1 %v9331_v30 }
0x24cc   : > { %8662 = vmatpush3.msra.mxu0 %v10573_v1  ;;  %8675 = vmatpush3.msra.mxu1 %v10621_v57 }
0x24cd   : > { %8664 = vmatmul.mubr.msk.f32.vlgmr.msra.gmra.mxu0 %vm1394_vm6, %v6740_v47  ;;  %8681 = vmatprep.subr.mxu0 %v9331_v30 }
0x24ce   : > { %8682 = vmatpush3.msra.mxu0 %v10580_v31  ;;  %8693 = vmatprep.mubr.msk.f32.mxu0 %vm9332_vm2, %v9331_v30 }
0x24cf   : > { %8683 = vmatprep.subr.mxu0 %v9331_v30  ;;  %8676 = vmatprep.subr.mxu1 %v9331_v30 }
0x24d0   : > { %8684 = vmatpush3.msra.mxu0 %v10588_v53  ;;  %8677 = vmatpush3.msra.mxu1 %v10626_v11 }
0x24d1   : > { %8685 = vmatprep.subr.mxu0 %v9331_v30  ;;  %8678 = vmatprep.mubr.msk.f32.mxu1 %vm9332_vm2, %v9331_v30 }
0x24d2   : > { %8686 = vmatpush3.msra.mxu0 %v10595_v40  ;;  %8696 = vmatprep.subr.mxu1 %v9331_v30 }
0x24d3   : > { %8687 = vmatprep.subr.mxu0 %v9331_v30 }
0x24d4   : > { %8688 = vmatpush3.msra.mxu0 %v10600_v19 }
0x24d5   : > { %8689 = vmatprep.subr.mxu0 %v9331_v30 }
0x24d6   : > { %8690 = vmatpush3.msra.mxu0 %v10605_v17 }
0x24d7   : > { %8691 = vmatprep.subr.mxu0 %v9331_v30 }
0x24d8   : > { %8692 = vmatpush3.msra.mxu0 %v10610_v54 }
0x24d9   : > { %8694 = vmatmul.mubr.msk.f32.vlgmr.msra.gmra.mxu0 %vm1394_vm6, %v10522_v25  ;;  %8711 = vmatprep.subr.mxu0 %v9331_v30 }
0x24da   : > { %8712 = vmatpush3.msra.mxu0 %v10631_v20  ;;  %8723 = vmatprep.mubr.msk.f32.mxu0 %vm9332_vm2, %v9331_v30 }
0x24db   : > { %8713 = vmatprep.subr.mxu0 %v9331_v30 }
0x24dc   : > { %8714 = vmatpush3.msra.mxu0 %v10636_v34 }
0x24dd   : > { %8715 = vmatprep.subr.mxu0 %v9331_v30 }
0x24de   : > { %8716 = vmatpush3.msra.mxu0 %v10641_v60 }
0x24df   : > { %8717 = vmatprep.subr.mxu0 %v9331_v30 }
0x24e0   : > { %8718 = vmatpush3.msra.mxu0 %v10646_v58 }
0x24e1   : > { %8719 = vmatprep.subr.mxu0 %v9331_v30 }
0x24e2   : > { %8720 = vmatpush3.msra.mxu0 %v10651_v23 }
0x24e3   : > { %8721 = vmatprep.subr.mxu0 %v9331_v30 }
0x24e4   : > { %8722 = vmatpush3.msra.mxu0 %v10656_v61 }
0x24e5   : > { %8741 = vmatprep.subr.mxu0 %v9331_v30 }
0x2575   : > { %v6580_v25 = vpop.f32.mrf.mxu1 }
0x2577   : > { %v8620_v45 = vpop.f32.mrf.mxu1 }
0x2581   : > { %v6653_v49 = vpop.f32.mrf.mxu0  ;;  %v6726_v56 = vpop.f32.mrf.mxu1 }
0x2582   : > { %v6654_v13 = vadd.f32 %v6653_v49, %v6580_v25 }
0x2583   : > { %v8635_v35 = vpop.f32.mrf.mxu0  ;;  %v8650_v55 = vpop.f32.mrf.mxu1 }
0x2584   : > { %v6730_v59 = vadd.f32 %v6726_v56, %v6654_v13 }
0x2586   : > { %v6737_v1 = vadd.f32 %v10868_v50, %v6730_v59 }
0x2588   : > { %6738 = vst [vmem:[%s11030_s2] sm:$0xff] %v6737_v1 }
0x258d   : > { %v6810_v31 = vpop.f32.mrf.mxu0 }
0x258e   : > { %v6811_v53 = vadd.f32 %v10660_v62, %v6810_v31 }
0x258f   : > { %v8665_v40 = vpop.f32.mrf.mxu0 }
0x2590   : > { %8679 = vmatmul.mubr.msk.f32.vlgmr.msra.gmra.mxu1 %vm1394_vm6, %v6811_v53 }
0x2591   : > { %8697 = vmatpush3.msra.mxu1 %v10664_v2  ;;  %8708 = vmatprep.mubr.msk.f32.mxu1 %vm9332_vm2, %v9331_v30 }
0x2592   : > { %8698 = vmatprep.subr.mxu1 %v9331_v30 }
0x2593   : > { %8699 = vmatpush3.msra.mxu1 %v10668_v4 }
0x2594   : > { %8700 = vmatprep.subr.mxu1 %v9331_v30 }
0x2595   : > { %8701 = vmatpush3.msra.mxu1 %v10675_v22 }
0x2596   : > { %8702 = vmatprep.subr.mxu1 %v9331_v30 }
0x2597   : > { %8703 = vmatpush3.msra.mxu1 %v10680_v5 }
0x2598   : > { %8704 = vmatprep.subr.mxu1 %v9331_v30 }
0x2599   : > { %v6957_v19 = vpop.f32.mrf.mxu0  ;;  %8705 = vmatpush3.msra.mxu1 %v10685_v6 }
0x259a   : > { %v6958_v17 = vadd.f32 %v10688_v43, %v6957_v19  ;;  %8706 = vmatprep.subr.mxu1 %v9331_v30 }
0x259b   : > { %v8695_v54 = vpop.f32.mrf.mxu0  ;;  %8707 = vmatpush3.msra.mxu1 %v10692_v51 }
0x259c   : > { %8709 = vmatmul.mubr.msk.f32.vlgmr.msra.gmra.mxu1 %vm1394_vm6, %v6958_v17  ;;  %8724 = vmatmul.mubr.msk.f32.vlgmr.msra.gmra.mxu0 %vm1394_vm6, %v6958_v17 }
0x259d   : > { %8726 = vmatprep.subr.mxu1 %v9331_v30  ;;  %8738 = vmatprep.mubr.msk.f32.mxu1 %vm9332_vm2, %v9331_v30 }
0x259e   : > { %8727 = vmatpush3.msra.mxu1 %v10699_v52  ;;  %8742 = vmatpush3.msra.mxu0 %v10735_v26 }
0x259f   : > { %8728 = vmatprep.subr.mxu1 %v9331_v30  ;;  %8743 = vmatprep.subr.mxu0 %v9331_v30 }
0x25a0   : > { %8729 = vmatpush3.msra.mxu1 %v10705_v8  ;;  %8744 = vmatpush3.msra.mxu0 %v10741_v12 }
0x25a1   : > { %8730 = vmatprep.subr.mxu1 %v9331_v30  ;;  %8745 = vmatprep.subr.mxu0 %v9331_v30 }
0x25a2   : > { %8731 = vmatpush3.msra.mxu1 %v10714_v39  ;;  %8746 = vmatpush3.msra.mxu0 %v10746_v37 }
0x25a3   : > { %8732 = vmatprep.subr.mxu1 %v9331_v30  ;;  %8747 = vmatprep.subr.mxu0 %v9331_v30 }
0x25a4   : > { %8733 = vmatpush3.msra.mxu1 %v10721_v15  ;;  %8748 = vmatpush3.msra.mxu0 %v10751_v10 }
0x25a5   : > { %8734 = vmatprep.subr.mxu1 %v9331_v30  ;;  %8749 = vmatprep.subr.mxu0 %v9331_v30 }
0x25a6   : > { %8735 = vmatpush3.msra.mxu1 %v10726_v44  ;;  %8750 = vmatpush3.msra.mxu0 %v10756_v16 }
0x25a7   : > { %8736 = vmatprep.subr.mxu1 %v9331_v30  ;;  %8751 = vmatprep.subr.mxu0 %v9331_v30 }
0x25a8   : > { %8737 = vmatpush3.msra.mxu1 %v10731_v14  ;;  %8752 = vmatpush3.msra.mxu0 %v10761_v27 }
0x25a9   : > { %8756 = vmatprep.subr.mxu1 %v9331_v30  ;;  %8753 = vmatprep.mubr.msk.f32.mxu0 %vm9332_vm2, %v9331_v30 }
0x2650   : > { %v6883_v57 = vpop.f32.mrf.mxu1 }
0x2651   : > { %v6884_v11 = vadd.f32 %v10765_v18, %v6883_v57 }
0x2652   : > { %v8680_v20 = vpop.f32.mrf.mxu1 }
0x2653   : > { %v6887_v34 = vmax.f32 %v6884_v11, 0.0 }
0x2655   : > { %8739 = vmatmul.mubr.msk.f32.vlgmr.msra.gmra.mxu1 %vm1394_vm6, %v6887_v34 }
0x2656   : > { %8757 = vmatpush3.msra.mxu1 %v10769_v32  ;;  %8768 = vmatprep.mubr.msk.f32.mxu1 %vm9332_vm2, %v9331_v30 }
0x2657   : > { %8758 = vmatprep.subr.mxu1 %v9331_v30 }
0x2658   : > { %8759 = vmatpush3.msra.mxu1 %v10773_v24 }
0x2659   : > { %8760 = vmatprep.subr.mxu1 %v9331_v30 }
0x265a   : > { %8761 = vmatpush3.msra.mxu1 %v10780_v42 }
0x265b   : > { %8762 = vmatprep.subr.mxu1 %v9331_v30 }
0x265c   : > { %v7030_v60 = vpop.f32.mrf.mxu1  ;;  %v7101_v58 = vpop.f32.mrf.mxu0  ;;  %8763 = vmatpush3.msra.mxu1 %v10785_v33 }
0x265d   : > { %v7031_v23 = vadd.f32 %v10788_v38, %v7030_v60  ;;  %v7102_v61 = vadd.f32 %v10790_v41, %v7101_v58  ;;  %8764 = vmatprep.subr.mxu1 %v9331_v30 }
0x265e   : > { %v8710_v62 = vpop.f32.mrf.mxu1  ;;  %v8725_v2 = vpop.f32.mrf.mxu0  ;;  %8765 = vmatpush3.msra.mxu1 %v10794_v21 }
0x265f   : > { %v7034_v4 = vmax.f32 %v7031_v23, 0.0  ;;  %v7105_v22 = vmax.f32 %v7102_v61, 0.0  ;;  %8766 = vmatprep.subr.mxu1 %v9331_v30 }
0x2660   : > { %8767 = vmatpush3.msra.mxu1 %v10801_v36 }
0x2661   : > { %8754 = vmatmul.mubr.msk.f32.vlgmr.msra.gmra.mxu0 %vm1394_vm6, %v7034_v4  ;;  %8769 = vmatmul.mubr.msk.f32.vlgmr.msra.gmra.mxu1 %vm1394_vm6, %v7105_v22 }
0x2715   : > { %v7175_v5 = vpop.f32.mrf.mxu1 }
0x2717   : > { %v8740_v6 = vpop.f32.mrf.mxu1 }
0x2721   : > { %v7248_v43 = vpop.f32.mrf.mxu0  ;;  %v7321_v51 = vpop.f32.mrf.mxu1 }
0x2722   : > { %v7249_v52 = vadd.f32 %v7248_v43, %v7175_v5 }
0x2723   : > { %v8755_v8 = vpop.f32.mrf.mxu0  ;;  %v8770_v39 = vpop.f32.mrf.mxu1 }
0x2724   : > { %v7325_v15 = vadd.f32 %v7321_v51, %v7249_v52 }
0x2726   : > { %v7326_v44 = vadd.f32 %v10868_v50, %v7325_v15 }
0x2728   : > { %7696 = vst [vmem:[%s11031_s23 + $0x8] sm:$0xff] %v7326_v44 }
0x2729 PF: > { %s11032_s2 = sld [smem:[#allocation44_spill]]  ;;  %s11034_s28 = smov %s9282_s1 }
0x272a   : > { %s11033_s17 = sld [smem:[#allocation45_spill]] }
0x272f   : > { %p84_p7 = scmp.ge.s32.totalorder %s11032_s2, 10  }
0x2730   : > { %s11035_s1 = smov %s11033_s17 }
0x2731   :  { %86 = sbr.rel (!%p84_p7) target bundleno = 75 (0x4b), region = 335 }
0x2736   :  { %7340 = vsyncpa [#allocation7], 1 }
0x2737   :  { %7342 = vsyncpa [#allocation7 + $0x1], 1 }
0x2738   :  { %7343 = vsyncpa [#allocation9], 1 }
0x2739   :  { %7344 = vsyncpa [#allocation12], 1 }
0x273a   :  { %7345 = vsyncpa [#allocation15], 1 }

</bundles_post_ra>
